<compile_context>
chip_gen: v7x
topology: tpu7x:2x2x1
jax: 0.10.0
libtpu: 0.0.40
codegen_flags: <defaults>
</compile_context>

<pallas_src>
import jax
import jax.numpy as jnp
import numpy as np
from jax import lax
from jax.experimental import pallas as pl
from jax.experimental.pallas import tpu as pltpu

NEG_SLOPE = 0.01                      # nn.LeakyReLU() default
LANE = 128                            # lane width: pad channel dims to a multiple
_VMEM_BUDGET = 20 * 1024 * 1024       # per-kernel working-set target (fits v7x)
_VMEM_LIMIT = 48 * 1024 * 1024        # explicit scoped-VMEM limit (< 64 MiB v7x)


def _round_up(x, m):
    return (x + m - 1) // m * m


def _lrelu(x):
    return jnp.where(x > 0, x, NEG_SLOPE * x)


# ---------------------------------------------------------------------------
# In-kernel helpers
# ---------------------------------------------------------------------------
def _fetch_halo(xp_ref, in_buf, sem, TH):
    """Double-buffered (TH+2)-row halo fetch of the padded input image.

    xp_ref: HBM ref (N, Hp+2, Wb, Cin).  in_buf: VMEM (2, TH+2, Wb, Cin).
    The halo of row-tile i+1 is prefetched while tile i is being computed.
    Priming happens at i == 0 of every image, so the batch grid axis can be
    megacore-"parallel" while the row-tile axis stays "arbitrary" (sequential).
    """
    n = pl.program_id(0)
    i = pl.program_id(1)
    gi = pl.num_programs(1)

    def _start(tile, slot):
        pltpu.make_async_copy(
            xp_ref.at[n, pl.ds(pl.multiple_of(tile * TH, TH), TH + 2)],
            in_buf.at[slot], sem.at[slot]).start()

    @pl.when(i == 0)                       # prime: first tile of this image
    def _():
        _start(0, 0)

    slot = lax.rem(i, 2)

    @pl.when(i + 1 < gi)                   # prefetch next tile into the other slot
    def _():
        _start(i + 1, 1 - slot)

    # Wait for the current tile's halo (descriptor shape must match the start).
    pltpu.make_async_copy(
        xp_ref.at[n, pl.ds(0, TH + 2)], in_buf.at[slot], sem.at[slot]).wait()
    return in_buf[slot]                    # (TH+2, Wb, Cin) bf16


def _taps3(halo, w3_ref, acc_ref, TH, W, Cin):
    """3-tap 3x3 conv: fold dx into channels (K = 3*Cin), 3 dots over dy.

    halo:   (TH+2, Wb, Cin) bf16 value (Wb >= W+2).
    w3_ref: (3, 3*Cin, Cout) ref.   acc_ref: (TH*W, Cout) f32 VMEM scratch.
    """
    x_cat = jnp.concatenate(
        [halo[:, 0:W], halo[:, 1:W + 1], halo[:, 2:W + 2]], axis=-1)
    K3 = 3 * Cin
    acc_ref[...] = jnp.dot(x_cat[0:TH].reshape(TH * W, K3), w3_ref[0],
                           preferred_element_type=jnp.float32)
    acc_ref[...] += jnp.dot(x_cat[1:TH + 1].reshape(TH * W, K3), w3_ref[1],
                            preferred_element_type=jnp.float32)
    acc_ref[...] += jnp.dot(x_cat[2:TH + 2].reshape(TH * W, K3), w3_ref[2],
                            preferred_element_type=jnp.float32)


# ---------------------------------------------------------------------------
# Kernel factories
# ---------------------------------------------------------------------------
def _make_conv1_kernel(TH, W, Wb, Cp, C2p):
    """conv0 (1x1) + conv1 (3x3, replicate pad) + residual 1x1 conv, fused."""

    def kernel(xp_ref, w0_ref, b0_ref, wr_ref, br_ref, w3_ref, b3_ref,
               out1_ref, outr_ref, in_buf, sem, acc_ref):
        halo_x = _fetch_halo(xp_ref, in_buf, sem, TH)       # (TH+2, Wb, Cp) bf16

        # Residual branch: lrelu(x @ wc + bc) on this tile's centre pixels.
        cx = halo_x[1:TH + 1, 1:W + 1].reshape(TH * W, Cp)
        res = _lrelu(jnp.dot(cx, wr_ref[...],
                             preferred_element_type=jnp.float32) + br_ref[...])
        outr_ref[...] = res.reshape(1, TH, W, Cp).astype(outr_ref.dtype)

        # conv0 (1x1) fused onto the halo window: a pointwise op commutes with
        # replicate padding, so applying it to the padded window is exact.
        hx = halo_x.reshape((TH + 2) * Wb, Cp)
        h0 = _lrelu(jnp.dot(hx, w0_ref[...],
                            preferred_element_type=jnp.float32) + b0_ref[...])
        halo0 = h0.astype(jnp.bfloat16).reshape(TH + 2, Wb, Cp)

        # conv1 (3x3) on conv0's output.
        _taps3(halo0, w3_ref, acc_ref, TH, W, Cp)
        out1_ref[...] = _lrelu(acc_ref[...] + b3_ref[...]
                               ).reshape(1, TH, W, C2p).astype(out1_ref.dtype)

    return kernel


def _make_conv3x3_kernel(TH, W, Cin, Cout):
    """Plain 3x3 conv (replicate padding) + bias + LeakyReLU."""

    def kernel(xp_ref, w3_ref, b3_ref, out_ref, in_buf, sem, acc_ref):
        halo = _fetch_halo(xp_ref, in_buf, sem, TH)
        _taps3(halo, w3_ref, acc_ref, TH, W, Cin)
        out_ref[...] = _lrelu(acc_ref[...] + b3_ref[...]
                              ).reshape(1, TH, W, Cout).astype(out_ref.dtype)

    return kernel


def _make_conv3x3_proj_kernel(TH, W, Cin, Cmid, Cout):
    """3x3 conv (-> Cmid) with a fused 1x1 projection (-> Cout) epilogue."""
    del Cmid  # shape carried by acc_ref

    def kernel(xp_ref, w3_ref, b3_ref, wp_ref, bp_ref, out_ref,
               in_buf, sem, acc_ref):
        halo = _fetch_halo(xp_ref, in_buf, sem, TH)
        _taps3(halo, w3_ref, acc_ref, TH, W, Cin)
        mid = _lrelu(acc_ref[...] + b3_ref[...]).astype(jnp.bfloat16)   # conv3 out
        out = _lrelu(jnp.dot(mid, wp_ref[...],
                             preferred_element_type=jnp.float32) + bp_ref[...])
        out_ref[...] = out.reshape(1, TH, W, Cout).astype(out_ref.dtype)

    return kernel


# ---------------------------------------------------------------------------
# Host-side tiling helpers
# ---------------------------------------------------------------------------
def _conv_vmem(th, W, Cin, Cout, extra=0):
    """Rough per-kernel VMEM working-set estimate (bytes) for a row tile `th`."""
    Wb = _round_up(W + 2, 8)
    return (2 * (th + 2) * Wb * Cin * 2          # double-buffered halo (bf16)
            + th * W * Cout * 4                  # f32 accumulator scratch
            + 2 * th * W * Cout * 2              # double-buffered output block
            + 2 * 9 * Cin * Cout * 2             # 3x3 weights (x2 pipelining)
            + (th + 2) * W * 3 * Cin * 2 * 2     # x_cat + dy-slice temporaries
            + extra)


def _pick_th(H, vmem_fn):
    """Largest row tile (multiple of 8) that fits the VMEM budget without
    padding H by more than half a tile."""
    h8 = _round_up(H, 8)
    for th in (64, 32, 16, 8):
        if th > h8:
            continue
        if _round_up(H, th) - H > th // 2:
            continue
        if vmem_fn(th) <= _VMEM_BUDGET:
            return th
    return 8


def _prep_padded_input(x_nhwc, TH):
    """Replicate-pad H/W by 1, zero-pad rows to Hp (multiple of TH) and the
    width to Wb (multiple of 8) so in-kernel reshapes stay sublane-aligned."""
    N, H, W, _ = x_nhwc.shape
    Hp = _round_up(H, TH)
    Wb = _round_up(W + 2, 8)
    xp = jnp.pad(x_nhwc, ((0, 0), (1, 1), (1, 1), (0, 0)), mode="edge")
    xp = jnp.pad(xp, ((0, 0), (0, Hp - H), (0, Wb - (W + 2)), (0, 0)))
    return xp, Hp, Wb


# ---------------------------------------------------------------------------
# pallas_call wrappers
# ---------------------------------------------------------------------------
def conv0_conv1_residual_lrelu(x_nhwc, w0, b0, wr, br, w1, b1):
    """Fused conv0 (1x1) + conv1 (3x3, replicate pad) + residual 1x1 conv.
    x_nhwc: (N,H,W,Cp) bf16 -> out1 (N,H,W,C2p) bf16, out_res (N,H,W,Cp) f32."""
    N, H, W, Cp = x_nhwc.shape
    C2p = w1.shape[-1]
    Wb0 = _round_up(W + 2, 8)
    vm = lambda th: _conv_vmem(
        th, W, Cp, C2p,
        extra=(th + 2) * Wb0 * Cp * 6       # conv0 f32+bf16 intermediates
              + 2 * th * W * Cp * 4         # residual output block (f32, x2)
              + 4 * Cp * Cp * 2)            # two 1x1 weights (x2)
    TH = _pick_th(H, vm)
    xp, Hp, Wb = _prep_padded_input(x_nhwc, TH)

    out1, out_res = pl.pallas_call(
        _make_conv1_kernel(TH, W, Wb, Cp, C2p),
        out_shape=(jax.ShapeDtypeStruct((N, Hp, W, C2p), jnp.bfloat16),
                   jax.ShapeDtypeStruct((N, Hp, W, Cp), jnp.float32)),
        grid=(N, Hp // TH),
        in_specs=[
            pl.BlockSpec(memory_space=pl.ANY),                     # padded x (manual DMA)
            pl.BlockSpec((Cp, Cp), lambda n, i: (0, 0)),           # w0
            pl.BlockSpec((1, Cp), lambda n, i: (0, 0)),            # b0
            pl.BlockSpec((Cp, Cp), lambda n, i: (0, 0)),           # wc (residual)
            pl.BlockSpec((1, Cp), lambda n, i: (0, 0)),            # bc
            pl.BlockSpec((3, 3 * Cp, C2p), lambda n, i: (0, 0, 0)),  # w1 (3,3Cin,Cout)
            pl.BlockSpec((1, C2p), lambda n, i: (0, 0)),           # b1
        ],
        out_specs=(pl.BlockSpec((1, TH, W, C2p), lambda n, i: (n, i, 0, 0)),
                   pl.BlockSpec((1, TH, W, Cp), lambda n, i: (n, i, 0, 0))),
        scratch_shapes=[
            pltpu.VMEM((2, TH + 2, Wb, Cp), jnp.bfloat16),   # halo double buffer
            pltpu.SemaphoreType.DMA((2,)),
            pltpu.VMEM((TH * W, C2p), jnp.float32),          # conv1 accumulator
        ],
        compiler_params=pltpu.CompilerParams(
            dimension_semantics=("parallel", "arbitrary"),
            vmem_limit_bytes=_VMEM_LIMIT),
        cost_estimate=pl.CostEstimate(
            flops=2 * N * Hp * W * (9 * Cp * C2p + 2 * Cp * Cp),
            transcendentals=0,
            bytes_accessed=2 * (N * (Hp + 2) * Wb * Cp + 9 * Cp * C2p
                                + 2 * Cp * Cp + N * Hp * W * C2p)
                           + 4 * N * Hp * W * Cp),
    )(xp,
      w0, b0.reshape(1, Cp).astype(jnp.float32),
      wr, br.reshape(1, Cp).astype(jnp.float32),
      w1.reshape(3, 3 * Cp, C2p), b1.reshape(1, C2p).astype(jnp.float32))
    return out1[:, :H], out_res[:, :H]


def conv3x3_lrelu(x_nhwc, w3, b3):
    """3x3 conv (replicate pad) + bias + LeakyReLU.  Channels lane-padded."""
    N, H, W, Cin = x_nhwc.shape
    Cout = w3.shape[-1]
    TH = _pick_th(H, lambda th: _conv_vmem(th, W, Cin, Cout))
    xp, Hp, Wb = _prep_padded_input(x_nhwc, TH)

    out = pl.pallas_call(
        _make_conv3x3_kernel(TH, W, Cin, Cout),
        out_shape=jax.ShapeDtypeStruct((N, Hp, W, Cout), jnp.bfloat16),
        grid=(N, Hp // TH),
        in_specs=[
            pl.BlockSpec(memory_space=pl.ANY),
            pl.BlockSpec((3, 3 * Cin, Cout), lambda n, i: (0, 0, 0)),
            pl.BlockSpec((1, Cout), lambda n, i: (0, 0)),
        ],
        out_specs=pl.BlockSpec((1, TH, W, Cout), lambda n, i: (n, i, 0, 0)),
        scratch_shapes=[
            pltpu.VMEM((2, TH + 2, Wb, Cin), jnp.bfloat16),
            pltpu.SemaphoreType.DMA((2,)),
            pltpu.VMEM((TH * W, Cout), jnp.float32),
        ],
        compiler_params=pltpu.CompilerParams(
            dimension_semantics=("parallel", "arbitrary"),
            vmem_limit_bytes=_VMEM_LIMIT),
        cost_estimate=pl.CostEstimate(
            flops=2 * N * Hp * W * 9 * Cin * Cout,
            transcendentals=0,
            bytes_accessed=2 * (N * (Hp + 2) * Wb * Cin + 9 * Cin * Cout
                                + N * Hp * W * Cout)),
    )(xp, w3.reshape(3, 3 * Cin, Cout), b3.reshape(1, Cout).astype(jnp.float32))
    return out[:, :H]


def conv3x3_proj_lrelu(x_nhwc, w3, b3, wp, bp):
    """3x3 conv (replicate pad) + lrelu, then a fused 1x1 projection + lrelu."""
    N, H, W, Cin = x_nhwc.shape
    Cmid = w3.shape[-1]
    Cout = wp.shape[-1]
    vm = lambda th: _conv_vmem(
        th, W, Cin, Cmid,
        extra=th * W * (Cmid * 2 + Cout * 4)   # mid bf16 + projection f32 result
              + 2 * th * W * Cout * 4          # output block (f32, x2)
              + 2 * Cmid * Cout * 2)           # projection weight (x2)
    TH = _pick_th(H, vm)
    xp, Hp, Wb = _prep_padded_input(x_nhwc, TH)

    out = pl.pallas_call(
        _make_conv3x3_proj_kernel(TH, W, Cin, Cmid, Cout),
        out_shape=jax.ShapeDtypeStruct((N, Hp, W, Cout), jnp.float32),
        grid=(N, Hp // TH),
        in_specs=[
            pl.BlockSpec(memory_space=pl.ANY),
            pl.BlockSpec((3, 3 * Cin, Cmid), lambda n, i: (0, 0, 0)),
            pl.BlockSpec((1, Cmid), lambda n, i: (0, 0)),
            pl.BlockSpec((Cmid, Cout), lambda n, i: (0, 0)),
            pl.BlockSpec((1, Cout), lambda n, i: (0, 0)),
        ],
        out_specs=pl.BlockSpec((1, TH, W, Cout), lambda n, i: (n, i, 0, 0)),
        scratch_shapes=[
            pltpu.VMEM((2, TH + 2, Wb, Cin), jnp.bfloat16),
            pltpu.SemaphoreType.DMA((2,)),
            pltpu.VMEM((TH * W, Cmid), jnp.float32),
        ],
        compiler_params=pltpu.CompilerParams(
            dimension_semantics=("parallel", "arbitrary"),
            vmem_limit_bytes=_VMEM_LIMIT),
        cost_estimate=pl.CostEstimate(
            flops=2 * N * Hp * W * (9 * Cin * Cmid + Cmid * Cout),
            transcendentals=0,
            bytes_accessed=2 * (N * (Hp + 2) * Wb * Cin + 9 * Cin * Cmid
                                + Cmid * Cout) + 4 * N * Hp * W * Cout),
    )(xp, w3.reshape(3, 3 * Cin, Cmid), b3.reshape(1, Cmid).astype(jnp.float32),
      wp, bp.reshape(1, Cout).astype(jnp.float32))
    return out[:, :H]


# ---------------------------------------------------------------------------
# Parameter padding helpers (zero-pad channel dims to lane multiples)
# ---------------------------------------------------------------------------
def _pad_bias(b, n):
    return jnp.pad(b, (0, n - b.shape[0])).astype(jnp.float32)


def _pad_w1x1(w, ci, co):
    return jnp.pad(w, ((0, ci - w.shape[0]), (0, co - w.shape[1])))


def _pad_w3x3(w, ci, co):
    return jnp.pad(w, ((0, 0), (0, 0),
                       (0, ci - w.shape[2]), (0, co - w.shape[3])))


# ---------------------------------------------------------------------------
# ResidualModule3 forward
# ---------------------------------------------------------------------------
def residual_module3(x_nchw, p):
    N, C, H, W = x_nchw.shape
    Cp = _round_up(C, LANE)
    C2p = _round_up(2 * C, LANE)
    C4p = _round_up(4 * C, LANE)

    # NCHW -> NHWC, lane-pad channels, bf16 inputs for the MXU (f32 accumulate).
    x = jnp.transpose(x_nchw, (0, 2, 3, 1))
    x = jnp.pad(x, ((0, 0), (0, 0), (0, 0), (0, Cp - C))).astype(jnp.bfloat16)

    w0 = _pad_w1x1(p["w0"], Cp, Cp).astype(jnp.bfloat16)
    wc = _pad_w1x1(p["wc"], Cp, Cp).astype(jnp.bfloat16)
    w4 = _pad_w1x1(p["w4"], C2p, Cp).astype(jnp.bfloat16)
    w1 = _pad_w3x3(p["w1"], Cp, C2p).astype(jnp.bfloat16)
    w2 = _pad_w3x3(p["w2"], C2p, C4p).astype(jnp.bfloat16)
    w3 = _pad_w3x3(p["w3"], C4p, C2p).astype(jnp.bfloat16)

    # k1: conv0 + conv1 + residual conv (x read from HBM once, out0 stays in VMEM).
    out1, out_res = conv0_conv1_residual_lrelu(
        x, w0, _pad_bias(p["b0"], Cp), wc, _pad_bias(p["bc"], Cp),
        w1, _pad_bias(p["b1"], C2p))
    # k2: conv2 (3x3).
    out2 = conv3x3_lrelu(out1, w2, _pad_bias(p["b2"], C4p))
    # k3: conv3 (3x3) with conv4 (1x1) fused into the epilogue (out3 stays in VMEM).
    out4 = conv3x3_proj_lrelu(out2, w3, _pad_bias(p["b3"], C2p),
                              w4, _pad_bias(p["b4"], Cp))

    # channel concat([residual branch, out4]) and back to NCHW.
    final = jnp.concatenate([out_res[..., :C], out4[..., :C]], axis=-1)
    return jnp.transpose(final, (0, 3, 1, 2)).astype(jnp.float32)


def init_params(channel, key):
    ks = jax.random.split(key, 12)

    def w1x1(k, cin, cout):
        return 0.1 * jax.random.normal(k, (cin, cout), jnp.float32)

    def w3x3(k, cin, cout):
        return 0.1 * jax.random.normal(k, (3, 3, cin, cout), jnp.float32)

    def bias(k, cout):
        return 0.05 * jax.random.normal(k, (cout,), jnp.float32)

    C = channel
    return {
        "w0": w1x1(ks[0], C, C),         "b0": bias(ks[1], C),
        "w1": w3x3(ks[2], C, 2 * C),     "b1": bias(ks[3], 2 * C),
        "w2": w3x3(ks[4], 2 * C, 4 * C), "b2": bias(ks[5], 4 * C),
        "w3": w3x3(ks[6], 4 * C, 2 * C), "b3": bias(ks[7], 2 * C),
        "w4": w1x1(ks[8], 2 * C, C),     "b4": bias(ks[9], C),
        "wc": w1x1(ks[10], C, C),        "bc": bias(ks[11], C),
    }


# ---------------------------------------------------------------------------
# Pure-JAX f32 reference (correctness check only)
# ---------------------------------------------------------------------------
def _conv_ref(x_nchw, w_hwio, b, replicate):
    w_oihw = jnp.transpose(w_hwio, (3, 2, 0, 1))
    if replicate:
        x_nchw = jnp.pad(x_nchw, ((0, 0), (0, 0), (1, 1), (1, 1)), mode="edge")
    out = jax.lax.conv_general_dilated(
        x_nchw, w_oihw, (1, 1), "VALID",
        dimension_numbers=("NCHW", "OIHW", "NCHW"))
    return out + b[None, :, None, None]


def residual_module3_ref(x, p):
    def c1(x, w, b):
        return _conv_ref(x, w[None, None, :, :], b, False)

    out0 = _lrelu(c1(x, p["w0"], p["b0"]))
    out1 = _lrelu(_conv_ref(out0, p["w1"], p["b1"], True))
    out2 = _lrelu(_conv_ref(out1, p["w2"], p["b2"], True))
    out3 = _lrelu(_conv_ref(out2, p["w3"], p["b3"], True))
    out4 = _lrelu(c1(out3, p["w4"], p["b4"]))
    out = _lrelu(c1(x, p["wc"], p["bc"]))
    return jnp.concatenate([out, out4], axis=1)


if __name__ == "__main__":
    channel = 4
    N, H, W = 2, 16, 16
    key = jax.random.PRNGKey(0)
    kx, kx2, kp = jax.random.split(key, 3)
    params = init_params(channel, kp)
    fwd = jax.jit(residual_module3)

    # Main run.
    x = jax.random.normal(kx, (N, channel, H, W), jnp.float32)
    y = jax.block_until_ready(fwd(x, params))
    assert y.shape == (N, 2 * channel, H, W), y.shape
    y_ref = residual_module3_ref(x, params)
    # bf16 MXU inputs / bf16 inter-layer activations with f32 accumulation.
    np.testing.assert_allclose(np.asarray(y), np.asarray(y_ref),
                               rtol=3e-2, atol=3e-2)

    # Extra validation: H not a multiple of the row tile -> exercises the
    # Hp-padding crop and the cross-tile halo prefetch (2 row tiles per image).
    x2 = jax.random.normal(kx2, (N, channel, 24, W), jnp.float32)
    y2 = jax.block_until_ready(fwd(x2, params))
    y2_ref = residual_module3_ref(x2, params)
    np.testing.assert_allclose(np.asarray(y2), np.asarray(y2_ref),
                               rtol=3e-2, atol=3e-2)

    print("KERNEL_OK")
</pallas_src>

<mosaic_0001>
module attributes {stable_mosaic.version = 11 : i64} {
  func.func @kernel(%arg0: i32, %arg1: i32, %arg2: memref<2x18x24x128xbf16, #tpu.memory_space<any>>, %arg3: memref<3x384x128xbf16, #tpu.memory_space<vmem>>, %arg4: memref<1x128xf32, #tpu.memory_space<vmem>>, %arg5: memref<1x16x16x128xbf16, #tpu.memory_space<vmem>>, %arg6: memref<2x18x24x128xbf16, #tpu.memory_space<vmem>>, %arg7: memref<2x!tpu.dma_semaphore, #tpu.memory_space<semaphore_mem>>, %arg8: memref<256x128xf32, #tpu.memory_space<vmem>>) attributes {dimension_semantics = [#tpu.dimension_semantics<parallel>, #tpu.dimension_semantics<arbitrary>], iteration_bounds = array<i64: 2, 1>, scalar_prefetch = 0 : i64, scratch_operands = 3 : i64, tpu.core_type = #tpu.core_type<tc>, window_params = [{}, {pipeline_mode = #tpu.pipeline_mode<synchronous>, transform_indices = @transform_1, window_bounds = array<i64: 3, 384, 128>}, {pipeline_mode = #tpu.pipeline_mode<synchronous>, transform_indices = @transform_2, window_bounds = array<i64: 1, 128>}, {transform_indices = @transform_3, window_bounds = array<i64: 1, 16, 16, 128>}]} {
    %c0_i32 = arith.constant 0 : i32
    %0 = arith.cmpi eq, %arg1, %c0_i32 : i32
    %1 = arith.extui %0 : i1 to i32
    %c0_i32_0 = arith.constant 0 : i32
    %2 = arith.cmpi ne, %1, %c0_i32_0 : i32
    scf.if %2 {
      %c0_i32_40 = arith.constant 0 : i32
      %55 = tpu.assume_multiple %c0_i32_40, 16 : i32
      %c0_i32_41 = arith.constant 0 : i32
      %c0_i32_42 = arith.constant 0 : i32
      %c0_i32_43 = arith.constant 0 : i32
      %c0_i32_44 = arith.constant 0 : i32
      %56 = tpu.memref_slice %arg2[%arg0, %55, %c0_i32_43, %c0_i32_44] : memref<2x18x24x128xbf16, #tpu.memory_space<any>> -> memref<1x18x24x128xbf16, #tpu.memory_space<any>>
      %57 = tpu.memref_squeeze %56 : memref<1x18x24x128xbf16, #tpu.memory_space<any>> -> memref<18x24x128xbf16, #tpu.memory_space<any>>
      %c0_i32_45 = arith.constant 0 : i32
      %c0_i32_46 = arith.constant 0 : i32
      %c0_i32_47 = arith.constant 0 : i32
      %58 = tpu.memref_slice %arg6[%c0_i32_41, %c0_i32_45, %c0_i32_46, %c0_i32_47] : memref<2x18x24x128xbf16, #tpu.memory_space<vmem>> -> memref<1x18x24x128xbf16, #tpu.memory_space<vmem>>
      %59 = tpu.memref_squeeze %58 : memref<1x18x24x128xbf16, #tpu.memory_space<vmem>> -> memref<18x24x128xbf16, #tpu.memory_space<vmem>>
      %60 = tpu.memref_slice %arg7[%c0_i32_42] : memref<2x!tpu.dma_semaphore, #tpu.memory_space<semaphore_mem>> -> memref<1x!tpu.dma_semaphore, #tpu.memory_space<semaphore_mem>>
      %61 = tpu.memref_squeeze %60 : memref<1x!tpu.dma_semaphore, #tpu.memory_space<semaphore_mem>> -> memref<!tpu.dma_semaphore, #tpu.memory_space<semaphore_mem>>
      tpu.enqueue_dma source(%57 : memref<18x24x128xbf16, #tpu.memory_space<any>>) target(%59 : memref<18x24x128xbf16, #tpu.memory_space<vmem>>) target_semaphore(%61 : memref<!tpu.dma_semaphore, #tpu.memory_space<semaphore_mem>>)
    } else {
    }
    %c2_i32 = arith.constant 2 : i32
    %3 = arith.remsi %arg1, %c2_i32 : i32
    %c1_i32 = arith.constant 1 : i32
    %4 = arith.addi %arg1, %c1_i32 : i32
    %c1_i32_1 = arith.constant 1 : i32
    %5 = arith.cmpi slt, %4, %c1_i32_1 : i32
    %6 = arith.extui %5 : i1 to i32
    %c0_i32_2 = arith.constant 0 : i32
    %7 = arith.cmpi ne, %6, %c0_i32_2 : i32
    scf.if %7 {
      %c1_i32_40 = arith.constant 1 : i32
      %55 = arith.addi %arg1, %c1_i32_40 : i32
      %c1_i32_41 = arith.constant 1 : i32
      %56 = arith.subi %c1_i32_41, %3 : i32
      %c16_i32 = arith.constant 16 : i32
      %57 = arith.muli %55, %c16_i32 : i32
      %58 = tpu.assume_multiple %57, 16 : i32
      %c0_i32_42 = arith.constant 0 : i32
      %c0_i32_43 = arith.constant 0 : i32
      %59 = tpu.memref_slice %arg2[%arg0, %58, %c0_i32_42, %c0_i32_43] : memref<2x18x24x128xbf16, #tpu.memory_space<any>> -> memref<1x18x24x128xbf16, #tpu.memory_space<any>>
      %60 = tpu.memref_squeeze %59 : memref<1x18x24x128xbf16, #tpu.memory_space<any>> -> memref<18x24x128xbf16, #tpu.memory_space<any>>
      %c0_i32_44 = arith.constant 0 : i32
      %c0_i32_45 = arith.constant 0 : i32
      %c0_i32_46 = arith.constant 0 : i32
      %61 = tpu.memref_slice %arg6[%56, %c0_i32_44, %c0_i32_45, %c0_i32_46] : memref<2x18x24x128xbf16, #tpu.memory_space<vmem>> -> memref<1x18x24x128xbf16, #tpu.memory_space<vmem>>
      %62 = tpu.memref_squeeze %61 : memref<1x18x24x128xbf16, #tpu.memory_space<vmem>> -> memref<18x24x128xbf16, #tpu.memory_space<vmem>>
      %63 = tpu.memref_slice %arg7[%56] : memref<2x!tpu.dma_semaphore, #tpu.memory_space<semaphore_mem>> -> memref<1x!tpu.dma_semaphore, #tpu.memory_space<semaphore_mem>>
      %64 = tpu.memref_squeeze %63 : memref<1x!tpu.dma_semaphore, #tpu.memory_space<semaphore_mem>> -> memref<!tpu.dma_semaphore, #tpu.memory_space<semaphore_mem>>
      tpu.enqueue_dma source(%60 : memref<18x24x128xbf16, #tpu.memory_space<any>>) target(%62 : memref<18x24x128xbf16, #tpu.memory_space<vmem>>) target_semaphore(%64 : memref<!tpu.dma_semaphore, #tpu.memory_space<semaphore_mem>>)
    } else {
    }
    %c0_i32_3 = arith.constant 0 : i32
    %c0_i32_4 = arith.constant 0 : i32
    %c0_i32_5 = arith.constant 0 : i32
    %8 = tpu.memref_slice %arg2[%arg0, %c0_i32_3, %c0_i32_4, %c0_i32_5] : memref<2x18x24x128xbf16, #tpu.memory_space<any>> -> memref<1x18x24x128xbf16, #tpu.memory_space<any>>
    %9 = tpu.memref_squeeze %8 : memref<1x18x24x128xbf16, #tpu.memory_space<any>> -> memref<18x24x128xbf16, #tpu.memory_space<any>>
    %c0_i32_6 = arith.constant 0 : i32
    %c0_i32_7 = arith.constant 0 : i32
    %c0_i32_8 = arith.constant 0 : i32
    %10 = tpu.memref_slice %arg6[%3, %c0_i32_6, %c0_i32_7, %c0_i32_8] : memref<2x18x24x128xbf16, #tpu.memory_space<vmem>> -> memref<1x18x24x128xbf16, #tpu.memory_space<vmem>>
    %11 = tpu.memref_squeeze %10 : memref<1x18x24x128xbf16, #tpu.memory_space<vmem>> -> memref<18x24x128xbf16, #tpu.memory_space<vmem>>
    %12 = tpu.memref_slice %arg7[%3] : memref<2x!tpu.dma_semaphore, #tpu.memory_space<semaphore_mem>> -> memref<1x!tpu.dma_semaphore, #tpu.memory_space<semaphore_mem>>
    %13 = tpu.memref_squeeze %12 : memref<1x!tpu.dma_semaphore, #tpu.memory_space<semaphore_mem>> -> memref<!tpu.dma_semaphore, #tpu.memory_space<semaphore_mem>>
    tpu.wait_dma2 semaphore(%13 : memref<!tpu.dma_semaphore, #tpu.memory_space<semaphore_mem>>) src(%9 : memref<18x24x128xbf16, #tpu.memory_space<any>>) dst(%11 : memref<18x24x128xbf16, #tpu.memory_space<vmem>>)
    %14 = arith.index_cast %3 : i32 to index
    %c0 = arith.constant 0 : index
    %c0_9 = arith.constant 0 : index
    %c0_10 = arith.constant 0 : index
    %15 = vector.load %arg6[%14, %c0, %c0_9, %c0_10] : memref<2x18x24x128xbf16, #tpu.memory_space<vmem>>, vector<1x18x24x128xbf16>
    %16 = vector.shape_cast %15 : vector<1x18x24x128xbf16> to vector<18x24x128xbf16>
    %17 = vector.extract_strided_slice %16 {offsets = [0, 0, 0], sizes = [18, 16, 128], strides = [1, 1, 1]} : vector<18x24x128xbf16> to vector<18x16x128xbf16>
    %18 = vector.extract_strided_slice %16 {offsets = [0, 1, 0], sizes = [18, 16, 128], strides = [1, 1, 1]} : vector<18x24x128xbf16> to vector<18x16x128xbf16>
    %19 = vector.extract_strided_slice %16 {offsets = [0, 2, 0], sizes = [18, 16, 128], strides = [1, 1, 1]} : vector<18x24x128xbf16> to vector<18x16x128xbf16>
    %20 = tpu.concatenate %17, %18, %19 in 2 : vector<18x16x128xbf16>, vector<18x16x128xbf16>, vector<18x16x128xbf16> -> vector<18x16x384xbf16>
    %21 = vector.extract_strided_slice %20 {offsets = [0, 0, 0], sizes = [16, 16, 384], strides = [1, 1, 1]} : vector<18x16x384xbf16> to vector<16x16x384xbf16>
    %22 = vector.shape_cast %21 : vector<16x16x384xbf16> to vector<256x384xbf16>
    %c0_11 = arith.constant 0 : index
    %c0_12 = arith.constant 0 : index
    %c0_13 = arith.constant 0 : index
    %23 = vector.load %arg3[%c0_11, %c0_12, %c0_13] : memref<3x384x128xbf16, #tpu.memory_space<vmem>>, vector<1x384x128xbf16>
    %24 = vector.shape_cast %23 : vector<1x384x128xbf16> to vector<384x128xbf16>
    %cst = arith.constant dense<0.000000e+00> : vector<256x128xf32>
    %25 = tpu.matmul %22, %24, %cst {dimension_numbers = #tpu.dot_dimension_numbers<[1], [0], [0], [1], [0, 0, 1, 1], [], []>} : vector<256x384xbf16>, vector<384x128xbf16>, vector<256x128xf32> -> vector<256x128xf32>
    %c0_14 = arith.constant 0 : index
    %c0_15 = arith.constant 0 : index
    %26 = vector.load %arg8[%c0_14, %c0_15] : memref<256x128xf32, #tpu.memory_space<vmem>>, vector<256x128xf32>
    tpu.vector_store %arg8[%c0_14, %c0_15], %25 {strides = array<i32>} : memref<256x128xf32, #tpu.memory_space<vmem>>, vector<256x128xf32>,
    %c0_16 = arith.constant 0 : index
    %c0_17 = arith.constant 0 : index
    %27 = vector.load %arg8[%c0_16, %c0_17] : memref<256x128xf32, #tpu.memory_space<vmem>>, vector<256x128xf32>
    %28 = vector.extract_strided_slice %20 {offsets = [1, 0, 0], sizes = [16, 16, 384], strides = [1, 1, 1]} : vector<18x16x384xbf16> to vector<16x16x384xbf16>
    %29 = vector.shape_cast %28 : vector<16x16x384xbf16> to vector<256x384xbf16>
    %c1 = arith.constant 1 : index
    %c0_18 = arith.constant 0 : index
    %c0_19 = arith.constant 0 : index
    %30 = vector.load %arg3[%c1, %c0_18, %c0_19] : memref<3x384x128xbf16, #tpu.memory_space<vmem>>, vector<1x384x128xbf16>
    %31 = vector.shape_cast %30 : vector<1x384x128xbf16> to vector<384x128xbf16>
    %cst_20 = arith.constant dense<0.000000e+00> : vector<256x128xf32>
    %32 = tpu.matmul %29, %31, %cst_20 {dimension_numbers = #tpu.dot_dimension_numbers<[1], [0], [0], [1], [0, 0, 1, 1], [], []>} : vector<256x384xbf16>, vector<384x128xbf16>, vector<256x128xf32> -> vector<256x128xf32>
    %33 = arith.addf %27, %32 : vector<256x128xf32>
    %c0_21 = arith.constant 0 : index
    %c0_22 = arith.constant 0 : index
    %34 = vector.load %arg8[%c0_21, %c0_22] : memref<256x128xf32, #tpu.memory_space<vmem>>, vector<256x128xf32>
    tpu.vector_store %arg8[%c0_21, %c0_22], %33 {strides = array<i32>} : memref<256x128xf32, #tpu.memory_space<vmem>>, vector<256x128xf32>,
    %c0_23 = arith.constant 0 : index
    %c0_24 = arith.constant 0 : index
    %35 = vector.load %arg8[%c0_23, %c0_24] : memref<256x128xf32, #tpu.memory_space<vmem>>, vector<256x128xf32>
    %36 = vector.extract_strided_slice %20 {offsets = [2, 0, 0], sizes = [16, 16, 384], strides = [1, 1, 1]} : vector<18x16x384xbf16> to vector<16x16x384xbf16>
    %37 = vector.shape_cast %36 : vector<16x16x384xbf16> to vector<256x384xbf16>
    %c2 = arith.constant 2 : index
    %c0_25 = arith.constant 0 : index
    %c0_26 = arith.constant 0 : index
    %38 = vector.load %arg3[%c2, %c0_25, %c0_26] : memref<3x384x128xbf16, #tpu.memory_space<vmem>>, vector<1x384x128xbf16>
    %39 = vector.shape_cast %38 : vector<1x384x128xbf16> to vector<384x128xbf16>
    %cst_27 = arith.constant dense<0.000000e+00> : vector<256x128xf32>
    %40 = tpu.matmul %37, %39, %cst_27 {dimension_numbers = #tpu.dot_dimension_numbers<[1], [0], [0], [1], [0, 0, 1, 1], [], []>} : vector<256x384xbf16>, vector<384x128xbf16>, vector<256x128xf32> -> vector<256x128xf32>
    %41 = arith.addf %35, %40 : vector<256x128xf32>
    %c0_28 = arith.constant 0 : index
    %c0_29 = arith.constant 0 : index
    %42 = vector.load %arg8[%c0_28, %c0_29] : memref<256x128xf32, #tpu.memory_space<vmem>>, vector<256x128xf32>
    tpu.vector_store %arg8[%c0_28, %c0_29], %41 {strides = array<i32>} : memref<256x128xf32, #tpu.memory_space<vmem>>, vector<256x128xf32>,
    %c0_30 = arith.constant 0 : index
    %c0_31 = arith.constant 0 : index
    %43 = vector.load %arg8[%c0_30, %c0_31] : memref<256x128xf32, #tpu.memory_space<vmem>>, vector<256x128xf32>
    %c0_32 = arith.constant 0 : index
    %c0_33 = arith.constant 0 : index
    %44 = vector.load %arg4[%c0_32, %c0_33] : memref<1x128xf32, #tpu.memory_space<vmem>>, vector<1x128xf32>
    %45 = vector.broadcast %44 : vector<1x128xf32> to vector<256x128xf32>
    %46 = arith.addf %43, %45 : vector<256x128xf32>
    %cst_34 = arith.constant 0.000000e+00 : f32
    %47 = vector.broadcast %cst_34 : f32 to vector<256x128xf32>
    %48 = arith.cmpf ogt, %46, %47 : vector<256x128xf32>
    %cst_35 = arith.constant 0.00999999977 : f32
    %49 = vector.broadcast %cst_35 : f32 to vector<256x128xf32>
    %50 = arith.mulf %49, %46 : vector<256x128xf32>
    %51 = arith.select %48, %46, %50 : vector<256x128xi1>, vector<256x128xf32>
    %52 = vector.shape_cast %51 : vector<256x128xf32> to vector<1x16x16x128xf32>
    %53 = arith.truncf %52 : vector<1x16x16x128xf32> to vector<1x16x16x128xbf16>
    %c0_36 = arith.constant 0 : index
    %c0_37 = arith.constant 0 : index
    %c0_38 = arith.constant 0 : index
    %c0_39 = arith.constant 0 : index
    %54 = vector.load %arg5[%c0_36, %c0_37, %c0_38, %c0_39] : memref<1x16x16x128xbf16, #tpu.memory_space<vmem>>, vector<1x16x16x128xbf16>
    tpu.vector_store %arg5[%c0_36, %c0_37, %c0_38, %c0_39], %53 {strides = array<i32>} : memref<1x16x16x128xbf16, #tpu.memory_space<vmem>>, vector<1x16x16x128xbf16>,
    return
  }
  func.func @transform_1(%arg0: i32, %arg1: i32) -> (i32, i32, i32) {
    %c0_i32 = arith.constant 0 : i32
    %c0_i32_0 = arith.constant 0 : i32
    %c0_i32_1 = arith.constant 0 : i32
    %c0_i32_2 = arith.constant 0 : i32
    return %c0_i32, %c0_i32_0, %c0_i32_1 : i32, i32, i32
  }
  func.func @transform_2(%arg0: i32, %arg1: i32) -> (i32, i32) {
    %c0_i32 = arith.constant 0 : i32
    %c0_i32_0 = arith.constant 0 : i32
    %c0_i32_1 = arith.constant 0 : i32
    return %c0_i32, %c0_i32_0 : i32, i32
  }
  func.func @transform_3(%arg0: i32, %arg1: i32) -> (i32, i32, i32, i32) {
    %c0_i32 = arith.constant 0 : i32
    %c0_i32_0 = arith.constant 0 : i32
    %c0_i32_1 = arith.constant 0 : i32
    return %arg0, %arg1, %c0_i32, %c0_i32_0 : i32, i32, i32, i32
  }
}

module attributes {stable_mosaic.version = 11 : i64} {
  func.func @kernel(%arg0: i32, %arg1: i32, %arg2: memref<2x18x24x128xbf16, #tpu.memory_space<any>>, %arg3: memref<128x128xbf16, #tpu.memory_space<vmem>>, %arg4: memref<1x128xf32, #tpu.memory_space<vmem>>, %arg5: memref<128x128xbf16, #tpu.memory_space<vmem>>, %arg6: memref<1x128xf32, #tpu.memory_space<vmem>>, %arg7: memref<3x384x128xbf16, #tpu.memory_space<vmem>>, %arg8: memref<1x128xf32, #tpu.memory_space<vmem>>, %arg9: memref<1x16x16x128xbf16, #tpu.memory_space<vmem>>, %arg10: memref<1x16x16x128xf32, #tpu.memory_space<vmem>>, %arg11: memref<2x18x24x128xbf16, #tpu.memory_space<vmem>>, %arg12: memref<2x!tpu.dma_semaphore, #tpu.memory_space<semaphore_mem>>, %arg13: memref<256x128xf32, #tpu.memory_space<vmem>>) attributes {dimension_semantics = [#tpu.dimension_semantics<parallel>, #tpu.dimension_semantics<arbitrary>], iteration_bounds = array<i64: 2, 1>, scalar_prefetch = 0 : i64, scratch_operands = 3 : i64, tpu.core_type = #tpu.core_type<tc>, window_params = [{}, {pipeline_mode = #tpu.pipeline_mode<synchronous>, transform_indices = @transform_1, window_bounds = array<i64: 128, 128>}, {pipeline_mode = #tpu.pipeline_mode<synchronous>, transform_indices = @transform_2, window_bounds = array<i64: 1, 128>}, {pipeline_mode = #tpu.pipeline_mode<synchronous>, transform_indices = @transform_3, window_bounds = array<i64: 128, 128>}, {pipeline_mode = #tpu.pipeline_mode<synchronous>, transform_indices = @transform_4, window_bounds = array<i64: 1, 128>}, {pipeline_mode = #tpu.pipeline_mode<synchronous>, transform_indices = @transform_5, window_bounds = array<i64: 3, 384, 128>}, {pipeline_mode = #tpu.pipeline_mode<synchronous>, transform_indices = @transform_6, window_bounds = array<i64: 1, 128>}, {transform_indices = @transform_7, window_bounds = array<i64: 1, 16, 16, 128>}, {transform_indices = @transform_8, window_bounds = array<i64: 1, 16, 16, 128>}]} {
    %c0_i32 = arith.constant 0 : i32
    %0 = arith.cmpi eq, %arg1, %c0_i32 : i32
    %1 = arith.extui %0 : i1 to i32
    %c0_i32_0 = arith.constant 0 : i32
    %2 = arith.cmpi ne, %1, %c0_i32_0 : i32
    scf.if %2 {
      %c0_i32_58 = arith.constant 0 : i32
      %82 = tpu.assume_multiple %c0_i32_58, 16 : i32
      %c0_i32_59 = arith.constant 0 : i32
      %c0_i32_60 = arith.constant 0 : i32
      %c0_i32_61 = arith.constant 0 : i32
      %c0_i32_62 = arith.constant 0 : i32
      %83 = tpu.memref_slice %arg2[%arg0, %82, %c0_i32_61, %c0_i32_62] : memref<2x18x24x128xbf16, #tpu.memory_space<any>> -> memref<1x18x24x128xbf16, #tpu.memory_space<any>>
      %84 = tpu.memref_squeeze %83 : memref<1x18x24x128xbf16, #tpu.memory_space<any>> -> memref<18x24x128xbf16, #tpu.memory_space<any>>
      %c0_i32_63 = arith.constant 0 : i32
      %c0_i32_64 = arith.constant 0 : i32
      %c0_i32_65 = arith.constant 0 : i32
      %85 = tpu.memref_slice %arg11[%c0_i32_59, %c0_i32_63, %c0_i32_64, %c0_i32_65] : memref<2x18x24x128xbf16, #tpu.memory_space<vmem>> -> memref<1x18x24x128xbf16, #tpu.memory_space<vmem>>
      %86 = tpu.memref_squeeze %85 : memref<1x18x24x128xbf16, #tpu.memory_space<vmem>> -> memref<18x24x128xbf16, #tpu.memory_space<vmem>>
      %87 = tpu.memref_slice %arg12[%c0_i32_60] : memref<2x!tpu.dma_semaphore, #tpu.memory_space<semaphore_mem>> -> memref<1x!tpu.dma_semaphore, #tpu.memory_space<semaphore_mem>>
      %88 = tpu.memref_squeeze %87 : memref<1x!tpu.dma_semaphore, #tpu.memory_space<semaphore_mem>> -> memref<!tpu.dma_semaphore, #tpu.memory_space<semaphore_mem>>
      tpu.enqueue_dma source(%84 : memref<18x24x128xbf16, #tpu.memory_space<any>>) target(%86 : memref<18x24x128xbf16, #tpu.memory_space<vmem>>) target_semaphore(%88 : memref<!tpu.dma_semaphore, #tpu.memory_space<semaphore_mem>>)
    } else {
    }
    %c2_i32 = arith.constant 2 : i32
    %3 = arith.remsi %arg1, %c2_i32 : i32
    %c1_i32 = arith.constant 1 : i32
    %4 = arith.addi %arg1, %c1_i32 : i32
    %c1_i32_1 = arith.constant 1 : i32
    %5 = arith.cmpi slt, %4, %c1_i32_1 : i32
    %6 = arith.extui %5 : i1 to i32
    %c0_i32_2 = arith.constant 0 : i32
    %7 = arith.cmpi ne, %6, %c0_i32_2 : i32
    scf.if %7 {
      %c1_i32_58 = arith.constant 1 : i32
      %82 = arith.addi %arg1, %c1_i32_58 : i32
      %c1_i32_59 = arith.constant 1 : i32
      %83 = arith.subi %c1_i32_59, %3 : i32
      %c16_i32 = arith.constant 16 : i32
      %84 = arith.muli %82, %c16_i32 : i32
      %85 = tpu.assume_multiple %84, 16 : i32
      %c0_i32_60 = arith.constant 0 : i32
      %c0_i32_61 = arith.constant 0 : i32
      %86 = tpu.memref_slice %arg2[%arg0, %85, %c0_i32_60, %c0_i32_61] : memref<2x18x24x128xbf16, #tpu.memory_space<any>> -> memref<1x18x24x128xbf16, #tpu.memory_space<any>>
      %87 = tpu.memref_squeeze %86 : memref<1x18x24x128xbf16, #tpu.memory_space<any>> -> memref<18x24x128xbf16, #tpu.memory_space<any>>
      %c0_i32_62 = arith.constant 0 : i32
      %c0_i32_63 = arith.constant 0 : i32
      %c0_i32_64 = arith.constant 0 : i32
      %88 = tpu.memref_slice %arg11[%83, %c0_i32_62, %c0_i32_63, %c0_i32_64] : memref<2x18x24x128xbf16, #tpu.memory_space<vmem>> -> memref<1x18x24x128xbf16, #tpu.memory_space<vmem>>
      %89 = tpu.memref_squeeze %88 : memref<1x18x24x128xbf16, #tpu.memory_space<vmem>> -> memref<18x24x128xbf16, #tpu.memory_space<vmem>>
      %90 = tpu.memref_slice %arg12[%83] : memref<2x!tpu.dma_semaphore, #tpu.memory_space<semaphore_mem>> -> memref<1x!tpu.dma_semaphore, #tpu.memory_space<semaphore_mem>>
      %91 = tpu.memref_squeeze %90 : memref<1x!tpu.dma_semaphore, #tpu.memory_space<semaphore_mem>> -> memref<!tpu.dma_semaphore, #tpu.memory_space<semaphore_mem>>
      tpu.enqueue_dma source(%87 : memref<18x24x128xbf16, #tpu.memory_space<any>>) target(%89 : memref<18x24x128xbf16, #tpu.memory_space<vmem>>) target_semaphore(%91 : memref<!tpu.dma_semaphore, #tpu.memory_space<semaphore_mem>>)
    } else {
    }
    %c0_i32_3 = arith.constant 0 : i32
    %c0_i32_4 = arith.constant 0 : i32
    %c0_i32_5 = arith.constant 0 : i32
    %8 = tpu.memref_slice %arg2[%arg0, %c0_i32_3, %c0_i32_4, %c0_i32_5] : memref<2x18x24x128xbf16, #tpu.memory_space<any>> -> memref<1x18x24x128xbf16, #tpu.memory_space<any>>
    %9 = tpu.memref_squeeze %8 : memref<1x18x24x128xbf16, #tpu.memory_space<any>> -> memref<18x24x128xbf16, #tpu.memory_space<any>>
    %c0_i32_6 = arith.constant 0 : i32
    %c0_i32_7 = arith.constant 0 : i32
    %c0_i32_8 = arith.constant 0 : i32
    %10 = tpu.memref_slice %arg11[%3, %c0_i32_6, %c0_i32_7, %c0_i32_8] : memref<2x18x24x128xbf16, #tpu.memory_space<vmem>> -> memref<1x18x24x128xbf16, #tpu.memory_space<vmem>>
    %11 = tpu.memref_squeeze %10 : memref<1x18x24x128xbf16, #tpu.memory_space<vmem>> -> memref<18x24x128xbf16, #tpu.memory_space<vmem>>
    %12 = tpu.memref_slice %arg12[%3] : memref<2x!tpu.dma_semaphore, #tpu.memory_space<semaphore_mem>> -> memref<1x!tpu.dma_semaphore, #tpu.memory_space<semaphore_mem>>
    %13 = tpu.memref_squeeze %12 : memref<1x!tpu.dma_semaphore, #tpu.memory_space<semaphore_mem>> -> memref<!tpu.dma_semaphore, #tpu.memory_space<semaphore_mem>>
    tpu.wait_dma2 semaphore(%13 : memref<!tpu.dma_semaphore, #tpu.memory_space<semaphore_mem>>) src(%9 : memref<18x24x128xbf16, #tpu.memory_space<any>>) dst(%11 : memref<18x24x128xbf16, #tpu.memory_space<vmem>>)
    %14 = arith.index_cast %3 : i32 to index
    %c0 = arith.constant 0 : index
    %c0_9 = arith.constant 0 : index
    %c0_10 = arith.constant 0 : index
    %15 = vector.load %arg11[%14, %c0, %c0_9, %c0_10] : memref<2x18x24x128xbf16, #tpu.memory_space<vmem>>, vector<1x18x24x128xbf16>
    %16 = vector.shape_cast %15 : vector<1x18x24x128xbf16> to vector<18x24x128xbf16>
    %17 = vector.extract_strided_slice %16 {offsets = [1, 1, 0], sizes = [16, 16, 128], strides = [1, 1, 1]} : vector<18x24x128xbf16> to vector<16x16x128xbf16>
    %18 = vector.shape_cast %17 : vector<16x16x128xbf16> to vector<256x128xbf16>
    %c0_11 = arith.constant 0 : index
    %c0_12 = arith.constant 0 : index
    %19 = vector.load %arg5[%c0_11, %c0_12] : memref<128x128xbf16, #tpu.memory_space<vmem>>, vector<128x128xbf16>
    %cst = arith.constant dense<0.000000e+00> : vector<256x128xf32>
    %20 = tpu.matmul %18, %19, %cst {dimension_numbers = #tpu.dot_dimension_numbers<[1], [0], [0], [1], [0, 0, 1, 1], [], []>} : vector<256x128xbf16>, vector<128x128xbf16>, vector<256x128xf32> -> vector<256x128xf32>
    %c0_13 = arith.constant 0 : index
    %c0_14 = arith.constant 0 : index
    %21 = vector.load %arg6[%c0_13, %c0_14] : memref<1x128xf32, #tpu.memory_space<vmem>>, vector<1x128xf32>
    %22 = vector.broadcast %21 : vector<1x128xf32> to vector<256x128xf32>
    %23 = arith.addf %20, %22 : vector<256x128xf32>
    %cst_15 = arith.constant 0.000000e+00 : f32
    %24 = vector.broadcast %cst_15 : f32 to vector<256x128xf32>
    %25 = arith.cmpf ogt, %23, %24 : vector<256x128xf32>
    %cst_16 = arith.constant 0.00999999977 : f32
    %26 = vector.broadcast %cst_16 : f32 to vector<256x128xf32>
    %27 = arith.mulf %26, %23 : vector<256x128xf32>
    %28 = arith.select %25, %23, %27 : vector<256x128xi1>, vector<256x128xf32>
    %29 = vector.shape_cast %28 : vector<256x128xf32> to vector<1x16x16x128xf32>
    %c0_17 = arith.constant 0 : index
    %c0_18 = arith.constant 0 : index
    %c0_19 = arith.constant 0 : index
    %c0_20 = arith.constant 0 : index
    %30 = vector.load %arg10[%c0_17, %c0_18, %c0_19, %c0_20] : memref<1x16x16x128xf32, #tpu.memory_space<vmem>>, vector<1x16x16x128xf32>
    tpu.vector_store %arg10[%c0_17, %c0_18, %c0_19, %c0_20], %29 {strides = array<i32>} : memref<1x16x16x128xf32, #tpu.memory_space<vmem>>, vector<1x16x16x128xf32>,
    %31 = vector.shape_cast %16 : vector<18x24x128xbf16> to vector<432x128xbf16>
    %c0_21 = arith.constant 0 : index
    %c0_22 = arith.constant 0 : index
    %32 = vector.load %arg3[%c0_21, %c0_22] : memref<128x128xbf16, #tpu.memory_space<vmem>>, vector<128x128xbf16>
    %cst_23 = arith.constant dense<0.000000e+00> : vector<432x128xf32>
    %33 = tpu.matmul %31, %32, %cst_23 {dimension_numbers = #tpu.dot_dimension_numbers<[1], [0], [0], [1], [0, 0, 1, 1], [], []>} : vector<432x128xbf16>, vector<128x128xbf16>, vector<432x128xf32> -> vector<432x128xf32>
    %c0_24 = arith.constant 0 : index
    %c0_25 = arith.constant 0 : index
    %34 = vector.load %arg4[%c0_24, %c0_25] : memref<1x128xf32, #tpu.memory_space<vmem>>, vector<1x128xf32>
    %35 = vector.broadcast %34 : vector<1x128xf32> to vector<432x128xf32>
    %36 = arith.addf %33, %35 : vector<432x128xf32>
    %cst_26 = arith.constant 0.000000e+00 : f32
    %37 = vector.broadcast %cst_26 : f32 to vector<432x128xf32>
    %38 = arith.cmpf ogt, %36, %37 : vector<432x128xf32>
    %cst_27 = arith.constant 0.00999999977 : f32
    %39 = vector.broadcast %cst_27 : f32 to vector<432x128xf32>
    %40 = arith.mulf %39, %36 : vector<432x128xf32>
    %41 = arith.select %38, %36, %40 : vector<432x128xi1>, vector<432x128xf32>
    %42 = arith.truncf %41 : vector<432x128xf32> to vector<432x128xbf16>
    %43 = vector.shape_cast %42 : vector<432x128xbf16> to vector<18x24x128xbf16>
    %44 = vector.extract_strided_slice %43 {offsets = [0, 0, 0], sizes = [18, 16, 128], strides = [1, 1, 1]} : vector<18x24x128xbf16> to vector<18x16x128xbf16>
    %45 = vector.extract_strided_slice %43 {offsets = [0, 1, 0], sizes = [18, 16, 128], strides = [1, 1, 1]} : vector<18x24x128xbf16> to vector<18x16x128xbf16>
    %46 = vector.extract_strided_slice %43 {offsets = [0, 2, 0], sizes = [18, 16, 128], strides = [1, 1, 1]} : vector<18x24x128xbf16> to vector<18x16x128xbf16>
    %47 = tpu.concatenate %44, %45, %46 in 2 : vector<18x16x128xbf16>, vector<18x16x128xbf16>, vector<18x16x128xbf16> -> vector<18x16x384xbf16>
    %48 = vector.extract_strided_slice %47 {offsets = [0, 0, 0], sizes = [16, 16, 384], strides = [1, 1, 1]} : vector<18x16x384xbf16> to vector<16x16x384xbf16>
    %49 = vector.shape_cast %48 : vector<16x16x384xbf16> to vector<256x384xbf16>
    %c0_28 = arith.constant 0 : index
    %c0_29 = arith.constant 0 : index
    %c0_30 = arith.constant 0 : index
    %50 = vector.load %arg7[%c0_28, %c0_29, %c0_30] : memref<3x384x128xbf16, #tpu.memory_space<vmem>>, vector<1x384x128xbf16>
    %51 = vector.shape_cast %50 : vector<1x384x128xbf16> to vector<384x128xbf16>
    %cst_31 = arith.constant dense<0.000000e+00> : vector<256x128xf32>
    %52 = tpu.matmul %49, %51, %cst_31 {dimension_numbers = #tpu.dot_dimension_numbers<[1], [0], [0], [1], [0, 0, 1, 1], [], []>} : vector<256x384xbf16>, vector<384x128xbf16>, vector<256x128xf32> -> vector<256x128xf32>
    %c0_32 = arith.constant 0 : index
    %c0_33 = arith.constant 0 : index
    %53 = vector.load %arg13[%c0_32, %c0_33] : memref<256x128xf32, #tpu.memory_space<vmem>>, vector<256x128xf32>
    tpu.vector_store %arg13[%c0_32, %c0_33], %52 {strides = array<i32>} : memref<256x128xf32, #tpu.memory_space<vmem>>, vector<256x128xf32>,
    %c0_34 = arith.constant 0 : index
    %c0_35 = arith.constant 0 : index
    %54 = vector.load %arg13[%c0_34, %c0_35] : memref<256x128xf32, #tpu.memory_space<vmem>>, vector<256x128xf32>
    %55 = vector.extract_strided_slice %47 {offsets = [1, 0, 0], sizes = [16, 16, 384], strides = [1, 1, 1]} : vector<18x16x384xbf16> to vector<16x16x384xbf16>
    %56 = vector.shape_cast %55 : vector<16x16x384xbf16> to vector<256x384xbf16>
    %c1 = arith.constant 1 : index
    %c0_36 = arith.constant 0 : index
    %c0_37 = arith.constant 0 : index
    %57 = vector.load %arg7[%c1, %c0_36, %c0_37] : memref<3x384x128xbf16, #tpu.memory_space<vmem>>, vector<1x384x128xbf16>
    %58 = vector.shape_cast %57 : vector<1x384x128xbf16> to vector<384x128xbf16>
    %cst_38 = arith.constant dense<0.000000e+00> : vector<256x128xf32>
    %59 = tpu.matmul %56, %58, %cst_38 {dimension_numbers = #tpu.dot_dimension_numbers<[1], [0], [0], [1], [0, 0, 1, 1], [], []>} : vector<256x384xbf16>, vector<384x128xbf16>, vector<256x128xf32> -> vector<256x128xf32>
    %60 = arith.addf %54, %59 : vector<256x128xf32>
    %c0_39 = arith.constant 0 : index
    %c0_40 = arith.constant 0 : index
    %61 = vector.load %arg13[%c0_39, %c0_40] : memref<256x128xf32, #tpu.memory_space<vmem>>, vector<256x128xf32>
    tpu.vector_store %arg13[%c0_39, %c0_40], %60 {strides = array<i32>} : memref<256x128xf32, #tpu.memory_space<vmem>>, vector<256x128xf32>,
    %c0_41 = arith.constant 0 : index
    %c0_42 = arith.constant 0 : index
    %62 = vector.load %arg13[%c0_41, %c0_42] : memref<256x128xf32, #tpu.memory_space<vmem>>, vector<256x128xf32>
    %63 = vector.extract_strided_slice %47 {offsets = [2, 0, 0], sizes = [16, 16, 384], strides = [1, 1, 1]} : vector<18x16x384xbf16> to vector<16x16x384xbf16>
    %64 = vector.shape_cast %63 : vector<16x16x384xbf16> to vector<256x384xbf16>
    %c2 = arith.constant 2 : index
    %c0_43 = arith.constant 0 : index
    %c0_44 = arith.constant 0 : index
    %65 = vector.load %arg7[%c2, %c0_43, %c0_44] : memref<3x384x128xbf16, #tpu.memory_space<vmem>>, vector<1x384x128xbf16>
    %66 = vector.shape_cast %65 : vector<1x384x128xbf16> to vector<384x128xbf16>
    %cst_45 = arith.constant dense<0.000000e+00> : vector<256x128xf32>
    %67 = tpu.matmul %64, %66, %cst_45 {dimension_numbers = #tpu.dot_dimension_numbers<[1], [0], [0], [1], [0, 0, 1, 1], [], []>} : vector<256x384xbf16>, vector<384x128xbf16>, vector<256x128xf32> -> vector<256x128xf32>
    %68 = arith.addf %62, %67 : vector<256x128xf32>
    %c0_46 = arith.constant 0 : index
    %c0_47 = arith.constant 0 : index
    %69 = vector.load %arg13[%c0_46, %c0_47] : memref<256x128xf32, #tpu.memory_space<vmem>>, vector<256x128xf32>
    tpu.vector_store %arg13[%c0_46, %c0_47], %68 {strides = array<i32>} : memref<256x128xf32, #tpu.memory_space<vmem>>, vector<256x128xf32>,
    %c0_48 = arith.constant 0 : index
    %c0_49 = arith.constant 0 : index
    %70 = vector.load %arg13[%c0_48, %c0_49] : memref<256x128xf32, #tpu.memory_space<vmem>>, vector<256x128xf32>
    %c0_50 = arith.constant 0 : index
    %c0_51 = arith.constant 0 : index
    %71 = vector.load %arg8[%c0_50, %c0_51] : memref<1x128xf32, #tpu.memory_space<vmem>>, vector<1x128xf32>
    %72 = vector.broadcast %71 : vector<1x128xf32> to vector<256x128xf32>
    %73 = arith.addf %70, %72 : vector<256x128xf32>
    %cst_52 = arith.constant 0.000000e+00 : f32
    %74 = vector.broadcast %cst_52 : f32 to vector<256x128xf32>
    %75 = arith.cmpf ogt, %73, %74 : vector<256x128xf32>
    %cst_53 = arith.constant 0.00999999977 : f32
    %76 = vector.broadcast %cst_53 : f32 to vector<256x128xf32>
    %77 = arith.mulf %76, %73 : vector<256x128xf32>
    %78 = arith.select %75, %73, %77 : vector<256x128xi1>, vector<256x128xf32>
    %79 = vector.shape_cast %78 : vector<256x128xf32> to vector<1x16x16x128xf32>
    %80 = arith.truncf %79 : vector<1x16x16x128xf32> to vector<1x16x16x128xbf16>
    %c0_54 = arith.constant 0 : index
    %c0_55 = arith.constant 0 : index
    %c0_56 = arith.constant 0 : index
    %c0_57 = arith.constant 0 : index
    %81 = vector.load %arg9[%c0_54, %c0_55, %c0_56, %c0_57] : memref<1x16x16x128xbf16, #tpu.memory_space<vmem>>, vector<1x16x16x128xbf16>
    tpu.vector_store %arg9[%c0_54, %c0_55, %c0_56, %c0_57], %80 {strides = array<i32>} : memref<1x16x16x128xbf16, #tpu.memory_space<vmem>>, vector<1x16x16x128xbf16>,
    return
  }
  func.func @transform_1(%arg0: i32, %arg1: i32) -> (i32, i32) {
    %c0_i32 = arith.constant 0 : i32
    %c0_i32_0 = arith.constant 0 : i32
    %c0_i32_1 = arith.constant 0 : i32
    return %c0_i32, %c0_i32_0 : i32, i32
  }
  func.func @transform_2(%arg0: i32, %arg1: i32) -> (i32, i32) {
    %c0_i32 = arith.constant 0 : i32
    %c0_i32_0 = arith.constant 0 : i32
    %c0_i32_1 = arith.constant 0 : i32
    return %c0_i32, %c0_i32_0 : i32, i32
  }
  func.func @transform_3(%arg0: i32, %arg1: i32) -> (i32, i32) {
    %c0_i32 = arith.constant 0 : i32
    %c0_i32_0 = arith.constant 0 : i32
    %c0_i32_1 = arith.constant 0 : i32
    return %c0_i32, %c0_i32_0 : i32, i32
  }
  func.func @transform_4(%arg0: i32, %arg1: i32) -> (i32, i32) {
    %c0_i32 = arith.constant 0 : i32
    %c0_i32_0 = arith.constant 0 : i32
    %c0_i32_1 = arith.constant 0 : i32
    return %c0_i32, %c0_i32_0 : i32, i32
  }
  func.func @transform_5(%arg0: i32, %arg1: i32) -> (i32, i32, i32) {
    %c0_i32 = arith.constant 0 : i32
    %c0_i32_0 = arith.constant 0 : i32
    %c0_i32_1 = arith.constant 0 : i32
    %c0_i32_2 = arith.constant 0 : i32
    return %c0_i32, %c0_i32_0, %c0_i32_1 : i32, i32, i32
  }
  func.func @transform_6(%arg0: i32, %arg1: i32) -> (i32, i32) {
    %c0_i32 = arith.constant 0 : i32
    %c0_i32_0 = arith.constant 0 : i32
    %c0_i32_1 = arith.constant 0 : i32
    return %c0_i32, %c0_i32_0 : i32, i32
  }
  func.func @transform_7(%arg0: i32, %arg1: i32) -> (i32, i32, i32, i32) {
    %c0_i32 = arith.constant 0 : i32
    %c0_i32_0 = arith.constant 0 : i32
    %c0_i32_1 = arith.constant 0 : i32
    return %arg0, %arg1, %c0_i32, %c0_i32_0 : i32, i32, i32, i32
  }
  func.func @transform_8(%arg0: i32, %arg1: i32) -> (i32, i32, i32, i32) {
    %c0_i32 = arith.constant 0 : i32
    %c0_i32_0 = arith.constant 0 : i32
    %c0_i32_1 = arith.constant 0 : i32
    return %arg0, %arg1, %c0_i32, %c0_i32_0 : i32, i32, i32, i32
  }
}

module attributes {stable_mosaic.version = 11 : i64} {
  func.func @kernel(%arg0: i32, %arg1: i32, %arg2: memref<2x18x24x128xbf16, #tpu.memory_space<any>>, %arg3: memref<3x384x128xbf16, #tpu.memory_space<vmem>>, %arg4: memref<1x128xf32, #tpu.memory_space<vmem>>, %arg5: memref<128x128xbf16, #tpu.memory_space<vmem>>, %arg6: memref<1x128xf32, #tpu.memory_space<vmem>>, %arg7: memref<1x16x16x128xf32, #tpu.memory_space<vmem>>, %arg8: memref<2x18x24x128xbf16, #tpu.memory_space<vmem>>, %arg9: memref<2x!tpu.dma_semaphore, #tpu.memory_space<semaphore_mem>>, %arg10: memref<256x128xf32, #tpu.memory_space<vmem>>) attributes {dimension_semantics = [#tpu.dimension_semantics<parallel>, #tpu.dimension_semantics<arbitrary>], iteration_bounds = array<i64: 2, 1>, scalar_prefetch = 0 : i64, scratch_operands = 3 : i64, tpu.core_type = #tpu.core_type<tc>, window_params = [{}, {pipeline_mode = #tpu.pipeline_mode<synchronous>, transform_indices = @transform_1, window_bounds = array<i64: 3, 384, 128>}, {pipeline_mode = #tpu.pipeline_mode<synchronous>, transform_indices = @transform_2, window_bounds = array<i64: 1, 128>}, {pipeline_mode = #tpu.pipeline_mode<synchronous>, transform_indices = @transform_3, window_bounds = array<i64: 128, 128>}, {pipeline_mode = #tpu.pipeline_mode<synchronous>, transform_indices = @transform_4, window_bounds = array<i64: 1, 128>}, {transform_indices = @transform_5, window_bounds = array<i64: 1, 16, 16, 128>}]} {
    %c0_i32 = arith.constant 0 : i32
    %0 = arith.cmpi eq, %arg1, %c0_i32 : i32
    %1 = arith.extui %0 : i1 to i32
    %c0_i32_0 = arith.constant 0 : i32
    %2 = arith.cmpi ne, %1, %c0_i32_0 : i32
    scf.if %2 {
      %c0_i32_47 = arith.constant 0 : i32
      %65 = tpu.assume_multiple %c0_i32_47, 16 : i32
      %c0_i32_48 = arith.constant 0 : i32
      %c0_i32_49 = arith.constant 0 : i32
      %c0_i32_50 = arith.constant 0 : i32
      %c0_i32_51 = arith.constant 0 : i32
      %66 = tpu.memref_slice %arg2[%arg0, %65, %c0_i32_50, %c0_i32_51] : memref<2x18x24x128xbf16, #tpu.memory_space<any>> -> memref<1x18x24x128xbf16, #tpu.memory_space<any>>
      %67 = tpu.memref_squeeze %66 : memref<1x18x24x128xbf16, #tpu.memory_space<any>> -> memref<18x24x128xbf16, #tpu.memory_space<any>>
      %c0_i32_52 = arith.constant 0 : i32
      %c0_i32_53 = arith.constant 0 : i32
      %c0_i32_54 = arith.constant 0 : i32
      %68 = tpu.memref_slice %arg8[%c0_i32_48, %c0_i32_52, %c0_i32_53, %c0_i32_54] : memref<2x18x24x128xbf16, #tpu.memory_space<vmem>> -> memref<1x18x24x128xbf16, #tpu.memory_space<vmem>>
      %69 = tpu.memref_squeeze %68 : memref<1x18x24x128xbf16, #tpu.memory_space<vmem>> -> memref<18x24x128xbf16, #tpu.memory_space<vmem>>
      %70 = tpu.memref_slice %arg9[%c0_i32_49] : memref<2x!tpu.dma_semaphore, #tpu.memory_space<semaphore_mem>> -> memref<1x!tpu.dma_semaphore, #tpu.memory_space<semaphore_mem>>
      %71 = tpu.memref_squeeze %70 : memref<1x!tpu.dma_semaphore, #tpu.memory_space<semaphore_mem>> -> memref<!tpu.dma_semaphore, #tpu.memory_space<semaphore_mem>>
      tpu.enqueue_dma source(%67 : memref<18x24x128xbf16, #tpu.memory_space<any>>) target(%69 : memref<18x24x128xbf16, #tpu.memory_space<vmem>>) target_semaphore(%71 : memref<!tpu.dma_semaphore, #tpu.memory_space<semaphore_mem>>)
    } else {
    }
    %c2_i32 = arith.constant 2 : i32
    %3 = arith.remsi %arg1, %c2_i32 : i32
    %c1_i32 = arith.constant 1 : i32
    %4 = arith.addi %arg1, %c1_i32 : i32
    %c1_i32_1 = arith.constant 1 : i32
    %5 = arith.cmpi slt, %4, %c1_i32_1 : i32
    %6 = arith.extui %5 : i1 to i32
    %c0_i32_2 = arith.constant 0 : i32
    %7 = arith.cmpi ne, %6, %c0_i32_2 : i32
    scf.if %7 {
      %c1_i32_47 = arith.constant 1 : i32
      %65 = arith.addi %arg1, %c1_i32_47 : i32
      %c1_i32_48 = arith.constant 1 : i32
      %66 = arith.subi %c1_i32_48, %3 : i32
      %c16_i32 = arith.constant 16 : i32
      %67 = arith.muli %65, %c16_i32 : i32
      %68 = tpu.assume_multiple %67, 16 : i32
      %c0_i32_49 = arith.constant 0 : i32
      %c0_i32_50 = arith.constant 0 : i32
      %69 = tpu.memref_slice %arg2[%arg0, %68, %c0_i32_49, %c0_i32_50] : memref<2x18x24x128xbf16, #tpu.memory_space<any>> -> memref<1x18x24x128xbf16, #tpu.memory_space<any>>
      %70 = tpu.memref_squeeze %69 : memref<1x18x24x128xbf16, #tpu.memory_space<any>> -> memref<18x24x128xbf16, #tpu.memory_space<any>>
      %c0_i32_51 = arith.constant 0 : i32
      %c0_i32_52 = arith.constant 0 : i32
      %c0_i32_53 = arith.constant 0 : i32
      %71 = tpu.memref_slice %arg8[%66, %c0_i32_51, %c0_i32_52, %c0_i32_53] : memref<2x18x24x128xbf16, #tpu.memory_space<vmem>> -> memref<1x18x24x128xbf16, #tpu.memory_space<vmem>>
      %72 = tpu.memref_squeeze %71 : memref<1x18x24x128xbf16, #tpu.memory_space<vmem>> -> memref<18x24x128xbf16, #tpu.memory_space<vmem>>
      %73 = tpu.memref_slice %arg9[%66] : memref<2x!tpu.dma_semaphore, #tpu.memory_space<semaphore_mem>> -> memref<1x!tpu.dma_semaphore, #tpu.memory_space<semaphore_mem>>
      %74 = tpu.memref_squeeze %73 : memref<1x!tpu.dma_semaphore, #tpu.memory_space<semaphore_mem>> -> memref<!tpu.dma_semaphore, #tpu.memory_space<semaphore_mem>>
      tpu.enqueue_dma source(%70 : memref<18x24x128xbf16, #tpu.memory_space<any>>) target(%72 : memref<18x24x128xbf16, #tpu.memory_space<vmem>>) target_semaphore(%74 : memref<!tpu.dma_semaphore, #tpu.memory_space<semaphore_mem>>)
    } else {
    }
    %c0_i32_3 = arith.constant 0 : i32
    %c0_i32_4 = arith.constant 0 : i32
    %c0_i32_5 = arith.constant 0 : i32
    %8 = tpu.memref_slice %arg2[%arg0, %c0_i32_3, %c0_i32_4, %c0_i32_5] : memref<2x18x24x128xbf16, #tpu.memory_space<any>> -> memref<1x18x24x128xbf16, #tpu.memory_space<any>>
    %9 = tpu.memref_squeeze %8 : memref<1x18x24x128xbf16, #tpu.memory_space<any>> -> memref<18x24x128xbf16, #tpu.memory_space<any>>
    %c0_i32_6 = arith.constant 0 : i32
    %c0_i32_7 = arith.constant 0 : i32
    %c0_i32_8 = arith.constant 0 : i32
    %10 = tpu.memref_slice %arg8[%3, %c0_i32_6, %c0_i32_7, %c0_i32_8] : memref<2x18x24x128xbf16, #tpu.memory_space<vmem>> -> memref<1x18x24x128xbf16, #tpu.memory_space<vmem>>
    %11 = tpu.memref_squeeze %10 : memref<1x18x24x128xbf16, #tpu.memory_space<vmem>> -> memref<18x24x128xbf16, #tpu.memory_space<vmem>>
    %12 = tpu.memref_slice %arg9[%3] : memref<2x!tpu.dma_semaphore, #tpu.memory_space<semaphore_mem>> -> memref<1x!tpu.dma_semaphore, #tpu.memory_space<semaphore_mem>>
    %13 = tpu.memref_squeeze %12 : memref<1x!tpu.dma_semaphore, #tpu.memory_space<semaphore_mem>> -> memref<!tpu.dma_semaphore, #tpu.memory_space<semaphore_mem>>
    tpu.wait_dma2 semaphore(%13 : memref<!tpu.dma_semaphore, #tpu.memory_space<semaphore_mem>>) src(%9 : memref<18x24x128xbf16, #tpu.memory_space<any>>) dst(%11 : memref<18x24x128xbf16, #tpu.memory_space<vmem>>)
    %14 = arith.index_cast %3 : i32 to index
    %c0 = arith.constant 0 : index
    %c0_9 = arith.constant 0 : index
    %c0_10 = arith.constant 0 : index
    %15 = vector.load %arg8[%14, %c0, %c0_9, %c0_10] : memref<2x18x24x128xbf16, #tpu.memory_space<vmem>>, vector<1x18x24x128xbf16>
    %16 = vector.shape_cast %15 : vector<1x18x24x128xbf16> to vector<18x24x128xbf16>
    %17 = vector.extract_strided_slice %16 {offsets = [0, 0, 0], sizes = [18, 16, 128], strides = [1, 1, 1]} : vector<18x24x128xbf16> to vector<18x16x128xbf16>
    %18 = vector.extract_strided_slice %16 {offsets = [0, 1, 0], sizes = [18, 16, 128], strides = [1, 1, 1]} : vector<18x24x128xbf16> to vector<18x16x128xbf16>
    %19 = vector.extract_strided_slice %16 {offsets = [0, 2, 0], sizes = [18, 16, 128], strides = [1, 1, 1]} : vector<18x24x128xbf16> to vector<18x16x128xbf16>
    %20 = tpu.concatenate %17, %18, %19 in 2 : vector<18x16x128xbf16>, vector<18x16x128xbf16>, vector<18x16x128xbf16> -> vector<18x16x384xbf16>
    %21 = vector.extract_strided_slice %20 {offsets = [0, 0, 0], sizes = [16, 16, 384], strides = [1, 1, 1]} : vector<18x16x384xbf16> to vector<16x16x384xbf16>
    %22 = vector.shape_cast %21 : vector<16x16x384xbf16> to vector<256x384xbf16>
    %c0_11 = arith.constant 0 : index
    %c0_12 = arith.constant 0 : index
    %c0_13 = arith.constant 0 : index
    %23 = vector.load %arg3[%c0_11, %c0_12, %c0_13] : memref<3x384x128xbf16, #tpu.memory_space<vmem>>, vector<1x384x128xbf16>
    %24 = vector.shape_cast %23 : vector<1x384x128xbf16> to vector<384x128xbf16>
    %cst = arith.constant dense<0.000000e+00> : vector<256x128xf32>
    %25 = tpu.matmul %22, %24, %cst {dimension_numbers = #tpu.dot_dimension_numbers<[1], [0], [0], [1], [0, 0, 1, 1], [], []>} : vector<256x384xbf16>, vector<384x128xbf16>, vector<256x128xf32> -> vector<256x128xf32>
    %c0_14 = arith.constant 0 : index
    %c0_15 = arith.constant 0 : index
    %26 = vector.load %arg10[%c0_14, %c0_15] : memref<256x128xf32, #tpu.memory_space<vmem>>, vector<256x128xf32>
    tpu.vector_store %arg10[%c0_14, %c0_15], %25 {strides = array<i32>} : memref<256x128xf32, #tpu.memory_space<vmem>>, vector<256x128xf32>,
    %c0_16 = arith.constant 0 : index
    %c0_17 = arith.constant 0 : index
    %27 = vector.load %arg10[%c0_16, %c0_17] : memref<256x128xf32, #tpu.memory_space<vmem>>, vector<256x128xf32>
    %28 = vector.extract_strided_slice %20 {offsets = [1, 0, 0], sizes = [16, 16, 384], strides = [1, 1, 1]} : vector<18x16x384xbf16> to vector<16x16x384xbf16>
    %29 = vector.shape_cast %28 : vector<16x16x384xbf16> to vector<256x384xbf16>
    %c1 = arith.constant 1 : index
    %c0_18 = arith.constant 0 : index
    %c0_19 = arith.constant 0 : index
    %30 = vector.load %arg3[%c1, %c0_18, %c0_19] : memref<3x384x128xbf16, #tpu.memory_space<vmem>>, vector<1x384x128xbf16>
    %31 = vector.shape_cast %30 : vector<1x384x128xbf16> to vector<384x128xbf16>
    %cst_20 = arith.constant dense<0.000000e+00> : vector<256x128xf32>
    %32 = tpu.matmul %29, %31, %cst_20 {dimension_numbers = #tpu.dot_dimension_numbers<[1], [0], [0], [1], [0, 0, 1, 1], [], []>} : vector<256x384xbf16>, vector<384x128xbf16>, vector<256x128xf32> -> vector<256x128xf32>
    %33 = arith.addf %27, %32 : vector<256x128xf32>
    %c0_21 = arith.constant 0 : index
    %c0_22 = arith.constant 0 : index
    %34 = vector.load %arg10[%c0_21, %c0_22] : memref<256x128xf32, #tpu.memory_space<vmem>>, vector<256x128xf32>
    tpu.vector_store %arg10[%c0_21, %c0_22], %33 {strides = array<i32>} : memref<256x128xf32, #tpu.memory_space<vmem>>, vector<256x128xf32>,
    %c0_23 = arith.constant 0 : index
    %c0_24 = arith.constant 0 : index
    %35 = vector.load %arg10[%c0_23, %c0_24] : memref<256x128xf32, #tpu.memory_space<vmem>>, vector<256x128xf32>
    %36 = vector.extract_strided_slice %20 {offsets = [2, 0, 0], sizes = [16, 16, 384], strides = [1, 1, 1]} : vector<18x16x384xbf16> to vector<16x16x384xbf16>
    %37 = vector.shape_cast %36 : vector<16x16x384xbf16> to vector<256x384xbf16>
    %c2 = arith.constant 2 : index
    %c0_25 = arith.constant 0 : index
    %c0_26 = arith.constant 0 : index
    %38 = vector.load %arg3[%c2, %c0_25, %c0_26] : memref<3x384x128xbf16, #tpu.memory_space<vmem>>, vector<1x384x128xbf16>
    %39 = vector.shape_cast %38 : vector<1x384x128xbf16> to vector<384x128xbf16>
    %cst_27 = arith.constant dense<0.000000e+00> : vector<256x128xf32>
    %40 = tpu.matmul %37, %39, %cst_27 {dimension_numbers = #tpu.dot_dimension_numbers<[1], [0], [0], [1], [0, 0, 1, 1], [], []>} : vector<256x384xbf16>, vector<384x128xbf16>, vector<256x128xf32> -> vector<256x128xf32>
    %41 = arith.addf %35, %40 : vector<256x128xf32>
    %c0_28 = arith.constant 0 : index
    %c0_29 = arith.constant 0 : index
    %42 = vector.load %arg10[%c0_28, %c0_29] : memref<256x128xf32, #tpu.memory_space<vmem>>, vector<256x128xf32>
    tpu.vector_store %arg10[%c0_28, %c0_29], %41 {strides = array<i32>} : memref<256x128xf32, #tpu.memory_space<vmem>>, vector<256x128xf32>,
    %c0_30 = arith.constant 0 : index
    %c0_31 = arith.constant 0 : index
    %43 = vector.load %arg10[%c0_30, %c0_31] : memref<256x128xf32, #tpu.memory_space<vmem>>, vector<256x128xf32>
    %c0_32 = arith.constant 0 : index
    %c0_33 = arith.constant 0 : index
    %44 = vector.load %arg4[%c0_32, %c0_33] : memref<1x128xf32, #tpu.memory_space<vmem>>, vector<1x128xf32>
    %45 = vector.broadcast %44 : vector<1x128xf32> to vector<256x128xf32>
    %46 = arith.addf %43, %45 : vector<256x128xf32>
    %cst_34 = arith.constant 0.000000e+00 : f32
    %47 = vector.broadcast %cst_34 : f32 to vector<256x128xf32>
    %48 = arith.cmpf ogt, %46, %47 : vector<256x128xf32>
    %cst_35 = arith.constant 0.00999999977 : f32
    %49 = vector.broadcast %cst_35 : f32 to vector<256x128xf32>
    %50 = arith.mulf %49, %46 : vector<256x128xf32>
    %51 = arith.select %48, %46, %50 : vector<256x128xi1>, vector<256x128xf32>
    %52 = arith.truncf %51 : vector<256x128xf32> to vector<256x128xbf16>
    %c0_36 = arith.constant 0 : index
    %c0_37 = arith.constant 0 : index
    %53 = vector.load %arg5[%c0_36, %c0_37] : memref<128x128xbf16, #tpu.memory_space<vmem>>, vector<128x128xbf16>
    %cst_38 = arith.constant dense<0.000000e+00> : vector<256x128xf32>
    %54 = tpu.matmul %52, %53, %cst_38 {dimension_numbers = #tpu.dot_dimension_numbers<[1], [0], [0], [1], [0, 0, 1, 1], [], []>} : vector<256x128xbf16>, vector<128x128xbf16>, vector<256x128xf32> -> vector<256x128xf32>
    %c0_39 = arith.constant 0 : index
    %c0_40 = arith.constant 0 : index
    %55 = vector.load %arg6[%c0_39, %c0_40] : memref<1x128xf32, #tpu.memory_space<vmem>>, vector<1x128xf32>
    %56 = vector.broadcast %55 : vector<1x128xf32> to vector<256x128xf32>
    %57 = arith.addf %54, %56 : vector<256x128xf32>
    %cst_41 = arith.constant 0.000000e+00 : f32
    %58 = vector.broadcast %cst_41 : f32 to vector<256x128xf32>
    %59 = arith.cmpf ogt, %57, %58 : vector<256x128xf32>
    %cst_42 = arith.constant 0.00999999977 : f32
    %60 = vector.broadcast %cst_42 : f32 to vector<256x128xf32>
    %61 = arith.mulf %60, %57 : vector<256x128xf32>
    %62 = arith.select %59, %57, %61 : vector<256x128xi1>, vector<256x128xf32>
    %63 = vector.shape_cast %62 : vector<256x128xf32> to vector<1x16x16x128xf32>
    %c0_43 = arith.constant 0 : index
    %c0_44 = arith.constant 0 : index
    %c0_45 = arith.constant 0 : index
    %c0_46 = arith.constant 0 : index
    %64 = vector.load %arg7[%c0_43, %c0_44, %c0_45, %c0_46] : memref<1x16x16x128xf32, #tpu.memory_space<vmem>>, vector<1x16x16x128xf32>
    tpu.vector_store %arg7[%c0_43, %c0_44, %c0_45, %c0_46], %63 {strides = array<i32>} : memref<1x16x16x128xf32, #tpu.memory_space<vmem>>, vector<1x16x16x128xf32>,
    return
  }
  func.func @transform_1(%arg0: i32, %arg1: i32) -> (i32, i32, i32) {
    %c0_i32 = arith.constant 0 : i32
    %c0_i32_0 = arith.constant 0 : i32
    %c0_i32_1 = arith.constant 0 : i32
    %c0_i32_2 = arith.constant 0 : i32
    return %c0_i32, %c0_i32_0, %c0_i32_1 : i32, i32, i32
  }
  func.func @transform_2(%arg0: i32, %arg1: i32) -> (i32, i32) {
    %c0_i32 = arith.constant 0 : i32
    %c0_i32_0 = arith.constant 0 : i32
    %c0_i32_1 = arith.constant 0 : i32
    return %c0_i32, %c0_i32_0 : i32, i32
  }
  func.func @transform_3(%arg0: i32, %arg1: i32) -> (i32, i32) {
    %c0_i32 = arith.constant 0 : i32
    %c0_i32_0 = arith.constant 0 : i32
    %c0_i32_1 = arith.constant 0 : i32
    return %c0_i32, %c0_i32_0 : i32, i32
  }
  func.func @transform_4(%arg0: i32, %arg1: i32) -> (i32, i32) {
    %c0_i32 = arith.constant 0 : i32
    %c0_i32_0 = arith.constant 0 : i32
    %c0_i32_1 = arith.constant 0 : i32
    return %c0_i32, %c0_i32_0 : i32, i32
  }
  func.func @transform_5(%arg0: i32, %arg1: i32) -> (i32, i32, i32, i32) {
    %c0_i32 = arith.constant 0 : i32
    %c0_i32_0 = arith.constant 0 : i32
    %c0_i32_1 = arith.constant 0 : i32
    return %arg0, %arg1, %c0_i32, %c0_i32_0 : i32, i32, i32, i32
  }
}

</mosaic_0001>

<bundles_post_ra>
// kernel: residual_module3.4
= control target key start
LH: loop header
LB: loop body
LE: loop exit
PB: predicated region body
PF: predicated region fallthrough
CT: control target
= control target key end

     0   :  { %s4464_s12 = smov 0   ;;  %s4466_s13 = smov 0   ;;  %s5498_s0 = inlined_call_operand.vmem [shape: bf16[2,18,24,128], index: 0, kind: input, shape index: {}]   ;;  %s5499_s1 = inlined_call_operand.vmem [shape: bf16[3,384,128], index: 1, kind: input, shape index: {}]   ;;  %s5500_s2 = inlined_call_operand.vmem [shape: f32[1,128], index: 2, kind: input, shape index: {}]   ;;  %s5501_s3 = inlined_call_operand.vmem [shape: bf16[2,16,16,128], index: 3, kind: output, shape index: {}]  }
   0x1   :  { %s4468_s14 = smov 0  }
   0x2 LB: > { %s25_s15 = sadd.s32 1, %s4438_s13  ;;  %p3120_p0 = scmp.ge.s32.totalorder %s4442_s14, 1  ;;  %s4442_s14 = sphi %s4468_s14, %s13_s14   ;;  %s4438_s13 = sphi %s4466_s13, %s5507_s13   ;;  %s4434_s12 = sphi %s4464_s12, %s5506_s12  }
   0x3   : > { %p27_p1 = scmp.ge.s32.totalorder %s25_s15, 2  ;;  %p117_p2 = scmp.lt.s32.totalorder %s4442_s14, 3 }
   0x5   : > { %s5509_s15 = smov (%p27_p1, %s25_s15), 0  ;;  %p118_p3 = pnand %p3120_p0, %p117_p2 }
   0x7   : > { %121 = sbr.rel (%p118_p3) target bundleno = 578 (0x242), region = 28 }
   0xe   : > { %p140_p4 = scmp.lt.s32.totalorder %s4434_s12, 1  ;;  %s3423_s16 = smul.u32 216, %s4434_s12 }
  0x10   : > { %s5511_s12 = smov (!%p140_p4, %s4434_s12), 1  ;;  %s4485_s19 = scalar_lea.vmem %s5498_s0, %s3423_s16 }
  0x11   : > { %s3422_s20 = sshll.u32 %s5511_s12, 7  ;;  %v192_v0 = vld [vmem:[%s4485_s19] sm:$0xff]  ;;  %v194_v1 = vld [vmem:[%s4485_s19 + $0x8] sm:$0xff]  ;;  %v196_v2 = vld [vmem:[%s4485_s19 + $0x10] sm:$0xff] }
  0x12   : > { %s4493_s23 = scalar_lea.vmem %s5501_s3, %s3422_s20  ;;  %193 = vst [vmem:[#allocation2] sm:$0xff] %v192_v0  ;;  %195 = vst [vmem:[#allocation2 + $0x8] sm:$0xff] %v194_v1  ;;  %v198_v3 = vld [vmem:[%s4485_s19 + $0x18] sm:$0xff]  ;;  %v200_v4 = vld [vmem:[%s4485_s19 + $0x20] sm:$0xff] }
  0x13   : > { %197 = vst [vmem:[#allocation2 + $0x10] sm:$0xff] %v196_v2  ;;  %v202_v5 = vld [vmem:[%s4485_s19 + $0x28] sm:$0xff]  ;;  %199 = vst [vmem:[#allocation2 + $0x18] sm:$0xff] %v198_v3  ;;  %v204_v6 = vld [vmem:[%s4485_s19 + $0x30] sm:$0xff] }
  0x14   : > { %201 = vst [vmem:[#allocation2 + $0x20] sm:$0xff] %v200_v4  ;;  %203 = vst [vmem:[#allocation2 + $0x28] sm:$0xff] %v202_v5  ;;  %v206_v7 = vld [vmem:[%s4485_s19 + $0x38] sm:$0xff]  ;;  %v208_v8 = vld [vmem:[%s4485_s19 + $0x40] sm:$0xff] }
  0x15   : > { %205 = vst [vmem:[#allocation2 + $0x30] sm:$0xff] %v204_v6  ;;  %207 = vst [vmem:[#allocation2 + $0x38] sm:$0xff] %v206_v7  ;;  %v210_v9 = vld [vmem:[%s4485_s19 + $0x48] sm:$0xff]  ;;  %v212_v10 = vld [vmem:[%s4485_s19 + $0x50] sm:$0xff] }
  0x16   : > { %209 = vst [vmem:[#allocation2 + $0x40] sm:$0xff] %v208_v8  ;;  %v214_v11 = vld [vmem:[%s4485_s19 + $0x58] sm:$0xff]  ;;  %211 = vst [vmem:[#allocation2 + $0x48] sm:$0xff] %v210_v9  ;;  %v216_v12 = vld [vmem:[%s4485_s19 + $0x60] sm:$0xff] }
  0x17   : > { %213 = vst [vmem:[#allocation2 + $0x50] sm:$0xff] %v212_v10  ;;  %215 = vst [vmem:[#allocation2 + $0x58] sm:$0xff] %v214_v11  ;;  %v218_v13 = vld [vmem:[%s4485_s19 + $0x68] sm:$0xff]  ;;  %v220_v14 = vld [vmem:[%s4485_s19 + $0x70] sm:$0xff] }
  0x18   : > { %217 = vst [vmem:[#allocation2 + $0x60] sm:$0xff] %v216_v12  ;;  %219 = vst [vmem:[#allocation2 + $0x68] sm:$0xff] %v218_v13  ;;  %v222_v15 = vld [vmem:[%s4485_s19 + $0x78] sm:$0xff]  ;;  %v224_v16 = vld [vmem:[%s4485_s19 + $0x80] sm:$0xff] }
  0x19   : > { %221 = vst [vmem:[#allocation2 + $0x70] sm:$0xff] %v220_v14  ;;  %v226_v17 = vld [vmem:[%s4485_s19 + $0x88] sm:$0xff]  ;;  %223 = vst [vmem:[#allocation2 + $0x78] sm:$0xff] %v222_v15  ;;  %v228_v18 = vld [vmem:[%s4485_s19 + $0x90] sm:$0xff] }
  0x1a   : > { %225 = vst [vmem:[#allocation2 + $0x80] sm:$0xff] %v224_v16  ;;  %227 = vst [vmem:[#allocation2 + $0x88] sm:$0xff] %v226_v17  ;;  %v230_v19 = vld [vmem:[%s4485_s19 + $0x98] sm:$0xff]  ;;  %v232_v20 = vld [vmem:[%s4485_s19 + $0xa0] sm:$0xff] }
  0x1b   : > { %229 = vst [vmem:[#allocation2 + $0x90] sm:$0xff] %v228_v18  ;;  %231 = vst [vmem:[#allocation2 + $0x98] sm:$0xff] %v230_v19  ;;  %v234_v21 = vld [vmem:[%s4485_s19 + $0xa8] sm:$0xff]  ;;  %v236_v22 = vld [vmem:[%s4485_s19 + $0xb0] sm:$0xff] }
  0x1c   : > { %233 = vst [vmem:[#allocation2 + $0xa0] sm:$0xff] %v232_v20  ;;  %v238_v23 = vld [vmem:[%s4485_s19 + $0xb8] sm:$0xff]  ;;  %235 = vst [vmem:[#allocation2 + $0xa8] sm:$0xff] %v234_v21  ;;  %v240_v24 = vld [vmem:[%s4485_s19 + $0xc0] sm:$0xff] }
  0x1d   : > { %237 = vst [vmem:[#allocation2 + $0xb0] sm:$0xff] %v236_v22  ;;  %239 = vst [vmem:[#allocation2 + $0xb8] sm:$0xff] %v238_v23  ;;  %v242_v25 = vld [vmem:[%s4485_s19 + $0xc8] sm:$0xff]  ;;  %v244_v26 = vld [vmem:[%s4485_s19 + $0xd0] sm:$0xff] }
  0x1e   : > { %241 = vst [vmem:[#allocation2 + $0xc0] sm:$0xff] %v240_v24  ;;  %243 = vst [vmem:[#allocation2 + $0xc8] sm:$0xff] %v242_v25 }
  0x1f   : > { %245 = vst [vmem:[#allocation2 + $0xd0] sm:$0xff] %v244_v26 }
  0x20   : > { %253 = vsyncadd [#allocation3], 3456 }
  0x21   : > { %4430 = dma.done.wait [#allocation3], 3456 }
  0x22   : > { %4431 = vsyncadd [#allocation3], 4294963840  ;;  %v4303_v27 = vld [vmem:[%s5499_s1 + $0x40] sm:$0xff]   ;;  %v4306_v30 = vld [vmem:[%s5499_s1 + $0x48] sm:$0xff]   ;;  %vm595_vm0 = vsmask.f32 7424 }
  0x23   : > { %v4525_v28 = vld [vmem:[%s5499_s1 + $0x80] sm:$0xff]   ;;  %3551 = vmatprep.subr.bf16.mxu0 %v4303_v27  ;;  %v4538_v31 = vld [vmem:[%s5499_s1 + $0x88] sm:$0xff]   ;;  %v4309_v33 = vld [vmem:[%s5499_s1 + $0x50] sm:$0xff]   ;;  %vm830_vm1 = vcmask 1046528  }
  0x24   : > { %v4305_v29 = vld [vmem:[%s5499_s1] sm:$0xff]   ;;  %4103 = vmatprep.subr.bf16.mxu1 %v4525_v28  ;;  %v4308_v32 = vld [vmem:[%s5499_s1 + $0x8] sm:$0xff]   ;;  %v4550_v34 = vld [vmem:[%s5499_s1 + $0x90] sm:$0xff]  }
  0x25   : > { %3552 = vmatpush3.bf16.msra.mxu0 %v4305_v29  ;;  %4111 = vmatpush3.bf16.msra.mxu1 %v4525_v28  ;;  %v4311_v35 = vld [vmem:[%s5499_s1 + $0x10] sm:$0xff]   ;;  %v4312_v36 = vld [vmem:[%s5499_s1 + $0x58] sm:$0xff]   ;;  %v4315_v39 = vld [vmem:[%s5499_s1 + $0x60] sm:$0xff]  }
  0x26   : > { %3553 = vmatprep.subr.bf16.mxu0 %v4306_v30  ;;  %4104 = vmatprep.subr.bf16.mxu1 %v4538_v31  ;;  %v4563_v37 = vld [vmem:[%s5499_s1 + $0x98] sm:$0xff]   ;;  %v4576_v40 = vld [vmem:[%s5499_s1 + $0xa0] sm:$0xff]   ;;  %v4318_v42 = vld [vmem:[%s5499_s1 + $0x68] sm:$0xff]  }
  0x27   : > { %v4314_v38 = vld [vmem:[%s5499_s1 + $0x18] sm:$0xff]   ;;  %v4317_v41 = vld [vmem:[%s5499_s1 + $0x20] sm:$0xff]   ;;  %v4589_v43 = vld [vmem:[%s5499_s1 + $0xa8] sm:$0xff]  }
  0x28   : > { %v4320_v44 = vld [vmem:[%s5499_s1 + $0x28] sm:$0xff]   ;;  %v4321_v45 = vld [vmem:[%s5499_s1 + $0x70] sm:$0xff]   ;;  %v4324_v48 = vld [vmem:[%s5499_s1 + $0x78] sm:$0xff]  }
  0x29   : > { %3554 = vmatpush3.bf16.msra.mxu0 %v4308_v32  ;;  %4112 = vmatpush3.bf16.msra.mxu1 %v4538_v31  ;;  %v4602_v46 = vld [vmem:[%s5499_s1 + $0xb0] sm:$0xff]   ;;  %v4613_v49 = vld [vmem:[%s5499_s1 + $0xb8] sm:$0xff]   ;;  %v4617_v50 = vld [vmem:[#allocation2] sm:$0xff]  }
  0x2a   : > { %3555 = vmatprep.subr.bf16.mxu0 %v4309_v33  ;;  %4105 = vmatprep.subr.bf16.mxu1 %v4550_v34  ;;  %v4323_v47 = vld [vmem:[%s5499_s1 + $0x30] sm:$0xff]   ;;  %v4619_v51 = vld [vmem:[#allocation2 + $0x8] ss:$0 sps:$4 sm:$0xff]   ;;  %v4326_v52 = vld [vmem:[%s5499_s1 + $0x38] sm:$0xff]   ;;  %v597_v54 = vshrl.u32 %v4617_v50, 16  ;;  %v599_v55 = vshll.u32 %v4617_v50, 16 }
  0x2b   : > { %v4624_v53 = vld [vmem:[#allocation2 + $0x60] sm:$0xff]   ;;  %v604_v56 = vshll.u32 %v4619_v51, 16  ;;  %v4629_v57 = vld [vmem:[#allocation2 + $0x68] ss:$0 sps:$4 sm:$0xff]   ;;  %v4631_v58 = vld [vmem:[#allocation2 + $0x6c] sm:$0xff]  }
  0x2c   : > { %v855_v59 = vrot.slane %v4624_v53, 1  ;;  %v4333_v60 = vld [vmem:[%s5499_s1 + $0x100] sm:$0xff]   ;;  %v601_v61 = vrot.slane %v599_v55, 1  ;;  %v856_v63 = vrot.slane %v4629_v57, 1  ;;  %v858_v0 = vrot.slane %v4631_v58, 1  ;;  %v4335_v7 = vld [vmem:[%s5499_s1 + $0x108] sm:$0xff]  }
  0x2d   : > { %3556 = vmatpush3.bf16.msra.mxu0 %v4311_v35  ;;  %4113 = vmatpush3.bf16.msra.mxu1 %v4550_v34  ;;  %v606_v62 = vrot.slane %v604_v56, 1  ;;  %v4641_v1 = vld [vmem:[#allocation2 + $0x74] ss:$0 sps:$4 sm:$0xff]   ;;  %v4334_v5 = vld [vmem:[%s5499_s1 + $0xc0] sm:$0xff]   ;;  %v4336_v9 = vld [vmem:[%s5499_s1 + $0xc8] sm:$0xff]  }
  0x2e   : > { %3557 = vmatprep.subr.bf16.mxu0 %v4312_v36  ;;  %4106 = vmatprep.subr.bf16.mxu1 %v4563_v37  ;;  %v602_v2 = vor.u32 %v601_v61, %v597_v54  ;;  %v4644_v3 = vsel %vm830_vm1, %v855_v59, %v856_v63  ;;  %v859_v4 = vrot.slane %v4641_v1, 1  ;;  %v4665_v10 = vld [vmem:[#allocation2 + $0xc] sm:$0xff]   ;;  %v4667_v11 = vld [vmem:[#allocation2 + $0x14] ss:$0 sps:$4 sm:$0xff]   ;;  %v4670_v12 = vld [vmem:[#allocation2 + $0x78] sm:$0xff]  }
  0x2f   : > { %3991 = vmatprep.mubr.bf16.mxu1 %v4644_v3  ;;  %v609_v13 = vshrl.u32 %v4665_v10, 16  ;;  %v611_v14 = vshll.u32 %v4665_v10, 16  ;;  %v616_v15 = vshll.u32 %v4667_v11, 16  ;;  %v4675_v16 = vld [vmem:[#allocation2 + $0x80] ss:$0 sps:$4 sm:$0xff]   ;;  %v4677_v17 = vld [vmem:[#allocation2 + $0x84] sm:$0xff]  }
  0x30   : > { %v607_v6 = vsel %vm595_vm0, %v602_v2, %v606_v62  ;;  %v4658_v8 = vsel %vm830_vm1, %v858_v0, %v859_v4  ;;  %v861_v18 = vrot.slane %v4670_v12, 1  ;;  %v4343_v19 = vld [vmem:[%s5499_s1 + $0x110] sm:$0xff]   ;;  %v862_v22 = vrot.slane %v4675_v16, 1  ;;  %v4686_v24 = vld [vmem:[#allocation2 + $0x8c] ss:$0 sps:$4 sm:$0xff]   ;;  %v4345_v29 = vld [vmem:[%s5499_s1 + $0x118] sm:$0xff]  }
  0x31   : > { %3558 = vmatpush3.bf16.msra.mxu0 %v4314_v38  ;;  %4114 = vmatpush3.bf16.msra.mxu1 %v4563_v37  ;;  %v613_v20 = vrot.slane %v611_v14, 1  ;;  %v618_v21 = vrot.slane %v616_v15, 1  ;;  %v864_v23 = vrot.slane %v4677_v17, 1  ;;  %v4344_v27 = vld [vmem:[%s5499_s1 + $0xd0] sm:$0xff]   ;;  %v4713_v33 = vld [vmem:[#allocation2 + $0x18] sm:$0xff]   ;;  %v4355_v62 = vld [vmem:[%s5499_s1 + $0x128] sm:$0xff]  }
  0x32   : > { %3559 = vmatprep.subr.bf16.mxu0 %v4315_v39  ;;  %4107 = vmatprep.subr.bf16.mxu1 %v4576_v40  ;;  %v4690_v26 = vsel %vm830_vm1, %v861_v18, %v862_v22  ;;  %v4715_v35 = vld [vmem:[#allocation2 + $0x20] ss:$0 sps:$4 sm:$0xff]   ;;  %v4717_v36 = vld [vmem:[#allocation2 + $0x90] sm:$0xff]   ;;  %v621_v38 = vshrl.u32 %v4713_v33, 16  ;;  %v623_v39 = vshll.u32 %v4713_v33, 16  ;;  %v4356_v63 = vld [vmem:[%s5499_s1 + $0xe8] sm:$0xff]  }
  0x33   : > { %1127 = vmatprep.mubr.bf16.mxu0 %v607_v6  ;;  %v614_v25 = vor.u32 %v613_v20, %v609_v13  ;;  %v4734_v55 = vld [vmem:[#allocation2 + $0xa4] ss:$0 sps:$4 sm:$0xff]   ;;  %v4763_v4 = vld [vmem:[#allocation2 + $0x2c] ss:$0 sps:$4 sm:$0xff]   ;;  %v4771_v13 = vld [vmem:[#allocation2 + $0xb0] ss:$0 sps:$4 sm:$0xff]  }
  0x34   : > { %v871_v61 = vrot.slane %v4734_v55, 1  ;;  %v4761_v2 = vld [vmem:[#allocation2 + $0x24] sm:$0xff]   ;;  %v4773_v14 = vld [vmem:[#allocation2 + $0xb4] sm:$0xff]   ;;  %v874_v20 = vrot.slane %v4771_v13, 1  ;;  %v4782_v22 = vld [vmem:[#allocation2 + $0xbc] ss:$0 sps:$4 sm:$0xff]  }
  0x35   : > { %3560 = vmatpush3.bf16.msra.mxu0 %v4317_v41  ;;  %4115 = vmatpush3.bf16.msra.mxu1 %v4576_v40  ;;  %v4702_v30 = vsel %vm595_vm0, %v614_v25, %v618_v21  ;;  %v628_v41 = vshll.u32 %v4715_v35, 16  ;;  %v633_v6 = vshrl.u32 %v4761_v2, 16  ;;  %v4363_v18 = vld [vmem:[%s5499_s1 + $0x130] sm:$0xff]   ;;  %v876_v21 = vrot.slane %v4773_v14, 1 }
  0x36   : > { %3561 = vmatprep.subr.bf16.mxu0 %v4318_v42  ;;  %4108 = vmatprep.subr.bf16.mxu1 %v4589_v43  ;;  %v4723_v42 = vld [vmem:[#allocation2 + $0x98] ss:$0 sps:$4 sm:$0xff]  }
  0x39   : > { %3562 = vmatpush3.bf16.msra.mxu0 %v4320_v44  ;;  %4116 = vmatpush3.bf16.msra.mxu1 %v4589_v43  ;;  %v4725_v44 = vld [vmem:[#allocation2 + $0x9c] sm:$0xff]  }
  0x3a   : > { %3563 = vmatprep.subr.bf16.mxu0 %v4321_v45  ;;  %4109 = vmatprep.subr.bf16.mxu1 %v4602_v46  ;;  %v867_v45 = vrot.slane %v4717_v36, 1  ;;  %v870_v54 = vrot.slane %v4725_v44, 1 }
  0x3c   : > { %v4757_v0 = vsel %vm830_vm1, %v870_v54, %v871_v61  ;;  %v4824_v54 = vld [vmem:[#allocation2 + $0x44] ss:$0 sps:$4 sm:$0xff]  }
  0x3d   : > { %3564 = vmatpush3.bf16.msra.mxu0 %v4323_v47  ;;  %4117 = vmatpush3.bf16.msra.mxu1 %v4602_v46  ;;  %v4353_v47 = vld [vmem:[%s5499_s1 + $0x120] sm:$0xff]   ;;  %v664_v61 = vshll.u32 %v4824_v54, 16 }
  0x3e   : > { %3565 = vmatprep.subr.bf16.mxu0 %v4324_v48  ;;  %4110 = vmatprep.subr.bf16.mxu1 %v4613_v49  ;;  %v630_v48 = vrot.slane %v628_v41, 1  ;;  %v4811_v41 = vld [vmem:[#allocation2 + $0x38] ss:$0 sps:$4 sm:$0xff]  }
  0x41   : > { %3566 = vmatpush3.bf16.msra.mxu0 %v4326_v52  ;;  %4118 = vmatpush3.bf16.msra.mxu1 %v4613_v49  ;;  %v868_v52 = vrot.slane %v4723_v42, 1 }
  0x42   : > { %3959 = vmatprep.subr.bf16.mxu0 %v4525_v28  ;;  %3687 = vmatprep.subr.bf16.mxu1 %v4333_v60  ;;  %v4354_v60 = vld [vmem:[%s5499_s1 + $0xe0] sm:$0xff]  }
  0x43   : > { %v4738_v59 = vsel %vm830_vm1, %v867_v45, %v868_v52  ;;  %v4369_v45 = vld [vmem:[%s5499_s1 + $0x140] sm:$0xff]  }
  0x44   : > { %1128 = vmatmul.mubr.bf16.vlgmr.msra.gmra.mrb[0].mxu0 %v4617_v50  ;;  %3992 = vmatmul.mubr.bf16.vlgmr.msra.gmra.mrb[0].mxu1 %v4658_v8  ;;  %v4821_v52 = vld [vmem:[#allocation2 + $0x3c] sm:$0xff]  }
  0x45   : > { %3960 = vmatpush3.bf16.msra.mxu0 %v4525_v28  ;;  %3688 = vmatpush3.bf16.msra.mxu1 %v4334_v5  ;;  %v865_v28 = vrot.slane %v4686_v24, 1  ;;  %v4765_v5 = vld [vmem:[#allocation2 + $0xa8] sm:$0xff]  }
  0x46   : > { %3689 = vmatprep.subr.bf16.mxu1 %v4335_v7  ;;  %3961 = vmatprep.subr.bf16.mxu0 %v4538_v31  ;;  %v635_v7 = vshll.u32 %v4761_v2, 16  ;;  %v873_v15 = vrot.slane %v4765_v5, 1 }
  0x47   : > { %3995 = vmatprep.mubr.bf16.mxu1 %v4690_v26  ;;  %1135 = vmatprep.mubr.bf16.mxu0 %v4702_v30  ;;  %v4709_v32 = vsel %vm830_vm1, %v864_v23, %v865_v28  ;;  %v877_v28 = vrot.slane %v4782_v22, 1 }
  0x48   : > { %v4786_v25 = vsel %vm830_vm1, %v873_v15, %v874_v20 }
  0x49   : > { %3690 = vmatpush3.bf16.msra.mxu1 %v4336_v9  ;;  %3962 = vmatpush3.bf16.msra.mxu0 %v4538_v31  ;;  %v4346_v31 = vld [vmem:[%s5499_s1 + $0xd8] sm:$0xff]   ;;  %v640_v9 = vshll.u32 %v4763_v4, 16 }
  0x4a   : > { %3691 = vmatprep.subr.bf16.mxu1 %v4343_v19  ;;  %3963 = vmatprep.subr.bf16.mxu0 %v4550_v34 }
  0x4b   : > { %v642_v19 = vrot.slane %v640_v9, 1  ;;  %v666_v9 = vrot.slane %v664_v61, 1  ;;  %v4379_v61 = vld [vmem:[%s5499_s1 + $0x160] sm:$0xff]  }
  0x4c   : > { %1136 = vmatmul.mubr.bf16.gmra.mrb[4].mxu0 %v4665_v10  ;;  %3996 = vmatmul.mubr.bf16.gmra.mrb[4].mxu1 %v4709_v32 }
  0x4d   : > { %3692 = vmatpush3.bf16.msra.mxu1 %v4344_v27  ;;  %3964 = vmatpush3.bf16.msra.mxu0 %v4550_v34  ;;  %v625_v34 = vrot.slane %v623_v39, 1  ;;  %v4364_v27 = vld [vmem:[%s5499_s1 + $0xf0] sm:$0xff]  }
  0x4e   : > { %3693 = vmatprep.subr.bf16.mxu1 %v4345_v29  ;;  %3965 = vmatprep.subr.bf16.mxu0 %v4563_v37  ;;  %v4365_v29 = vld [vmem:[%s5499_s1 + $0x138] sm:$0xff]   ;;  %v4809_v39 = vld [vmem:[#allocation2 + $0x30] sm:$0xff]  }
  0x4f   : > { %v626_v56 = vor.u32 %v625_v34, %v621_v38  ;;  %3999 = vmatprep.mubr.bf16.mxu1 %v4738_v59  ;;  %v4805_v38 = vsel %vm830_vm1, %v876_v21, %v877_v28  ;;  %v647_v34 = vshll.u32 %v4809_v39, 16  ;;  %v4377_v28 = vld [vmem:[%s5499_s1 + $0x150] sm:$0xff]  }
  0x51   : > { %3694 = vmatpush3.bf16.msra.mxu1 %v4346_v31  ;;  %3966 = vmatpush3.bf16.msra.mxu0 %v4563_v37  ;;  %v4750_v37 = vsel %vm595_vm0, %v626_v56, %v630_v48  ;;  %v4366_v31 = vld [vmem:[%s5499_s1 + $0xf8] sm:$0xff]   ;;  %v652_v48 = vshll.u32 %v4811_v41, 16 }
  0x52   : > { %3695 = vmatprep.subr.bf16.mxu1 %v4353_v47  ;;  %3967 = vmatprep.subr.bf16.mxu0 %v4576_v40  ;;  %v645_v47 = vshrl.u32 %v4809_v39, 16 }
  0x53   : > { %1143 = vmatprep.mubr.bf16.mxu0 %v4750_v37  ;;  %v654_v56 = vrot.slane %v652_v48, 1  ;;  %v4381_v48 = vld [vmem:[%s5499_s1 + $0x1c0] sm:$0xff]  }
  0x54   : > { %1144 = vmatmul.mubr.bf16.gmra.mrb[8].mxu0 %v4713_v33  ;;  %4000 = vmatmul.mubr.bf16.gmra.mrb[8].mxu1 %v4757_v0 }
  0x55   : > { %3696 = vmatpush3.bf16.msra.mxu1 %v4354_v60  ;;  %3968 = vmatpush3.bf16.msra.mxu0 %v4576_v40  ;;  %v637_v40 = vrot.slane %v635_v7, 1  ;;  %v657_v60 = vshrl.u32 %v4821_v52, 16 }
  0x56   : > { %3697 = vmatprep.subr.bf16.mxu1 %v4355_v62  ;;  %3969 = vmatprep.subr.bf16.mxu0 %v4589_v43  ;;  %v4829_v62 = vld [vmem:[#allocation2 + $0x48] sm:$0xff]  }
  0x57   : > { %v638_v23 = vor.u32 %v637_v40, %v633_v6  ;;  %4003 = vmatprep.mubr.bf16.mxu1 %v4786_v25  ;;  %v669_v15 = vshrl.u32 %v4829_v62, 16  ;;  %v4374_v40 = vld [vmem:[%s5499_s1 + $0x148] sm:$0xff]  }
  0x59   : > { %3698 = vmatpush3.bf16.msra.mxu1 %v4356_v63  ;;  %3970 = vmatpush3.bf16.msra.mxu0 %v4589_v43  ;;  %v4798_v43 = vsel %vm595_vm0, %v638_v23, %v642_v19  ;;  %v4831_v63 = vld [vmem:[#allocation2 + $0x50] ss:$0 sps:$4 sm:$0xff]  }
  0x5a   : > { %3699 = vmatprep.subr.bf16.mxu1 %v4363_v18  ;;  %3971 = vmatprep.subr.bf16.mxu0 %v4602_v46  ;;  %v671_v18 = vshll.u32 %v4829_v62, 16  ;;  %v676_v21 = vshll.u32 %v4831_v63, 16 }
  0x5b   : > { %1151 = vmatprep.mubr.bf16.mxu0 %v4798_v43 }
  0x5c   : > { %1152 = vmatmul.mubr.bf16.gmra.mrb[12].mxu0 %v4761_v2  ;;  %4004 = vmatmul.mubr.bf16.gmra.mrb[12].mxu1 %v4805_v38  ;;  %v673_v23 = vrot.slane %v671_v18, 1  ;;  %v695_v18 = vshll.u32 %v4624_v53, 16 }
  0x5d   : > { %3700 = vmatpush3.bf16.msra.mxu1 %v4364_v27  ;;  %1706 = vmatprep.mubr.bf16.mxu1 %v4702_v30  ;;  %v649_v30 = vrot.slane %v647_v34, 1  ;;  %v4378_v34 = vld [vmem:[%s5499_s1 + $0x158] sm:$0xff]  }
  0x5e   : > { %3701 = vmatprep.subr.bf16.mxu1 %v4365_v29  ;;  %3972 = vmatpush3.bf16.msra.mxu0 %v4602_v46  ;;  %v659_v46 = vshll.u32 %v4821_v52, 16  ;;  %v674_v29 = vor.u32 %v673_v23, %v669_v15  ;;  %v4380_v23 = vld [vmem:[%s5499_s1 + $0x168] sm:$0xff]  }
  0x5f   : > { %3973 = vmatprep.subr.bf16.mxu0 %v4613_v49  ;;  %v650_v6 = vor.u32 %v649_v30, %v645_v47  ;;  %v4856_v47 = vld [vmem:[#allocation2 + $0x5c] ss:$0 sps:$4 sm:$0xff]  }
  0x60   : > { %v661_v7 = vrot.slane %v659_v46, 1  ;;  %v688_v46 = vshll.u32 %v4856_v47, 16 }
  0x61   : > { %3702 = vmatpush3.bf16.msra.mxu1 %v4366_v31  ;;  %v4840_v19 = vsel %vm595_vm0, %v650_v6, %v654_v56  ;;  %v678_v31 = vrot.slane %v676_v21, 1  ;;  %v831_v6 = vrot.slane %v4617_v50, 1  ;;  %v835_v21 = vrot.slane %v4667_v11, 1  ;;  %v4383_v11 = vld [vmem:[%s5499_s1 + $0x170] sm:$0xff]  }
  0x62   : > { %4007 = vmatprep.subr.bf16.mxu1 %v4369_v45  ;;  %3974 = vmatpush3.bf16.msra.mxu0 %v4613_v49  ;;  %v662_v20 = vor.u32 %v661_v7, %v657_v60  ;;  %v4844_v49 = vld [vmem:[#allocation2 + $0x54] sm:$0xff]   ;;  %v832_v7 = vrot.slane %v4619_v51, 1  ;;  %v690_v15 = vrot.slane %v688_v46, 1  ;;  %v693_v50 = vshrl.u32 %v4624_v53, 16 }
  0x63   : > { %1159 = vmatprep.mubr.bf16.mxu0 %v4840_v19  ;;  %v681_v30 = vshrl.u32 %v4844_v49, 16  ;;  %v4868_v56 = vsel %vm595_vm0, %v674_v29, %v678_v31  ;;  %3823 = vmatprep.subr.bf16.mxu0 %v4381_v48  ;;  %v700_v29 = vshll.u32 %v4629_v57, 16  ;;  %v707_v31 = vshll.u32 %v4631_v58, 16  ;;  %v4392_v57 = vld [vmem:[%s5499_s1 + $0x178] sm:$0xff]  }
  0x64   : > { %1707 = vmatmul.mubr.bf16.vlgmr.msra.gmra.mrb[16].mxu1 %v4665_v10  ;;  %1160 = vmatmul.mubr.bf16.gmra.mrb[16].mxu0 %v4809_v39  ;;  %v4849_v27 = vsel %vm595_vm0, %v662_v20, %v666_v9  ;;  %v4882_v20 = vsel %vm830_vm1, %v831_v6, %v832_v7  ;;  %v705_v48 = vshrl.u32 %v4631_v58, 16  ;;  %v719_v7 = vshll.u32 %v4670_v12, 16 }
  0x65   : > { %4008 = vmatpush3.bf16.msra.mxu1 %v4369_v45  ;;  %1714 = vmatprep.mubr.bf16.mxu1 %v4750_v37  ;;  %v683_v45 = vshll.u32 %v4844_v49, 16 }
  0x66   : > { %1167 = vmatprep.mubr.bf16.mxu0 %v4849_v27  ;;  %4009 = vmatprep.subr.bf16.mxu1 %v4374_v40 }
  0x67   : > { %v685_v60 = vrot.slane %v683_v45, 1 }
  0x69   : > { %4010 = vmatpush3.bf16.msra.mxu1 %v4374_v40  ;;  %v686_v9 = vor.u32 %v685_v60, %v681_v30  ;;  %v834_v40 = vrot.slane %v4665_v10, 1  ;;  %v709_v30 = vrot.slane %v707_v31, 1  ;;  %v712_v60 = vshll.u32 %v4641_v1, 16 }
  0x6a   : > { %4011 = vmatprep.subr.bf16.mxu1 %v4377_v28  ;;  %v724_v1 = vshll.u32 %v4675_v16, 16 }
  0x6b   : > { %v4890_v51 = vsel %vm830_vm1, %v834_v40, %v835_v21  ;;  %v4894_v10 = vsel %vm595_vm0, %v686_v9, %v690_v15  ;;  %v714_v6 = vrot.slane %v712_v60, 1  ;;  %v4921_v9 = vld [vmem:[%s5499_s1 + $0x200] sm:$0xff]   ;;  %v721_v40 = vrot.slane %v719_v7, 1 }
  0x6c   : > { %1715 = vmatmul.mubr.bf16.gmra.mrb[20].mxu1 %v4713_v33  ;;  %1168 = vmatmul.mubr.bf16.gmra.mrb[20].mxu0 %v4821_v52  ;;  %v726_v16 = vrot.slane %v724_v1, 1  ;;  %v731_v21 = vshll.u32 %v4677_v17, 16  ;;  %v753_v1 = vshrl.u32 %v4725_v44, 16 }
  0x6d   : > { %1722 = vmatprep.mubr.bf16.mxu1 %v4798_v43  ;;  %4012 = vmatpush3.bf16.msra.mxu1 %v4377_v28  ;;  %v697_v28 = vrot.slane %v695_v18, 1  ;;  %v717_v18 = vshrl.u32 %v4670_v12, 16 }
  0x6e   : > { %4013 = vmatprep.subr.bf16.mxu1 %v4378_v34  ;;  %1175 = vmatprep.mubr.bf16.mxu0 %v4868_v56 }
  0x6f   : > { %v698_v45 = vor.u32 %v697_v28, %v693_v50  ;;  %v729_v28 = vshrl.u32 %v4677_v17, 16 }
  0x71   : > { %4014 = vmatpush3.bf16.msra.mxu1 %v4378_v34  ;;  %v702_v34 = vrot.slane %v700_v29, 1  ;;  %v733_v29 = vrot.slane %v731_v21, 1  ;;  %v767_v21 = vshll.u32 %v4765_v5, 16 }
  0x72   : > { %4015 = vmatprep.subr.bf16.mxu1 %v4379_v61 }
  0x73   : > { %v4911_v46 = vsel %vm595_vm0, %v698_v45, %v702_v34  ;;  %v734_v31 = vor.u32 %v733_v29, %v729_v28  ;;  %v743_v34 = vshll.u32 %v4717_v36, 16  ;;  %v769_v28 = vrot.slane %v767_v21, 1 }
  0x74   : > { %1723 = vmatmul.mubr.bf16.gmra.mrb[24].mxu1 %v4761_v2  ;;  %1176 = vmatmul.mubr.bf16.gmra.mrb[24].mxu0 %v4829_v62 }
  0x75   : > { %1730 = vmatprep.mubr.bf16.mxu1 %v4840_v19  ;;  %4016 = vmatpush3.bf16.msra.mxu1 %v4379_v61  ;;  %v710_v61 = vor.u32 %v709_v30, %v705_v48  ;;  %v745_v30 = vrot.slane %v743_v34, 1 }
  0x76   : > { %4017 = vmatprep.subr.bf16.mxu1 %v4380_v23  ;;  %1183 = vmatprep.mubr.bf16.mxu0 %v4894_v10 }
  0x77   : > { %v4925_v15 = vsel %vm595_vm0, %v710_v61, %v714_v6  ;;  %v755_v6 = vshll.u32 %v4725_v44, 16 }
  0x79   : > { %4018 = vmatpush3.bf16.msra.mxu1 %v4380_v23  ;;  %v722_v23 = vor.u32 %v721_v40, %v717_v18  ;;  %v757_v18 = vrot.slane %v755_v6, 1  ;;  %v840_v6 = vrot.slane %v4761_v2, 1 }
  0x7a   : > { %4019 = vmatprep.subr.bf16.mxu1 %v4383_v11 }
  0x7b   : > { %v4935_v50 = vsel %vm595_vm0, %v722_v23, %v726_v16  ;;  %v758_v40 = vor.u32 %v757_v18, %v753_v1  ;;  %v765_v23 = vshrl.u32 %v4765_v5, 16  ;;  %v841_v1 = vrot.slane %v4763_v4, 1  ;;  %v4386_v18 = vld [vmem:[%s5499_s1 + $0x1d0] sm:$0xff]  }
  0x7c   : > { %1731 = vmatmul.mubr.bf16.gmra.mrb[28].mxu1 %v4809_v39  ;;  %1184 = vmatmul.mubr.bf16.gmra.mrb[28].mxu0 %v4844_v49  ;;  %v4387_v4 = vld [vmem:[%s5499_s1 + $0x190] sm:$0xff]  }
  0x7d   : > { %1738 = vmatprep.mubr.bf16.mxu1 %v4849_v27  ;;  %4020 = vmatpush3.bf16.msra.mxu1 %v4383_v11  ;;  %v736_v11 = vshll.u32 %v4686_v24, 16  ;;  %v748_v24 = vshll.u32 %v4723_v42, 16  ;;  %v760_v42 = vshll.u32 %v4734_v55, 16  ;;  %v772_v55 = vshll.u32 %v4771_v13, 16 }
  0x7e   : > { %4021 = vmatprep.subr.bf16.mxu1 %v4392_v57  ;;  %1191 = vmatprep.mubr.bf16.mxu0 %v4911_v46  ;;  %v770_v29 = vor.u32 %v769_v28, %v765_v23  ;;  %v784_v13 = vshll.u32 %v4782_v22, 16  ;;  %v837_v22 = vrot.slane %v4713_v33, 1  ;;  %v5026_v28 = vsel %vm830_vm1, %v840_v6, %v841_v1  ;;  %v4398_v1 = vld [vmem:[%s5499_s1 + $0x1b0] sm:$0xff]  }
  0x7f   : > { %v738_v45 = vrot.slane %v736_v11, 1  ;;  %v750_v61 = vrot.slane %v748_v24, 1  ;;  %v762_v16 = vrot.slane %v760_v42, 1  ;;  %v774_v11 = vrot.slane %v772_v55, 1  ;;  %v4995_v24 = vld [vmem:[#allocation2 + $0xc0] sm:$0xff]  }
  0x80   : > { %v843_v42 = vrot.slane %v4809_v39, 1 }
  0x81   : > { %4022 = vmatpush3.bf16.msra.mxu1 %v4392_v57  ;;  %v4945_v48 = vsel %vm595_vm0, %v734_v31, %v738_v45  ;;  %v741_v57 = vshrl.u32 %v4717_v36, 16  ;;  %v779_v31 = vshll.u32 %v4773_v14, 16  ;;  %v777_v45 = vshrl.u32 %v4773_v14, 16 }
  0x82   : > { %4055 = vmatprep.subr.bf16.mxu1 %v4921_v9 }
  0x83   : > { %v746_v60 = vor.u32 %v745_v30, %v741_v57  ;;  %v781_v34 = vrot.slane %v779_v31, 1  ;;  %v786_v30 = vrot.slane %v784_v13, 1  ;;  %v4389_v31 = vld [vmem:[%s5499_s1 + $0x198] sm:$0xff]   ;;  %v4390_v13 = vld [vmem:[%s5499_s1 + $0x1e0] sm:$0xff]  }
  0x84   : > { %1739 = vmatmul.mubr.bf16.gmra.mrb[32].mxu1 %v4821_v52  ;;  %1192 = vmatmul.mubr.bf16.gmra.mrb[32].mxu0 %v4624_v53 }
  0x85   : > { %1746 = vmatprep.mubr.bf16.mxu1 %v4868_v56  ;;  %1199 = vmatprep.mubr.bf16.mxu0 %v4925_v15  ;;  %v4955_v7 = vsel %vm595_vm0, %v746_v60, %v750_v61  ;;  %v782_v57 = vor.u32 %v781_v34, %v777_v45  ;;  %v4382_v60 = vld [vmem:[%s5499_s1 + $0x180] sm:$0xff]   ;;  %v846_v45 = vrot.slane %v4821_v52, 1  ;;  %v847_v34 = vrot.slane %v4824_v54, 1 }
  0x86   : > { %v4391_v54 = vld [vmem:[%s5499_s1 + $0x1a0] sm:$0xff]  }
  0x8c   : > { %1747 = vmatmul.mubr.bf16.gmra.mrb[36].mxu1 %v4829_v62  ;;  %1200 = vmatmul.mubr.bf16.gmra.mrb[36].mxu0 %v4631_v58 }
  0x8d   : > { %1754 = vmatprep.mubr.bf16.mxu1 %v4894_v10  ;;  %1207 = vmatprep.mubr.bf16.mxu0 %v4935_v50 }
  0x94   : > { %1755 = vmatmul.mubr.bf16.gmra.mrb[40].mxu1 %v4844_v49  ;;  %1208 = vmatmul.mubr.bf16.gmra.mrb[40].mxu0 %v4670_v12 }
  0x95   : > { %1762 = vmatprep.mubr.bf16.mxu1 %v4911_v46  ;;  %1215 = vmatprep.mubr.bf16.mxu0 %v4945_v48 }
  0x9c   : > { %1763 = vmatmul.mubr.bf16.gmra.mrb[44].mxu1 %v4624_v53  ;;  %1216 = vmatmul.mubr.bf16.gmra.mrb[44].mxu0 %v4677_v17  ;;  %v4965_v53 = vsel %vm595_vm0, %v758_v40, %v762_v16  ;;  %v844_v40 = vrot.slane %v4811_v41, 1  ;;  %v789_v16 = vshrl.u32 %v4995_v24, 16  ;;  %v4388_v41 = vld [vmem:[%s5499_s1 + $0x1d8] sm:$0xff]  }
  0x9d   : > { %1770 = vmatprep.mubr.bf16.mxu1 %v4925_v15  ;;  %1223 = vmatprep.mubr.bf16.mxu0 %v4955_v7 }
  0x9e   : > { %v5036_v55 = vsel %vm830_vm1, %v843_v42, %v844_v40  ;;  %v4402_v42 = vld [vmem:[%s5499_s1 + $0x208] sm:$0xff]  }
  0xa4   : > { %1771 = vmatmul.mubr.bf16.gmra.mrb[48].mxu1 %v4631_v58  ;;  %1224 = vmatmul.mubr.bf16.gmra.mrb[48].mxu0 %v4717_v36  ;;  %v4975_v58 = vsel %vm595_vm0, %v770_v29, %v774_v11 }
  0xa5   : > { %1778 = vmatprep.mubr.bf16.mxu1 %v4935_v50  ;;  %1231 = vmatprep.mubr.bf16.mxu0 %v4965_v53 }
  0xac   : > { %1779 = vmatmul.mubr.bf16.gmra.mrb[52].mxu1 %v4670_v12  ;;  %1232 = vmatmul.mubr.bf16.gmra.mrb[52].mxu0 %v4725_v44  ;;  %v4984_v12 = vsel %vm595_vm0, %v782_v57, %v786_v30  ;;  %v849_v57 = vrot.slane %v4829_v62, 1  ;;  %v850_v30 = vrot.slane %v4831_v63, 1 }
  0xad   : > { %1786 = vmatprep.mubr.bf16.mxu1 %v4945_v48  ;;  %1239 = vmatprep.mubr.bf16.mxu0 %v4975_v58 }
  0xae   : > { %v5065_v63 = vsel %vm830_vm1, %v849_v57, %v850_v30 }
  0xb4   : > { %1787 = vmatmul.mubr.bf16.gmra.mrb[56].mxu1 %v4677_v17  ;;  %1240 = vmatmul.mubr.bf16.gmra.mrb[56].mxu0 %v4765_v5  ;;  %v838_v17 = vrot.slane %v4715_v35, 1  ;;  %v5009_v35 = vld [vmem:[#allocation2 + $0xc8] ss:$0 sps:$4 sm:$0xff]  }
  0xb5   : > { %1794 = vmatprep.mubr.bf16.mxu1 %v4955_v7  ;;  %1247 = vmatprep.mubr.bf16.mxu0 %v4984_v12  ;;  %v796_v23 = vshll.u32 %v5009_v35, 16 }
  0xb6   : > { %v5005_v61 = vsel %vm830_vm1, %v837_v22, %v838_v17  ;;  %v5055_v17 = vsel %vm830_vm1, %v846_v45, %v847_v34 }
  0xb7   : > { %v798_v11 = vrot.slane %v796_v23, 1 }
  0xbc   : > { %1795 = vmatmul.mubr.bf16.gmra.mrb[60].mxu1 %v4717_v36  ;;  %1248 = vmatmul.mubr.bf16.gmra.mrb[60].mxu0 %v4773_v14  ;;  %v4384_v36 = vld [vmem:[%s5499_s1 + $0x1c8] sm:$0xff]  }
  0xbd   : > { %1802 = vmatprep.mubr.bf16.mxu1 %v4965_v53  ;;  %3975 = vmatprep.mubr.bf16.mxu0 %v4882_v20  ;;  %v791_v20 = vshll.u32 %v4995_v24, 16 }
  0xbf   : > { %v793_v21 = vrot.slane %v791_v20, 1  ;;  %v853_v20 = vrot.slane %v4856_v47, 1  ;;  %v4399_v47 = vld [vmem:[%s5499_s1 + $0x1f8] sm:$0xff]  }
  0xc1   : > { %v794_v29 = vor.u32 %v793_v21, %v789_v16  ;;  %v4411_v16 = vld [vmem:[#allocation2 + $0x60] sm:$0xff]  }
  0xc3   : > { %v5052_v22 = vsel %vm595_vm0, %v794_v29, %v798_v11  ;;  %v4413_v11 = vld [vmem:[#allocation2 + $0x78] sm:$0xff]  }
  0xc4   : > { %1803 = vmatmul.mubr.bf16.gmra.mrb[64].mxu1 %v4725_v44  ;;  %3976 = vmatmul.mubr.bf16.vlgmr.msra.gmra.mrb[64].mxu0 %v4890_v51  ;;  %v4385_v44 = vld [vmem:[%s5499_s1 + $0x188] sm:$0xff]  }
  0xc5   : > { %1810 = vmatprep.mubr.bf16.mxu1 %v4975_v58  ;;  %3824 = vmatpush3.bf16.msra.mxu0 %v4382_v60  ;;  %v4393_v60 = vld [vmem:[%s5499_s1 + $0x1e8] sm:$0xff]  }
  0xc6   : > { %3979 = vmatprep.mubr.bf16.mxu0 %v5005_v61  ;;  %3825 = vmatprep.subr.bf16.mxu0 %v4384_v36  ;;  %v4394_v36 = vld [vmem:[%s5499_s1 + $0x1a8] sm:$0xff]  }
  0xc9   : > { %3826 = vmatpush3.bf16.msra.mxu0 %v4385_v44  ;;  %v4397_v44 = vld [vmem:[%s5499_s1 + $0x1f0] sm:$0xff]  }
  0xca   : > { %3827 = vmatprep.subr.bf16.mxu0 %v4386_v18  ;;  %v4400_v18 = vld [vmem:[%s5499_s1 + $0x1b8] sm:$0xff]  }
  0xcc   : > { %1811 = vmatmul.mubr.bf16.gmra.mrb[68].mxu1 %v4765_v5  ;;  %3980 = vmatmul.mubr.bf16.gmra.mrb[68].mxu0 %v5026_v28 }
  0xcd   : > { %1818 = vmatprep.mubr.bf16.mxu1 %v4984_v12  ;;  %3828 = vmatpush3.bf16.msra.mxu0 %v4387_v4 }
  0xce   : > { %3983 = vmatprep.mubr.bf16.mxu0 %v5036_v55  ;;  %3829 = vmatprep.subr.bf16.mxu0 %v4388_v41  ;;  %v4412_v41 = vld [vmem:[#allocation2 + $0x6c] sm:$0xff]  }
  0xd1   : > { %3830 = vmatpush3.bf16.msra.mxu0 %v4389_v31 }
  0xd2   : > { %3831 = vmatprep.subr.bf16.mxu0 %v4390_v13 }
  0xd4   : > { %1819 = vmatmul.mubr.bf16.gmra.mrb[72].mxu1 %v4773_v14  ;;  %3984 = vmatmul.mubr.bf16.gmra.mrb[72].mxu0 %v5055_v17  ;;  %v852_v14 = vrot.slane %v4844_v49, 1 }
  0xd5   : > { %1826 = vmatprep.mubr.bf16.mxu1 %v5052_v22  ;;  %3832 = vmatpush3.bf16.msra.mxu0 %v4391_v54 }
  0xd6   : > { %3987 = vmatprep.mubr.bf16.mxu0 %v5065_v63  ;;  %3833 = vmatprep.subr.bf16.mxu0 %v4393_v60  ;;  %v5079_v6 = vsel %vm830_vm1, %v852_v14, %v853_v20 }
  0xd9   : > { %3834 = vmatpush3.bf16.msra.mxu0 %v4394_v36 }
  0xda   : > { %3835 = vmatprep.subr.bf16.mxu0 %v4397_v44 }
  0xdc   : > { %1827 = vmatmul.mubr.bf16.gmra.mrb[76].mxu1 %v4995_v24  ;;  %3988 = vmatmul.mubr.bf16.gmra.mrb[76].mxu0 %v5079_v6 }
  0xdd   : > { %4023 = vmatprep.mubr.bf16.mxu1 %v4890_v51  ;;  %3836 = vmatpush3.bf16.msra.mxu0 %v4398_v1  ;;  %v4403_v51 = vld [vmem:[%s5499_s1 + $0x210] sm:$0xff]  }
  0xde   : > { %2317 = vmatprep.mubr.bf16.mxu0 %v4750_v37  ;;  %3837 = vmatprep.subr.bf16.mxu0 %v4399_v47  ;;  %v4404_v37 = vld [vmem:[%s5499_s1 + $0x218] sm:$0xff]  }
  0xe1   : > { %3838 = vmatpush3.bf16.msra.mxu0 %v4400_v18 }
  0xe4   : > { %4024 = vmatmul.mubr.bf16.vlgmr.msra.gmra.mrb[80].mxu1 %v5005_v61  ;;  %2318 = vmatmul.mubr.bf16.vlgmr.msra.gmra.mrb[80].mxu0 %v4713_v33  ;;  %v4405_v33 = vld [vmem:[%s5499_s1 + $0x220] sm:$0xff]  }
  0xe5   : > { %4056 = vmatpush3.bf16.msra.mxu1 %v4921_v9  ;;  %4027 = vmatprep.mubr.bf16.mxu1 %v5026_v28 }
  0xe6   : > { %4057 = vmatprep.subr.bf16.mxu1 %v4402_v42  ;;  %2325 = vmatprep.mubr.bf16.mxu0 %v4798_v43  ;;  %v4406_v43 = vld [vmem:[%s5499_s1 + $0x228] sm:$0xff]  }
  0xe9   : > { %4058 = vmatpush3.bf16.msra.mxu1 %v4402_v42 }
  0xea   : > { %4059 = vmatprep.subr.bf16.mxu1 %v4403_v51 }
  0xec   : > { %4028 = vmatmul.mubr.bf16.gmra.mrb[84].mxu1 %v5036_v55  ;;  %2326 = vmatmul.mubr.bf16.gmra.mrb[84].mxu0 %v4761_v2  ;;  %v4407_v2 = vld [vmem:[%s5499_s1 + $0x230] sm:$0xff]  }
  0xed   : > { %4031 = vmatprep.mubr.bf16.mxu1 %v5055_v17  ;;  %4060 = vmatpush3.bf16.msra.mxu1 %v4403_v51 }
  0xee   : > { %4061 = vmatprep.subr.bf16.mxu1 %v4404_v37  ;;  %2333 = vmatprep.mubr.bf16.mxu0 %v4840_v19  ;;  %v4408_v19 = vld [vmem:[%s5499_s1 + $0x238] sm:$0xff]  }
  0xf1   : > { %4062 = vmatpush3.bf16.msra.mxu1 %v4404_v37 }
  0xf2   : > { %4063 = vmatprep.subr.bf16.mxu1 %v4405_v33 }
  0xf4   : > { %4032 = vmatmul.mubr.bf16.gmra.mrb[88].mxu1 %v5065_v63  ;;  %2334 = vmatmul.mubr.bf16.gmra.mrb[88].mxu0 %v4809_v39 }
  0xf5   : > { %4035 = vmatprep.mubr.bf16.mxu1 %v5079_v6  ;;  %4064 = vmatpush3.bf16.msra.mxu1 %v4405_v33 }
  0xf6   : > { %4065 = vmatprep.subr.bf16.mxu1 %v4406_v43  ;;  %2341 = vmatprep.mubr.bf16.mxu0 %v4849_v27 }
  0xf9   : > { %4066 = vmatpush3.bf16.msra.mxu1 %v4406_v43 }
  0xfa   : > { %4067 = vmatprep.subr.bf16.mxu1 %v4407_v2 }
  0xfc   : > { %4036 = vmatmul.mubr.bf16.gmra.mrb[92].mxu1 %v4644_v3  ;;  %2342 = vmatmul.mubr.bf16.gmra.mrb[92].mxu0 %v4821_v52 }
  0xfd   : > { %4039 = vmatprep.mubr.bf16.mxu1 %v4658_v8  ;;  %4068 = vmatpush3.bf16.msra.mxu1 %v4407_v2 }
  0xfe   : > { %4069 = vmatprep.subr.bf16.mxu1 %v4408_v19  ;;  %2349 = vmatprep.mubr.bf16.mxu0 %v4868_v56 }
 0x101   : > { %4070 = vmatpush3.bf16.msra.mxu1 %v4408_v19 }
 0x104   : > { %4040 = vmatmul.mubr.bf16.gmra.mrb[0].mxu1 %v4690_v26  ;;  %2350 = vmatmul.mubr.bf16.gmra.mrb[96].mxu0 %v4829_v62  ;;  %v879_v62 = vrot.slane %v4995_v24, 1 }
 0x105   : > { %4043 = vmatprep.mubr.bf16.mxu1 %v4709_v32  ;;  %2357 = vmatprep.mubr.bf16.mxu0 %v4894_v10  ;;  %v880_v10 = vrot.slane %v5009_v35, 1 }
 0x10c   : > { %4044 = vmatmul.mubr.bf16.gmra.mrb[4].mxu1 %v4738_v59  ;;  %2358 = vmatmul.mubr.bf16.gmra.mrb[100].mxu0 %v4844_v49  ;;  %v5150_v49 = vsel %vm830_vm1, %v879_v62, %v880_v10  ;;  %v4410_v10 = vld [vmem:[#allocation2 + $0xd4] ss:$0 sps:$4 sm:$0xff]  }
 0x10d   : > { %4047 = vmatprep.mubr.bf16.mxu1 %v4757_v0  ;;  %2365 = vmatprep.mubr.bf16.mxu0 %v4911_v46 }
 0x114   : > { %4048 = vmatmul.mubr.bf16.gmra.mrb[8].mxu1 %v4786_v25  ;;  %2366 = vmatmul.mubr.bf16.gmra.mrb[104].mxu0 %v4411_v16 }
 0x115   : > { %4051 = vmatprep.mubr.bf16.mxu1 %v4805_v38  ;;  %2373 = vmatprep.mubr.bf16.mxu0 %v4925_v15 }
 0x117   : > { %v3567_v39 = vpop.f32.mrb[0].mxu0 }
 0x118   : > { %v3568_v52 = vpop.f32.mrb[1].mxu0 }
 0x119   : > { %v5140_v27 = vadd.f32 %v3568_v52, %v3567_v39  ;;  %v3570_v56 = vpop.f32.mrb[2].mxu0 }
 0x11a   : > { %v3571_v9 = vpop.f32.mrb[3].mxu0 }
 0x11b   : > { %v5143_v40 = vadd.f32 %v3571_v9, %v3570_v56 }
 0x11c   : > { %4052 = vmatmul.mubr.bf16.gmra.mrb[12].mxu1 %v5150_v49  ;;  %2374 = vmatmul.mubr.bf16.gmra.mrb[108].mxu0 %v4412_v41 }
 0x11d   : > { %4071 = vmatprep.mubr.bf16.mxu1 %v5005_v61  ;;  %2381 = vmatprep.mubr.bf16.mxu0 %v4935_v50  ;;  %v4414_v50 = vld [vmem:[#allocation2 + $0x84] sm:$0xff]  }
 0x11f   : > { %v3573_v46 = vpop.f32.mrb[4].mxu0 }
 0x120   : > { %v3574_v21 = vpop.f32.mrb[5].mxu0 }
 0x121   : > { %v5153_v23 = vadd.f32 %v3574_v21, %v3573_v46  ;;  %v3576_v4 = vpop.f32.mrb[6].mxu0 }
 0x122   : > { %v3577_v29 = vpop.f32.mrb[7].mxu0 }
 0x123   : > { %v5156_v35 = vadd.f32 %v3577_v29, %v3576_v4 }
 0x124   : > { %4072 = vmatmul.mubr.bf16.vlgmr.msra.gmra.mrb[80].mxu1 %v5026_v28  ;;  %2382 = vmatmul.mubr.bf16.gmra.mrb[112].mxu0 %v4413_v11 }
 0x125   : > { %4075 = vmatprep.mubr.bf16.mxu1 %v5036_v55  ;;  %2389 = vmatprep.mubr.bf16.mxu0 %v4945_v48  ;;  %v4415_v48 = vld [vmem:[#allocation2 + $0x90] sm:$0xff]  }
 0x127   : > { %v3579_v15 = vpop.f32.mrb[8].mxu0 }
 0x128   : > { %v3580_v31 = vpop.f32.mrb[9].mxu0 }
 0x129   : > { %v5161_v45 = vadd.f32 %v3580_v31, %v3579_v15  ;;  %v3582_v34 = vpop.f32.mrb[10].mxu0 }
 0x12a   : > { %v3583_v61 = vpop.f32.mrb[11].mxu0 }
 0x12b   : > { %v5164_v13 = vadd.f32 %v3583_v61, %v3582_v34  ;;  %v4417_v61 = vld [vmem:[#allocation2 + $0xb4] sm:$0xff]  }
 0x12c   : > { %4076 = vmatmul.mubr.bf16.gmra.mrb[84].mxu1 %v5055_v17  ;;  %2390 = vmatmul.mubr.bf16.gmra.mrb[116].mxu0 %v4414_v50 }
 0x12d   : > { %4079 = vmatprep.mubr.bf16.mxu1 %v5065_v63  ;;  %2397 = vmatprep.mubr.bf16.mxu0 %v4955_v7 }
 0x12f   : > { %v3585_v28 = vpop.f32.mrb[12].mxu0 }
 0x130   : > { %v3586_v55 = vpop.f32.mrb[13].mxu0 }
 0x131   : > { %v5169_v57 = vadd.f32 %v3586_v55, %v3585_v28  ;;  %v3588_v30 = vpop.f32.mrb[14].mxu0 }
 0x132   : > { %v3589_v54 = vpop.f32.mrb[15].mxu0 }
 0x133   : > { %v5171_v60 = vadd.f32 %v3589_v54, %v3588_v30 }
 0x134   : > { %4080 = vmatmul.mubr.bf16.gmra.mrb[88].mxu1 %v5079_v6  ;;  %2398 = vmatmul.mubr.bf16.gmra.mrb[120].mxu0 %v4415_v48 }
 0x135   : > { %4083 = vmatprep.mubr.bf16.mxu1 %v4644_v3  ;;  %2405 = vmatprep.mubr.bf16.mxu0 %v4965_v53  ;;  %v4416_v53 = vld [vmem:[#allocation2 + $0x9c] sm:$0xff]  }
 0x137   : > { %v3703_v17 = vpop.f32.mrb[16].mxu1  ;;  %v3591_v36 = vpop.f32.mrb[16].mxu0 }
 0x138   : > { %v3704_v63 = vpop.f32.mrb[17].mxu1  ;;  %v3592_v20 = vpop.f32.mrb[17].mxu0 }
 0x139   : > { %v5176_v14 = vadd.f32 %v3704_v63, %v3703_v17  ;;  %v3706_v7 = vpop.f32.mrb[18].mxu1  ;;  %v5178_v1 = vadd.f32 %v3592_v20, %v3591_v36  ;;  %v3594_v47 = vpop.f32.mrb[18].mxu0 }
 0x13a   : > { %v3707_v44 = vpop.f32.mrb[19].mxu1  ;;  %v3595_v6 = vpop.f32.mrb[19].mxu0 }
 0x13b   : > { %v5180_v18 = vadd.f32 %v3707_v44, %v3706_v7  ;;  %v5183_v3 = vadd.f32 %v3595_v6, %v3594_v47  ;;  %v883_v6 = vrot.slane %v4410_v10, 1 }
 0x13c   : > { %4084 = vmatmul.mubr.bf16.gmra.mrb[92].mxu1 %v4658_v8  ;;  %2406 = vmatmul.mubr.bf16.gmra.mrb[124].mxu0 %v4416_v53 }
 0x13d   : > { %4087 = vmatprep.mubr.bf16.mxu1 %v4690_v26  ;;  %2413 = vmatprep.mubr.bf16.mxu0 %v4975_v58  ;;  %v4409_v26 = vld [vmem:[#allocation2 + $0xcc] sm:$0xff]  }
 0x13e   : > { %v803_v16 = vshll.u32 %v4409_v26, 16  ;;  %v882_v47 = vrot.slane %v4409_v26, 1 }
 0x13f   : > { %v3709_v42 = vpop.f32.mrb[20].mxu1  ;;  %v3597_v37 = vpop.f32.mrb[20].mxu0 }
 0x140   : > { %v3710_v51 = vpop.f32.mrb[21].mxu1  ;;  %v3598_v2 = vpop.f32.mrb[21].mxu0  ;;  %v805_v31 = vrot.slane %v803_v16, 1 }
 0x141   : > { %v5187_v33 = vadd.f32 %v3710_v51, %v3709_v42  ;;  %v3712_v43 = vpop.f32.mrb[22].mxu1  ;;  %v5189_v39 = vadd.f32 %v3598_v2, %v3597_v37  ;;  %v3600_v52 = vpop.f32.mrb[22].mxu0  ;;  %v884_v2 = vsel %vm830_vm1, %v882_v47, %v883_v6 }
 0x142   : > { %v3713_v19 = vpop.f32.mrb[23].mxu1  ;;  %v3601_v56 = vpop.f32.mrb[23].mxu0 }
 0x143   : > { %v5191_v8 = vadd.f32 %v3713_v19, %v3712_v43  ;;  %v5194_v9 = vadd.f32 %v3601_v56, %v3600_v52 }
 0x144   : > { %4088 = vmatmul.mubr.bf16.gmra.mrb[0].mxu1 %v4709_v32  ;;  %2414 = vmatmul.mubr.bf16.gmra.mrb[128].mxu0 %v4765_v5  ;;  %v801_v5 = vshrl.u32 %v4409_v26, 16 }
 0x145   : > { %4091 = vmatprep.mubr.bf16.mxu1 %v4738_v59  ;;  %2421 = vmatprep.mubr.bf16.mxu0 %v4984_v12  ;;  %v808_v12 = vshll.u32 %v4410_v10, 16 }
 0x146   : > { %v806_v55 = vor.u32 %v805_v31, %v801_v5 }
 0x147   : > { %v3715_v58 = vpop.f32.mrb[24].mxu1  ;;  %v3603_v46 = vpop.f32.mrb[24].mxu0  ;;  %v810_v30 = vrot.slane %v808_v12, 1 }
 0x148   : > { %v3716_v62 = vpop.f32.mrb[25].mxu1  ;;  %v3604_v41 = vpop.f32.mrb[25].mxu0 }
 0x149   : > { %v5199_v21 = vadd.f32 %v3716_v62, %v3715_v58  ;;  %v3718_v4 = vpop.f32.mrb[26].mxu1  ;;  %v5201_v32 = vadd.f32 %v3604_v41, %v3603_v46  ;;  %v3606_v15 = vpop.f32.mrb[26].mxu0  ;;  %v811_v44 = vsel %vm595_vm0, %v806_v55, %v810_v30 }
 0x14a   : > { %v3719_v29 = vpop.f32.mrb[27].mxu1  ;;  %v3607_v59 = vpop.f32.mrb[27].mxu0 }
 0x14b   : > { %v5203_v11 = vadd.f32 %v3719_v29, %v3718_v4  ;;  %v5206_v34 = vadd.f32 %v3607_v59, %v3606_v15 }
 0x14c   : > { %4092 = vmatmul.mubr.bf16.gmra.mrb[4].mxu1 %v4757_v0  ;;  %2422 = vmatmul.mubr.bf16.gmra.mrb[132].mxu0 %v4417_v61 }
 0x14d   : > { %4095 = vmatprep.mubr.bf16.mxu1 %v4786_v25  ;;  %2429 = vmatprep.mubr.bf16.mxu0 %v5052_v22 }
 0x14f   : > { %v3721_v50 = vpop.f32.mrb[28].mxu1  ;;  %v3609_v54 = vpop.f32.mrb[28].mxu0 }
 0x150   : > { %v3722_v28 = vpop.f32.mrb[29].mxu1  ;;  %v3610_v0 = vpop.f32.mrb[29].mxu0 }
 0x151   : > { %v5210_v48 = vadd.f32 %v3722_v28, %v3721_v50  ;;  %v3724_v17 = vpop.f32.mrb[30].mxu1  ;;  %v5212_v36 = vadd.f32 %v3610_v0, %v3609_v54  ;;  %v3612_v7 = vpop.f32.mrb[30].mxu0 }
 0x152   : > { %v3725_v63 = vpop.f32.mrb[31].mxu1  ;;  %v3613_v25 = vpop.f32.mrb[31].mxu0 }
 0x153   : > { %v5214_v20 = vadd.f32 %v3725_v63, %v3724_v17  ;;  %v5218_v22 = vadd.f32 %v3613_v25, %v3612_v7 }
 0x154   : > { %4096 = vmatmul.mubr.bf16.gmra.mrb[8].mxu1 %v4805_v38  ;;  %2430 = vmatmul.mubr.bf16.gmra.mrb[136].mxu0 %v4995_v24 }
 0x155   : > { %4099 = vmatprep.mubr.bf16.mxu1 %v5150_v49  ;;  %2437 = vmatprep.mubr.bf16.mxu0 %v811_v44 }
 0x157   : > { %v3727_v53 = vpop.f32.mrb[32].mxu1  ;;  %v3615_v51 = vpop.f32.mrb[32].mxu0 }
 0x158   : > { %v3728_v42 = vpop.f32.mrb[33].mxu1  ;;  %v3616_v38 = vpop.f32.mrb[33].mxu0 }
 0x159   : > { %v5222_v37 = vadd.f32 %v3728_v42, %v3727_v53  ;;  %v3730_v43 = vpop.f32.mrb[34].mxu1  ;;  %v3617_v52 = vadd.f32 %v3616_v38, %v3615_v51  ;;  %v3618_v56 = vpop.f32.mrb[34].mxu0 }
 0x15a   : > { %v3731_v19 = vpop.f32.mrb[35].mxu1  ;;  %v3619_v49 = vpop.f32.mrb[35].mxu0 }
 0x15b   : > { %v5225_v58 = vadd.f32 %v3731_v19, %v3730_v43  ;;  %v3620_v62 = vadd.f32 %v3619_v49, %v3618_v56 }
 0x15c   : > { %4100 = vmatmul.mubr.bf16.gmra.mrb[12].mxu1 %v884_v2  ;;  %2438 = vmatmul.mubr.bf16.gmra.mrb[140].mxu0 %v4409_v26 }
 0x15f   : > { %v3733_v24 = vpop.f32.mrb[36].mxu1  ;;  %v3621_v16 = vpop.f32.mrb[36].mxu0 }
 0x160   : > { %v3734_v10 = vpop.f32.mrb[37].mxu1  ;;  %v3622_v41 = vpop.f32.mrb[37].mxu0 }
 0x161   : > { %v5227_v46 = vadd.f32 %v3734_v10, %v3733_v24  ;;  %v3736_v4 = vpop.f32.mrb[38].mxu1  ;;  %v3623_v15 = vadd.f32 %v3622_v41, %v3621_v16  ;;  %v3624_v59 = vpop.f32.mrb[38].mxu0 }
 0x162   : > { %v3737_v29 = vpop.f32.mrb[39].mxu1  ;;  %v3625_v31 = vpop.f32.mrb[39].mxu0 }
 0x163   : > { %v5229_v5 = vadd.f32 %v3737_v29, %v3736_v4  ;;  %v3626_v12 = vadd.f32 %v3625_v31, %v3624_v59 }
 0x167   : > { %v3739_v61 = vpop.f32.mrb[40].mxu1  ;;  %v3627_v28 = vpop.f32.mrb[40].mxu0 }
 0x168   : > { %v3740_v50 = vpop.f32.mrb[41].mxu1  ;;  %v3628_v30 = vpop.f32.mrb[41].mxu0 }
 0x169   : > { %v5231_v55 = vadd.f32 %v3740_v50, %v3739_v61  ;;  %v3742_v26 = vpop.f32.mrb[42].mxu1  ;;  %v3629_v17 = vadd.f32 %v3628_v30, %v3627_v28  ;;  %v3630_v0 = vpop.f32.mrb[42].mxu0 }
 0x16a   : > { %v3743_v54 = vpop.f32.mrb[43].mxu1  ;;  %v3631_v7 = vpop.f32.mrb[43].mxu0 }
 0x16b   : > { %v5233_v63 = vadd.f32 %v3743_v54, %v3742_v26  ;;  %v3632_v25 = vadd.f32 %v3631_v7, %v3630_v0 }
 0x16f   : > { %v3745_v44 = vpop.f32.mrb[44].mxu1  ;;  %v3633_v6 = vpop.f32.mrb[44].mxu0 }
 0x170   : > { %v3746_v47 = vpop.f32.mrb[45].mxu1  ;;  %v3634_v51 = vpop.f32.mrb[45].mxu0 }
 0x171   : > { %v5235_v53 = vadd.f32 %v3746_v47, %v3745_v44  ;;  %v3748_v42 = vpop.f32.mrb[46].mxu1  ;;  %v3635_v2 = vadd.f32 %v3634_v51, %v3633_v6  ;;  %v3636_v38 = vpop.f32.mrb[46].mxu0 }
 0x172   : > { %v3749_v43 = vpop.f32.mrb[47].mxu1  ;;  %v3637_v56 = vpop.f32.mrb[47].mxu0 }
 0x173   : > { %v5237_v19 = vadd.f32 %v3749_v43, %v3748_v42  ;;  %v3638_v49 = vadd.f32 %v3637_v56, %v3636_v38 }
 0x177   : > { %v3751_v24 = vpop.f32.mrb[48].mxu1  ;;  %v3639_v16 = vpop.f32.mrb[48].mxu0 }
 0x178   : > { %v3752_v10 = vpop.f32.mrb[49].mxu1  ;;  %v3640_v29 = vpop.f32.mrb[49].mxu0 }
 0x179   : > { %v3753_v4 = vadd.f32 %v3752_v10, %v3751_v24  ;;  %v3754_v41 = vpop.f32.mrb[50].mxu1  ;;  %v3641_v31 = vadd.f32 %v3640_v29, %v3639_v16  ;;  %v3642_v50 = vpop.f32.mrb[50].mxu0 }
 0x17a   : > { %v3755_v59 = vpop.f32.mrb[51].mxu1  ;;  %v3643_v26 = vpop.f32.mrb[51].mxu0 }
 0x17b   : > { %v5239_v61 = vadd.f32 %v3753_v4, %v3617_v52  ;;  %v3756_v28 = vadd.f32 %v3755_v59, %v3754_v41  ;;  %v3644_v30 = vadd.f32 %v3643_v26, %v3642_v50 }
 0x17d   : > { %v5241_v54 = vadd.f32 %v3756_v28, %v3620_v62 }
 0x17f   : > { %v3757_v0 = vpop.f32.mrb[52].mxu1  ;;  %v3645_v44 = vpop.f32.mrb[52].mxu0 }
 0x180   : > { %v3758_v7 = vpop.f32.mrb[53].mxu1  ;;  %v3646_v42 = vpop.f32.mrb[53].mxu0 }
 0x181   : > { %v3759_v47 = vadd.f32 %v3758_v7, %v3757_v0  ;;  %v3760_v6 = vpop.f32.mrb[54].mxu1  ;;  %v5243_v43 = vadd.f32 %v3646_v42, %v3645_v44  ;;  %v3648_v56 = vpop.f32.mrb[54].mxu0 }
 0x182   : > { %v3761_v51 = vpop.f32.mrb[55].mxu1  ;;  %v3649_v24 = vpop.f32.mrb[55].mxu0 }
 0x183   : > { %v5245_v38 = vadd.f32 %v3759_v47, %v3623_v15  ;;  %v3762_v52 = vadd.f32 %v3761_v51, %v3760_v6  ;;  %v5247_v10 = vadd.f32 %v3649_v24, %v3648_v56 }
 0x185   : > { %v5249_v16 = vadd.f32 %v3762_v52, %v3626_v12 }
 0x187   : > { %v3763_v62 = vpop.f32.mrb[56].mxu1  ;;  %v3651_v41 = vpop.f32.mrb[56].mxu0 }
 0x188   : > { %v3764_v4 = vpop.f32.mrb[57].mxu1  ;;  %v3652_v50 = vpop.f32.mrb[57].mxu0 }
 0x189   : > { %v3765_v29 = vadd.f32 %v3764_v4, %v3763_v62  ;;  %v3766_v59 = vpop.f32.mrb[58].mxu1  ;;  %v5251_v26 = vadd.f32 %v3652_v50, %v3651_v41  ;;  %v3654_v15 = vpop.f32.mrb[58].mxu0 }
 0x18a   : > { %v3767_v28 = vpop.f32.mrb[59].mxu1  ;;  %v3655_v44 = vpop.f32.mrb[59].mxu0 }
 0x18b   : > { %v5253_v0 = vadd.f32 %v3765_v29, %v3629_v17  ;;  %v3768_v7 = vadd.f32 %v3767_v28, %v3766_v59  ;;  %v5255_v47 = vadd.f32 %v3655_v44, %v3654_v15 }
 0x18d   : > { %5502 = vst [vmem:[#allocation8_spill] sm:$0xff] %v5253_v0  ;;  %v5257_v6 = vadd.f32 %v3768_v7, %v3632_v25 }
 0x18f   : > { %5503 = vst [vmem:[#allocation9_spill] sm:$0xff] %v5257_v6  ;;  %v3769_v12 = vpop.f32.mrb[60].mxu1  ;;  %v3657_v51 = vpop.f32.mrb[60].mxu0 }
 0x190   : > { %v3770_v42 = vpop.f32.mrb[61].mxu1  ;;  %v3658_v24 = vpop.f32.mrb[61].mxu0 }
 0x191   : > { %v3771_v56 = vadd.f32 %v3770_v42, %v3769_v12  ;;  %v3772_v52 = vpop.f32.mrb[62].mxu1  ;;  %v5259_v4 = vadd.f32 %v3658_v24, %v3657_v51  ;;  %v3660_v17 = vpop.f32.mrb[62].mxu0 }
 0x192   : > { %v3773_v62 = vpop.f32.mrb[63].mxu1  ;;  %v3661_v50 = vpop.f32.mrb[63].mxu0 }
 0x193   : > { %v5261_v41 = vadd.f32 %v3771_v56, %v3635_v2  ;;  %v3774_v29 = vadd.f32 %v3773_v62, %v3772_v52  ;;  %v5263_v59 = vadd.f32 %v3661_v50, %v3660_v17 }
 0x195   : > { %v5265_v28 = vadd.f32 %v3774_v29, %v3638_v49 }
 0x197   : > { %v3775_v25 = vpop.f32.mrb[64].mxu1  ;;  %v3977_v7 = vpop.f32.mrb[64].mxu0 }
 0x198   : > { %v3776_v15 = vpop.f32.mrb[65].mxu1  ;;  %v1299_v12 = vadd.f32 %v3977_v7, %v5153_v23  ;;  %v1290_v42 = vpop.f32.mrb[65].mxu0 }
 0x199   : > { %v3777_v44 = vadd.f32 %v3776_v15, %v3775_v25  ;;  %v3778_v6 = vpop.f32.mrb[66].mxu1  ;;  %v1291_v51 = vadd.f32 %v5140_v27, %v1290_v42  ;;  %v3978_v56 = vpop.f32.mrb[66].mxu0 }
 0x19a   : > { %v3779_v0 = vpop.f32.mrb[67].mxu1  ;;  %v5272_v24 = vadd.f32 %v5187_v33, %v1299_v12  ;;  %v1302_v49 = vadd.f32 %v3978_v56, %v5156_v35  ;;  %v1293_v62 = vpop.f32.mrb[67].mxu0 }
 0x19b   : > { %v5269_v2 = vadd.f32 %v3777_v44, %v3641_v31  ;;  %v3780_v52 = vadd.f32 %v3779_v0, %v3778_v6  ;;  %v5276_v17 = vadd.f32 %v5176_v14, %v1291_v51  ;;  %v1294_v29 = vadd.f32 %v5143_v40, %v1293_v62 }
 0x19c   : > { %v5282_v50 = vadd.f32 %v5191_v8, %v1302_v49 }
 0x19d   : > { %v5279_v23 = vadd.f32 %v3780_v52, %v3644_v30  ;;  %v5285_v27 = vadd.f32 %v5180_v18, %v1294_v29 }
 0x19f   : > { %v3781_v31 = vpop.f32.mrb[68].mxu1  ;;  %v3981_v33 = vpop.f32.mrb[68].mxu0 }
 0x1a0   : > { %v3782_v0 = vpop.f32.mrb[69].mxu1  ;;  %v1315_v35 = vadd.f32 %v3981_v33, %v5169_v57  ;;  %v1306_v15 = vpop.f32.mrb[69].mxu0 }
 0x1a1   : > { %v3783_v6 = vadd.f32 %v3782_v0, %v3781_v31  ;;  %v3784_v25 = vpop.f32.mrb[70].mxu1  ;;  %v1307_v7 = vadd.f32 %v5161_v45, %v1306_v15  ;;  %v3982_v30 = vpop.f32.mrb[70].mxu0 }
 0x1a2   : > { %v3785_v14 = vpop.f32.mrb[71].mxu1  ;;  %v5293_v44 = vadd.f32 %v5210_v48, %v1315_v35  ;;  %v1318_v18 = vadd.f32 %v3982_v30, %v5171_v60  ;;  %v1309_v12 = vpop.f32.mrb[71].mxu0 }
 0x1a3   : > { %v5290_v40 = vadd.f32 %v3783_v6, %v5243_v43  ;;  %v3786_v8 = vadd.f32 %v3785_v14, %v3784_v25  ;;  %v5297_v42 = vadd.f32 %v5199_v21, %v1307_v7  ;;  %v1310_v57 = vadd.f32 %v5164_v13, %v1309_v12 }
 0x1a4   : > { %v5304_v45 = vadd.f32 %v5214_v20, %v1318_v18 }
 0x1a5   : > { %v5301_v51 = vadd.f32 %v3786_v8, %v5247_v10  ;;  %v5307_v43 = vadd.f32 %v5203_v11, %v1310_v57 }
 0x1a7   : > { %v3787_v56 = vpop.f32.mrb[72].mxu1  ;;  %v3985_v52 = vpop.f32.mrb[72].mxu0 }
 0x1a8   : > { %v3788_v48 = vpop.f32.mrb[73].mxu1  ;;  %v1331_v62 = vadd.f32 %v3985_v52, %v5189_v39  ;;  %v1322_v21 = vpop.f32.mrb[73].mxu0 }
 0x1a9   : > { %v3789_v49 = vadd.f32 %v3788_v48, %v3787_v56  ;;  %v3790_v60 = vpop.f32.mrb[74].mxu1  ;;  %v1323_v13 = vadd.f32 %v5178_v1, %v1322_v21  ;;  %v3986_v31 = vpop.f32.mrb[74].mxu0 }
 0x1aa   : > { %v3791_v29 = vpop.f32.mrb[75].mxu1  ;;  %v5315_v0 = vadd.f32 %v5227_v46, %v1331_v62  ;;  %v1334_v11 = vadd.f32 %v3986_v31, %v5194_v9  ;;  %v1325_v33 = vpop.f32.mrb[75].mxu0 }
 0x1ab   : > { %v5312_v10 = vadd.f32 %v3789_v49, %v5251_v26  ;;  %v3792_v20 = vadd.f32 %v3791_v29, %v3790_v60  ;;  %v5319_v6 = vadd.f32 %v5222_v37, %v1323_v13  ;;  %v1326_v39 = vadd.f32 %v5183_v3, %v1325_v33 }
 0x1ac   : > { %v5326_v1 = vadd.f32 %v5229_v5, %v1334_v11 }
 0x1ad   : > { %v5323_v25 = vadd.f32 %v3792_v20, %v5255_v47  ;;  %v4164_v26 = vadd.f32 %v5225_v58, %v1326_v39 }
 0x1af   : > { %v3793_v35 = vpop.f32.mrb[76].mxu1  ;;  %v3989_v46 = vpop.f32.mrb[76].mxu0 }
 0x1b0   : > { %v3794_v15 = vpop.f32.mrb[77].mxu1  ;;  %v1347_v9 = vadd.f32 %v3989_v46, %v5212_v36  ;;  %v1338_v30 = vpop.f32.mrb[77].mxu0 }
 0x1b1   : > { %v3795_v14 = vadd.f32 %v3794_v15, %v3793_v35  ;;  %v3796_v7 = vpop.f32.mrb[78].mxu1  ;;  %v1339_v8 = vadd.f32 %v5201_v32, %v1338_v30  ;;  %v3990_v47 = vpop.f32.mrb[78].mxu0 }
 0x1b2   : > { %v3797_v37 = vpop.f32.mrb[79].mxu1  ;;  %v5335_v5 = vadd.f32 %v5235_v53, %v1347_v9  ;;  %v1350_v58 = vadd.f32 %v3990_v47, %v5218_v22  ;;  %v1341_v12 = vpop.f32.mrb[79].mxu0 }
 0x1b3   : > { %v5332_v3 = vadd.f32 %v3795_v14, %v5259_v4  ;;  %v3798_v18 = vadd.f32 %v3797_v37, %v3796_v7  ;;  %v4172_v57 = vadd.f32 %v5231_v55, %v1339_v8  ;;  %v1342_v56 = vadd.f32 %v5206_v34, %v1341_v12 }
 0x1b4   : > { %v5344_v32 = vadd.f32 %v5237_v19, %v1350_v58 }
 0x1b5   : > { %v5341_v36 = vadd.f32 %v3798_v18, %v5263_v59  ;;  %v4180_v4 = vadd.f32 %v5233_v63, %v1342_v56 }
 0x1b7   : > { %v3839_v48 = vpop.f32.mrb[80].mxu0 }
 0x1b8   : > { %v3840_v52 = vpop.f32.mrb[81].mxu0 }
 0x1b9   : > { %v3841_v49 = vadd.f32 %v3840_v52, %v3839_v48  ;;  %v3842_v53 = vpop.f32.mrb[82].mxu0 }
 0x1ba   : > { %v3843_v60 = vpop.f32.mrb[83].mxu0 }
 0x1bb   : > { %v3844_v62 = vadd.f32 %v3843_v60, %v3842_v53  ;;  %v5348_v22 = vadd.f32 %v5276_v17, %v3841_v49 }
 0x1bd   : > { %v5351_v55 = vadd.f32 %v5285_v27, %v3844_v62 }
 0x1bf   : > { %v3845_v34 = vpop.f32.mrb[84].mxu0 }
 0x1c0   : > { %v3846_v59 = vpop.f32.mrb[85].mxu0 }
 0x1c1   : > { %v3847_v21 = vadd.f32 %v3846_v59, %v3845_v34  ;;  %v3848_v29 = vpop.f32.mrb[86].mxu0 }
 0x1c2   : > { %v3849_v19 = vpop.f32.mrb[87].mxu0 }
 0x1c3   : > { %v3850_v13 = vadd.f32 %v3849_v19, %v3848_v29  ;;  %v4121_v63 = vadd.f32 %v5272_v24, %v3847_v21 }
 0x1c5   : > { %v4129_v31 = vadd.f32 %v5282_v50, %v3850_v13 }
 0x1c7   : > { %v3851_v20 = vpop.f32.mrb[88].mxu0 }
 0x1c8   : > { %v3852_v11 = vpop.f32.mrb[89].mxu0 }
 0x1c9   : > { %v3853_v33 = vadd.f32 %v3852_v11, %v3851_v20  ;;  %v3854_v39 = vpop.f32.mrb[90].mxu0 }
 0x1ca   : > { %v3855_v35 = vpop.f32.mrb[91].mxu0 }
 0x1cb   : > { %v3856_v17 = vadd.f32 %v3855_v35, %v3854_v39  ;;  %v5356_v15 = vadd.f32 %v5297_v42, %v3853_v33 }
 0x1cd   : > { %v5359_v27 = vadd.f32 %v5307_v43, %v3856_v17 }
 0x1cf   : > { %v3857_v46 = vpop.f32.mrb[92].mxu0 }
 0x1d0   : > { %v3858_v14 = vpop.f32.mrb[93].mxu0 }
 0x1d1   : > { %v3859_v7 = vadd.f32 %v3858_v14, %v3857_v46  ;;  %v3860_v9 = vpop.f32.mrb[94].mxu0  ;;  %v5388_v46 = vld [vmem:[%s5500_s2] ss:$0 sm:$0xff] }
 0x1d2   : > { %v3861_v30 = vpop.f32.mrb[95].mxu0 }
 0x1d3   : > { %v3862_v24 = vadd.f32 %v3861_v30, %v3860_v9  ;;  %v5362_v50 = vadd.f32 %v5293_v44, %v3859_v7 }
 0x1d5   : > { %v5365_v37 = vadd.f32 %v5304_v45, %v3862_v24 }
 0x1d7   : > { %v3863_v8 = vpop.f32.mrb[96].mxu0 }
 0x1d8   : > { %v3864_v47 = vpop.f32.mrb[97].mxu0 }
 0x1d9   : > { %v3865_v18 = vadd.f32 %v3864_v47, %v3863_v8  ;;  %v3866_v42 = vpop.f32.mrb[98].mxu0 }
 0x1da   : > { %v3867_v58 = vpop.f32.mrb[99].mxu0 }
 0x1db   : > { %v3868_v12 = vadd.f32 %v3867_v58, %v3866_v42  ;;  %v5368_v43 = vadd.f32 %v5319_v6, %v3865_v18 }
 0x1dd   : > { %v5370_v56 = vadd.f32 %v4164_v26, %v3868_v12 }
 0x1df   : > { %v3869_v48 = vpop.f32.mrb[100].mxu0 }
 0x1e0   : > { %v3870_v52 = vpop.f32.mrb[101].mxu0 }
 0x1e1   : > { %v3871_v49 = vadd.f32 %v3870_v52, %v3869_v48  ;;  %v3872_v53 = vpop.f32.mrb[102].mxu0 }
 0x1e2   : > { %v3873_v44 = vpop.f32.mrb[103].mxu0 }
 0x1e3   : > { %v3874_v60 = vadd.f32 %v3873_v44, %v3872_v53  ;;  %v5373_v45 = vadd.f32 %v5315_v0, %v3871_v49 }
 0x1e5   : > { %v5376_v62 = vadd.f32 %v5326_v1, %v3874_v60 }
 0x1e7   : > { %v3875_v34 = vpop.f32.mrb[104].mxu0 }
 0x1e8   : > { %v3876_v59 = vpop.f32.mrb[105].mxu0 }
 0x1e9   : > { %v3877_v21 = vadd.f32 %v3876_v59, %v3875_v34  ;;  %v3878_v29 = vpop.f32.mrb[106].mxu0 }
 0x1ea   : > { %v3879_v6 = vpop.f32.mrb[107].mxu0 }
 0x1eb   : > { %v3880_v19 = vadd.f32 %v3879_v6, %v3878_v29  ;;  %v5378_v26 = vadd.f32 %v4172_v57, %v3877_v21 }
 0x1ed   : > { %v5380_v13 = vadd.f32 %v4180_v4, %v3880_v19 }
 0x1ef   : > { %v3881_v20 = vpop.f32.mrb[108].mxu0 }
 0x1f0   : > { %v3882_v11 = vpop.f32.mrb[109].mxu0 }
 0x1f1   : > { %v3883_v33 = vadd.f32 %v3882_v11, %v3881_v20  ;;  %v3884_v39 = vpop.f32.mrb[110].mxu0 }
 0x1f2   : > { %v3885_v35 = vpop.f32.mrb[111].mxu0 }
 0x1f3   : > { %v3886_v0 = vadd.f32 %v3885_v35, %v3884_v39  ;;  %v5383_v17 = vadd.f32 %v5335_v5, %v3883_v33 }
 0x1f5   : > { %v5391_v57 = vadd.f32 %v5344_v32, %v3886_v0 }
 0x1f7   : > { %v4073_v1 = vpop.f32.mrb[80].mxu1  ;;  %v3887_v7 = vpop.f32.mrb[112].mxu0 }
 0x1f8   : > { %v4122_v4 = vadd.f32 %v4121_v63, %v4073_v1  ;;  %v2480_v14 = vpop.f32.mrb[81].mxu1  ;;  %v3888_v8 = vpop.f32.mrb[113].mxu0 }
 0x1f9   : > { %v4126_v9 = vadd.f32 %v5348_v22, %v2480_v14  ;;  %v4074_v30 = vpop.f32.mrb[82].mxu1  ;;  %v3889_v18 = vadd.f32 %v3888_v8, %v3887_v7  ;;  %v3890_v58 = vpop.f32.mrb[114].mxu0 }
 0x1fa   : > { %v2712_v24 = vadd.f32 %v4122_v4, %v5388_v46  ;;  %v4130_v5 = vadd.f32 %v4129_v31, %v4074_v30  ;;  %v2483_v47 = vpop.f32.mrb[83].mxu1  ;;  %v3891_v63 = vpop.f32.mrb[115].mxu0 }
 0x1fb   : > { %v2710_v42 = vadd.f32 %v4126_v9, %v5388_v46  ;;  %v4134_v12 = vadd.f32 %v5351_v55, %v2483_v47  ;;  %v3892_v49 = vadd.f32 %v3891_v63, %v3890_v58  ;;  %v5400_v31 = vadd.f32 %v5239_v61, %v3889_v18 }
 0x1fc   : > { %v2776_v48 = vmul.f32 0.01, %v2712_v24  ;;  %v2713_v32 = vadd.f32 %v4130_v5, %v5388_v46  ;;  %vm2744_vm2 = vcmp.gt.f32.partialorder %v2712_v24, 0.0 }
 0x1fd   : > { %v2774_v52 = vmul.f32 0.01, %v2710_v42  ;;  %v2711_v22 = vadd.f32 %v4134_v12, %v5388_v46  ;;  %vm2742_vm3 = vcmp.gt.f32.partialorder %v2710_v42, 0.0  ;;  %v5403_v55 = vadd.f32 %v5241_v54, %v3892_v49 }
 0x1fe   : > { %vm2745_vm4 = vcmp.gt.f32.partialorder %v2713_v32, 0.0  ;;  %v2777_v53 = vmul.f32 0.01, %v2713_v32  ;;  %v2808_v34 = vsel %vm2744_vm2, %v2712_v24, %v2776_v48 }
 0x1ff   : > { %vm2743_vm5 = vcmp.gt.f32.partialorder %v2711_v22, 0.0  ;;  %v2775_v44 = vmul.f32 0.01, %v2711_v22  ;;  %v4077_v60 = vpop.f32.mrb[84].mxu1  ;;  %v2806_v6 = vsel %vm2742_vm3, %v2710_v42, %v2774_v52  ;;  %v3893_v11 = vpop.f32.mrb[116].mxu0 }
 0x200   : > { %v2809_v59 = vsel %vm2745_vm4, %v2713_v32, %v2777_v53  ;;  %v4138_v21 = vadd.f32 %v5362_v50, %v4077_v60  ;;  %v2496_v29 = vpop.f32.mrb[85].mxu1  ;;  %v3894_v0 = vpop.f32.mrb[117].mxu0 }
 0x201   : > { %v3464_v19 = vpack.c.bf16 %v2809_v59, %v2808_v34  ;;  %v2807_v20 = vsel %vm2743_vm5, %v2711_v22, %v2775_v44  ;;  %v4142_v61 = vadd.f32 %v5356_v15, %v2496_v29  ;;  %v4078_v33 = vpop.f32.mrb[86].mxu1  ;;  %v3895_v4 = vadd.f32 %v3894_v0, %v3893_v11  ;;  %v3896_v14 = vpop.f32.mrb[118].mxu0 }
 0x202   : > { %v3459_v39 = vpack.c.bf16 %v2807_v20, %v2806_v6  ;;  %v2716_v35 = vadd.f32 %v4138_v21, %v5388_v46  ;;  %v4146_v54 = vadd.f32 %v5365_v37, %v4078_v33  ;;  %v2499_v1 = vpop.f32.mrb[87].mxu1  ;;  %v3897_v15 = vpop.f32.mrb[119].mxu0 }
 0x203   : > { %3536 = vst [vmem:[%s4493_s23 + $0x8] sm:$0xff] %v3464_v19   ;;  %v2714_v50 = vadd.f32 %v4142_v61, %v5388_v46  ;;  %v4150_v7 = vadd.f32 %v5359_v27, %v2499_v1  ;;  %v3898_v8 = vadd.f32 %v3897_v15, %v3896_v14  ;;  %v5416_v47 = vadd.f32 %v5245_v38, %v3895_v4 }
 0x204   : > { %3460 = vst [vmem:[%s4493_s23] sm:$0xff] %v3459_v39   ;;  %v2780_v9 = vmul.f32 0.01, %v2716_v35  ;;  %v2717_v30 = vadd.f32 %v4146_v54, %v5388_v46  ;;  %vm2748_vm6 = vcmp.gt.f32.partialorder %v2716_v35, 0.0  ;;  %v5504_v39 = vld [vmem:[#allocation8_spill] sm:$0xff] }
 0x205   : > { %v2778_v24 = vmul.f32 0.01, %v2714_v50  ;;  %v2715_v5 = vadd.f32 %v4150_v7, %v5388_v46  ;;  %vm2746_vm7 = vcmp.gt.f32.partialorder %v2714_v50, 0.0  ;;  %v5419_v27 = vadd.f32 %v5249_v16, %v3898_v8 }
 0x206   : > { %vm2749_vm8 = vcmp.gt.f32.partialorder %v2717_v30, 0.0  ;;  %v2781_v37 = vmul.f32 0.01, %v2717_v30  ;;  %v2812_v58 = vsel %vm2748_vm6, %v2716_v35, %v2780_v9 }
 0x207   : > { %vm2747_vm9 = vcmp.gt.f32.partialorder %v2715_v5, 0.0  ;;  %v2779_v18 = vmul.f32 0.01, %v2715_v5  ;;  %v4081_v42 = vpop.f32.mrb[88].mxu1  ;;  %v2810_v63 = vsel %vm2746_vm7, %v2714_v50, %v2778_v24  ;;  %v3899_v22 = vpop.f32.mrb[120].mxu0 }
 0x208   : > { %v2813_v12 = vsel %vm2749_vm8, %v2717_v30, %v2781_v37  ;;  %v4154_v48 = vadd.f32 %v5373_v45, %v4081_v42  ;;  %v2512_v32 = vpop.f32.mrb[89].mxu1  ;;  %v3900_v34 = vpop.f32.mrb[121].mxu0 }
 0x209   : > { %v3474_v52 = vpack.c.bf16 %v2813_v12, %v2812_v58  ;;  %v2811_v49 = vsel %vm2747_vm9, %v2715_v5, %v2779_v18  ;;  %v4158_v38 = vadd.f32 %v5368_v43, %v2512_v32  ;;  %v4082_v53 = vpop.f32.mrb[90].mxu1  ;;  %v3901_v21 = vadd.f32 %v3900_v34, %v3899_v22  ;;  %v3902_v29 = vpop.f32.mrb[122].mxu0 }
 0x20a   : > { %v3469_v44 = vpack.c.bf16 %v2811_v49, %v2810_v63  ;;  %v2720_v60 = vadd.f32 %v4154_v48, %v5388_v46  ;;  %v4162_v16 = vadd.f32 %v5376_v62, %v4082_v53  ;;  %v2515_v59 = vpop.f32.mrb[91].mxu1  ;;  %v3903_v43 = vpop.f32.mrb[123].mxu0 }
 0x20b   : > { %3538 = vst [vmem:[%s4493_s23 + $0x18] sm:$0xff] %v3474_v52   ;;  %v2718_v45 = vadd.f32 %v4158_v38, %v5388_v46  ;;  %v4166_v6 = vadd.f32 %v5370_v56, %v2515_v59  ;;  %v3904_v61 = vadd.f32 %v3903_v43, %v3902_v29  ;;  %v5432_v35 = vadd.f32 %v5504_v39, %v3901_v21  ;;  %v5505_v56 = vld [vmem:[#allocation9_spill] sm:$0xff] }
 0x20c   : > { %3537 = vst [vmem:[%s4493_s23 + $0x10] sm:$0xff] %v3469_v44   ;;  %v2784_v19 = vmul.f32 0.01, %v2720_v60  ;;  %v2721_v20 = vadd.f32 %v4162_v16, %v5388_v46  ;;  %vm2752_vm10 = vcmp.gt.f32.partialorder %v2720_v60, 0.0 }
 0x20d   : > { %v2782_v11 = vmul.f32 0.01, %v2718_v45  ;;  %v2719_v33 = vadd.f32 %v4166_v6, %v5388_v46  ;;  %vm2750_vm11 = vcmp.gt.f32.partialorder %v2718_v45, 0.0  ;;  %v5435_v1 = vadd.f32 %v5505_v56, %v3904_v61 }
 0x20e   : > { %vm2753_vm12 = vcmp.gt.f32.partialorder %v2721_v20, 0.0  ;;  %v2785_v62 = vmul.f32 0.01, %v2721_v20  ;;  %v2816_v4 = vsel %vm2752_vm10, %v2720_v60, %v2784_v19 }
 0x20f   : > { %vm2751_vm13 = vcmp.gt.f32.partialorder %v2719_v33, 0.0  ;;  %v2783_v0 = vmul.f32 0.01, %v2719_v33  ;;  %v4085_v54 = vpop.f32.mrb[92].mxu1  ;;  %v2814_v9 = vsel %vm2750_vm11, %v2718_v45, %v2782_v11  ;;  %v3905_v24 = vpop.f32.mrb[124].mxu0 }
 0x210   : > { %v2817_v50 = vsel %vm2753_vm12, %v2721_v20, %v2785_v62  ;;  %v4170_v14 = vadd.f32 %v5383_v17, %v4085_v54  ;;  %v2528_v7 = vpop.f32.mrb[93].mxu1  ;;  %v3906_v42 = vpop.f32.mrb[125].mxu0 }
 0x211   : > { %v3484_v30 = vpack.c.bf16 %v2817_v50, %v2816_v4  ;;  %v2815_v15 = vsel %vm2751_vm13, %v2719_v33, %v2783_v0  ;;  %v4174_v8 = vadd.f32 %v5378_v26, %v2528_v7  ;;  %v4086_v5 = vpop.f32.mrb[94].mxu1  ;;  %v3907_v48 = vadd.f32 %v3906_v42, %v3905_v24  ;;  %v3908_v32 = vpop.f32.mrb[126].mxu0 }
 0x212   : > { %v3479_v37 = vpack.c.bf16 %v2815_v15, %v2814_v9  ;;  %v2724_v18 = vadd.f32 %v4170_v14, %v5388_v46  ;;  %v4178_v58 = vadd.f32 %v5391_v57, %v4086_v5  ;;  %v2531_v12 = vpop.f32.mrb[95].mxu1  ;;  %v3909_v26 = vpop.f32.mrb[127].mxu0 }
 0x213   : > { %3540 = vst [vmem:[%s4493_s23 + $0x28] sm:$0xff] %v3484_v30   ;;  %v2722_v17 = vadd.f32 %v4174_v8, %v5388_v46  ;;  %v4182_v63 = vadd.f32 %v5380_v13, %v2531_v12  ;;  %v3910_v38 = vadd.f32 %v3909_v26, %v3908_v32  ;;  %v4196_v44 = vadd.f32 %v5261_v41, %v3907_v48 }
 0x214   : > { %3539 = vst [vmem:[%s4493_s23 + $0x20] sm:$0xff] %v3479_v37   ;;  %v2788_v52 = vmul.f32 0.01, %v2724_v18  ;;  %v2725_v49 = vadd.f32 %v4178_v58, %v5388_v46  ;;  %vm2756_vm14 = vcmp.gt.f32.partialorder %v2724_v18, 0.0 }
 0x215   : > { %v2786_v22 = vmul.f32 0.01, %v2722_v17  ;;  %v2723_v53 = vadd.f32 %v4182_v63, %v5388_v46  ;;  %vm2754_vm15 = vcmp.gt.f32.partialorder %v2722_v17, 0.0  ;;  %v4202_v13 = vadd.f32 %v5265_v28, %v3910_v38 }
 0x216   : > { %vm2757_vm0 = vcmp.gt.f32.partialorder %v2725_v49, 0.0  ;;  %v2789_v57 = vmul.f32 0.01, %v2725_v49  ;;  %v2820_v16 = vsel %vm2756_vm14, %v2724_v18, %v2788_v52 }
 0x217   : > { %vm2755_vm1 = vcmp.gt.f32.partialorder %v2723_v53, 0.0  ;;  %v2787_v60 = vmul.f32 0.01, %v2723_v53  ;;  %v4089_v34 = vpop.f32.mrb[0].mxu1  ;;  %v2818_v29 = vsel %vm2754_vm15, %v2722_v17, %v2786_v22  ;;  %v3911_v20 = vpop.f32.mrb[128].mxu0 }
 0x218   : > { %v2821_v59 = vsel %vm2757_vm0, %v2725_v49, %v2789_v57  ;;  %v4185_v21 = vadd.f32 %v5416_v47, %v4089_v34  ;;  %v2544_v45 = vpop.f32.mrb[1].mxu1  ;;  %v3912_v33 = vpop.f32.mrb[129].mxu0 }
 0x219   : > { %v3494_v6 = vpack.c.bf16 %v2821_v59, %v2820_v16  ;;  %v2819_v19 = vsel %vm2755_vm1, %v2723_v53, %v2787_v60  ;;  %v4188_v43 = vadd.f32 %v5400_v31, %v2544_v45  ;;  %v4090_v11 = vpop.f32.mrb[2].mxu1  ;;  %v3913_v39 = vadd.f32 %v3912_v33, %v3911_v20  ;;  %v3914_v0 = vpop.f32.mrb[130].mxu0 }
 0x21a   : > { %v3489_v41 = vpack.c.bf16 %v2819_v19, %v2818_v29  ;;  %v2728_v61 = vadd.f32 %v4185_v21, %v5388_v46  ;;  %v4191_v28 = vadd.f32 %v5419_v27, %v4090_v11  ;;  %v2547_v62 = vpop.f32.mrb[3].mxu1  ;;  %v3915_v31 = vpop.f32.mrb[131].mxu0 }
 0x21b   : > { %3542 = vst [vmem:[%s4493_s23 + $0x38] sm:$0xff] %v3494_v6   ;;  %v2726_v47 = vadd.f32 %v4188_v43, %v5388_v46  ;;  %v4194_v54 = vadd.f32 %v5403_v55, %v2547_v62  ;;  %v3916_v14 = vadd.f32 %v3915_v31, %v3914_v0  ;;  %v4211_v9 = vadd.f32 %v5269_v2, %v3913_v39 }
 0x21c   : > { %3541 = vst [vmem:[%s4493_s23 + $0x30] sm:$0xff] %v3489_v41   ;;  %v2792_v56 = vmul.f32 0.01, %v2728_v61  ;;  %v2729_v4 = vadd.f32 %v4191_v28, %v5388_v46  ;;  %vm2760_vm2 = vcmp.gt.f32.partialorder %v2728_v61, 0.0 }
 0x21d   : > { %v2790_v50 = vmul.f32 0.01, %v2726_v47  ;;  %v2727_v7 = vadd.f32 %v4194_v54, %v5388_v46  ;;  %vm2758_vm3 = vcmp.gt.f32.partialorder %v2726_v47, 0.0  ;;  %v4217_v55 = vadd.f32 %v5279_v23, %v3916_v14 }
 0x21e   : > { %vm2761_vm4 = vcmp.gt.f32.partialorder %v2729_v4, 0.0  ;;  %v2793_v27 = vmul.f32 0.01, %v2729_v4  ;;  %v2824_v24 = vsel %vm2760_vm2, %v2728_v61, %v2792_v56 }
 0x21f   : > { %vm2759_vm5 = vcmp.gt.f32.partialorder %v2727_v7, 0.0  ;;  %v2791_v30 = vmul.f32 0.01, %v2727_v7  ;;  %v4093_v15 = vpop.f32.mrb[4].mxu1  ;;  %v2822_v18 = vsel %vm2758_vm3, %v2726_v47, %v2790_v50  ;;  %v3917_v12 = vpop.f32.mrb[132].mxu0 }
 0x220   : > { %v2825_v8 = vsel %vm2761_vm4, %v2729_v4, %v2793_v27  ;;  %v4197_v5 = vadd.f32 %v4196_v44, %v4093_v15  ;;  %v2560_v37 = vpop.f32.mrb[5].mxu1  ;;  %v3918_v63 = vpop.f32.mrb[133].mxu0 }
 0x221   : > { %v3504_v42 = vpack.c.bf16 %v2825_v8, %v2824_v24  ;;  %v2823_v58 = vsel %vm2759_vm5, %v2727_v7, %v2791_v30  ;;  %v4200_v48 = vadd.f32 %v5432_v35, %v2560_v37  ;;  %v4094_v17 = vpop.f32.mrb[6].mxu1  ;;  %v3919_v23 = vadd.f32 %v3918_v63, %v3917_v12  ;;  %v3920_v22 = vpop.f32.mrb[134].mxu0 }
 0x222   : > { %v3499_v32 = vpack.c.bf16 %v2823_v58, %v2822_v18  ;;  %v2732_v2 = vadd.f32 %v4197_v5, %v5388_v46  ;;  %v4203_v52 = vadd.f32 %v4202_v13, %v4094_v17  ;;  %v2563_v49 = vpop.f32.mrb[7].mxu1  ;;  %v3921_v44 = vpop.f32.mrb[135].mxu0 }
 0x223   : > { %3544 = vst [vmem:[%s4493_s23 + $0x48] sm:$0xff] %v3504_v42   ;;  %v2730_v26 = vadd.f32 %v4200_v48, %v5388_v46  ;;  %v4206_v38 = vadd.f32 %v5435_v1, %v2563_v49  ;;  %v3922_v60 = vadd.f32 %v3921_v44, %v3920_v22  ;;  %v4208_v16 = vadd.f32 %v5290_v40, %v3919_v23 }
 0x224   : > { %3543 = vst [vmem:[%s4493_s23 + $0x40] sm:$0xff] %v3499_v32   ;;  %v2796_v53 = vmul.f32 0.01, %v2732_v2  ;;  %v2733_v57 = vadd.f32 %v4203_v52, %v5388_v46  ;;  %vm2764_vm6 = vcmp.gt.f32.partialorder %v2732_v2, 0.0 }
 0x225   : > { %v2794_v35 = vmul.f32 0.01, %v2730_v26  ;;  %v2731_v34 = vadd.f32 %v4206_v38, %v5388_v46  ;;  %vm2762_vm7 = vcmp.gt.f32.partialorder %v2730_v26, 0.0  ;;  %v4214_v1 = vadd.f32 %v5301_v51, %v3922_v60 }
 0x226   : > { %vm2765_vm8 = vcmp.gt.f32.partialorder %v2733_v57, 0.0  ;;  %v2797_v13 = vmul.f32 0.01, %v2733_v57  ;;  %v2828_v45 = vsel %vm2764_vm6, %v2732_v2, %v2796_v53 }
 0x227   : > { %vm2763_vm9 = vcmp.gt.f32.partialorder %v2731_v34, 0.0  ;;  %v2795_v59 = vmul.f32 0.01, %v2731_v34  ;;  %v4097_v21 = vpop.f32.mrb[8].mxu1  ;;  %v2826_v20 = vsel %vm2762_vm7, %v2730_v26, %v2794_v35  ;;  %v3923_v41 = vpop.f32.mrb[136].mxu0 }
 0x228   : > { %v2829_v29 = vsel %vm2765_vm8, %v2733_v57, %v2797_v13  ;;  %v4209_v6 = vadd.f32 %v4208_v16, %v4097_v21  ;;  %v2576_v19 = vpop.f32.mrb[9].mxu1  ;;  %v3924_v62 = vpop.f32.mrb[137].mxu0 }
 0x229   : > { %v3514_v43 = vpack.c.bf16 %v2829_v29, %v2828_v45  ;;  %v2827_v11 = vsel %vm2763_vm9, %v2731_v34, %v2795_v59  ;;  %v4212_v61 = vadd.f32 %v4211_v9, %v2576_v19  ;;  %v4098_v33 = vpop.f32.mrb[10].mxu1  ;;  %v3925_v51 = vadd.f32 %v3924_v62, %v3923_v41  ;;  %v3926_v54 = vpop.f32.mrb[138].mxu0 }
 0x22a   : > { %v3509_v28 = vpack.c.bf16 %v2827_v11, %v2826_v20  ;;  %v2736_v40 = vadd.f32 %v4209_v6, %v5388_v46  ;;  %v4215_v39 = vadd.f32 %v4214_v1, %v4098_v33  ;;  %v2579_v47 = vpop.f32.mrb[11].mxu1  ;;  %v3927_v50 = vpop.f32.mrb[139].mxu0 }
 0x22b   : > { %3546 = vst [vmem:[%s4493_s23 + $0x58] sm:$0xff] %v3514_v43   ;;  %v2734_v0 = vadd.f32 %v4212_v61, %v5388_v46  ;;  %v4218_v56 = vadd.f32 %v4217_v55, %v2579_v47  ;;  %v3928_v7 = vadd.f32 %v3927_v50, %v3926_v54  ;;  %v4223_v30 = vadd.f32 %v5312_v10, %v3925_v51 }
 0x22c   : > { %3545 = vst [vmem:[%s4493_s23 + $0x50] sm:$0xff] %v3509_v28   ;;  %v2800_v4 = vmul.f32 0.01, %v2736_v40  ;;  %v2737_v31 = vadd.f32 %v4215_v39, %v5388_v46  ;;  %vm2768_vm10 = vcmp.gt.f32.partialorder %v2736_v40, 0.0 }
 0x22d   : > { %v2798_v14 = vmul.f32 0.01, %v2734_v0  ;;  %v2735_v27 = vadd.f32 %v4218_v56, %v5388_v46  ;;  %vm2766_vm11 = vcmp.gt.f32.partialorder %v2734_v0, 0.0  ;;  %v4229_v55 = vadd.f32 %v5323_v25, %v3928_v7 }
 0x22e   : > { %vm2769_vm12 = vcmp.gt.f32.partialorder %v2737_v31, 0.0  ;;  %v2801_v9 = vmul.f32 0.01, %v2737_v31  ;;  %v2832_v8 = vsel %vm2768_vm10, %v2736_v40, %v2800_v4 }
 0x22f   : > { %vm2767_vm13 = vcmp.gt.f32.partialorder %v2735_v27, 0.0  ;;  %v2799_v15 = vmul.f32 0.01, %v2735_v27  ;;  %v4101_v24 = vpop.f32.mrb[12].mxu1  ;;  %v2830_v18 = vsel %vm2766_vm11, %v2734_v0, %v2798_v14  ;;  %v3929_v12 = vpop.f32.mrb[140].mxu0 }
 0x230   : > { %v2833_v5 = vsel %vm2769_vm12, %v2737_v31, %v2801_v9  ;;  %v2592_v37 = vpop.f32.mrb[13].mxu1  ;;  %v3930_v2 = vpop.f32.mrb[141].mxu0 }
 0x231   : > { %v3524_v42 = vpack.c.bf16 %v2833_v5, %v2832_v8  ;;  %v2831_v58 = vsel %vm2767_vm13, %v2735_v27, %v2799_v15  ;;  %v4224_v48 = vadd.f32 %v4223_v30, %v2592_v37  ;;  %v4102_v17 = vpop.f32.mrb[14].mxu1  ;;  %v3931_v10 = vadd.f32 %v3930_v2, %v3929_v12  ;;  %v3932_v49 = vpop.f32.mrb[142].mxu0 }
 0x232   : > { %v3519_v32 = vpack.c.bf16 %v2831_v58, %v2830_v18  ;;  %v2595_v63 = vpop.f32.mrb[15].mxu1  ;;  %v3933_v25 = vpop.f32.mrb[143].mxu0 }
 0x233   : > { %3548 = vst [vmem:[%s4493_s23 + $0x68] sm:$0xff] %v3524_v42   ;;  %v2738_v52 = vadd.f32 %v4224_v48, %v5388_v46  ;;  %v4230_v23 = vadd.f32 %v4229_v55, %v2595_v63  ;;  %v4220_v26 = vadd.f32 %v5332_v3, %v3931_v10  ;;  %v3934_v22 = vadd.f32 %v3933_v25, %v3932_v49 }
 0x234   : > { %3547 = vst [vmem:[%s4493_s23 + $0x60] sm:$0xff] %v3519_v32  }
 0x235   : > { %v2802_v38 = vmul.f32 0.01, %v2738_v52  ;;  %v2739_v53 = vadd.f32 %v4230_v23, %v5388_v46  ;;  %v4221_v57 = vadd.f32 %v4220_v26, %v4101_v24  ;;  %vm2770_vm14 = vcmp.gt.f32.partialorder %v2738_v52, 0.0 }
 0x236   : > { %v4226_v44 = vadd.f32 %v5341_v36, %v3934_v22 }
 0x237   : > { %vm2771_vm15 = vcmp.gt.f32.partialorder %v2739_v53, 0.0  ;;  %v2803_v35 = vmul.f32 0.01, %v2739_v53  ;;  %v2740_v60 = vadd.f32 %v4221_v57, %v5388_v46  ;;  %v2834_v13 = vsel %vm2770_vm14, %v2738_v52, %v2802_v38 }
 0x238   : > { %v4227_v34 = vadd.f32 %v4226_v44, %v4102_v17 }
 0x239   : > { %v2835_v16 = vsel %vm2771_vm15, %v2739_v53, %v2803_v35  ;;  %v2804_v59 = vmul.f32 0.01, %v2740_v60  ;;  %vm2772_vm0 = vcmp.gt.f32.partialorder %v2740_v60, 0.0 }
 0x23a   : > { %v2741_v3 = vadd.f32 %v4227_v34, %v5388_v46  ;;  %v3529_v21 = vpack.c.bf16 %v2835_v16, %v2834_v13 }
 0x23b   : > { %v2836_v45 = vsel %vm2772_vm0, %v2740_v60, %v2804_v59 }
 0x23c   : > { %vm2773_vm1 = vcmp.gt.f32.partialorder %v2741_v3, 0.0  ;;  %v2805_v1 = vmul.f32 0.01, %v2741_v3  ;;  %3549 = vst [vmem:[%s4493_s23 + $0x70] sm:$0xff] %v3529_v21  }
 0x23e   : > { %v2837_v29 = vsel %vm2773_vm1, %v2741_v3, %v2805_v1 }
 0x23f   : > { %v3534_v6 = vpack.c.bf16 %v2837_v29, %v2836_v45 }
 0x241   : > { %3550 = vst [vmem:[%s4493_s23 + $0x78] sm:$0xff] %v3534_v6  }
 0x242 PF: > { %s13_s14 = sadd.s32 1, %s4442_s14   ;;  %s5506_s12 = smov %s4438_s13 }
 0x243   : > { %p10_p5 = scmp.ge.s32.totalorder %s13_s14, 4   ;;  %s5507_s13 = smov %s5509_s15 }
 0x245   :  { %12 = sbr.rel (!%p10_p5) target bundleno = 2 (0x2), region = 156 }
 0x24c   :  { %3030 = vsyncmov [#allocation3] }
 0x24f   :  { %s3031_s5 = vpop.sfrf %3030 }
 0x250   :  { %p3420_p6 = scmp.ne.s32.totalorder %s3031_s5, 0 }
 0x252   :  { %3035 = shalt.err (%p3420_p6)  }
 0x253   :  { %3037 = vsyncmov [#allocation3 + $0x1] }
 0x256   :  { %s3038_s6 = vpop.sfrf %3037 }
 0x257   :  { %p3421_p7 = scmp.ne.s32.totalorder %s3038_s6, 0 }
 0x259   :  { %3042 = shalt.err (%p3421_p7)  }

// kernel: residual_module3.3
= control target key start
LH: loop header
LB: loop body
LE: loop exit
PB: predicated region body
PF: predicated region fallthrough
CT: control target
= control target key end

     0   :  { %s6467_s27 = smov 0   ;;  %s6469_s28 = smov 0   ;;  %s8320_s0 = inlined_call_operand.vmem [shape: bf16[2,18,24,128], index: 0, kind: input, shape index: {}]   ;;  %s8321_s1 = inlined_call_operand.vmem [shape: bf16[128,128], index: 1, kind: input, shape index: {}]   ;;  %s8322_s2 = inlined_call_operand.vmem [shape: f32[1,128], index: 2, kind: input, shape index: {}]   ;;  %s8323_s3 = inlined_call_operand.vmem [shape: bf16[128,128], index: 3, kind: input, shape index: {}]   ;;  %s8324_s4 = inlined_call_operand.vmem [shape: f32[1,128], index: 4, kind: input, shape index: {}]   ;;  %s8325_s5 = inlined_call_operand.vmem [shape: bf16[3,384,128], index: 5, kind: input, shape index: {}]   ;;  %s8326_s6 = inlined_call_operand.vmem [shape: f32[1,128], index: 6, kind: input, shape index: {}]   ;;  %s8327_s7 = inlined_call_operand.vmem [shape: bf16[2,16,16,128], index: 7, kind: output, shape index: {0}]   ;;  %s8328_s8 = inlined_call_operand.vmem [shape: f32[2,16,16,128], index: 8, kind: output, shape index: {1}]  }
   0x1   :  { %s6471_s29 = smov 0  }
   0x2 LB: > { %s31_s30 = sadd.s32 1, %s6414_s28  ;;  %p4792_p0 = scmp.ge.s32.totalorder %s6418_s29, 1  ;;  %s6418_s29 = sphi %s6471_s29, %s19_s29   ;;  %s6414_s28 = sphi %s6469_s28, %s8446_s28   ;;  %s6410_s27 = sphi %s6467_s27, %s8445_s27  }
   0x3   : > { %p33_p1 = scmp.ge.s32.totalorder %s31_s30, 2  ;;  %p247_p2 = scmp.lt.s32.totalorder %s6418_s29, 3 }
   0x5   : > { %s8448_s30 = smov (%p33_p1, %s31_s30), 0  ;;  %p248_p3 = pnand %p4792_p0, %p247_p2 }
   0x7   : > { %251 = sbr.rel (%p248_p3) target bundleno = 960 (0x3c0), region = 44 }
   0xe   : > { %p290_p4 = scmp.lt.s32.totalorder %s6410_s27, 1  ;;  %s5141_s9 = smul.u32 216, %s6410_s27 }
  0x10   : > { %s8450_s27 = smov (!%p290_p4, %s6410_s27), 1  ;;  %s6488_s12 = scalar_lea.vmem %s8320_s0, %s5141_s9 }
  0x11   : > { %s5139_s13 = sshll.u32 %s8450_s27, 7  ;;  %s5140_s14 = sshll.u32 %s8450_s27, 8  ;;  %v353_v0 = vld [vmem:[%s6488_s12] sm:$0xff]  ;;  %v355_v1 = vld [vmem:[%s6488_s12 + $0x8] sm:$0xff]  ;;  %v357_v2 = vld [vmem:[%s6488_s12 + $0x10] sm:$0xff] }
  0x12   : > { %s6496_s17 = scalar_lea.vmem %s8327_s7, %s5139_s13  ;;  %s6501_s20 = scalar_lea.vmem %s8328_s8, %s5140_s14  ;;  %354 = vst [vmem:[#allocation2] sm:$0xff] %v353_v0  ;;  %356 = vst [vmem:[#allocation2 + $0x8] sm:$0xff] %v355_v1  ;;  %v359_v3 = vld [vmem:[%s6488_s12 + $0x18] sm:$0xff]  ;;  %v361_v4 = vld [vmem:[%s6488_s12 + $0x20] sm:$0xff] }
  0x13   : > { %358 = vst [vmem:[#allocation2 + $0x10] sm:$0xff] %v357_v2  ;;  %v363_v5 = vld [vmem:[%s6488_s12 + $0x28] sm:$0xff]  ;;  %360 = vst [vmem:[#allocation2 + $0x18] sm:$0xff] %v359_v3  ;;  %v365_v6 = vld [vmem:[%s6488_s12 + $0x30] sm:$0xff] }
  0x14   : > { %362 = vst [vmem:[#allocation2 + $0x20] sm:$0xff] %v361_v4  ;;  %364 = vst [vmem:[#allocation2 + $0x28] sm:$0xff] %v363_v5  ;;  %v367_v7 = vld [vmem:[%s6488_s12 + $0x38] sm:$0xff]  ;;  %v369_v8 = vld [vmem:[%s6488_s12 + $0x40] sm:$0xff] }
  0x15   : > { %366 = vst [vmem:[#allocation2 + $0x30] sm:$0xff] %v365_v6  ;;  %368 = vst [vmem:[#allocation2 + $0x38] sm:$0xff] %v367_v7  ;;  %v371_v9 = vld [vmem:[%s6488_s12 + $0x48] sm:$0xff]  ;;  %v373_v10 = vld [vmem:[%s6488_s12 + $0x50] sm:$0xff] }
  0x16   : > { %370 = vst [vmem:[#allocation2 + $0x40] sm:$0xff] %v369_v8  ;;  %v375_v11 = vld [vmem:[%s6488_s12 + $0x58] sm:$0xff]  ;;  %372 = vst [vmem:[#allocation2 + $0x48] sm:$0xff] %v371_v9  ;;  %v377_v12 = vld [vmem:[%s6488_s12 + $0x60] sm:$0xff] }
  0x17   : > { %374 = vst [vmem:[#allocation2 + $0x50] sm:$0xff] %v373_v10  ;;  %376 = vst [vmem:[#allocation2 + $0x58] sm:$0xff] %v375_v11  ;;  %v379_v13 = vld [vmem:[%s6488_s12 + $0x68] sm:$0xff]  ;;  %v381_v14 = vld [vmem:[%s6488_s12 + $0x70] sm:$0xff] }
  0x18   : > { %378 = vst [vmem:[#allocation2 + $0x60] sm:$0xff] %v377_v12  ;;  %380 = vst [vmem:[#allocation2 + $0x68] sm:$0xff] %v379_v13  ;;  %v383_v15 = vld [vmem:[%s6488_s12 + $0x78] sm:$0xff]  ;;  %v385_v16 = vld [vmem:[%s6488_s12 + $0x80] sm:$0xff] }
  0x19   : > { %382 = vst [vmem:[#allocation2 + $0x70] sm:$0xff] %v381_v14  ;;  %v387_v17 = vld [vmem:[%s6488_s12 + $0x88] sm:$0xff]  ;;  %384 = vst [vmem:[#allocation2 + $0x78] sm:$0xff] %v383_v15  ;;  %v389_v18 = vld [vmem:[%s6488_s12 + $0x90] sm:$0xff] }
  0x1a   : > { %386 = vst [vmem:[#allocation2 + $0x80] sm:$0xff] %v385_v16  ;;  %388 = vst [vmem:[#allocation2 + $0x88] sm:$0xff] %v387_v17  ;;  %v391_v19 = vld [vmem:[%s6488_s12 + $0x98] sm:$0xff]  ;;  %v393_v20 = vld [vmem:[%s6488_s12 + $0xa0] sm:$0xff] }
  0x1b   : > { %390 = vst [vmem:[#allocation2 + $0x90] sm:$0xff] %v389_v18  ;;  %392 = vst [vmem:[#allocation2 + $0x98] sm:$0xff] %v391_v19  ;;  %v395_v21 = vld [vmem:[%s6488_s12 + $0xa8] sm:$0xff]  ;;  %v397_v22 = vld [vmem:[%s6488_s12 + $0xb0] sm:$0xff] }
  0x1c   : > { %394 = vst [vmem:[#allocation2 + $0xa0] sm:$0xff] %v393_v20  ;;  %v399_v23 = vld [vmem:[%s6488_s12 + $0xb8] sm:$0xff]  ;;  %396 = vst [vmem:[#allocation2 + $0xa8] sm:$0xff] %v395_v21  ;;  %v401_v24 = vld [vmem:[%s6488_s12 + $0xc0] sm:$0xff] }
  0x1d   : > { %398 = vst [vmem:[#allocation2 + $0xb0] sm:$0xff] %v397_v22  ;;  %400 = vst [vmem:[#allocation2 + $0xb8] sm:$0xff] %v399_v23  ;;  %v403_v25 = vld [vmem:[%s6488_s12 + $0xc8] sm:$0xff]  ;;  %v405_v26 = vld [vmem:[%s6488_s12 + $0xd0] sm:$0xff] }
  0x1e   : > { %402 = vst [vmem:[#allocation2 + $0xc0] sm:$0xff] %v401_v24  ;;  %404 = vst [vmem:[#allocation2 + $0xc8] sm:$0xff] %v403_v25 }
  0x1f   : > { %406 = vst [vmem:[#allocation2 + $0xd0] sm:$0xff] %v405_v26 }
  0x20   : > { %414 = vsyncadd [#allocation3], 3456 }
  0x21   : > { %6406 = dma.done.wait [#allocation3], 3456 }
  0x22   : > { %6407 = vsyncadd [#allocation3], 4294963840  ;;  %v8329_v27 = vmov 0.0   ;;  %vm6421_vm0 = vmmov 0   ;;  %v6272_v28 = vld [vmem:[%s8321_s1] sm:$0xff]   ;;  %v6273_v29 = vld [vmem:[%s8321_s1 + $0x8] sm:$0xff]  }
  0x23   : > { %5802 = vmatprep.subr.bf16.mxu1 %v8329_v27  ;;  %5818 = vmatprep.mubr.msk.bf16.mxu1 %vm6421_vm0, %v8329_v27  ;;  %v6274_v30 = vld [vmem:[%s8321_s1 + $0x10] sm:$0xff]   ;;  %v6275_v31 = vld [vmem:[%s8321_s1 + $0x18] sm:$0xff]   ;;  %v6276_v32 = vld [vmem:[%s8321_s1 + $0x20] sm:$0xff]   ;;  %vm594_vm1 = vsmask.f32 3328  ;;  %vm2446_vm8 = vcmask 1046528  }
  0x24   : > { %5803 = vmatpush3.bf16.msra.mxu1 %v6272_v28  ;;  %v6548_v33 = vld [vmem:[#allocation2 + $0x18] sm:$0xf]  ;;  %v6550_v34 = vld [vmem:[#allocation2 + $0x1c] sm:$0xf]  ;;  %v6554_v37 = vld [vmem:[#allocation2 + $0x20] sm:$0xf] }
  0x25   : > { %5804 = vmatprep.subr.bf16.mxu1 %v8329_v27  ;;  %v622_v35 = vshrl.u32 %v6548_v33, 16  ;;  %v625_v36 = vshll.u32 %v6548_v33, 16  ;;  %v6556_v38 = vld [vmem:[#allocation2 + $0x24] sm:$0xf]  ;;  %v631_v39 = vshll.u32 %v6550_v34, 16  ;;  %v635_v40 = vshrl.u32 %v6550_v34, 16 }
  0x26   : > { %v641_v41 = vshll.u32 %v6554_v37, 16  ;;  %v646_v42 = vshrl.u32 %v6556_v38, 16  ;;  %v649_v43 = vshll.u32 %v6556_v38, 16  ;;  %v6564_v44 = vld [vmem:[#allocation2 + $0x28] sm:$0xf]  ;;  %v6278_v57 = vld [vmem:[%s8321_s1 + $0x30] sm:$0xff]  }
  0x27   : > { %v6566_v45 = vld [vmem:[#allocation2 + $0x2c] sm:$0xf]  ;;  %v655_v46 = vshll.u32 %v6564_v44, 16  ;;  %v659_v47 = vshrl.u32 %v6564_v44, 16  ;;  %v6574_v50 = vrot.slane %v622_v35, 4  ;;  %v6576_v51 = vrot.slane %v625_v36, 5 }
  0x28   : > { %5805 = vmatpush3.bf16.msra.mxu1 %v6273_v29  ;;  %v665_v48 = vshll.u32 %v6566_v45, 16  ;;  %v6277_v49 = vld [vmem:[%s8321_s1 + $0x28] sm:$0xff]   ;;  %v6579_v52 = vrot.slane %v631_v39, 5  ;;  %v6581_v53 = vrot.slane %v635_v40, 4  ;;  %v6583_v54 = vrot.slane %v641_v41, 5  ;;  %v6279_v21 = vld [vmem:[%s8321_s1 + $0x38] sm:$0xff]  }
  0x29   : > { %5806 = vmatprep.subr.bf16.mxu1 %v8329_v27  ;;  %v6585_v55 = vrot.slane %v646_v42, 4  ;;  %v6587_v56 = vld [vmem:[#allocation2 + $0x30] sm:$0xf]  ;;  %v6592_v58 = vrot.slane %v649_v43, 5  ;;  %v6594_v59 = vld [vmem:[#allocation2 + $0x34] sm:$0xf] }
  0x2a   : > { %v670_v60 = vshrl.u32 %v6587_v56, 16  ;;  %v6597_v61 = vld [vmem:[#allocation2 + $0x38] sm:$0xf]  ;;  %v6599_v62 = vrot.slane %v655_v46, 5  ;;  %v6601_v63 = vrot.slane %v659_v47, 4  ;;  %v6603_v0 = vrot.slane %v665_v48, 5 }
  0x2b   : > { %v673_v1 = vshll.u32 %v6587_v56, 16  ;;  %v6606_v2 = vld [vmem:[#allocation2 + $0x3c] sm:$0xf]  ;;  %v679_v3 = vshll.u32 %v6594_v59, 16  ;;  %v683_v4 = vshrl.u32 %v6594_v59, 16  ;;  %v689_v5 = vshll.u32 %v6597_v61, 16 }
  0x2c   : > { %5807 = vmatpush3.bf16.msra.mxu1 %v6274_v30  ;;  %v694_v6 = vshrl.u32 %v6606_v2, 16  ;;  %v6612_v7 = vld [vmem:[#allocation2 + $0x40] sm:$0xf]  ;;  %v697_v8 = vshll.u32 %v6606_v2, 16  ;;  %v6616_v9 = vld [vmem:[#allocation2 + $0x44] sm:$0xf] }
  0x2d   : > { %5808 = vmatprep.subr.bf16.mxu1 %v8329_v27  ;;  %8356 = vst [vmem:[#allocation8_spill] sm:$0xff] %v6612_v7  ;;  %v703_v10 = vshll.u32 %v6612_v7, 16  ;;  %v6619_v11 = vld [vmem:[#allocation2 + $0x48] sm:$0xf]  ;;  %v707_v12 = vshrl.u32 %v6612_v7, 16  ;;  %v713_v13 = vshll.u32 %v6616_v9, 16 }
  0x2e   : > { %8357 = vst [vmem:[#allocation9_spill] sm:$0xff] %v6619_v11  ;;  %v6623_v14 = vld [vmem:[#allocation2 + $0x4c] sm:$0xf]  ;;  %v6625_v15 = vld [vmem:[#allocation2 + $0x50] sm:$0xf]  ;;  %v718_v16 = vshrl.u32 %v6619_v11, 16 }
  0x2f   : > { %8358 = vst [vmem:[#allocation10_spill] sm:$0xff] %v6623_v14  ;;  %8359 = vst [vmem:[#allocation11_spill] sm:$0xff] %v6625_v15  ;;  %v721_v17 = vshll.u32 %v6619_v11, 16  ;;  %v727_v18 = vshll.u32 %v6623_v14, 16  ;;  %v731_v19 = vshrl.u32 %v6623_v14, 16  ;;  %v6636_v22 = vrot.slane %v670_v60, 4 }
  0x30   : > { %5809 = vmatpush3.bf16.msra.mxu1 %v6275_v31  ;;  %v6631_v20 = vld [vmem:[#allocation2 + $0x54] sm:$0xf]  ;;  %v6638_v23 = vrot.slane %v673_v1, 5  ;;  %v737_v24 = vshll.u32 %v6625_v15, 16  ;;  %v6280_v26 = vld [vmem:[#allocation2] sm:$0xff]   ;;  %v6643_v28 = vrot.slane %v679_v3, 5 }
  0x31   : > { %5810 = vmatprep.subr.bf16.mxu1 %v8329_v27  ;;  %8360 = vst [vmem:[#allocation12_spill] sm:$0xff] %v6631_v20  ;;  %v742_v25 = vshrl.u32 %v6631_v20, 16  ;;  %v6645_v29 = vrot.slane %v683_v4, 4  ;;  %v6647_v30 = vrot.slane %v689_v5, 5  ;;  %v6649_v31 = vrot.slane %v694_v6, 4 }
  0x32   : > { %v6653_v35 = vld [vmem:[#allocation2 + $0xc] sm:$0xf]  ;;  %v6655_v36 = vrot.slane %v697_v8, 5  ;;  %v6657_v39 = vrot.slane %v703_v10, 5  ;;  %v6659_v40 = vrot.slane %v707_v12, 4  ;;  %v6661_v41 = vrot.slane %v713_v13, 5 }
  0x33   : > { %v6663_v42 = vld [vmem:[#allocation2 + $0x58] sm:$0xf]  ;;  %v6665_v43 = vrot.slane %v718_v16, 4  ;;  %v6667_v46 = vrot.slane %v721_v17, 5  ;;  %v6669_v47 = vrot.slane %v727_v18, 5  ;;  %v6671_v48 = vrot.slane %v731_v19, 4 }
  0x34   : > { %5811 = vmatpush3.bf16.msra.mxu1 %v6276_v32  ;;  %v6651_v32 = vld [vmem:[#allocation2 + $0x8] sm:$0xf]  ;;  %8361 = vst [vmem:[#allocation13_spill] sm:$0xff] %v6663_v42  ;;  %v6677_v60 = vrot.slane %v742_v25, 4  ;;  %v745_v1 = vshll.u32 %v6631_v20, 16  ;;  %v751_v3 = vshll.u32 %v6663_v42, 16 }
  0x35   : > { %5812 = vmatprep.subr.bf16.mxu1 %v8329_v27  ;;  %v6681_v4 = vld [vmem:[#allocation2 + $0x60] sm:$0xf]  ;;  %v755_v5 = vshrl.u32 %v6663_v42, 16  ;;  %v6685_v8 = vld [vmem:[#allocation2 + $0x64] sm:$0xf]  ;;  %v4882_v19 = vcombine.low %v6651_v32, %v6653_v35  ;;  %v8367_v42 = vmov 0.0  }
  0x36   : > { %8364 = vst [vmem:[#allocation16_spill] sm:$0xff] %v6677_v60  ;;  %8365 = vst [vmem:[#allocation17_spill] sm:$0xff] %v6681_v4  ;;  %v766_v10 = vshrl.u32 %v6681_v4, 16  ;;  %v769_v12 = vshll.u32 %v6681_v4, 16  ;;  %v775_v13 = vshll.u32 %v6685_v8, 16  ;;  %v779_v16 = vshrl.u32 %v6685_v8, 16 }
  0x37   : > { %8366 = vst [vmem:[#allocation18_spill] sm:$0xff] %v6685_v8  ;;  %v566_v17 = vld [vmem:[#allocation2 + $0x68] sm:$0xf]  ;;  %v567_v18 = vld [vmem:[#allocation2 + $0x6c] sm:$0xf]  ;;  %v6695_v14 = vrot.slane %v745_v1, 5 }
  0x38   : > { %5813 = vmatpush3.bf16.msra.mxu1 %v6277_v49  ;;  %v6673_v49 = vld [vmem:[#allocation2 + $0x5c] sm:$0xf]  ;;  %v568_v25 = vld [vmem:[#allocation2 + $0x70] sm:$0xf]  ;;  %v570_v11 = vld [vmem:[#allocation2 + $0x78] sm:$0xf] }
  0x39   : > { %5814 = vmatprep.subr.bf16.mxu1 %v8329_v27  ;;  %8362 = vst [vmem:[#allocation14_spill] sm:$0xff] %v6673_v49  ;;  %v761_v6 = vshll.u32 %v6673_v49, 16  ;;  %v793_v49 = vshll.u32 %v567_v18, 16  ;;  %v799_v15 = vshll.u32 %v568_v25, 16  ;;  %v803_v4 = vshrl.u32 %v568_v25, 16 }
  0x3a   : > { %v6697_v8 = vrot.slane %v751_v3, 5  ;;  %v814_v60 = vshrl.u32 %v570_v11, 16  ;;  %v6707_v7 = vrot.slane %v775_v13, 5  ;;  %v571_v1 = vld [vmem:[#allocation2 + $0x7c] sm:$0xf]  ;;  %v817_v3 = vshll.u32 %v570_v11, 16 }
  0x3b   : > { %v6701_v32 = vrot.slane %v761_v6, 5  ;;  %v6719_v6 = vrot.slane %v803_v4, 4  ;;  %v6725_v13 = vld [vmem:[#allocation2 + $0x14] sm:$0xf]  ;;  %v6298_v11 = vld [vmem:[%s8323_s3] sm:$0xff]  }
  0x3c   : > { %5815 = vmatpush3.bf16.msra.mxu1 %v6278_v57  ;;  %v6675_v57 = vrot.slane %v737_v24, 5  ;;  %v790_v24 = vshrl.u32 %v567_v18, 16  ;;  %8368 = vst [vmem:[#allocation19_spill] sm:$0xff] %v6697_v8  ;;  %v6709_v18 = vrot.slane %v779_v16, 4  ;;  %v6715_v8 = vrot.slane %v793_v49, 5  ;;  %5754 = vmatprep.subr.bf16.mxu0 %v6298_v11 }
  0x3d   : > { %5816 = vmatprep.subr.bf16.mxu1 %v8329_v27  ;;  %v569_v27 = vld [vmem:[#allocation2 + $0x74] sm:$0xf]  ;;  %8369 = vst [vmem:[#allocation20_spill] sm:$0xff] %v6701_v32  ;;  %8374 = vst [vmem:[#allocation25_spill] sm:$0xff] %v6719_v6  ;;  %v6727_v16 = vrot.slane %v814_v60, 4  ;;  %5755 = vmatpush3.bf16.msra.mxu0 %v6298_v11 }
  0x3e   : > { %8363 = vst [vmem:[#allocation15_spill] sm:$0xff] %v6675_v57  ;;  %v809_v20 = vshll.u32 %v569_v27, 16  ;;  %v6705_v57 = vrot.slane %v769_v12, 5  ;;  %v6713_v27 = vrot.slane %v790_v24, 4  ;;  %8372 = vst [vmem:[#allocation23_spill] sm:$0xff] %v6715_v8  ;;  %v6301_v11 = vld [vmem:[%s8323_s3 + $0x10] sm:$0xff]  }
  0x3f   : > { %v6723_v12 = vld [vmem:[#allocation2 + $0x10] sm:$0xf]  ;;  %8376 = vst [vmem:[#allocation27_spill] sm:$0xff] %v6727_v16  ;;  %v6729_v24 = vld [vmem:[#allocation2 + $0x80] sm:$0xf] }
  0x40   : > { %5817 = vmatpush3.bf16.msra.mxu1 %v6279_v21  ;;  %v785_v21 = vshll.u32 %v566_v17, 16  ;;  %v6703_v17 = vrot.slane %v766_v10, 4  ;;  %8371 = vst [vmem:[#allocation22_spill] sm:$0xff] %v6713_v27  ;;  %v6721_v10 = vrot.slane %v809_v20, 5  ;;  %8377 = vst [vmem:[#allocation28_spill] sm:$0xff] %v6729_v24  ;;  %v6299_v20 = vld [vmem:[%s8323_s3 + $0x8] sm:$0xff]  }
  0x41   : > { %v6731_v32 = vld [vmem:[#allocation2 + $0x84] sm:$0xf]  ;;  %v6743_v49 = vld [vmem:[#allocation2 + $0x90] sm:$0xf]  ;;  %v6745_v60 = vld [vmem:[#allocation2 + $0x94] sm:$0xf]  ;;  %5756 = vmatprep.subr.bf16.mxu0 %v6299_v20 }
  0x42   : > { %v6711_v25 = vrot.slane %v785_v21, 5  ;;  %8375 = vst [vmem:[#allocation26_spill] sm:$0xff] %v6721_v10  ;;  %v823_v21 = vshll.u32 %v571_v1, 16  ;;  %8378 = vst [vmem:[#allocation29_spill] sm:$0xff] %v6731_v32  ;;  %v833_v4 = vshll.u32 %v6729_v24, 16  ;;  %v841_v6 = vshll.u32 %v6731_v32, 16  ;;  %5757 = vmatpush3.bf16.msra.mxu0 %v6299_v20 }
  0x43   : > { %5819 = vmatmul.mubr.bf16.vlgmr.msra.gmra.mrb[0].mxu1 %v6280_v26  ;;  %v6699_v26 = vrot.slane %v755_v5, 4  ;;  %v6717_v5 = vrot.slane %v799_v15, 5  ;;  %v6736_v15 = vrot.slane %v817_v3, 5  ;;  %8380 = vst [vmem:[#allocation31_spill] sm:$0xff] %v6743_v49  ;;  %8381 = vst [vmem:[#allocation32_spill] sm:$0xff] %v6745_v60  ;;  %5758 = vmatprep.subr.bf16.mxu0 %v6301_v11  ;;  %v862_v27 = vshrl.u32 %v6743_v49, 16 }
  0x44   : > { %5822 = vmatprep.mubr.msk.bf16.mxu1 %vm6421_vm0, %v8367_v42  ;;  %8370 = vst [vmem:[#allocation21_spill] sm:$0xff] %v6711_v25  ;;  %v827_v25 = vshrl.u32 %v571_v1, 16  ;;  %v838_v1 = vshrl.u32 %v6731_v32, 16  ;;  %v6749_v10 = vld [vmem:[#allocation2 + $0x88] sm:$0xf]  ;;  %v6780_v32 = vrot.slane %v841_v6, 5 }
  0x45   : > { %8373 = vst [vmem:[#allocation24_spill] sm:$0xff] %v6717_v5  ;;  %8379 = vst [vmem:[#allocation30_spill] sm:$0xff] %v6736_v15  ;;  %v6755_v15 = vrot.slane %v823_v21, 5  ;;  %v847_v24 = vshll.u32 %v6749_v10, 16  ;;  %v6761_v5 = vrot.slane %v833_v4, 5  ;;  %v851_v3 = vshrl.u32 %v6749_v10, 16 }
  0x46   : > { %8382 = vst [vmem:[#allocation33_spill] sm:$0xff] %v6749_v10  ;;  %v6757_v16 = vrot.slane %v827_v25, 4  ;;  %v6763_v8 = vld [vmem:[#allocation2 + $0x8c] sm:$0xf]  ;;  %v6302_v25 = vld [vmem:[%s8323_s3 + $0x18] sm:$0xff]   ;;  %v6778_v4 = vrot.slane %v838_v1, 4  ;;  %5759 = vmatpush3.bf16.msra.mxu0 %v6301_v11 }
  0x47   : > { %8383 = vst [vmem:[#allocation34_spill] sm:$0xff] %v6755_v15  ;;  %8385 = vst [vmem:[#allocation36_spill] sm:$0xff] %v6761_v5  ;;  %v6774_v21 = vld [vmem:[#allocation2 + $0x98] sm:$0xf]  ;;  %v6776_v20 = vld [vmem:[#allocation2 + $0x9c] sm:$0xf]  ;;  %v4884_v5 = vcombine.low %v6548_v33, %v6550_v34  ;;  %5760 = vmatprep.subr.bf16.mxu0 %v6302_v25 }
  0x48   : > { %8384 = vst [vmem:[#allocation35_spill] sm:$0xff] %v6757_v16  ;;  %8386 = vst [vmem:[#allocation37_spill] sm:$0xff] %v6763_v8  ;;  %v6787_v16 = vrot.slane %v847_v24, 5  ;;  %v6789_v15 = vrot.slane %v851_v3, 4  ;;  %v865_v1 = vshll.u32 %v6743_v49, 16  ;;  %v6304_v11 = vld [vmem:[%s8323_s3 + $0x20] sm:$0xff]   ;;  %v4885_v49 = vcombine.low %v6554_v37, %v6556_v38 }
  0x49   : > { %8387 = vst [vmem:[#allocation38_spill] sm:$0xff] %v6774_v21  ;;  %8388 = vst [vmem:[#allocation39_spill] sm:$0xff] %v6776_v20  ;;  %v871_v10 = vshll.u32 %v6745_v60, 16  ;;  %v6305_v33 = vld [vmem:[%s8323_s3 + $0x28] sm:$0xff]   ;;  %v6804_v34 = vld [vmem:[#allocation2 + $0xa0] sm:$0xf] }
  0x4a   : > { %8389 = vst [vmem:[#allocation40_spill] sm:$0xff] %v6787_v16  ;;  %8390 = vst [vmem:[#allocation41_spill] sm:$0xff] %v6789_v15  ;;  %5761 = vmatpush3.bf16.msra.mxu0 %v6302_v25  ;;  %v6806_v24 = vld [vmem:[#allocation2 + $0xa4] sm:$0xf]  ;;  %v6808_v3 = vrot.slane %v862_v27, 4  ;;  %v6810_v25 = vrot.slane %v865_v1, 5 }
  0x4b   : > { %5823 = vmatmul.mubr.bf16.gmra.mrb[4].mxu1 %v4882_v19  ;;  %v4883_v19 = vcombine.low %v6723_v12, %v6725_v13  ;;  %5762 = vmatprep.subr.bf16.mxu0 %v6304_v11  ;;  %8392 = vst [vmem:[#allocation43_spill] sm:$0xff] %v6804_v34  ;;  %v889_v15 = vshll.u32 %v6776_v20, 16  ;;  %v895_v27 = vshll.u32 %v6804_v34, 16  ;;  %v598_v1 = vshrl.u32 %v6653_v35, 16  ;;  %v6307_v37 = vld [vmem:[%s8323_s3 + $0x30] sm:$0xff]  }
  0x4c   : > { %5826 = vmatprep.mubr.msk.bf16.mxu1 %vm6421_vm0, %v8367_v42  ;;  %8393 = vst [vmem:[#allocation44_spill] sm:$0xff] %v6808_v3  ;;  %8394 = vst [vmem:[#allocation45_spill] sm:$0xff] %v6810_v25  ;;  %v899_v16 = vshrl.u32 %v6804_v34, 16  ;;  %vm595_vm2 = vsmask.f32 7440 }
  0x4d   : > { %v600_v38 = vrot.slane %v598_v1, 4  ;;  %vm6842_vm3 = vmor %vm594_vm1, %vm595_vm2  ;;  %v6847_v1 = vld [vmem:[#allocation2 + $0xac] sm:$0xf]  ;;  %vm2211_vm9 = vsmask.f32 7424 }
  0x4e   : > { %5763 = vmatpush3.bf16.msra.mxu0 %v6304_v11  ;;  %v607_v11 = vshll.u32 %v6723_v12, 16 }
  0x4f   : > { %5764 = vmatprep.subr.bf16.mxu0 %v6305_v33 }
  0x50   : > { %v609_v25 = vrot.slane %v607_v11, 5  ;;  %v628_v11 = vor.u32 %v6576_v51, %v6574_v50 }
  0x52   : > { %5765 = vmatpush3.bf16.msra.mxu0 %v6305_v33  ;;  %v6836_v33 = vld [vmem:[#allocation2 + $0xa8] sm:$0xf]  ;;  %v629_v51 = vrot.slane %v628_v11, 4 }
  0x53   : > { %5827 = vmatmul.mubr.bf16.gmra.mrb[8].mxu1 %v4883_v19  ;;  %v857_v19 = vshll.u32 %v6763_v8, 16  ;;  %v881_v8 = vshll.u32 %v6774_v21, 16  ;;  %5766 = vmatprep.subr.bf16.mxu0 %v6307_v37 }
  0x54   : > { %5830 = vmatprep.mubr.msk.bf16.mxu1 %vm6421_vm0, %v8367_v42 }
  0x55   : > { %v6793_v6 = vrot.slane %v857_v19, 5  ;;  %v611_v19 = vshrl.u32 %v6723_v12, 16 }
  0x56   : > { %5767 = vmatpush3.bf16.msra.mxu0 %v6307_v37  ;;  %v905_v37 = vshll.u32 %v6806_v24, 16 }
  0x57   : > { %8391 = vst [vmem:[#allocation42_spill] sm:$0xff] %v6793_v6  ;;  %v886_v6 = vshrl.u32 %v6776_v20, 16  ;;  %v613_v3 = vrot.slane %v611_v19, 4  ;;  %v4886_v20 = vcombine.low %v6564_v44, %v6566_v45  ;;  %v617_v45 = vshll.u32 %v6725_v13, 16 }
  0x58   : > { %v4902_v13 = vcombine.low %v6836_v33, %v6847_v1 }
  0x59   : > { %v619_v34 = vrot.slane %v617_v45, 5  ;;  %v919_v45 = vshll.u32 %v6847_v1, 16 }
  0x5b   : > { %5831 = vmatmul.mubr.bf16.gmra.mrb[12].mxu1 %v4884_v5  ;;  %v875_v5 = vshrl.u32 %v6745_v60, 16  ;;  %v601_v60 = vshll.u32 %v6653_v35, 16  ;;  %v6308_v35 = vld [vmem:[%s8323_s3 + $0x38] sm:$0xff]  }
  0x5c   : > { %5834 = vmatprep.mubr.msk.bf16.mxu1 %vm6421_vm0, %v8367_v42  ;;  %5768 = vmatprep.subr.bf16.mxu0 %v6308_v35 }
  0x5d   : > { %v603_v21 = vrot.slane %v601_v60, 5  ;;  %v614_v60 = vor.u32 %v613_v3, %v609_v25  ;;  %v6840_v19 = vrot.slane %v875_v5, 4  ;;  %v6853_v3 = vrot.slane %v886_v6, 4  ;;  %5769 = vmatpush3.bf16.msra.mxu0 %v6308_v35  ;;  %v6884_v35 = vld [vmem:[#allocation2 + $0xb4] sm:$0xf] }
  0x5f   : > { %v604_v12 = vor.u32 %v603_v21, %v600_v38  ;;  %8396 = vst [vmem:[#allocation47_spill] sm:$0xff] %v6840_v19  ;;  %v6851_v21 = vrot.slane %v881_v8, 5  ;;  %v615_v5 = vrot.slane %v614_v60, 4  ;;  %v6855_v38 = vrot.slane %v889_v15, 5 }
  0x60   : > { %v6860_v19 = vrot.slane %v895_v27, 5  ;;  %v638_v15 = vor.u32 %v6581_v53, %v6579_v52  ;;  %v662_v53 = vor.u32 %v6601_v63, %v6599_v62  ;;  %v6886_v60 = vrot.slane %v905_v37, 5 }
  0x61   : > { %v620_v8 = vsel %vm6842_vm3, %v615_v5, %v619_v34  ;;  %v652_v34 = vor.u32 %v6592_v58, %v6585_v55  ;;  %v676_v37 = vor.u32 %v6638_v23, %v6636_v22  ;;  %v700_v23 = vor.u32 %v6655_v36, %v6649_v31 }
  0x62   : > { %v639_v27 = vrot.slane %v638_v15, 4  ;;  %v663_v55 = vrot.slane %v662_v53, 4  ;;  %v934_v15 = vshrl.u32 %v6884_v35, 16  ;;  %v724_v31 = vor.u32 %v6667_v46, %v6665_v43 }
  0x63   : > { %5835 = vmatmul.mubr.bf16.gmra.mrb[16].mxu1 %v4885_v49  ;;  %v6838_v49 = vrot.slane %v871_v10, 5  ;;  %v605_v10 = vrot.slane %v604_v12, 4  ;;  %v910_v12 = vshrl.u32 %v6836_v33, 16  ;;  %v653_v11 = vrot.slane %v652_v34, 4 }
  0x64   : > { %5838 = vmatprep.mubr.msk.bf16.mxu1 %vm6421_vm0, %v8367_v42  ;;  %v6931_v34 = vrot.slane %v919_v45, 5  ;;  %v725_v46 = vrot.slane %v724_v31, 4  ;;  %v8407_v31 = vld [vmem:[#allocation27_spill] sm:$0xff] }
  0x65   : > { %8395 = vst [vmem:[#allocation46_spill] sm:$0xff] %v6838_v49  ;;  %v6862_v49 = vrot.slane %v899_v16, 4  ;;  %v610_v50 = vsel %vm6842_vm3, %v605_v10, %v609_v25  ;;  %v634_v16 = vsel %vm6842_vm3, %v629_v51, %v6579_v52  ;;  %v4887_v25 = vcombine.low %v6587_v56, %v6594_v59 }
  0x66   : > { %v4856_v6 = vcombine.low %v610_v50, %v620_v8  ;;  %v913_v52 = vshll.u32 %v6836_v33, 16  ;;  %v644_v56 = vsel %vm6842_vm3, %v639_v27, %v6583_v54  ;;  %v6895_v63 = vrot.slane %v910_v12, 4  ;;  %v6925_v27 = vld [vmem:[#allocation2 + $0xb8] sm:$0xf] }
  0x67   : > { %v4857_v59 = vcombine.low %v634_v16, %v644_v56  ;;  %v923_v10 = vshrl.u32 %v6847_v1, 16  ;;  %v658_v54 = vsel %vm6842_vm3, %v653_v11, %v6599_v62  ;;  %v668_v50 = vsel %vm6842_vm3, %v663_v55, %v6603_v0  ;;  %v6330_v1 = vld [vmem:[#allocation2 + $0xd0] sm:$0xff]  }
  0x68   : > { %5770 = vmatprep.mubr.bf16.mxu0 %v4856_v6  ;;  %v686_v51 = vor.u32 %v6645_v29, %v6643_v28  ;;  %v4858_v8 = vcombine.low %v658_v54, %v668_v50  ;;  %v677_v6 = vrot.slane %v676_v37, 4  ;;  %v937_v12 = vshll.u32 %v6884_v35, 16  ;;  %v8399_v37 = vld [vmem:[#allocation8_spill] sm:$0xff]  ;;  %v8400_v50 = vld [vmem:[#allocation15_spill] sm:$0xff] }
  0x69   : > { %5771 = vmatmul.mubr.bf16.vlgmr.msra.gmra.mrb[0].mxu0 %v4857_v59  ;;  %v4888_v0 = vcombine.low %v6597_v61, %v6606_v2  ;;  %v710_v29 = vor.u32 %v6659_v40, %v6657_v39  ;;  %v6933_v53 = vrot.slane %v923_v10, 4  ;;  %v701_v2 = vrot.slane %v700_v23, 4 }
  0x6a   : > { %v687_v16 = vrot.slane %v686_v51, 4  ;;  %5774 = vmatprep.mubr.bf16.mxu0 %v4858_v8  ;;  %v682_v62 = vsel %vm6842_vm3, %v677_v6, %v6643_v28  ;;  %v6929_v28 = vrot.slane %v913_v52, 5  ;;  %v6941_v40 = vrot.slane %v934_v15, 4  ;;  %v8401_v51 = vld [vmem:[#allocation16_spill] sm:$0xff]  ;;  %v8402_v15 = vld [vmem:[#allocation19_spill] sm:$0xff] }
  0x6b   : > { %5839 = vmatmul.mubr.bf16.gmra.mrb[20].mxu1 %v4886_v20  ;;  %v6882_v20 = vld [vmem:[#allocation2 + $0xb0] sm:$0xf]  ;;  %v711_v56 = vrot.slane %v710_v29, 4  ;;  %v6943_v59 = vrot.slane %v937_v12, 5  ;;  %v734_v52 = vor.u32 %v6671_v48, %v6669_v47  ;;  %v706_v45 = vsel %vm6842_vm3, %v701_v2, %v6657_v39  ;;  %v6314_v12 = vld [vmem:[%s8325_s5 + $0x48] sm:$0xff]   ;;  %v8406_v2 = vld [vmem:[#allocation25_spill] sm:$0xff] }
  0x6c   : > { %5842 = vmatprep.mubr.msk.bf16.mxu1 %vm6421_vm0, %v8367_v42  ;;  %v4903_v58 = vcombine.low %v6882_v20, %v6884_v35  ;;  %v929_v5 = vshll.u32 %v6882_v20, 16  ;;  %v692_v22 = vsel %vm6842_vm3, %v687_v16, %v6647_v30  ;;  %v943_v43 = vshll.u32 %v6925_v27, 16 }
  0x6d   : > { %v4859_v61 = vcombine.low %v682_v62, %v692_v22  ;;  %v716_v11 = vsel %vm6842_vm3, %v711_v56, %v6661_v41  ;;  %v947_v10 = vshrl.u32 %v6925_v27, 16  ;;  %v4889_v54 = vcombine.low %v8399_v37, %v6616_v9  ;;  %v6312_v9 = vld [vmem:[%s8325_s5 + $0x40] sm:$0xff]   ;;  %v6316_v37 = vld [vmem:[%s8325_s5 + $0x50] sm:$0xff]  }
  0x6e   : > { %v6939_v36 = vrot.slane %v929_v5, 5  ;;  %v4860_v55 = vcombine.low %v706_v45, %v716_v11  ;;  %v735_v5 = vrot.slane %v734_v52, 4  ;;  %v730_v48 = vsel %vm6842_vm3, %v725_v46, %v6669_v47  ;;  %v6313_v47 = vld [vmem:[%s8325_s5] sm:$0xff]   ;;  %5346 = vmatprep.subr.bf16.mxu0 %v6312_v9  ;;  %v6315_v11 = vld [vmem:[%s8325_s5 + $0x8] sm:$0xff]   ;;  %6070 = vmatprep.subr.bf16.mxu1 %v6312_v9 }
  0x6f   : > { %v748_v8 = vor.u32 %v6695_v14, %v8401_v51  ;;  %v758_v6 = vor.u32 %v6699_v26, %v8402_v15  ;;  %v772_v14 = vor.u32 %v6705_v57, %v6703_v17  ;;  %v782_v26 = vor.u32 %v6709_v18, %v6707_v7  ;;  %v8403_v62 = vld [vmem:[#allocation22_spill] sm:$0xff]  ;;  %5347 = vmatpush3.bf16.msra.mxu0 %v6313_v47 }
  0x70   : > { %v740_v41 = vsel %vm6842_vm3, %v735_v5, %v8400_v50  ;;  %v8408_v52 = vld [vmem:[#allocation30_spill] sm:$0xff]  ;;  %6078 = vmatpush3.bf16.msra.mxu1 %v6313_v47  ;;  %v8411_v50 = vld [vmem:[#allocation20_spill] sm:$0xff]  ;;  %5348 = vmatprep.subr.bf16.mxu0 %v6314_v12 }
  0x71   : > { %5775 = vmatmul.mubr.bf16.gmra.mrb[4].mxu0 %v4859_v61  ;;  %v4861_v16 = vcombine.low %v730_v48, %v740_v41  ;;  %v749_v23 = vrot.slane %v748_v8, 4  ;;  %v759_v29 = vrot.slane %v758_v6, 4  ;;  %v8405_v61 = vld [vmem:[#allocation24_spill] sm:$0xff]  ;;  %v820_v45 = vor.u32 %v8408_v52, %v8407_v31  ;;  %v8409_v46 = vld [vmem:[#allocation34_spill] sm:$0xff]  ;;  %6071 = vmatprep.subr.bf16.mxu1 %v6314_v12  ;;  %v8419_v31 = vld [vmem:[#allocation47_spill] sm:$0xff] }
  0x72   : > { %5778 = vmatprep.mubr.bf16.mxu0 %v4860_v55  ;;  %v806_v56 = vor.u32 %v8406_v2, %v8405_v61  ;;  %v773_v57 = vrot.slane %v772_v14, 4  ;;  %v783_v17 = vrot.slane %v782_v26, 4  ;;  %v8410_v55 = vld [vmem:[#allocation35_spill] sm:$0xff]  ;;  %v8412_v14 = vld [vmem:[#allocation21_spill] sm:$0xff]  ;;  %v8413_v12 = vld [vmem:[#allocation26_spill] sm:$0xff] }
  0x73   : > { %5843 = vmatmul.mubr.bf16.gmra.mrb[24].mxu1 %v4887_v25  ;;  %v6927_v25 = vld [vmem:[#allocation2 + $0xbc] sm:$0xf]  ;;  %v830_v5 = vor.u32 %v8410_v55, %v8409_v46  ;;  %v754_v48 = vsel %vm6842_vm3, %v749_v23, %v8402_v15  ;;  %v764_v41 = vsel %vm6842_vm3, %v759_v29, %v8411_v50  ;;  %v821_v8 = vrot.slane %v820_v45, 4  ;;  %5349 = vmatpush3.bf16.msra.mxu0 %v6315_v11  ;;  %v8416_v29 = vld [vmem:[#allocation44_spill] sm:$0xff] }
  0x74   : > { %5846 = vmatprep.mubr.msk.bf16.mxu1 %vm6421_vm0, %v8367_v42  ;;  %v4904_v30 = vcombine.low %v6925_v27, %v6927_v25  ;;  %v953_v39 = vshll.u32 %v6927_v25, 16  ;;  %v807_v51 = vrot.slane %v806_v56, 4  ;;  %v4862_v6 = vcombine.low %v754_v48, %v764_v41  ;;  %v8418_v56 = vld [vmem:[#allocation46_spill] sm:$0xff]  ;;  %5350 = vmatprep.subr.bf16.mxu0 %v6316_v37  ;;  %v8421_v55 = vld [vmem:[#allocation9_spill] sm:$0xff]  ;;  %v8422_v50 = vld [vmem:[#allocation36_spill] sm:$0xff] }
  0x75   : > { %v778_v9 = vsel %vm6842_vm3, %v773_v57, %v6707_v7  ;;  %v788_v47 = vsel %vm6842_vm3, %v783_v17, %v8412_v14  ;;  %v831_v26 = vrot.slane %v830_v5, 4  ;;  %v844_v7 = vor.u32 %v6780_v32, %v6778_v4  ;;  %6079 = vmatpush3.bf16.msra.mxu1 %v6315_v11  ;;  %v8424_v14 = vld [vmem:[#allocation12_spill] sm:$0xff] }
  0x76   : > { %v878_v52 = vor.u32 %v8419_v31, %v8418_v56  ;;  %v4863_v45 = vcombine.low %v778_v9, %v788_v47  ;;  %6072 = vmatprep.subr.bf16.mxu1 %v6316_v37  ;;  %v826_v48 = vsel %vm6842_vm3, %v821_v8, %v8409_v46  ;;  %v8423_v37 = vld [vmem:[#allocation42_spill] sm:$0xff]  ;;  %v8425_v46 = vld [vmem:[#allocation11_spill] sm:$0xff] }
  0x77   : > { %v845_v57 = vrot.slane %v844_v7, 4  ;;  %v836_v41 = vsel %vm6842_vm3, %v831_v26, %v8422_v50  ;;  %v4891_v8 = vcombine.low %v8425_v46, %v8424_v14  ;;  %v926_v7 = vor.u32 %v6933_v53, %v6931_v34 }
  0x78   : > { %v879_v4 = vrot.slane %v878_v52, 4 }
  0x79   : > { %5779 = vmatmul.mubr.bf16.gmra.mrb[8].mxu0 %v4861_v16  ;;  %v812_v16 = vsel %vm6842_vm3, %v807_v51, %v8413_v12  ;;  %v902_v12 = vor.u32 %v6862_v49, %v6860_v19  ;;  %v949_v49 = vrot.slane %v947_v10, 4  ;;  %v927_v53 = vrot.slane %v926_v7, 4 }
  0x7a   : > { %5782 = vmatprep.mubr.bf16.mxu0 %v4862_v6  ;;  %v4865_v6 = vcombine.low %v826_v48, %v836_v41  ;;  %v6322_v41 = vld [vmem:[%s8325_s5 + $0x68] sm:$0xff]  }
  0x7b   : > { %5847 = vmatmul.mubr.bf16.gmra.mrb[28].mxu1 %v4888_v0  ;;  %v8404_v0 = vld [vmem:[#allocation23_spill] sm:$0xff]  ;;  %v932_v52 = vsel %vm6842_vm3, %v927_v53, %v6939_v36  ;;  %v6391_v53 = vld [vmem:[#allocation2 + $0x78] sm:$0xf] }
  0x7c   : > { %5850 = vmatprep.mubr.msk.bf16.mxu1 %vm6421_vm0, %v8367_v42  ;;  %v796_v22 = vor.u32 %v8404_v0, %v8403_v62  ;;  %v6317_v62 = vld [vmem:[%s8325_s5 + $0x10] sm:$0xff]  }
  0x7d   : > { %v8414_v0 = vld [vmem:[#allocation40_spill] sm:$0xff]  ;;  %5351 = vmatpush3.bf16.msra.mxu0 %v6317_v62  ;;  %6080 = vmatpush3.bf16.msra.mxu1 %v6317_v62  ;;  %v892_v62 = vor.u32 %v6855_v38, %v6853_v3  ;;  %v8427_v3 = vld [vmem:[#allocation13_spill] sm:$0xff] }
  0x7e   : > { %v797_v18 = vrot.slane %v796_v22, 4  ;;  %v8415_v22 = vld [vmem:[#allocation41_spill] sm:$0xff]  ;;  %v850_v11 = vsel %vm6842_vm3, %v845_v57, %v8414_v0 }
  0x7f   : > { %v854_v23 = vor.u32 %v8415_v22, %v8414_v0  ;;  %v6318_v0 = vld [vmem:[%s8325_s5 + $0x58] sm:$0xff]   ;;  %v893_v22 = vrot.slane %v892_v62, 4 }
  0x80   : > { %v802_v15 = vsel %vm6842_vm3, %v797_v18, %v8405_v61  ;;  %v8417_v61 = vld [vmem:[#allocation45_spill] sm:$0xff]  ;;  %5352 = vmatprep.subr.bf16.mxu0 %v6318_v0  ;;  %6073 = vmatprep.subr.bf16.mxu1 %v6318_v0 }
  0x81   : > { %v868_v2 = vor.u32 %v8417_v61, %v8416_v29  ;;  %v855_v17 = vrot.slane %v854_v23, 4  ;;  %v4864_v18 = vcombine.low %v802_v15, %v812_v16  ;;  %5783 = vmatmul.mubr.bf16.gmra.mrb[12].mxu0 %v4863_v45  ;;  %v884_v15 = vsel %vm6842_vm3, %v879_v4, %v6851_v21  ;;  %v8426_v29 = vld [vmem:[#allocation14_spill] sm:$0xff] }
  0x82   : > { %v916_v16 = vor.u32 %v6929_v28, %v6895_v63  ;;  %v945_v21 = vrot.slane %v943_v43, 5  ;;  %v903_v23 = vrot.slane %v902_v12, 4  ;;  %v4892_v38 = vcombine.low %v8427_v3, %v8426_v29  ;;  %v6319_v63 = vld [vmem:[%s8325_s5 + $0x18] sm:$0xff]   ;;  %v6388_v29 = vld [vmem:[#allocation2 + $0x6c] sm:$0xf] }
  0x83   : > { %5851 = vmatmul.mubr.bf16.gmra.mrb[32].mxu1 %v4889_v54  ;;  %v869_v32 = vrot.slane %v868_v2, 4  ;;  %v8420_v54 = vld [vmem:[#allocation10_spill] sm:$0xff]  ;;  %5786 = vmatprep.mubr.bf16.mxu0 %v4864_v18  ;;  %v860_v51 = vsel %vm6842_vm3, %v855_v17, %v8423_v37  ;;  %v898_v43 = vsel %vm6842_vm3, %v893_v22, %v6860_v19  ;;  %v940_v4 = vor.u32 %v6943_v59, %v6941_v40  ;;  %v8429_v40 = vld [vmem:[#allocation17_spill] sm:$0xff] }
  0x84   : > { %5854 = vmatprep.mubr.msk.bf16.mxu1 %vm6421_vm0, %v8367_v42  ;;  %v4890_v5 = vcombine.low %v8421_v55, %v8420_v54  ;;  %v4866_v9 = vcombine.low %v850_v11, %v860_v51  ;;  %v917_v28 = vrot.slane %v916_v16, 4  ;;  %v908_v61 = vsel %vm6842_vm3, %v903_v23, %v6886_v60  ;;  %v7080_v2 = vld [vmem:[#allocation2 + $0xc0] sm:$0xf]  ;;  %5353 = vmatpush3.bf16.msra.mxu0 %v6319_v63  ;;  %v7106_v55 = vld [vmem:[#allocation2 + $0xc8] sm:$0xf]  ;;  %v6324_v16 = vld [vmem:[%s8325_s5 + $0x70] sm:$0xff]  }
  0x85   : > { %v874_v47 = vsel %vm6842_vm3, %v869_v32, %v8418_v56  ;;  %v7082_v56 = vld [vmem:[#allocation2 + $0xc4] sm:$0xf]  ;;  %v4868_v10 = vcombine.low %v898_v43, %v908_v61  ;;  %v958_v19 = vshrl.u32 %v7080_v2, 16  ;;  %v961_v45 = vshll.u32 %v7080_v2, 16  ;;  %6081 = vmatpush3.bf16.msra.mxu1 %v6319_v63  ;;  %v6326_v22 = vld [vmem:[%s8325_s5 + $0x78] sm:$0xff]  }
  0x86   : > { %v4867_v26 = vcombine.low %v874_v47, %v884_v15  ;;  %v922_v31 = vsel %vm6842_vm3, %v917_v28, %v6931_v34  ;;  %v6320_v60 = vld [vmem:[%s8325_s5 + $0x60] sm:$0xff]   ;;  %v967_v57 = vshll.u32 %v7082_v56, 16  ;;  %v971_v17 = vshrl.u32 %v7082_v56, 16  ;;  %v6387_v23 = vld [vmem:[#allocation2 + $0x68] sm:$0xf]  ;;  %v6327_v3 = vld [vmem:[%s8325_s5 + $0x38] sm:$0xff]  }
  0x87   : > { %v955_v34 = vrot.slane %v953_v39, 5  ;;  %v4869_v36 = vcombine.low %v922_v31, %v932_v52  ;;  %v6321_v18 = vld [vmem:[%s8325_s5 + $0x20] sm:$0xff]   ;;  %v960_v32 = vrot.slane %v958_v19, 4  ;;  %5354 = vmatprep.subr.bf16.mxu0 %v6320_v60  ;;  %v950_v54 = vor.u32 %v949_v49, %v945_v21  ;;  %6074 = vmatprep.subr.bf16.mxu1 %v6320_v60  ;;  %v6389_v49 = vld [vmem:[#allocation2 + $0x70] sm:$0xf]  ;;  %v8432_v31 = vld [vmem:[#allocation37_spill] sm:$0xff] }
  0x88   : > { %v969_v48 = vrot.slane %v967_v57, 5  ;;  %5355 = vmatpush3.bf16.msra.mxu0 %v6321_v18  ;;  %v973_v39 = vrot.slane %v971_v17, 4  ;;  %v977_v50 = vshll.u32 %v7106_v55, 16  ;;  %v941_v11 = vrot.slane %v940_v4, 4  ;;  %v6390_v63 = vld [vmem:[#allocation2 + $0x74] sm:$0xf] }
  0x89   : > { %5787 = vmatmul.mubr.bf16.gmra.mrb[16].mxu0 %v4865_v6  ;;  %v951_v37 = vrot.slane %v950_v54, 4  ;;  %6082 = vmatpush3.bf16.msra.mxu1 %v6321_v18  ;;  %v8428_v6 = vld [vmem:[#allocation18_spill] sm:$0xff]  ;;  %v4894_v44 = vcombine.low %v6387_v23, %v6388_v29  ;;  %v4895_v28 = vcombine.low %v6389_v49, %v6390_v63  ;;  %v6392_v43 = vld [vmem:[#allocation2 + $0x7c] sm:$0xf]  ;;  %v8435_v57 = vld [vmem:[#allocation32_spill] sm:$0xff] }
  0x8a   : > { %5790 = vmatprep.mubr.bf16.mxu0 %v4866_v9  ;;  %v4893_v59 = vcombine.low %v8429_v40, %v8428_v6  ;;  %v6323_v9 = vld [vmem:[%s8325_s5 + $0x28] sm:$0xff]   ;;  %v974_v14 = vor.u32 %v973_v39, %v969_v48  ;;  %v979_v46 = vrot.slane %v977_v50, 5  ;;  %5356 = vmatprep.subr.bf16.mxu0 %v6322_v41  ;;  %v4896_v61 = vcombine.low %v6391_v53, %v6392_v43  ;;  %v8433_v52 = vld [vmem:[#allocation33_spill] sm:$0xff]  ;;  %v7158_v60 = vld [vmem:[%s8325_s5 + $0x80] sm:$0xff]  }
  0x8b   : > { %5855 = vmatmul.mubr.bf16.gmra.mrb[36].mxu1 %v4890_v5  ;;  %v963_v5 = vrot.slane %v961_v45, 5  ;;  %v956_v47 = vsel %vm6842_vm3, %v951_v37, %v955_v34  ;;  %6075 = vmatprep.subr.bf16.mxu1 %v6322_v41  ;;  %v4898_v19 = vcombine.low %v8433_v52, %v8432_v31  ;;  %v8434_v45 = vld [vmem:[#allocation31_spill] sm:$0xff]  ;;  %v8437_v34 = vld [vmem:[#allocation38_spill] sm:$0xff] }
  0x8c   : > { %5858 = vmatprep.mubr.msk.bf16.mxu1 %vm6421_vm0, %v8367_v42  ;;  %5357 = vmatpush3.bf16.msra.mxu0 %v6323_v9  ;;  %v975_v62 = vrot.slane %v974_v14, 4  ;;  %v8436_v17 = vcombine.low %v8434_v45, %v8435_v57  ;;  %v6332_v63 = vld [vmem:[%s8325_s5 + $0x88] sm:$0xff]  }
  0x8d   : > { %v964_v51 = vor.u32 %v963_v5, %v960_v32  ;;  %6083 = vmatpush3.bf16.msra.mxu1 %v6323_v9  ;;  %5358 = vmatprep.subr.bf16.mxu0 %v6324_v16  ;;  %v8440_v32 = vld [vmem:[#allocation43_spill] sm:$0xff] }
  0x8e   : > { %v980_v7 = vsel %vm6842_vm3, %v975_v62, %v979_v46  ;;  %6076 = vmatprep.subr.bf16.mxu1 %v6324_v16  ;;  %v8441_v4 = vcombine.low %v8440_v32, %v6806_v24  ;;  %v591_v24 = vld [vmem:[#allocation2 + $0xcc] sm:$0xf] }
  0x8f   : > { %v965_v15 = vrot.slane %v964_v51, 4  ;;  %v4906_v33 = vcombine.low %v7106_v55, %v591_v24 }
  0x91   : > { %5791 = vmatmul.mubr.bf16.gmra.mrb[20].mxu0 %v4867_v26  ;;  %v970_v12 = vsel %vm6842_vm3, %v965_v15, %v969_v48 }
  0x92   : > { %5794 = vmatprep.mubr.bf16.mxu0 %v4868_v10  ;;  %v4871_v0 = vcombine.low %v970_v12, %v980_v7 }
  0x93   : > { %5859 = vmatmul.mubr.bf16.gmra.mrb[40].mxu1 %v4891_v8  ;;  %v946_v8 = vsel %vm6842_vm3, %v941_v11, %v945_v21  ;;  %v6325_v21 = vld [vmem:[%s8325_s5 + $0x30] sm:$0xff]  }
  0x94   : > { %5862 = vmatprep.mubr.msk.bf16.mxu1 %vm6421_vm0, %v8367_v42  ;;  %v4870_v26 = vcombine.low %v946_v8, %v956_v47  ;;  %5359 = vmatpush3.bf16.msra.mxu0 %v6325_v21 }
  0x95   : > { %6084 = vmatpush3.bf16.msra.mxu1 %v6325_v21  ;;  %5360 = vmatprep.subr.bf16.mxu0 %v6326_v22 }
  0x96   : > { %6077 = vmatprep.subr.bf16.mxu1 %v6326_v22 }
  0x98   : > { %5361 = vmatpush3.bf16.msra.mxu0 %v6327_v3 }
  0x99   : > { %5795 = vmatmul.mubr.bf16.gmra.mrb[24].mxu0 %v4869_v36  ;;  %6085 = vmatpush3.bf16.msra.mxu1 %v6327_v3  ;;  %v8438_v36 = vld [vmem:[#allocation39_spill] sm:$0xff] }
  0x9a   : > { %5798 = vmatprep.mubr.bf16.mxu0 %v4870_v26  ;;  %5926 = vmatprep.subr.bf16.mxu0 %v7158_v60  ;;  %v8439_v18 = vcombine.low %v8437_v34, %v8438_v36 }
  0x9b   : > { %5863 = vmatmul.mubr.bf16.gmra.mrb[44].mxu1 %v4892_v38  ;;  %v4905_v38 = vcombine.low %v7080_v2, %v7082_v56  ;;  %v8430_v2 = vld [vmem:[#allocation29_spill] sm:$0xff]  ;;  %v8431_v56 = vld [vmem:[#allocation28_spill] sm:$0xff] }
  0x9c   : > { %5866 = vmatprep.mubr.msk.bf16.mxu1 %vm6421_vm0, %v8367_v42  ;;  %v4897_v10 = vcombine.low %v8431_v56, %v8430_v2  ;;  %v6333_v56 = vld [vmem:[%s8325_s5 + $0x90] sm:$0xff]  }
  0xa1   : > { %5799 = vmatmul.mubr.bf16.gmra.mrb[28].mxu0 %v4871_v0 }
  0xa3   : > { %5867 = vmatmul.mubr.bf16.gmra.mrb[48].mxu1 %v4893_v59 }
  0xa4   : > { %5870 = vmatprep.mubr.msk.bf16.mxu1 %vm6421_vm0, %v8367_v42 }
  0xab   : > { %5871 = vmatmul.mubr.bf16.gmra.mrb[52].mxu1 %v4894_v44 }
  0xac   : > { %5874 = vmatprep.mubr.msk.bf16.mxu1 %vm6421_vm0, %v8367_v42 }
  0xb3   : > { %5875 = vmatmul.mubr.bf16.gmra.mrb[56].mxu1 %v4895_v28 }
  0xb4   : > { %5878 = vmatprep.mubr.msk.bf16.mxu1 %vm6421_vm0, %v8367_v42 }
  0xbb   : > { %5879 = vmatmul.mubr.bf16.gmra.mrb[60].mxu1 %v4896_v61 }
  0xbc   : > { %5882 = vmatprep.mubr.msk.bf16.mxu1 %vm6421_vm0, %v8367_v42 }
  0xc3   : > { %5883 = vmatmul.mubr.bf16.gmra.mrb[64].mxu1 %v4897_v10 }
  0xc4   : > { %5886 = vmatprep.mubr.msk.bf16.mxu1 %vm6421_vm0, %v8367_v42 }
  0xcb   : > { %5887 = vmatmul.mubr.bf16.gmra.mrb[68].mxu1 %v4898_v19 }
  0xcc   : > { %5890 = vmatprep.mubr.msk.bf16.mxu1 %vm6421_vm0, %v8367_v42 }
  0xd3   : > { %5891 = vmatmul.mubr.bf16.gmra.mrb[72].mxu1 %v8436_v17 }
  0xd4   : > { %5894 = vmatprep.mubr.msk.bf16.mxu1 %vm6421_vm0, %v8367_v42 }
  0xdb   : > { %5895 = vmatmul.mubr.bf16.gmra.mrb[76].mxu1 %v8439_v18  ;;  %v6334_v18 = vld [vmem:[%s8325_s5 + $0x98] sm:$0xff]  }
  0xdc   : > { %5898 = vmatprep.mubr.msk.bf16.mxu1 %vm6421_vm0, %v8367_v42 }
  0xe3   : > { %5899 = vmatmul.mubr.bf16.gmra.mrb[80].mxu1 %v8441_v4 }
  0xe4   : > { %5902 = vmatprep.mubr.msk.bf16.mxu1 %vm6421_vm0, %v8367_v42 }
  0xeb   : > { %5903 = vmatmul.mubr.bf16.gmra.mrb[84].mxu1 %v4902_v13  ;;  %v7199_v13 = vld [vmem:[%s8322_s2] ss:$0 sm:$0xff] }
  0xec   : > { %5906 = vmatprep.mubr.msk.bf16.mxu1 %vm6421_vm0, %v8367_v42 }
  0xf3   : > { %5907 = vmatmul.mubr.bf16.gmra.mrb[88].mxu1 %v4903_v58 }
  0xf4   : > { %5910 = vmatprep.mubr.msk.bf16.mxu1 %vm6421_vm0, %v8367_v42 }
  0xfb   : > { %5911 = vmatmul.mubr.bf16.gmra.mrb[92].mxu1 %v4904_v30 }
  0xfc   : > { %5914 = vmatprep.mubr.msk.bf16.mxu1 %vm6421_vm0, %v8367_v42 }
 0x103   : > { %5915 = vmatmul.mubr.bf16.gmra.mrb[96].mxu1 %v4905_v38 }
 0x104   : > { %5918 = vmatprep.mubr.msk.bf16.mxu1 %vm6421_vm0, %v8367_v42 }
 0x10b   : > { %5919 = vmatmul.mubr.bf16.gmra.mrb[100].mxu1 %v4906_v33 }
 0x10c   : > { %5922 = vmatprep.mubr.msk.bf16.mxu1 %vm6421_vm0, %v8367_v42 }
 0x113   : > { %5923 = vmatmul.mubr.bf16.gmra.mrb[104].mxu1 %v6330_v1 }
 0x116   : > { %v1672_v20 = vpop.f32.mrb[0].mxu1 }
 0x117   : > { %v1673_v35 = vadd.f32 %v7199_v13, %v1672_v20  ;;  %v5820_v58 = vpop.f32.mrb[1].mxu1 }
 0x118   : > { %v1675_v27 = vpop.f32.mrb[2].mxu1 }
 0x119   : > { %v1941_v25 = vmul.f32 0.01, %v1673_v35  ;;  %v1676_v30 = vadd.f32 %v7199_v13, %v1675_v27  ;;  %v5821_v54 = vpop.f32.mrb[3].mxu1  ;;  %vm1887_vm4 = vcmp.gt.f32.partialorder %v1673_v35, 0.0 }
 0x11b   : > { %vm1888_vm5 = vcmp.gt.f32.partialorder %v1676_v30, 0.0  ;;  %v1942_v55 = vmul.f32 0.01, %v1676_v30  ;;  %v1995_v42 = vsel %vm1887_vm4, %v1673_v35, %v1941_v25  ;;  %v6335_v25 = vld [vmem:[%s8325_s5 + $0xa0] sm:$0xff]  }
 0x11d   : > { %v1996_v5 = vsel %vm1888_vm5, %v1676_v30, %v1942_v55 }
 0x11e   : > { %v2049_v48 = vpack.c.bf16 %v1996_v5, %v1995_v42  ;;  %v1680_v39 = vpop.f32.mrb[4].mxu1 }
 0x11f   : > { %v1681_v50 = vadd.f32 %v7199_v13, %v1680_v39  ;;  %v5824_v41 = vpop.f32.mrb[5].mxu1 }
 0x120   : > { %v1683_v11 = vpop.f32.mrb[6].mxu1  ;;  %v2215_v37 = vshll.u32 %v2049_v48, 16  ;;  %v2213_v47 = vshrl.u32 %v2049_v48, 16  ;;  %v2447_v12 = vrot.slane %v2049_v48, 1 }
 0x121   : > { %vm1889_vm6 = vcmp.gt.f32.partialorder %v1681_v50, 0.0  ;;  %v1943_v51 = vmul.f32 0.01, %v1681_v50  ;;  %v1684_v6 = vadd.f32 %v7199_v13, %v1683_v11  ;;  %v5825_v40 = vpop.f32.mrb[7].mxu1 }
 0x122   : > { %v2217_v46 = vrot.slane %v2215_v37, 1  ;;  %v6336_v37 = vld [vmem:[%s8325_s5 + $0xa8] sm:$0xff]  }
 0x123   : > { %v1997_v59 = vsel %vm1889_vm6, %v1681_v50, %v1943_v51  ;;  %vm1890_vm7 = vcmp.gt.f32.partialorder %v1684_v6, 0.0  ;;  %v1944_v9 = vmul.f32 0.01, %v1684_v6 }
 0x124   : > { %v5142_v14 = vpack.c.bf16 %v1997_v59, %v1997_v59  ;;  %v2218_v22 = vor.u32 %v2217_v46, %v2213_v47 }
 0x125   : > { %v1998_v8 = vsel %vm1890_vm7, %v1684_v6, %v1944_v9 }
 0x126   : > { %v2050_v15 = vpack.c.bf16 %v1998_v8, %v1997_v59  ;;  %v1688_v26 = vpop.f32.mrb[8].mxu1  ;;  %v2220_v62 = vshll.u32 %v5142_v14, 16  ;;  %v2448_v16 = vrot.slane %v5142_v14, 1 }
 0x127   : > { %v1689_v7 = vadd.f32 %v7199_v13, %v1688_v26  ;;  %v5828_v21 = vpop.f32.mrb[9].mxu1 }
 0x128   : > { %v1691_v0 = vpop.f32.mrb[10].mxu1  ;;  %v2222_v23 = vrot.slane %v2220_v62, 1  ;;  %v7207_v29 = vsel %vm2446_vm8, %v2447_v12, %v2448_v16  ;;  %v2106_v52 = vunpack.c.h.b16 %v2050_v15  ;;  %v6337_v15 = vld [vmem:[%s8325_s5 + $0xb0] sm:$0xff]  }
 0x129   : > { %v1945_v44 = vmul.f32 0.01, %v1689_v7  ;;  %v1692_v3 = vadd.f32 %v7199_v13, %v1691_v0  ;;  %v5829_v38 = vpop.f32.mrb[11].mxu1  ;;  %vm1891_vm10 = vcmp.gt.f32.partialorder %v1689_v7, 0.0 }
 0x12a   : > { %v2223_v49 = vsel %vm2211_vm9, %v2218_v22, %v2222_v23 }
 0x12b   : > { %vm1892_vm11 = vcmp.gt.f32.partialorder %v1692_v3, 0.0  ;;  %v1946_v28 = vmul.f32 0.01, %v1692_v3  ;;  %2743 = vmatprep.mubr.bf16.mxu0 %v2223_v49  ;;  %v1999_v53 = vsel %vm1891_vm10, %v1689_v7, %v1945_v44  ;;  %v6338_v44 = vld [vmem:[%s8325_s5 + $0xb8] sm:$0xff]  }
 0x12c   : > { %2744 = vmatmul.mubr.bf16.vlgmr.msra.gmra.mrb[32].mxu0 %v2049_v48 }
 0x12d   : > { %v2000_v43 = vsel %vm1892_vm11, %v1692_v3, %v1946_v28  ;;  %5927 = vmatpush3.bf16.msra.mxu0 %v7158_v60 }
 0x12e   : > { %v2051_v61 = vpack.c.bf16 %v2000_v43, %v1999_v53  ;;  %v1696_v2 = vpop.f32.mrb[12].mxu1  ;;  %5928 = vmatprep.subr.bf16.mxu0 %v6332_v63  ;;  %v7219_v45 = vpack.c.bf16 %v2000_v43, %v2000_v43  ;;  %v7266_v53 = vld [vmem:[%s8325_s5 + $0x140] sm:$0xff]  }
 0x12f   : > { %v1697_v10 = vadd.f32 %v7199_v13, %v1696_v2  ;;  %v5832_v31 = vpop.f32.mrb[13].mxu1 }
 0x130   : > { %v2107_v19 = vunpack.c.l.b16 %v2051_v61  ;;  %v1699_v57 = vpop.f32.mrb[14].mxu1  ;;  %v2232_v24 = vshll.u32 %v7219_v45, 16 }
 0x131   : > { %v1947_v17 = vmul.f32 0.01, %v1697_v10  ;;  %v1700_v34 = vadd.f32 %v7199_v13, %v1699_v57  ;;  %v5833_v36 = vpop.f32.mrb[15].mxu1  ;;  %5929 = vmatpush3.bf16.msra.mxu0 %v6332_v63  ;;  %vm1893_vm12 = vcmp.gt.f32.partialorder %v1697_v10, 0.0 }
 0x132   : > { %v7222_v60 = vpack.c.b16 %v2107_v19, %v2106_v52  ;;  %5930 = vmatprep.subr.bf16.mxu0 %v6333_v56  ;;  %v2234_v5 = vrot.slane %v2232_v24, 1 }
 0x133   : > { %vm1894_vm13 = vcmp.gt.f32.partialorder %v1700_v34, 0.0  ;;  %v1948_v32 = vmul.f32 0.01, %v1700_v34  ;;  %v2001_v33 = vsel %vm1893_vm12, %v1697_v10, %v1947_v17 }
 0x134   : > { %v2227_v4 = vshll.u32 %v7222_v60, 16  ;;  %v2225_v58 = vshrl.u32 %v7222_v60, 16 }
 0x135   : > { %v2002_v1 = vsel %vm1894_vm13, %v1700_v34, %v1948_v32  ;;  %5931 = vmatpush3.bf16.msra.mxu0 %v6333_v56  ;;  %v6344_v34 = vld [vmem:[%s8325_s5 + $0x100] sm:$0xff]  }
 0x136   : > { %v7229_v20 = vpack.c.bf16 %v2002_v1, %v2001_v33  ;;  %v1704_v35 = vpop.f32.mrb[16].mxu1  ;;  %v2229_v27 = vrot.slane %v2227_v4, 1  ;;  %5932 = vmatprep.subr.bf16.mxu0 %v6334_v18  ;;  %5482 = vmatprep.subr.bf16.mxu1 %v6344_v34 }
 0x137   : > { %v1705_v30 = vadd.f32 %v7199_v13, %v1704_v35  ;;  %v5836_v54 = vpop.f32.mrb[17].mxu1 }
 0x138   : > { %v1707_v55 = vpop.f32.mrb[18].mxu1  ;;  %v2230_v42 = vor.u32 %v2229_v27, %v2225_v58  ;;  %v2239_v48 = vshll.u32 %v7229_v20, 16  ;;  %v2237_v8 = vshrl.u32 %v7229_v20, 16 }
 0x139   : > { %vm1895_vm14 = vcmp.gt.f32.partialorder %v1705_v30, 0.0  ;;  %v1949_v39 = vmul.f32 0.01, %v1705_v30  ;;  %v1708_v50 = vadd.f32 %v7199_v13, %v1707_v55  ;;  %v5837_v41 = vpop.f32.mrb[19].mxu1  ;;  %5933 = vmatpush3.bf16.msra.mxu0 %v6334_v18 }
 0x13a   : > { %v7239_v11 = vsel %vm2211_vm9, %v2230_v42, %v2234_v5  ;;  %5934 = vmatprep.subr.bf16.mxu0 %v6335_v25  ;;  %v2241_v59 = vrot.slane %v2239_v48, 1 }
 0x13b   : > { %v2003_v51 = vsel %vm1895_vm14, %v1705_v30, %v1949_v39  ;;  %vm1896_vm15 = vcmp.gt.f32.partialorder %v1708_v50, 0.0  ;;  %v1950_v6 = vmul.f32 0.01, %v1708_v50  ;;  %2751 = vmatprep.mubr.bf16.mxu0 %v7239_v11 }
 0x13c   : > { %v7245_v40 = vpack.c.bf16 %v2003_v51, %v2003_v51  ;;  %2752 = vmatmul.mubr.bf16.gmra.mrb[36].mxu0 %v7222_v60  ;;  %v2242_v16 = vor.u32 %v2241_v59, %v2237_v8 }
 0x13d   : > { %v2004_v9 = vsel %vm1896_vm15, %v1708_v50, %v1950_v6  ;;  %5935 = vmatpush3.bf16.msra.mxu0 %v6335_v25 }
 0x13e   : > { %v2053_v14 = vpack.c.bf16 %v2004_v9, %v2003_v51  ;;  %v1712_v46 = vpop.f32.mrb[20].mxu1  ;;  %v2244_v47 = vshll.u32 %v7245_v40, 16  ;;  %5936 = vmatprep.subr.bf16.mxu0 %v6336_v37 }
 0x13f   : > { %v1713_v26 = vadd.f32 %v7199_v13, %v1712_v46  ;;  %v5840_v62 = vpop.f32.mrb[21].mxu1 }
 0x140   : > { %v1715_v12 = vpop.f32.mrb[22].mxu1  ;;  %v2246_v7 = vrot.slane %v2244_v47, 1  ;;  %v2112_v2 = vunpack.c.h.b16 %v2053_v14 }
 0x141   : > { %v1951_v21 = vmul.f32 0.01, %v1713_v26  ;;  %v1716_v0 = vadd.f32 %v7199_v13, %v1715_v12  ;;  %v5841_v22 = vpop.f32.mrb[23].mxu1  ;;  %5937 = vmatpush3.bf16.msra.mxu0 %v6336_v37  ;;  %vm1897_vm0 = vcmp.gt.f32.partialorder %v1713_v26, 0.0 }
 0x142   : > { %v7256_v23 = vsel %vm2211_vm9, %v2242_v16, %v2246_v7  ;;  %5938 = vmatprep.subr.bf16.mxu0 %v6337_v15  ;;  %v2450_v22 = vrot.slane %v7222_v60, 1 }
 0x143   : > { %vm1898_vm1 = vcmp.gt.f32.partialorder %v1716_v0, 0.0  ;;  %v1952_v3 = vmul.f32 0.01, %v1716_v0  ;;  %2759 = vmatprep.mubr.bf16.mxu0 %v7256_v23  ;;  %v2005_v38 = vsel %vm1897_vm0, %v1713_v26, %v1951_v21 }
 0x144   : > { %2760 = vmatmul.mubr.bf16.gmra.mrb[40].mxu0 %v7229_v20 }
 0x145   : > { %v2006_v49 = vsel %vm1898_vm1, %v1716_v0, %v1952_v3  ;;  %5939 = vmatpush3.bf16.msra.mxu0 %v6337_v15  ;;  %v5772_v3 = vpop.f32.mrb[0].mxu0 }
 0x146   : > { %v2054_v63 = vpack.c.bf16 %v2006_v49, %v2005_v38  ;;  %v1720_v28 = vpop.f32.mrb[24].mxu1  ;;  %5940 = vmatprep.subr.bf16.mxu0 %v6338_v44  ;;  %v7269_v10 = vpack.c.bf16 %v2006_v49, %v2006_v49 }
 0x147   : > { %v1721_v43 = vadd.f32 %v7199_v13, %v1720_v28  ;;  %v5844_v61 = vpop.f32.mrb[25].mxu1  ;;  %v2451_v28 = vrot.slane %v7219_v45, 1 }
 0x148   : > { %v2113_v56 = vunpack.c.l.b16 %v2054_v63  ;;  %v1723_v31 = vpop.f32.mrb[26].mxu1  ;;  %v2256_v32 = vshll.u32 %v7269_v10, 16  ;;  %v7304_v63 = vld [vmem:[%s8324_s4] ss:$0 sm:$0xff] }
 0x149   : > { %v1953_v52 = vmul.f32 0.01, %v1721_v43  ;;  %v1724_v19 = vadd.f32 %v7199_v13, %v1723_v31  ;;  %v5845_v57 = vpop.f32.mrb[27].mxu1  ;;  %5941 = vmatpush3.bf16.msra.mxu0 %v6338_v44  ;;  %vm1899_vm2 = vcmp.gt.f32.partialorder %v1721_v43, 0.0  ;;  %v2454_v44 = vrot.slane %v7245_v40, 1 }
 0x14a   : > { %v7272_v17 = vpack.c.b16 %v2113_v56, %v2112_v2  ;;  %5974 = vmatprep.subr.bf16.mxu0 %v7266_v53  ;;  %v2258_v55 = vrot.slane %v2256_v32, 1  ;;  %v1159_v40 = vadd.f32 %v5772_v3, %v7304_v63  ;;  %v2457_v31 = vrot.slane %v7269_v10, 1  ;;  %v1150_v10 = vpop.f32.mrb[1].mxu0 }
 0x14b   : > { %vm1900_vm3 = vcmp.gt.f32.partialorder %v1724_v19, 0.0  ;;  %v1954_v36 = vmul.f32 0.01, %v1724_v19  ;;  %v2007_v4 = vsel %vm1899_vm2, %v1721_v43, %v1953_v52  ;;  %v2453_v43 = vrot.slane %v7229_v20, 1 }
 0x14c   : > { %v2251_v18 = vshll.u32 %v7272_v17, 16  ;;  %v2249_v35 = vshrl.u32 %v7272_v17, 16  ;;  %v2456_v49 = vrot.slane %v7272_v17, 1  ;;  %vm1279_vm10 = vcmp.gt.f32.partialorder %v1159_v40, 0.0 }
 0x14d   : > { %v2008_v24 = vsel %vm1900_vm3, %v1724_v19, %v1954_v36  ;;  %v1311_v36 = vmul.f32 0.01, %v1159_v40  ;;  %v7314_v32 = vsel %vm2446_vm8, %v2450_v22, %v2451_v28 }
 0x14e   : > { %v7280_v33 = vpack.c.bf16 %v2008_v24, %v2007_v4  ;;  %v1728_v1 = vpop.f32.mrb[28].mxu1  ;;  %v2253_v58 = vrot.slane %v2251_v18, 1  ;;  %v7317_v4 = vsel %vm2446_vm8, %v2453_v43, %v2454_v44  ;;  %v7320_v24 = vsel %vm2446_vm8, %v2456_v49, %v2457_v31 }
 0x14f   : > { %v1729_v27 = vadd.f32 %v7199_v13, %v1728_v1  ;;  %v5848_v25 = vpop.f32.mrb[29].mxu1 }
 0x150   : > { %v1731_v30 = vpop.f32.mrb[30].mxu1  ;;  %v2254_v54 = vor.u32 %v2253_v58, %v2249_v35  ;;  %v2263_v42 = vshll.u32 %v7280_v33, 16  ;;  %v2261_v46 = vshrl.u32 %v7280_v33, 16  ;;  %v2459_v52 = vrot.slane %v7280_v33, 1 }
 0x151   : > { %vm1901_vm4 = vcmp.gt.f32.partialorder %v1729_v27, 0.0  ;;  %v1955_v5 = vmul.f32 0.01, %v1729_v27  ;;  %v1732_v48 = vadd.f32 %v7199_v13, %v1731_v30  ;;  %v5849_v39 = vpop.f32.mrb[31].mxu1  ;;  %v1343_v25 = vsel %vm1279_vm10, %v1159_v40, %v1311_v36  ;;  %v5773_v30 = vpop.f32.mrb[2].mxu0 }
 0x152   : > { %v7287_v50 = vsel %vm2211_vm9, %v2254_v54, %v2258_v55  ;;  %v2265_v6 = vrot.slane %v2263_v42, 1  ;;  %1375 = vst [vmem:[%s6501_s20 + $0x10] sm:$0xff] %v1343_v25 }
 0x153   : > { %v2009_v41 = vsel %vm1901_vm4, %v1729_v27, %v1955_v5  ;;  %vm1902_vm5 = vcmp.gt.f32.partialorder %v1732_v48, 0.0  ;;  %v1956_v37 = vmul.f32 0.01, %v1732_v48  ;;  %2767 = vmatprep.mubr.bf16.mxu0 %v7287_v50  ;;  %v1151_v5 = vadd.f32 %v7304_v63, %v1150_v10 }
 0x154   : > { %v5146_v51 = vpack.c.bf16 %v2009_v41, %v2009_v41  ;;  %2768 = vmatmul.mubr.bf16.gmra.mrb[44].mxu0 %v7272_v17  ;;  %v2266_v62 = vor.u32 %v2265_v6, %v2261_v46 }
 0x155   : > { %v2010_v59 = vsel %vm1902_vm5, %v1732_v48, %v1956_v37  ;;  %v1153_v48 = vpop.f32.mrb[3].mxu0  ;;  %v1162_v37 = vadd.f32 %v5773_v30, %v7304_v63  ;;  %vm1277_vm13 = vcmp.gt.f32.partialorder %v1151_v5, 0.0 }
 0x156   : > { %v2056_v9 = vpack.c.bf16 %v2010_v59, %v2009_v41  ;;  %v1736_v14 = vpop.f32.mrb[32].mxu1  ;;  %v2268_v8 = vshll.u32 %v5146_v51, 16  ;;  %v2460_v61 = vrot.slane %v5146_v51, 1  ;;  %v1154_v51 = vadd.f32 %v7304_v63, %v1153_v48  ;;  %v5776_v6 = vpop.f32.mrb[4].mxu0 }
 0x157   : > { %v1737_v47 = vadd.f32 %v7199_v13, %v1736_v14  ;;  %v5852_v15 = vpop.f32.mrb[33].mxu1  ;;  %v1166_v14 = vpop.f32.mrb[5].mxu0  ;;  %vm1280_vm14 = vcmp.gt.f32.partialorder %v1162_v37, 0.0  ;;  %v1175_v40 = vadd.f32 %v5776_v6, %v7304_v63 }
 0x158   : > { %v1739_v26 = vpop.f32.mrb[34].mxu1  ;;  %v2270_v12 = vrot.slane %v2268_v8, 1  ;;  %v2118_v1 = vunpack.c.h.b16 %v2056_v9  ;;  %v7323_v27 = vsel %vm2446_vm8, %v2459_v52, %v2460_v61  ;;  %v1309_v15 = vmul.f32 0.01, %v1151_v5 }
 0x159   : > { %v1957_v16 = vmul.f32 0.01, %v1737_v47  ;;  %v1740_v7 = vadd.f32 %v7199_v13, %v1739_v26  ;;  %v5853_v21 = vpop.f32.mrb[35].mxu1  ;;  %vm1903_vm6 = vcmp.gt.f32.partialorder %v1737_v47, 0.0  ;;  %v5777_v26 = vpop.f32.mrb[6].mxu0  ;;  %vm1278_vm15 = vcmp.gt.f32.partialorder %v1154_v51, 0.0 }
 0x15a   : > { %v7295_v0 = vsel %vm2211_vm9, %v2266_v62, %v2270_v12  ;;  %v1341_v3 = vsel %vm1277_vm13, %v1151_v5, %v1309_v15  ;;  %v1310_v61 = vmul.f32 0.01, %v1154_v51  ;;  %vm1283_vm1 = vcmp.gt.f32.partialorder %v1175_v40, 0.0 }
 0x15b   : > { %vm1904_vm7 = vcmp.gt.f32.partialorder %v1740_v7, 0.0  ;;  %v1958_v38 = vmul.f32 0.01, %v1740_v7  ;;  %2775 = vmatprep.mubr.bf16.mxu0 %v7295_v0  ;;  %v2011_v2 = vsel %vm1903_vm6, %v1737_v47, %v1957_v16  ;;  %v1312_v16 = vmul.f32 0.01, %v1162_v37  ;;  %1373 = vst [vmem:[%s6501_s20] sm:$0xff] %v1341_v3 }
 0x15c   : > { %2776 = vmatmul.mubr.bf16.gmra.mrb[48].mxu0 %v7280_v33 }
 0x15d   : > { %v2012_v56 = vsel %vm1904_vm7, %v1740_v7, %v1958_v38  ;;  %v1169_v7 = vpop.f32.mrb[7].mxu0  ;;  %v1344_v43 = vsel %vm1280_vm14, %v1162_v37, %v1312_v16  ;;  %v1178_v37 = vadd.f32 %v5777_v26, %v7304_v63 }
 0x15e   : > { %v2057_v19 = vpack.c.bf16 %v2012_v56, %v2011_v2  ;;  %v5147_v57 = vpack.c.bf16 %v2012_v56, %v2012_v56  ;;  %v1744_v34 = vpop.f32.mrb[36].mxu1  ;;  %v7338_v38 = vpop.f32.mrb[8].mxu0  ;;  %1376 = vst [vmem:[%s6501_s20 + $0x18] sm:$0xff] %v1344_v43 }
 0x15f   : > { %v1745_v45 = vadd.f32 %v7199_v13, %v1744_v34  ;;  %v5856_v18 = vpop.f32.mrb[37].mxu1  ;;  %vm1284_vm4 = vcmp.gt.f32.partialorder %v1178_v37, 0.0  ;;  %v1316_v16 = vmul.f32 0.01, %v1178_v37 }
 0x160   : > { %v2119_v35 = vunpack.c.l.b16 %v2057_v19  ;;  %v1747_v58 = vpop.f32.mrb[38].mxu1  ;;  %v2280_v41 = vshll.u32 %v5147_v57, 16  ;;  %v2463_v9 = vrot.slane %v5147_v57, 1  ;;  %v7348_v57 = vpop.f32.mrb[9].mxu0  ;;  %v1342_v18 = vsel %vm1278_vm15, %v1154_v51, %v1310_v61 }
 0x161   : > { %vm1905_vm11 = vcmp.gt.f32.partialorder %v1745_v45, 0.0  ;;  %v1959_v54 = vmul.f32 0.01, %v1745_v45  ;;  %v1748_v55 = vadd.f32 %v7199_v13, %v1747_v58  ;;  %v5857_v42 = vpop.f32.mrb[39].mxu1  ;;  %v7352_v10 = vpop.f32.mrb[10].mxu0  ;;  %1374 = vst [vmem:[%s6501_s20 + $0x8] sm:$0xff] %v1342_v18  ;;  %v1191_v18 = vadd.f32 %v7338_v38, %v7304_v63 }
 0x162   : > { %v7328_v39 = vpack.c.b16 %v2119_v35, %v2118_v1  ;;  %v2282_v31 = vrot.slane %v2280_v41, 1  ;;  %v1315_v58 = vmul.f32 0.01, %v1175_v40  ;;  %v7359_v25 = vpop.f32.mrb[11].mxu0 }
 0x163   : > { %vm1906_vm12 = vcmp.gt.f32.partialorder %v1748_v55, 0.0  ;;  %v1960_v59 = vmul.f32 0.01, %v1748_v55  ;;  %v2013_v46 = vsel %vm1905_vm11, %v1745_v45, %v1959_v54  ;;  %v7365_v42 = vpop.f32.mrb[12].mxu0  ;;  %vm1287_vm10 = vcmp.gt.f32.partialorder %v1191_v18, 0.0 }
 0x164   : > { %v2275_v8 = vshll.u32 %v7328_v39, 16  ;;  %v2462_v47 = vrot.slane %v7328_v39, 1  ;;  %v2273_v12 = vshrl.u32 %v7328_v39, 16  ;;  %v1347_v41 = vsel %vm1283_vm1, %v1175_v40, %v1315_v58  ;;  %v7373_v51 = vpop.f32.mrb[13].mxu0 }
 0x165   : > { %v2014_v62 = vsel %vm1906_vm12, %v1748_v55, %v1960_v59  ;;  %v1167_v55 = vadd.f32 %v7304_v63, %v1166_v14  ;;  %1379 = vst [vmem:[%s6501_s20 + $0x30] sm:$0xff] %v1347_v41  ;;  %v7378_v14 = vpop.f32.mrb[14].mxu0  ;;  %v1319_v38 = vmul.f32 0.01, %v1191_v18 }
 0x166   : > { %v7336_v21 = vpack.c.bf16 %v2014_v62, %v2013_v46  ;;  %v1752_v22 = vpop.f32.mrb[40].mxu1  ;;  %v2277_v44 = vrot.slane %v2275_v8, 1  ;;  %v7345_v19 = vsel %vm2446_vm8, %v2462_v47, %v2463_v9  ;;  %v1170_v9 = vadd.f32 %v7304_v63, %v1169_v7  ;;  %v7383_v26 = vpop.f32.mrb[15].mxu0 }
 0x167   : > { %v1753_v49 = vadd.f32 %v7199_v13, %v1752_v22  ;;  %v5860_v28 = vpop.f32.mrb[41].mxu1  ;;  %vm1281_vm3 = vcmp.gt.f32.partialorder %v1167_v55, 0.0  ;;  %v1313_v59 = vmul.f32 0.01, %v1167_v55  ;;  %v7386_v7 = vpop.f32.mrb[16].mxu0 }
 0x168   : > { %v1755_v2 = vpop.f32.mrb[42].mxu1  ;;  %v2278_v56 = vor.u32 %v2277_v44, %v2273_v12  ;;  %v2287_v52 = vshll.u32 %v7336_v21, 16  ;;  %v2285_v35 = vshrl.u32 %v7336_v21, 16  ;;  %v2465_v15 = vrot.slane %v7336_v21, 1  ;;  %v7390_v43 = vpop.f32.mrb[17].mxu0 }
 0x169   : > { %vm1907_vm0 = vcmp.gt.f32.partialorder %v1753_v49, 0.0  ;;  %v1961_v34 = vmul.f32 0.01, %v1753_v49  ;;  %v1756_v36 = vadd.f32 %v7199_v13, %v1755_v2  ;;  %v5861_v45 = vpop.f32.mrb[43].mxu1  ;;  %v1345_v12 = vsel %vm1281_vm3, %v1167_v55, %v1313_v59  ;;  %v6347_v55 = vld [vmem:[%s8325_s5 + $0x108] sm:$0xff]  }
 0x16a   : > { %v7355_v1 = vsel %vm2211_vm9, %v2278_v56, %v2282_v31  ;;  %v2289_v48 = vrot.slane %v2287_v52, 1  ;;  %vm1282_vm5 = vcmp.gt.f32.partialorder %v1170_v9, 0.0  ;;  %1377 = vst [vmem:[%s6501_s20 + $0x20] sm:$0xff] %v1345_v12  ;;  %v1314_v28 = vmul.f32 0.01, %v1170_v9  ;;  %v7394_v31 = vpop.f32.mrb[18].mxu0 }
 0x16b   : > { %v7361_v30 = vsel %vm1907_vm0, %v1753_v49, %v1961_v34  ;;  %vm1908_vm2 = vcmp.gt.f32.partialorder %v1756_v36, 0.0  ;;  %v1962_v54 = vmul.f32 0.01, %v1756_v36  ;;  %2783 = vmatprep.mubr.bf16.mxu0 %v7355_v1  ;;  %v1348_v56 = vsel %vm1284_vm4, %v1178_v37, %v1316_v16  ;;  %v6340_v34 = vld [vmem:[%s8325_s5 + $0x148] sm:$0xff]   ;;  %v7411_v58 = vpop.f32.mrb[19].mxu0  ;;  %v6349_v16 = vld [vmem:[%s8325_s5 + $0x110] sm:$0xff]  }
 0x16c   : > { %v7369_v5 = vpack.c.bf16 %v7361_v30, %v7361_v30  ;;  %2784 = vmatmul.mubr.bf16.gmra.mrb[52].mxu0 %v7328_v39  ;;  %v2290_v44 = vor.u32 %v2289_v48, %v2285_v35  ;;  %1380 = vst [vmem:[%s6501_s20 + $0x38] sm:$0xff] %v1348_v56  ;;  %v1346_v45 = vsel %vm1282_vm5, %v1170_v9, %v1314_v28  ;;  %v7420_v48 = vpop.f32.mrb[20].mxu0 }
 0x16d   : > { %v2016_v6 = vsel %vm1908_vm2, %v1756_v36, %v1962_v54  ;;  %5942 = vmatprep.mubr.bf16.mxu0 %v7207_v29  ;;  %v6345_v36 = vld [vmem:[%s8325_s5 + $0xc0] sm:$0xff]   ;;  %v1183_v35 = vadd.f32 %v7304_v63, %v7348_v57  ;;  %1378 = vst [vmem:[%s6501_s20 + $0x28] sm:$0xff] %v1346_v45 }
 0x16e   : > { %v2059_v46 = vpack.c.bf16 %v2016_v6, %v7361_v30  ;;  %v1760_v8 = vpop.f32.mrb[44].mxu1  ;;  %v2292_v47 = vshll.u32 %v7369_v5, 16  ;;  %v2466_v49 = vrot.slane %v7369_v5, 1  ;;  %v1194_v5 = vadd.f32 %v7352_v10, %v7304_v63  ;;  %v7428_v6 = vpop.f32.mrb[21].mxu0 }
 0x16f   : > { %v1761_v29 = vadd.f32 %v7199_v13, %v1760_v8  ;;  %v5864_v62 = vpop.f32.mrb[45].mxu1  ;;  %vm1285_vm11 = vcmp.gt.f32.partialorder %v1183_v35, 0.0  ;;  %v1317_v57 = vmul.f32 0.01, %v1183_v35  ;;  %v1186_v10 = vadd.f32 %v7304_v63, %v7359_v25 }
 0x170   : > { %v1763_v22 = vpop.f32.mrb[46].mxu1  ;;  %v2294_v3 = vrot.slane %v2292_v47, 1  ;;  %vm1288_vm12 = vcmp.gt.f32.partialorder %v1194_v5, 0.0  ;;  %v1320_v37 = vmul.f32 0.01, %v1194_v5  ;;  %v2124_v59 = vunpack.c.h.b16 %v2059_v46  ;;  %v7439_v62 = vpop.f32.mrb[22].mxu0 }
 0x171   : > { %vm1909_vm6 = vcmp.gt.f32.partialorder %v1761_v29, 0.0  ;;  %v1963_v61 = vmul.f32 0.01, %v1761_v29  ;;  %v1764_v40 = vadd.f32 %v7199_v13, %v1763_v22  ;;  %v5865_v2 = vpop.f32.mrb[47].mxu1  ;;  %v1351_v25 = vsel %vm1287_vm10, %v1191_v18, %v1319_v38 }
 0x172   : > { %v7397_v52 = vsel %vm2211_vm9, %v2290_v44, %v2294_v3  ;;  %1383 = vst [vmem:[%s6501_s20 + $0x50] sm:$0xff] %v1351_v25  ;;  %v1349_v22 = vsel %vm1285_vm11, %v1183_v35, %v1317_v57  ;;  %v1352_v44 = vsel %vm1288_vm12, %v1194_v5, %v1320_v37  ;;  %vm1286_vm13 = vcmp.gt.f32.partialorder %v1186_v10, 0.0  ;;  %v7448_v3 = vpop.f32.mrb[23].mxu0 }
 0x173   : > { %v2017_v30 = vsel %vm1909_vm6, %v1761_v29, %v1963_v61  ;;  %vm1910_vm7 = vcmp.gt.f32.partialorder %v1764_v40, 0.0  ;;  %v1964_v54 = vmul.f32 0.01, %v1764_v40  ;;  %2791 = vmatprep.mubr.bf16.mxu1 %v7397_v52  ;;  %v6341_v29 = vld [vmem:[%s8325_s5 + $0x150] sm:$0xff]   ;;  %v7454_v2 = vsel %vm2446_vm8, %v2465_v15, %v2466_v49  ;;  %1381 = vst [vmem:[%s6501_s20 + $0x40] sm:$0xff] %v1349_v22  ;;  %1384 = vst [vmem:[%s6501_s20 + $0x58] sm:$0xff] %v1352_v44 }
 0x174   : > { %2792 = vmatmul.mubr.bf16.vlgmr.msra.gmra.mrb[108].mxu1 %v7336_v21  ;;  %5943 = vmatmul.mubr.bf16.vlgmr.msra.gmra.mrb[56].mxu0 %v7314_v32  ;;  %v1318_v56 = vmul.f32 0.01, %v1186_v10  ;;  %v6342_v49 = vld [vmem:[%s8325_s5 + $0x158] sm:$0xff]   ;;  %v1199_v38 = vadd.f32 %v7304_v63, %v7373_v51 }
 0x175   : > { %v2018_v41 = vsel %vm1910_vm7, %v1764_v40, %v1964_v54  ;;  %5946 = vmatprep.mubr.bf16.mxu0 %v7317_v4  ;;  %5975 = vmatpush3.bf16.msra.mxu0 %v7266_v53  ;;  %v6348_v53 = vld [vmem:[%s8325_s5 + $0xc8] sm:$0xff]  }
 0x176   : > { %v2060_v9 = vpack.c.bf16 %v2018_v41, %v2017_v30  ;;  %v7430_v8 = vpack.c.bf16 %v2018_v41, %v2018_v41  ;;  %v1768_v47 = vpop.f32.mrb[48].mxu1  ;;  %5976 = vmatprep.subr.bf16.mxu0 %v6340_v34  ;;  %5483 = vmatpush3.bf16.msra.mxu1 %v6345_v36  ;;  %v7458_v36 = vpop.f32.mrb[24].mxu0  ;;  %v1207_v30 = vadd.f32 %v7365_v42, %v7304_v63  ;;  %v6352_v42 = vld [vmem:[%s8325_s5 + $0x118] sm:$0xff]   ;;  %vm1289_vm1 = vcmp.gt.f32.partialorder %v1199_v38, 0.0 }
 0x177   : > { %v1769_v46 = vadd.f32 %v7199_v13, %v1768_v47  ;;  %v5868_v12 = vpop.f32.mrb[49].mxu1  ;;  %5484 = vmatprep.subr.bf16.mxu1 %v6347_v55  ;;  %v7463_v54 = vpop.f32.mrb[25].mxu0  ;;  %v1350_v5 = vsel %vm1286_vm13, %v1186_v10, %v1318_v56  ;;  %v1321_v25 = vmul.f32 0.01, %v1199_v38 }
 0x178   : > { %v2125_v28 = vunpack.c.l.b16 %v2060_v9  ;;  %v1771_v61 = vpop.f32.mrb[50].mxu1  ;;  %v2304_v40 = vshll.u32 %v7430_v8, 16  ;;  %v2469_v15 = vrot.slane %v7430_v8, 1  ;;  %v7480_v57 = vpop.f32.mrb[26].mxu0  ;;  %1382 = vst [vmem:[%s6501_s20 + $0x48] sm:$0xff] %v1350_v5  ;;  %vm1291_vm0 = vcmp.gt.f32.partialorder %v1207_v30, 0.0 }
 0x179   : > { %vm1911_vm14 = vcmp.gt.f32.partialorder %v1769_v46, 0.0  ;;  %v1965_v45 = vmul.f32 0.01, %v1769_v46  ;;  %v1772_v18 = vadd.f32 %v7199_v13, %v1771_v61  ;;  %v5869_v35 = vpop.f32.mrb[51].mxu1  ;;  %5977 = vmatpush3.bf16.msra.mxu0 %v6340_v34  ;;  %v6350_v34 = vld [vmem:[%s8325_s5 + $0xd0] sm:$0xff]   ;;  %v1210_v12 = vadd.f32 %v7378_v14, %v7304_v63  ;;  %v6343_v61 = vld [vmem:[%s8325_s5 + $0x160] sm:$0xff]  }
 0x17a   : > { %v7465_v55 = vpack.c.b16 %v2125_v28, %v2124_v59  ;;  %5978 = vmatprep.subr.bf16.mxu0 %v6341_v29  ;;  %5485 = vmatpush3.bf16.msra.mxu1 %v6348_v53  ;;  %v2306_v37 = vrot.slane %v2304_v40, 1  ;;  %v7483_v59 = vpop.f32.mrb[27].mxu0  ;;  %v1323_v47 = vmul.f32 0.01, %v1207_v30  ;;  %v1353_v35 = vsel %vm1289_vm1, %v1199_v38, %v1321_v25 }
 0x17b   : > { %vm1912_vm15 = vcmp.gt.f32.partialorder %v1772_v18, 0.0  ;;  %v1966_v41 = vmul.f32 0.01, %v1772_v18  ;;  %5486 = vmatprep.subr.bf16.mxu1 %v6349_v16  ;;  %v2019_v9 = vsel %vm1911_vm14, %v1769_v46, %v1965_v45  ;;  %v7489_v51 = vpop.f32.mrb[28].mxu0  ;;  %vm1292_vm2 = vcmp.gt.f32.partialorder %v1210_v12, 0.0  ;;  %1385 = vst [vmem:[%s6501_s20 + $0x60] sm:$0xff] %v1353_v35 }
 0x17c   : > { %8442 = vst [vmem:[#allocation8_spill] sm:$0xff] %v7465_v55  ;;  %5947 = vmatmul.mubr.bf16.gmra.mrb[60].mxu0 %v7320_v24  ;;  %v2299_v8 = vshll.u32 %v7465_v55, 16  ;;  %v2468_v10 = vrot.slane %v7465_v55, 1  ;;  %v7494_v46 = vpop.f32.mrb[29].mxu0  ;;  %v2297_v44 = vshrl.u32 %v7465_v55, 16  ;;  %v1355_v14 = vsel %vm1291_vm0, %v1207_v30, %v1323_v47 }
 0x17d   : > { %v2020_v53 = vsel %vm1912_vm15, %v1772_v18, %v1966_v41  ;;  %5950 = vmatprep.mubr.bf16.mxu0 %v7323_v27  ;;  %5979 = vmatpush3.bf16.msra.mxu0 %v6341_v29  ;;  %v6353_v29 = vld [vmem:[%s8325_s5 + $0xd8] sm:$0xff]   ;;  %v7506_v40 = vpop.f32.mrb[30].mxu0  ;;  %v6354_v18 = vld [vmem:[%s8325_s5 + $0x120] sm:$0xff]   ;;  %1387 = vst [vmem:[%s6501_s20 + $0x70] sm:$0xff] %v1355_v14  ;;  %v1215_v14 = vadd.f32 %v7304_v63, %v7390_v43 }
 0x17e   : > { %v7496_v16 = vpack.c.bf16 %v2020_v53, %v2019_v9  ;;  %v1776_v22 = vpop.f32.mrb[52].mxu1  ;;  %v2301_v28 = vrot.slane %v2299_v8, 1  ;;  %5980 = vmatprep.subr.bf16.mxu0 %v6342_v49  ;;  %5487 = vmatpush3.bf16.msra.mxu1 %v6350_v34  ;;  %v1324_v34 = vmul.f32 0.01, %v1210_v12  ;;  %v7514_v5 = vpop.f32.mrb[31].mxu0 }
 0x17f   : > { %v1777_v56 = vadd.f32 %v7199_v13, %v1776_v22  ;;  %v5872_v45 = vpop.f32.mrb[53].mxu1  ;;  %5488 = vmatprep.subr.bf16.mxu1 %v6352_v42  ;;  %v7519_v42 = vsel %vm2446_vm8, %v2468_v10, %v2469_v15  ;;  %v6355_v15 = vld [vmem:[%s8325_s5 + $0xe0] sm:$0xff]   ;;  %vm1293_vm7 = vcmp.gt.f32.partialorder %v1215_v14, 0.0 }
 0x180   : > { %v1779_v41 = vpop.f32.mrb[54].mxu1  ;;  %v2302_v30 = vor.u32 %v2301_v28, %v2297_v44  ;;  %v2309_v9 = vshrl.u32 %v7496_v16, 16  ;;  %v2311_v8 = vshll.u32 %v7496_v16, 16  ;;  %v1356_v25 = vsel %vm1292_vm2, %v1210_v12, %v1324_v34  ;;  %v6346_v28 = vld [vmem:[%s8325_s5 + $0x168] sm:$0xff]  }
 0x181   : > { %vm1913_vm3 = vcmp.gt.f32.partialorder %v1777_v56, 0.0  ;;  %v1967_v47 = vmul.f32 0.01, %v1777_v56  ;;  %v1780_v53 = vadd.f32 %v7199_v13, %v1779_v41  ;;  %v5873_v38 = vpop.f32.mrb[55].mxu1  ;;  %5981 = vmatpush3.bf16.msra.mxu0 %v6342_v49  ;;  %v2471_v44 = vrot.slane %v7496_v16, 1  ;;  %1388 = vst [vmem:[%s6501_s20 + $0x78] sm:$0xff] %v1356_v25 }
 0x182   : > { %v7524_v22 = vsel %vm2211_vm9, %v2302_v30, %v2306_v37  ;;  %5982 = vmatprep.subr.bf16.mxu0 %v6343_v61  ;;  %5489 = vmatpush3.bf16.msra.mxu1 %v6353_v29  ;;  %v1202_v49 = vadd.f32 %v7304_v63, %v7383_v26  ;;  %v1223_v37 = vadd.f32 %v7386_v7, %v7304_v63  ;;  %v6357_v29 = vld [vmem:[%s8325_s5 + $0x128] sm:$0xff]   ;;  %v2313_v7 = vrot.slane %v2311_v8, 1  ;;  %v6351_v30 = vld [vmem:[%s8325_s5 + $0x170] sm:$0xff]  }
 0x183   : > { %v7538_v10 = vsel %vm1913_vm3, %v1777_v56, %v1967_v47  ;;  %vm1914_vm4 = vcmp.gt.f32.partialorder %v1780_v53, 0.0  ;;  %v1968_v12 = vmul.f32 0.01, %v1780_v53  ;;  %2799 = vmatprep.mubr.bf16.mxu1 %v7524_v22  ;;  %5490 = vmatprep.subr.bf16.mxu1 %v6354_v18  ;;  %v6359_v38 = vld [vmem:[%s8325_s5 + $0x130] sm:$0xff]  }
 0x184   : > { %v5150_v26 = vpack.c.bf16 %v7538_v10, %v7538_v10  ;;  %2800 = vmatmul.mubr.bf16.gmra.mrb[112].mxu1 %v7465_v55  ;;  %5951 = vmatmul.mubr.bf16.gmra.mrb[64].mxu0 %v7345_v19  ;;  %vm1290_vm5 = vcmp.gt.f32.partialorder %v1202_v49, 0.0  ;;  %v1322_v56 = vmul.f32 0.01, %v1202_v49  ;;  %vm1295_vm6 = vcmp.gt.f32.partialorder %v1223_v37, 0.0 }
 0x185   : > { %v7550_v45 = vsel %vm1914_vm4, %v1780_v53, %v1968_v12  ;;  %5954 = vmatprep.mubr.bf16.mxu0 %v7454_v2  ;;  %5983 = vmatpush3.bf16.msra.mxu0 %v6343_v61  ;;  %v1327_v18 = vmul.f32 0.01, %v1223_v37  ;;  %v6358_v61 = vld [vmem:[%s8325_s5 + $0xe8] sm:$0xff]   ;;  %v1325_v12 = vmul.f32 0.01, %v1215_v14  ;;  %v2314_v43 = vor.u32 %v2313_v7, %v2309_v9  ;;  %v6356_v9 = vld [vmem:[%s8325_s5 + $0x178] sm:$0xff]  }
 0x186   : > { %v1784_v35 = vpop.f32.mrb[56].mxu1  ;;  %v2316_v34 = vshll.u32 %v5150_v26, 16  ;;  %v2472_v41 = vrot.slane %v5150_v26, 1  ;;  %5984 = vmatprep.subr.bf16.mxu0 %v6346_v28  ;;  %5491 = vmatpush3.bf16.msra.mxu1 %v6355_v15  ;;  %v1354_v8 = vsel %vm1290_vm5, %v1202_v49, %v1322_v56  ;;  %v1226_v15 = vadd.f32 %v7394_v31, %v7304_v63 }
 0x187   : > { %v1785_v47 = vadd.f32 %v7199_v13, %v1784_v35  ;;  %v5876_v53 = vpop.f32.mrb[57].mxu1  ;;  %5492 = vmatprep.subr.bf16.mxu1 %v6357_v29  ;;  %1386 = vst [vmem:[%s6501_s20 + $0x68] sm:$0xff] %v1354_v8  ;;  %v1359_v25 = vsel %vm1295_vm6, %v1223_v37, %v1327_v18  ;;  %v1218_v29 = vadd.f32 %v7304_v63, %v7411_v58  ;;  %v6360_v58 = vld [vmem:[%s8325_s5 + $0xf0] sm:$0xff]  }
 0x188   : > { %v1787_v26 = vpop.f32.mrb[58].mxu1  ;;  %v2318_v55 = vrot.slane %v2316_v34, 1  ;;  %v7571_v49 = vsel %vm2446_vm8, %v2471_v44, %v2472_v41  ;;  %1391 = vst [vmem:[%s6501_s20 + $0x90] sm:$0xff] %v1359_v25  ;;  %v1357_v18 = vsel %vm1293_vm7, %v1215_v14, %v1325_v12  ;;  %vm1296_vm11 = vcmp.gt.f32.partialorder %v1226_v15, 0.0  ;;  %v7616_v12 = vld [vmem:[%s8322_s2] ss:$0 sm:$0xff] }
 0x189   : > { %vm1915_vm10 = vcmp.gt.f32.partialorder %v1785_v47, 0.0  ;;  %v1969_v56 = vmul.f32 0.01, %v1785_v47  ;;  %v1788_v35 = vadd.f32 %v7199_v13, %v1787_v26  ;;  %v5877_v37 = vpop.f32.mrb[59].mxu1  ;;  %5985 = vmatpush3.bf16.msra.mxu0 %v6346_v28  ;;  %1389 = vst [vmem:[%s6501_s20 + $0x80] sm:$0xff] %v1357_v18  ;;  %vm1294_vm12 = vcmp.gt.f32.partialorder %v1218_v29, 0.0 }
 0x18a   : > { %v7579_v31 = vsel %vm2211_vm9, %v2314_v43, %v2318_v55  ;;  %5986 = vmatprep.subr.bf16.mxu0 %v6351_v30  ;;  %5493 = vmatpush3.bf16.msra.mxu1 %v6358_v61  ;;  %v1328_v13 = vmul.f32 0.01, %v1226_v15  ;;  %v6363_v55 = vld [vmem:[%s8325_s5 + $0x138] sm:$0xff]   ;;  %v1326_v14 = vmul.f32 0.01, %v1218_v29  ;;  %v1239_v43 = vadd.f32 %v7420_v48, %v7304_v63  ;;  %v6361_v48 = vld [vmem:[%s8325_s5 + $0x1c0] sm:$0xff]  }
 0x18b   : > { %v2023_v44 = vsel %vm1915_vm10, %v1785_v47, %v1969_v56  ;;  %vm1916_vm13 = vcmp.gt.f32.partialorder %v1788_v35, 0.0  ;;  %v1970_v28 = vmul.f32 0.01, %v1788_v35  ;;  %2807 = vmatprep.mubr.bf16.mxu1 %v7579_v31  ;;  %5494 = vmatprep.subr.bf16.mxu1 %v6359_v38  ;;  %v1231_v34 = vadd.f32 %v7304_v63, %v7428_v6  ;;  %v6364_v6 = vld [vmem:[%s8325_s5 + $0xf8] sm:$0xff]  }
 0x18c   : > { %2808 = vmatmul.mubr.bf16.gmra.mrb[116].mxu1 %v7496_v16  ;;  %5955 = vmatmul.mubr.bf16.gmra.mrb[68].mxu0 %v7519_v42  ;;  %v1360_v7 = vsel %vm1296_vm11, %v1226_v15, %v1328_v13  ;;  %v1358_v61 = vsel %vm1294_vm12, %v1218_v29, %v1326_v14  ;;  %v1242_v8 = vadd.f32 %v7439_v62, %v7304_v63  ;;  %vm1299_vm14 = vcmp.gt.f32.partialorder %v1239_v43, 0.0 }
 0x18d   : > { %v2024_v41 = vsel %vm1916_vm13, %v1788_v35, %v1970_v28  ;;  %5958 = vmatprep.mubr.bf16.mxu0 %v7571_v49  ;;  %5987 = vmatpush3.bf16.msra.mxu0 %v6351_v30  ;;  %1392 = vst [vmem:[%s6501_s20 + $0x98] sm:$0xff] %v1360_v7  ;;  %1390 = vst [vmem:[%s6501_s20 + $0x88] sm:$0xff] %v1358_v61  ;;  %v1331_v30 = vmul.f32 0.01, %v1239_v43  ;;  %v8443_v25 = vpack.c.bf16 %v7550_v45, %v7538_v10 }
 0x18e   : > { %v2063_v47 = vpack.c.bf16 %v2024_v41, %v2023_v44  ;;  %v5151_v53 = vpack.c.bf16 %v2024_v41, %v2024_v41  ;;  %v1792_v38 = vpop.f32.mrb[60].mxu1  ;;  %5988 = vmatprep.subr.bf16.mxu0 %v6356_v9  ;;  %5495 = vmatpush3.bf16.msra.mxu1 %v6360_v58  ;;  %vm1297_vm15 = vcmp.gt.f32.partialorder %v1231_v34, 0.0  ;;  %v1329_v29 = vmul.f32 0.01, %v1231_v34 }
 0x18f   : > { %v2130_v62 = vunpack.c.h.b16 %v8443_v25  ;;  %v1793_v15 = vadd.f32 %v7616_v12, %v1792_v38  ;;  %v5880_v26 = vpop.f32.mrb[61].mxu1  ;;  %5496 = vmatprep.subr.bf16.mxu1 %v6363_v55  ;;  %v1363_v18 = vsel %vm1299_vm14, %v1239_v43, %v1331_v30  ;;  %vm1300_vm0 = vcmp.gt.f32.partialorder %v1242_v8, 0.0 }
 0x190   : > { %v2131_v56 = vunpack.c.l.b16 %v2063_v47  ;;  %v1795_v35 = vpop.f32.mrb[62].mxu1  ;;  %v2475_v37 = vrot.slane %v5151_v53, 1  ;;  %1395 = vst [vmem:[%s6501_s20 + $0xb0] sm:$0xff] %v1363_v18  ;;  %v1361_v13 = vsel %vm1297_vm15, %v1231_v34, %v1329_v29  ;;  %v2328_v28 = vshll.u32 %v5151_v53, 16 }
 0x191   : > { %vm1917_vm1 = vcmp.gt.f32.partialorder %v1793_v15, 0.0  ;;  %v1971_v10 = vmul.f32 0.01, %v1793_v15  ;;  %v1796_v45 = vadd.f32 %v7616_v12, %v1795_v35  ;;  %v5881_v58 = vpop.f32.mrb[63].mxu1  ;;  %5989 = vmatpush3.bf16.msra.mxu0 %v6356_v9  ;;  %1393 = vst [vmem:[%s6501_s20 + $0xa0] sm:$0xff] %v1361_v13  ;;  %v1234_v14 = vadd.f32 %v7304_v63, %v7448_v3 }
 0x192   : > { %v7621_v44 = vpack.c.b16 %v2131_v56, %v2130_v62  ;;  %5618 = vmatprep.subr.bf16.mxu0 %v6361_v48  ;;  %5497 = vmatpush3.bf16.msra.mxu1 %v6364_v6  ;;  %v1332_v55 = vmul.f32 0.01, %v1242_v8  ;;  %v1255_v41 = vadd.f32 %v7458_v36, %v7304_v63  ;;  %v1258_v26 = vadd.f32 %v7480_v57, %v7304_v63 }
 0x193   : > { %v2025_v7 = vsel %vm1917_vm1, %v1793_v15, %v1971_v10  ;;  %vm1918_vm2 = vcmp.gt.f32.partialorder %v1796_v45, 0.0  ;;  %v1972_v43 = vmul.f32 0.01, %v1796_v45  ;;  %vm1298_vm3 = vcmp.gt.f32.partialorder %v1234_v14, 0.0 }
 0x194   : > { %v2474_v9 = vrot.slane %v7621_v44, 1  ;;  %v2321_v34 = vshrl.u32 %v7621_v44, 16  ;;  %v2323_v61 = vshll.u32 %v7621_v44, 16  ;;  %v1364_v47 = vsel %vm1300_vm0, %v1242_v8, %v1332_v55 }
 0x195   : > { %v2026_v53 = vsel %vm1918_vm2, %v1796_v45, %v1972_v43  ;;  %1396 = vst [vmem:[%s6501_s20 + $0xb8] sm:$0xff] %v1364_v47  ;;  %v1330_v38 = vmul.f32 0.01, %v1234_v14  ;;  %vm1303_vm4 = vcmp.gt.f32.partialorder %v1255_v41, 0.0  ;;  %v1335_v30 = vmul.f32 0.01, %v1255_v41 }
 0x196   : > { %v7633_v3 = vpack.c.bf16 %v2026_v53, %v2025_v7  ;;  %v1800_v48 = vpop.f32.mrb[64].mxu1  ;;  %v7636_v6 = vsel %vm2446_vm8, %v2474_v9, %v2475_v37  ;;  %v2325_v36 = vrot.slane %v2323_v61, 1  ;;  %v1247_v15 = vadd.f32 %v7304_v63, %v7463_v54 }
 0x197   : > { %v1801_v25 = vadd.f32 %v7616_v12, %v1800_v48  ;;  %v5884_v62 = vpop.f32.mrb[65].mxu1  ;;  %5959 = vmatmul.mubr.bf16.gmra.mrb[72].mxu0 %v7636_v6  ;;  %v1362_v8 = vsel %vm1298_vm3, %v1234_v14, %v1330_v38  ;;  %v2330_v35 = vrot.slane %v2328_v28, 1  ;;  %v1367_v13 = vsel %vm1303_vm4, %v1255_v41, %v1335_v30 }
 0x198   : > { %v1803_v29 = vpop.f32.mrb[66].mxu1  ;;  %v2326_v56 = vor.u32 %v2325_v36, %v2321_v34  ;;  %v2477_v37 = vrot.slane %v7633_v3, 1  ;;  %v2335_v18 = vshll.u32 %v7633_v3, 16  ;;  %1394 = vst [vmem:[%s6501_s20 + $0xa8] sm:$0xff] %v1362_v8  ;;  %v2333_v57 = vshrl.u32 %v7633_v3, 16  ;;  %1399 = vst [vmem:[%s6501_s20 + $0xd0] sm:$0xff] %v1367_v13 }
 0x199   : > { %vm1919_vm5 = vcmp.gt.f32.partialorder %v1801_v25, 0.0  ;;  %v1973_v10 = vmul.f32 0.01, %v1801_v25  ;;  %v1804_v45 = vadd.f32 %v7616_v12, %v1803_v29  ;;  %v5885_v58 = vpop.f32.mrb[67].mxu1  ;;  %vm1301_vm6 = vcmp.gt.f32.partialorder %v1247_v15, 0.0 }
 0x19a   : > { %v7650_v54 = vsel %vm2211_vm9, %v2326_v56, %v2330_v35  ;;  %v1333_v28 = vmul.f32 0.01, %v1247_v15  ;;  %vm1304_vm10 = vcmp.gt.f32.partialorder %v1258_v26, 0.0  ;;  %v2337_v43 = vrot.slane %v2335_v18, 1 }
 0x19b   : > { %v7654_v55 = vsel %vm1919_vm5, %v1801_v25, %v1973_v10  ;;  %vm1920_vm7 = vcmp.gt.f32.partialorder %v1804_v45, 0.0  ;;  %v1974_v14 = vmul.f32 0.01, %v1804_v45  ;;  %2815 = vmatprep.mubr.bf16.mxu1 %v7650_v54  ;;  %v1336_v9 = vmul.f32 0.01, %v1258_v26 }
 0x19c   : > { %v5152_v7 = vpack.c.bf16 %v7654_v55, %v7654_v55  ;;  %2816 = vmatmul.mubr.bf16.gmra.mrb[120].mxu1 %v7621_v44  ;;  %v1365_v41 = vsel %vm1301_vm6, %v1247_v15, %v1333_v28  ;;  %v1250_v61 = vadd.f32 %v7304_v63, %v7483_v59  ;;  %v1271_v47 = vadd.f32 %v7489_v51, %v7304_v63 }
 0x19d   : > { %v2028_v34 = vsel %vm1920_vm7, %v1804_v45, %v1974_v14  ;;  %1397 = vst [vmem:[%s6501_s20 + $0xc0] sm:$0xff] %v1365_v41  ;;  %v1263_v53 = vadd.f32 %v7304_v63, %v7494_v46  ;;  %v1368_v25 = vsel %vm1304_vm10, %v1258_v26, %v1336_v9  ;;  %v2338_v29 = vor.u32 %v2337_v43, %v2333_v57 }
 0x19e   : > { %v2065_v38 = vpack.c.bf16 %v2028_v34, %v7654_v55  ;;  %v1808_v48 = vpop.f32.mrb[68].mxu1  ;;  %v2478_v36 = vrot.slane %v5152_v7, 1  ;;  %v2340_v30 = vshll.u32 %v5152_v7, 16  ;;  %1400 = vst [vmem:[%s6501_s20 + $0xd8] sm:$0xff] %v1368_v25  ;;  %vm1302_vm11 = vcmp.gt.f32.partialorder %v1250_v61, 0.0 }
 0x19f   : > { %v1809_v62 = vadd.f32 %v7616_v12, %v1808_v48  ;;  %v5888_v8 = vpop.f32.mrb[69].mxu1  ;;  %v1334_v15 = vmul.f32 0.01, %v1250_v61  ;;  %vm1307_vm12 = vcmp.gt.f32.partialorder %v1271_v47, 0.0  ;;  %v1339_v56 = vmul.f32 0.01, %v1271_v47 }
 0x1a0   : > { %v1811_v59 = vpop.f32.mrb[70].mxu1  ;;  %v7671_v51 = vsel %vm2446_vm8, %v2477_v37, %v2478_v36  ;;  %v2342_v46 = vrot.slane %v2340_v30, 1  ;;  %vm1305_vm14 = vcmp.gt.f32.partialorder %v1263_v53, 0.0  ;;  %v1337_v37 = vmul.f32 0.01, %v1263_v53 }
 0x1a1   : > { %vm1921_vm13 = vcmp.gt.f32.partialorder %v1809_v62, 0.0  ;;  %v1975_v35 = vmul.f32 0.01, %v1809_v62  ;;  %v1812_v26 = vadd.f32 %v7616_v12, %v1811_v59  ;;  %v5889_v18 = vpop.f32.mrb[71].mxu1  ;;  %5962 = vmatprep.mubr.bf16.mxu0 %v7671_v51  ;;  %v1366_v10 = vsel %vm1302_vm11, %v1250_v61, %v1334_v15 }
 0x1a2   : > { %v7676_v45 = vsel %vm2211_vm9, %v2338_v29, %v2342_v46  ;;  %1398 = vst [vmem:[%s6501_s20 + $0xc8] sm:$0xff] %v1366_v10  ;;  %v1371_v58 = vsel %vm1307_vm12, %v1271_v47, %v1339_v56  ;;  %v1274_v57 = vadd.f32 %v7506_v40, %v7304_v63  ;;  %v1369_v28 = vsel %vm1305_vm14, %v1263_v53, %v1337_v37 }
 0x1a3   : > { %vm1922_vm15 = vcmp.gt.f32.partialorder %v1812_v26, 0.0  ;;  %v1976_v13 = vmul.f32 0.01, %v1812_v26  ;;  %2823 = vmatprep.mubr.bf16.mxu1 %v7676_v45  ;;  %1403 = vst [vmem:[%s6501_s20 + $0xf0] sm:$0xff] %v1371_v58  ;;  %v1266_v55 = vadd.f32 %v7304_v63, %v7514_v5  ;;  %v2029_v14 = vsel %vm1921_vm13, %v1809_v62, %v1975_v35  ;;  %1401 = vst [vmem:[%s6501_s20 + $0xe0] sm:$0xff] %v1369_v28 }
 0x1a4   : > { %2824 = vmatmul.mubr.bf16.gmra.mrb[124].mxu1 %v7633_v3  ;;  %vm1308_vm0 = vcmp.gt.f32.partialorder %v1274_v57, 0.0  ;;  %v1340_v43 = vmul.f32 0.01, %v1274_v57  ;;  %v2136_v53 = vunpack.c.h.b16 %v2065_v38 }
 0x1a5   : > { %v2030_v7 = vsel %vm1922_vm15, %v1812_v26, %v1976_v13  ;;  %vm1306_vm1 = vcmp.gt.f32.partialorder %v1266_v55, 0.0  ;;  %v1338_v34 = vmul.f32 0.01, %v1266_v55 }
 0x1a6   : > { %v2066_v41 = vpack.c.bf16 %v2030_v7, %v2029_v14  ;;  %v1816_v9 = vpop.f32.mrb[72].mxu1  ;;  %v1372_v47 = vsel %vm1308_vm0, %v1274_v57, %v1340_v43  ;;  %v5153_v36 = vpack.c.bf16 %v2030_v7, %v2030_v7 }
 0x1a7   : > { %v1817_v40 = vadd.f32 %v7616_v12, %v1816_v9  ;;  %v5892_v61 = vpop.f32.mrb[73].mxu1  ;;  %1404 = vst [vmem:[%s6501_s20 + $0xf8] sm:$0xff] %v1372_v47  ;;  %v1370_v5 = vsel %vm1306_vm1, %v1266_v55, %v1338_v34 }
 0x1a8   : > { %v2137_v48 = vunpack.c.l.b16 %v2066_v41  ;;  %v1819_v63 = vpop.f32.mrb[74].mxu1  ;;  %1402 = vst [vmem:[%s6501_s20 + $0xe8] sm:$0xff] %v1370_v5  ;;  %v2481_v29 = vrot.slane %v5153_v36, 1  ;;  %v2352_v46 = vshll.u32 %v5153_v36, 16 }
 0x1a9   : > { %v1977_v30 = vmul.f32 0.01, %v1817_v40  ;;  %v1820_v25 = vadd.f32 %v7616_v12, %v1819_v63  ;;  %v5893_v62 = vpop.f32.mrb[75].mxu1  ;;  %vm1923_vm2 = vcmp.gt.f32.partialorder %v1817_v40, 0.0 }
 0x1aa   : > { %v7692_v8 = vpack.c.b16 %v2137_v48, %v2136_v53  ;;  %v2354_v14 = vrot.slane %v2352_v46, 1 }
 0x1ab   : > { %vm1924_vm3 = vcmp.gt.f32.partialorder %v1820_v25, 0.0  ;;  %v1978_v15 = vmul.f32 0.01, %v1820_v25  ;;  %v2031_v56 = vsel %vm1923_vm2, %v1817_v40, %v1977_v30 }
 0x1ac   : > { %v2480_v59 = vrot.slane %v7692_v8, 1  ;;  %v2347_v38 = vshll.u32 %v7692_v8, 16  ;;  %v2345_v58 = vshrl.u32 %v7692_v8, 16 }
 0x1ad   : > { %v2032_v35 = vsel %vm1924_vm3, %v1820_v25, %v1978_v15 }
 0x1ae   : > { %v7696_v26 = vpack.c.bf16 %v2032_v35, %v2031_v56  ;;  %v1824_v18 = vpop.f32.mrb[76].mxu1  ;;  %v7699_v10 = vsel %vm2446_vm8, %v2480_v59, %v2481_v29  ;;  %v2349_v37 = vrot.slane %v2347_v38, 1 }
 0x1af   : > { %v1825_v13 = vadd.f32 %v7616_v12, %v1824_v18  ;;  %v5896_v57 = vpop.f32.mrb[77].mxu1  ;;  %5963 = vmatmul.mubr.bf16.gmra.mrb[76].mxu0 %v7699_v10 }
 0x1b0   : > { %v1827_v28 = vpop.f32.mrb[78].mxu1  ;;  %v2350_v55 = vor.u32 %v2349_v37, %v2345_v58  ;;  %v2359_v7 = vshll.u32 %v7696_v26, 16  ;;  %v2483_v36 = vrot.slane %v7696_v26, 1  ;;  %v2357_v25 = vshrl.u32 %v7696_v26, 16 }
 0x1b1   : > { %vm1925_vm4 = vcmp.gt.f32.partialorder %v1825_v13, 0.0  ;;  %v1979_v43 = vmul.f32 0.01, %v1825_v13  ;;  %v1828_v41 = vadd.f32 %v7616_v12, %v1827_v28  ;;  %v5897_v9 = vpop.f32.mrb[79].mxu1 }
 0x1b2   : > { %v7707_v34 = vsel %vm2211_vm9, %v2350_v55, %v2354_v14  ;;  %v2361_v53 = vrot.slane %v2359_v7, 1 }
 0x1b3   : > { %v2033_v40 = vsel %vm1925_vm4, %v1825_v13, %v1979_v43  ;;  %vm1926_vm5 = vcmp.gt.f32.partialorder %v1828_v41, 0.0  ;;  %v1980_v61 = vmul.f32 0.01, %v1828_v41  ;;  %2831 = vmatprep.mubr.bf16.mxu1 %v7707_v34 }
 0x1b4   : > { %v5154_v47 = vpack.c.bf16 %v2033_v40, %v2033_v40  ;;  %2832 = vmatmul.mubr.bf16.gmra.mrb[128].mxu1 %v7692_v8  ;;  %v2362_v46 = vor.u32 %v2361_v53, %v2357_v25 }
 0x1b5   : > { %v2034_v48 = vsel %vm1926_vm5, %v1828_v41, %v1980_v61 }
 0x1b6   : > { %v2068_v63 = vpack.c.bf16 %v2034_v48, %v2033_v40  ;;  %v1832_v5 = vpop.f32.mrb[80].mxu1  ;;  %v2484_v30 = vrot.slane %v5154_v47, 1  ;;  %v2364_v62 = vshll.u32 %v5154_v47, 16 }
 0x1b7   : > { %v1833_v15 = vadd.f32 %v7616_v12, %v1832_v5  ;;  %v5900_v59 = vpop.f32.mrb[81].mxu1 }
 0x1b8   : > { %v1835_v29 = vpop.f32.mrb[82].mxu1  ;;  %v7715_v38 = vsel %vm2446_vm8, %v2483_v36, %v2484_v30  ;;  %v2366_v56 = vrot.slane %v2364_v62, 1  ;;  %v2142_v41 = vunpack.c.h.b16 %v2068_v63 }
 0x1b9   : > { %v1981_v35 = vmul.f32 0.01, %v1833_v15  ;;  %v1836_v18 = vadd.f32 %v7616_v12, %v1835_v29  ;;  %v5901_v58 = vpop.f32.mrb[83].mxu1  ;;  %5966 = vmatprep.mubr.bf16.mxu0 %v7715_v38  ;;  %vm1927_vm6 = vcmp.gt.f32.partialorder %v1833_v15, 0.0 }
 0x1ba   : > { %v7720_v37 = vsel %vm2211_vm9, %v2362_v46, %v2366_v56 }
 0x1bb   : > { %vm1928_vm7 = vcmp.gt.f32.partialorder %v1836_v18, 0.0  ;;  %v1982_v13 = vmul.f32 0.01, %v1836_v18  ;;  %2839 = vmatprep.mubr.bf16.mxu1 %v7720_v37  ;;  %v2035_v57 = vsel %vm1927_vm6, %v1833_v15, %v1981_v35 }
 0x1bc   : > { %2840 = vmatmul.mubr.bf16.gmra.mrb[132].mxu1 %v7696_v26 }
 0x1bd   : > { %v2036_v28 = vsel %vm1928_vm7, %v1836_v18, %v1982_v13 }
 0x1be   : > { %v2069_v55 = vpack.c.bf16 %v2036_v28, %v2035_v57  ;;  %v1840_v14 = vpop.f32.mrb[84].mxu1  ;;  %v5155_v40 = vpack.c.bf16 %v2036_v28, %v2036_v28 }
 0x1bf   : > { %v1841_v7 = vadd.f32 %v7616_v12, %v1840_v14  ;;  %v5904_v43 = vpop.f32.mrb[85].mxu1 }
 0x1c0   : > { %v2143_v9 = vunpack.c.l.b16 %v2069_v55  ;;  %v1843_v61 = vpop.f32.mrb[86].mxu1  ;;  %v2487_v25 = vrot.slane %v5155_v40, 1  ;;  %v2376_v15 = vshll.u32 %v5155_v40, 16 }
 0x1c1   : > { %v1983_v47 = vmul.f32 0.01, %v1841_v7  ;;  %v1844_v53 = vadd.f32 %v7616_v12, %v1843_v61  ;;  %v5905_v48 = vpop.f32.mrb[87].mxu1  ;;  %vm1929_vm10 = vcmp.gt.f32.partialorder %v1841_v7, 0.0 }
 0x1c2   : > { %v7726_v36 = vpack.c.b16 %v2143_v9, %v2142_v41  ;;  %v2378_v55 = vrot.slane %v2376_v15, 1 }
 0x1c3   : > { %vm1930_vm11 = vcmp.gt.f32.partialorder %v1844_v53, 0.0  ;;  %v1984_v5 = vmul.f32 0.01, %v1844_v53  ;;  %v2037_v59 = vsel %vm1929_vm10, %v1841_v7, %v1983_v47 }
 0x1c4   : > { %v2486_v30 = vrot.slane %v7726_v36, 1  ;;  %v2371_v62 = vshll.u32 %v7726_v36, 16  ;;  %v2369_v35 = vshrl.u32 %v7726_v36, 16 }
 0x1c5   : > { %v2038_v63 = vsel %vm1930_vm11, %v1844_v53, %v1984_v5 }
 0x1c6   : > { %v7730_v29 = vpack.c.bf16 %v2038_v63, %v2037_v59  ;;  %v1848_v46 = vpop.f32.mrb[88].mxu1  ;;  %v7733_v56 = vsel %vm2446_vm8, %v2486_v30, %v2487_v25  ;;  %v2373_v18 = vrot.slane %v2371_v62, 1 }
 0x1c7   : > { %v1849_v58 = vadd.f32 %v7616_v12, %v1848_v46  ;;  %v5908_v13 = vpop.f32.mrb[89].mxu1  ;;  %5967 = vmatmul.mubr.bf16.gmra.mrb[80].mxu0 %v7733_v56 }
 0x1c8   : > { %v1851_v57 = vpop.f32.mrb[90].mxu1  ;;  %v2374_v28 = vor.u32 %v2373_v18, %v2369_v35  ;;  %v2383_v14 = vshll.u32 %v7730_v29, 16  ;;  %v2489_v5 = vrot.slane %v7730_v29, 1  ;;  %v2381_v15 = vshrl.u32 %v7730_v29, 16 }
 0x1c9   : > { %vm1931_vm12 = vcmp.gt.f32.partialorder %v1849_v58, 0.0  ;;  %v1985_v7 = vmul.f32 0.01, %v1849_v58  ;;  %v1852_v43 = vadd.f32 %v7616_v12, %v1851_v57  ;;  %v5909_v41 = vpop.f32.mrb[91].mxu1 }
 0x1ca   : > { %v7741_v9 = vsel %vm2211_vm9, %v2374_v28, %v2378_v55  ;;  %v2385_v53 = vrot.slane %v2383_v14, 1 }
 0x1cb   : > { %v2039_v40 = vsel %vm1931_vm12, %v1849_v58, %v1985_v7  ;;  %vm1932_vm13 = vcmp.gt.f32.partialorder %v1852_v43, 0.0  ;;  %v1986_v61 = vmul.f32 0.01, %v1852_v43  ;;  %2847 = vmatprep.mubr.bf16.mxu1 %v7741_v9 }
 0x1cc   : > { %v5156_v47 = vpack.c.bf16 %v2039_v40, %v2039_v40  ;;  %2848 = vmatmul.mubr.bf16.gmra.mrb[136].mxu1 %v7726_v36  ;;  %v2386_v58 = vor.u32 %v2385_v53, %v2381_v15 }
 0x1cd   : > { %v2040_v48 = vsel %vm1932_vm13, %v1852_v43, %v1986_v61 }
 0x1ce   : > { %v2071_v30 = vpack.c.bf16 %v2040_v48, %v2039_v40  ;;  %v1856_v25 = vpop.f32.mrb[92].mxu1  ;;  %v2490_v62 = vrot.slane %v5156_v47, 1  ;;  %v2388_v59 = vshll.u32 %v5156_v47, 16 }
 0x1cf   : > { %v1857_v63 = vadd.f32 %v7616_v12, %v1856_v25  ;;  %v5912_v46 = vpop.f32.mrb[93].mxu1 }
 0x1d0   : > { %v1859_v35 = vpop.f32.mrb[94].mxu1  ;;  %v7749_v18 = vsel %vm2446_vm8, %v2489_v5, %v2490_v62  ;;  %v2390_v13 = vrot.slane %v2388_v59, 1  ;;  %v2148_v48 = vunpack.c.h.b16 %v2071_v30 }
 0x1d1   : > { %v1987_v57 = vmul.f32 0.01, %v1857_v63  ;;  %v1860_v28 = vadd.f32 %v7616_v12, %v1859_v35  ;;  %v5913_v55 = vpop.f32.mrb[95].mxu1  ;;  %5970 = vmatprep.mubr.bf16.mxu0 %v7749_v18  ;;  %vm1933_vm14 = vcmp.gt.f32.partialorder %v1857_v63, 0.0 }
 0x1d2   : > { %v7754_v14 = vsel %vm2211_vm9, %v2386_v58, %v2390_v13 }
 0x1d3   : > { %vm1934_vm15 = vcmp.gt.f32.partialorder %v1860_v28, 0.0  ;;  %v1988_v7 = vmul.f32 0.01, %v1860_v28  ;;  %2855 = vmatprep.mubr.bf16.mxu1 %v7754_v14  ;;  %v2041_v43 = vsel %vm1933_vm14, %v1857_v63, %v1987_v57 }
 0x1d4   : > { %2856 = vmatmul.mubr.bf16.gmra.mrb[140].mxu1 %v7730_v29 }
 0x1d5   : > { %v2042_v41 = vsel %vm1934_vm15, %v1860_v28, %v1988_v7 }
 0x1d6   : > { %v2072_v40 = vpack.c.bf16 %v2042_v41, %v2041_v43  ;;  %v1864_v61 = vpop.f32.mrb[96].mxu1  ;;  %v5157_v25 = vpack.c.bf16 %v2042_v41, %v2042_v41 }
 0x1d7   : > { %v1865_v47 = vadd.f32 %v7616_v12, %v1864_v61  ;;  %v5916_v53 = vpop.f32.mrb[97].mxu1 }
 0x1d8   : > { %v2149_v5 = vunpack.c.l.b16 %v2072_v40  ;;  %v1867_v62 = vpop.f32.mrb[98].mxu1  ;;  %v2493_v57 = vrot.slane %v5157_v25, 1  ;;  %v2400_v55 = vshll.u32 %v5157_v25, 16 }
 0x1d9   : > { %vm1935_vm0 = vcmp.gt.f32.partialorder %v1865_v47, 0.0  ;;  %v1989_v15 = vmul.f32 0.01, %v1865_v47  ;;  %v1868_v59 = vadd.f32 %v7616_v12, %v1867_v62  ;;  %v5917_v46 = vpop.f32.mrb[99].mxu1 }
 0x1da   : > { %v7760_v35 = vpack.c.b16 %v2149_v5, %v2148_v48  ;;  %v2402_v5 = vrot.slane %v2400_v55, 1 }
 0x1db   : > { %v2043_v58 = vsel %vm1935_vm0, %v1865_v47, %v1989_v15  ;;  %vm1936_vm1 = vcmp.gt.f32.partialorder %v1868_v59, 0.0  ;;  %v1990_v63 = vmul.f32 0.01, %v1868_v59 }
 0x1dc   : > { %v2492_v13 = vrot.slane %v7760_v35, 1  ;;  %v2395_v28 = vshll.u32 %v7760_v35, 16  ;;  %v2393_v43 = vshrl.u32 %v7760_v35, 16 }
 0x1dd   : > { %v2044_v30 = vsel %vm1936_vm1, %v1868_v59, %v1990_v63  ;;  %v6365_v63 = vld [vmem:[%s8325_s5 + $0x1c8] sm:$0xff]  }
 0x1de   : > { %v7765_v7 = vsel %vm2446_vm8, %v2492_v13, %v2493_v57  ;;  %v2397_v41 = vrot.slane %v2395_v28, 1  ;;  %v7768_v40 = vpack.c.bf16 %v2044_v30, %v2043_v58  ;;  %v1872_v61 = vpop.f32.mrb[100].mxu1 }
 0x1df   : > { %5971 = vmatmul.mubr.bf16.gmra.mrb[84].mxu0 %v7765_v7  ;;  %v1873_v47 = vadd.f32 %v7616_v12, %v1872_v61  ;;  %v5920_v53 = vpop.f32.mrb[101].mxu1  ;;  %v6367_v61 = vld [vmem:[%s8325_s5 + $0x1d0] sm:$0xff]  }
 0x1e0   : > { %5990 = vmatprep.mubr.bf16.mxu0 %v7314_v32  ;;  %v2398_v48 = vor.u32 %v2397_v41, %v2393_v43  ;;  %v1875_v25 = vpop.f32.mrb[102].mxu1  ;;  %v6362_v32 = vld [vmem:[%s8325_s5 + $0x180] sm:$0xff]  }
 0x1e1   : > { %v1991_v62 = vmul.f32 0.01, %v1873_v47  ;;  %v1876_v15 = vadd.f32 %v7616_v12, %v1875_v25  ;;  %v5921_v59 = vpop.f32.mrb[103].mxu1  ;;  %vm1937_vm2 = vcmp.gt.f32.partialorder %v1873_v47, 0.0 }
 0x1e2   : > { %v7775_v46 = vsel %vm2211_vm9, %v2398_v48, %v2402_v5 }
 0x1e3   : > { %2863 = vmatprep.mubr.bf16.mxu1 %v7775_v46  ;;  %vm1938_vm3 = vcmp.gt.f32.partialorder %v1876_v15, 0.0  ;;  %v1992_v58 = vmul.f32 0.01, %v1876_v15  ;;  %v7786_v13 = vsel %vm1937_vm2, %v1873_v47, %v1991_v62  ;;  %v6368_v62 = vld [vmem:[%s8325_s5 + $0x190] sm:$0xff]  }
 0x1e4   : > { %2864 = vmatmul.mubr.bf16.gmra.mrb[144].mxu1 %v7760_v35 }
 0x1e5   : > { %3322 = vmatprep.mubr.bf16.mxu1 %v7239_v11  ;;  %v2046_v57 = vsel %vm1938_vm3, %v1876_v15, %v1992_v58  ;;  %v6366_v11 = vld [vmem:[%s8325_s5 + $0x188] sm:$0xff]   ;;  %v6369_v15 = vld [vmem:[%s8325_s5 + $0x1d8] sm:$0xff]  }
 0x1e6   : > { %v2074_v28 = vpack.c.bf16 %v2046_v57, %v7786_v13  ;;  %v1880_v55 = vpop.f32.mrb[104].mxu1 }
 0x1e7   : > { %5991 = vmatmul.mubr.bf16.vlgmr.msra.gmra.mrb[56].mxu0 %v7317_v4  ;;  %v1881_v30 = vadd.f32 %v7616_v12, %v1880_v55  ;;  %v5924_v43 = vpop.f32.mrb[105].mxu1  ;;  %v6373_v55 = vld [vmem:[%s8325_s5 + $0x1e8] sm:$0xff]  }
 0x1e8   : > { %5619 = vmatpush3.bf16.msra.mxu0 %v6362_v32  ;;  %5994 = vmatprep.mubr.bf16.mxu0 %v7320_v24  ;;  %v1883_v41 = vpop.f32.mrb[106].mxu1  ;;  %v6375_v43 = vld [vmem:[%s8325_s5 + $0x1f0] sm:$0xff]  }
 0x1e9   : > { %5620 = vmatprep.subr.bf16.mxu0 %v6365_v63  ;;  %vm1939_vm4 = vcmp.gt.f32.partialorder %v1881_v30, 0.0  ;;  %v1993_v47 = vmul.f32 0.01, %v1881_v30  ;;  %v1884_v53 = vadd.f32 %v7616_v12, %v1883_v41  ;;  %v5925_v48 = vpop.f32.mrb[107].mxu1  ;;  %v2154_v12 = vunpack.c.h.b16 %v2074_v28  ;;  %v6371_v63 = vld [vmem:[%s8325_s5 + $0x1e0] sm:$0xff]   ;;  %v6377_v41 = vld [vmem:[%s8325_s5 + $0x1f8] sm:$0xff]  }
 0x1ea   : > { %v6372_v28 = vld [vmem:[%s8325_s5 + $0x1a0] sm:$0xff]  }
 0x1eb   : > { %v2047_v5 = vsel %vm1939_vm4, %v1881_v30, %v1993_v47  ;;  %vm1940_vm5 = vcmp.gt.f32.partialorder %v1884_v53, 0.0  ;;  %v1994_v25 = vmul.f32 0.01, %v1884_v53  ;;  %v6374_v30 = vld [vmem:[%s8325_s5 + $0x1a8] sm:$0xff]  }
 0x1ec   : > { %3323 = vmatmul.mubr.bf16.vlgmr.msra.gmra.mrb[148].mxu1 %v7222_v60  ;;  %5621 = vmatpush3.bf16.msra.mxu0 %v6366_v11  ;;  %v6370_v60 = vld [vmem:[%s8325_s5 + $0x198] sm:$0xff]   ;;  %v6376_v11 = vld [vmem:[%s8325_s5 + $0x1b0] sm:$0xff]  }
 0x1ed   : > { %3330 = vmatprep.mubr.bf16.mxu1 %v7256_v23  ;;  %5622 = vmatprep.subr.bf16.mxu0 %v6367_v61  ;;  %v7807_v59 = vsel %vm1940_vm5, %v1884_v53, %v1994_v25  ;;  %v6378_v53 = vld [vmem:[%s8325_s5 + $0x1b8] sm:$0xff]   ;;  %v6379_v25 = vld [vmem:[%s8325_s5 + $0x200] sm:$0xff]  }
 0x1ee   : > { %v2075_v58 = vpack.c.bf16 %v7807_v59, %v2047_v5 }
 0x1ef   : > { %5995 = vmatmul.mubr.bf16.gmra.mrb[60].mxu0 %v7323_v27 }
 0x1f0   : > { %5998 = vmatprep.mubr.bf16.mxu0 %v7345_v19  ;;  %5623 = vmatpush3.bf16.msra.mxu0 %v6368_v62  ;;  %v2155_v32 = vunpack.c.l.b16 %v2075_v58 }
 0x1f1   : > { %5624 = vmatprep.subr.bf16.mxu0 %v6369_v15 }
 0x1f2   : > { %v7818_v57 = vpack.c.b16 %v2155_v32, %v2154_v12 }
 0x1f4   : > { %3331 = vmatmul.mubr.bf16.gmra.mrb[152].mxu1 %v7229_v20  ;;  %5625 = vmatpush3.bf16.msra.mxu0 %v6370_v60 }
 0x1f5   : > { %3338 = vmatprep.mubr.bf16.mxu1 %v7287_v50  ;;  %5626 = vmatprep.subr.bf16.mxu0 %v6371_v63 }
 0x1f7   : > { %5999 = vmatmul.mubr.bf16.gmra.mrb[64].mxu0 %v7454_v2 }
 0x1f8   : > { %6002 = vmatprep.mubr.bf16.mxu0 %v7519_v42  ;;  %5627 = vmatpush3.bf16.msra.mxu0 %v6372_v28 }
 0x1f9   : > { %5628 = vmatprep.subr.bf16.mxu0 %v6373_v55  ;;  %v7872_v55 = vpack.c.bf16 %v7786_v13, %v7786_v13 }
 0x1fc   : > { %3339 = vmatmul.mubr.bf16.gmra.mrb[156].mxu1 %v7272_v17  ;;  %5629 = vmatpush3.bf16.msra.mxu0 %v6374_v30 }
 0x1fd   : > { %3346 = vmatprep.mubr.bf16.mxu1 %v7295_v0  ;;  %5630 = vmatprep.subr.bf16.mxu0 %v6375_v43 }
 0x1ff   : > { %v5362_v61 = vpop.f32.mrb[32].mxu0  ;;  %6003 = vmatmul.mubr.bf16.gmra.mrb[68].mxu0 %v7571_v49 }
 0x200   : > { %v5363_v47 = vpop.f32.mrb[33].mxu0  ;;  %6006 = vmatprep.mubr.bf16.mxu0 %v7636_v6  ;;  %5631 = vmatpush3.bf16.msra.mxu0 %v6376_v11 }
 0x201   : > { %v7849_v48 = vadd.f32 %v5363_v47, %v5362_v61  ;;  %v5365_v5 = vpop.f32.mrb[34].mxu0  ;;  %5632 = vmatprep.subr.bf16.mxu0 %v6377_v41  ;;  %v2495_v47 = vrot.slane %v7768_v40, 1 }
 0x202   : > { %v5366_v62 = vpop.f32.mrb[35].mxu0 }
 0x203   : > { %v7854_v15 = vadd.f32 %v5366_v62, %v5365_v5  ;;  %v8444_v62 = vld [vmem:[#allocation8_spill] sm:$0xff] }
 0x204   : > { %3347 = vmatmul.mubr.bf16.gmra.mrb[160].mxu1 %v7280_v33  ;;  %5633 = vmatpush3.bf16.msra.mxu0 %v6378_v53  ;;  %v2496_v53 = vrot.slane %v7872_v55, 1 }
 0x205   : > { %3354 = vmatprep.mubr.bf16.mxu1 %v7355_v1  ;;  %6022 = vmatprep.subr.bf16.mxu0 %v6379_v25 }
 0x206   : > { %v7885_v13 = vsel %vm2446_vm8, %v2495_v47, %v2496_v53  ;;  %v6383_v53 = vld [vmem:[%s8325_s5 + $0x220] sm:$0xff]  }
 0x207   : > { %6007 = vmatmul.mubr.bf16.gmra.mrb[72].mxu0 %v7671_v51 }
 0x208   : > { %6010 = vmatprep.mubr.bf16.mxu0 %v7699_v10 }
 0x20c   : > { %3355 = vmatmul.mubr.bf16.gmra.mrb[164].mxu1 %v7328_v39 }
 0x20d   : > { %3362 = vmatprep.mubr.bf16.mxu1 %v7397_v52 }
 0x20f   : > { %v5368_v12 = vpop.f32.mrb[36].mxu0  ;;  %6011 = vmatmul.mubr.bf16.gmra.mrb[76].mxu0 %v7715_v38 }
 0x210   : > { %v5369_v58 = vpop.f32.mrb[37].mxu0  ;;  %6014 = vmatprep.mubr.bf16.mxu0 %v7733_v56 }
 0x211   : > { %v7864_v60 = vadd.f32 %v5369_v58, %v5368_v12  ;;  %v5371_v32 = vpop.f32.mrb[38].mxu0  ;;  %v6380_v12 = vld [vmem:[%s8325_s5 + $0x208] sm:$0xff]  }
 0x212   : > { %v5372_v63 = vpop.f32.mrb[39].mxu0 }
 0x213   : > { %v7866_v28 = vadd.f32 %v5372_v63, %v5371_v32 }
 0x214   : > { %3363 = vmatmul.mubr.bf16.gmra.mrb[168].mxu1 %v7336_v21 }
 0x215   : > { %3370 = vmatprep.mubr.bf16.mxu1 %v7524_v22 }
 0x217   : > { %v5374_v30 = vpop.f32.mrb[40].mxu0  ;;  %6015 = vmatmul.mubr.bf16.gmra.mrb[80].mxu0 %v7749_v18 }
 0x218   : > { %v5375_v43 = vpop.f32.mrb[41].mxu0  ;;  %6018 = vmatprep.mubr.bf16.mxu0 %v7765_v7 }
 0x219   : > { %v7876_v11 = vadd.f32 %v5375_v43, %v5374_v30  ;;  %v5377_v41 = vpop.f32.mrb[42].mxu0 }
 0x21a   : > { %v5378_v61 = vpop.f32.mrb[43].mxu0 }
 0x21b   : > { %v7880_v5 = vadd.f32 %v5378_v61, %v5377_v41 }
 0x21c   : > { %3371 = vmatmul.mubr.bf16.gmra.mrb[172].mxu1 %v8444_v62 }
 0x21d   : > { %3378 = vmatprep.mubr.bf16.mxu1 %v7579_v31 }
 0x21f   : > { %6019 = vmatmul.mubr.bf16.gmra.mrb[84].mxu0 %v7885_v13 }
 0x220   : > { %3933 = vmatprep.mubr.bf16.mxu0 %v7256_v23  ;;  %v6381_v23 = vld [vmem:[%s8325_s5 + $0x210] sm:$0xff]  }
 0x224   : > { %3379 = vmatmul.mubr.bf16.gmra.mrb[176].mxu1 %v7496_v16 }
 0x225   : > { %3386 = vmatprep.mubr.bf16.mxu1 %v7650_v54 }
 0x227   : > { %v5380_v58 = vpop.f32.mrb[44].mxu0  ;;  %3934 = vmatmul.mubr.bf16.vlgmr.msra.gmra.mrb[88].mxu0 %v7229_v20  ;;  %v6382_v20 = vld [vmem:[%s8325_s5 + $0x218] sm:$0xff]  }
 0x228   : > { %6023 = vmatpush3.bf16.msra.mxu0 %v6379_v25  ;;  %v5381_v32 = vpop.f32.mrb[45].mxu0  ;;  %3941 = vmatprep.mubr.bf16.mxu0 %v7287_v50 }
 0x229   : > { %v7896_v63 = vadd.f32 %v5381_v32, %v5380_v58  ;;  %v5383_v30 = vpop.f32.mrb[46].mxu0  ;;  %6024 = vmatprep.subr.bf16.mxu0 %v6380_v12  ;;  %v6386_v32 = vld [vmem:[%s8325_s5 + $0x238] sm:$0xff]  }
 0x22a   : > { %v5384_v43 = vpop.f32.mrb[47].mxu0 }
 0x22b   : > { %v7901_v41 = vadd.f32 %v5384_v43, %v5383_v30 }
 0x22c   : > { %3387 = vmatmul.mubr.bf16.gmra.mrb[180].mxu1 %v7621_v44  ;;  %6025 = vmatpush3.bf16.msra.mxu0 %v6380_v12 }
 0x22d   : > { %3394 = vmatprep.mubr.bf16.mxu1 %v7676_v45  ;;  %6026 = vmatprep.subr.bf16.mxu0 %v6381_v23 }
 0x22f   : > { %v5386_v50 = vpop.f32.mrb[48].mxu0  ;;  %3942 = vmatmul.mubr.bf16.gmra.mrb[92].mxu0 %v7272_v17  ;;  %v6384_v17 = vld [vmem:[%s8325_s5 + $0x228] sm:$0xff]  }
 0x230   : > { %v5387_v25 = vpop.f32.mrb[49].mxu0  ;;  %3949 = vmatprep.mubr.bf16.mxu0 %v7295_v0  ;;  %6027 = vmatpush3.bf16.msra.mxu0 %v6381_v23  ;;  %v6385_v0 = vld [vmem:[%s8325_s5 + $0x230] sm:$0xff]  }
 0x231   : > { %v7910_v61 = vadd.f32 %v5387_v25, %v5386_v50  ;;  %v5389_v47 = vpop.f32.mrb[50].mxu0  ;;  %6028 = vmatprep.subr.bf16.mxu0 %v6382_v20 }
 0x232   : > { %v5390_v12 = vpop.f32.mrb[51].mxu0 }
 0x233   : > { %v7915_v58 = vadd.f32 %v5390_v12, %v5389_v47  ;;  %v2407_v12 = vshll.u32 %v7768_v40, 16 }
 0x234   : > { %3395 = vmatmul.mubr.bf16.gmra.mrb[184].mxu1 %v7633_v3  ;;  %6029 = vmatpush3.bf16.msra.mxu0 %v6382_v20 }
 0x235   : > { %3402 = vmatprep.mubr.bf16.mxu1 %v7707_v34  ;;  %6030 = vmatprep.subr.bf16.mxu0 %v6383_v53 }
 0x237   : > { %3950 = vmatmul.mubr.bf16.gmra.mrb[96].mxu0 %v7280_v33 }
 0x238   : > { %3957 = vmatprep.mubr.bf16.mxu0 %v7355_v1  ;;  %6031 = vmatpush3.bf16.msra.mxu0 %v6383_v53 }
 0x239   : > { %6032 = vmatprep.subr.bf16.mxu0 %v6384_v17 }
 0x23c   : > { %3403 = vmatmul.mubr.bf16.gmra.mrb[188].mxu1 %v7692_v8  ;;  %6033 = vmatpush3.bf16.msra.mxu0 %v6384_v17  ;;  %v2412_v17 = vshll.u32 %v7872_v55, 16 }
 0x23d   : > { %3410 = vmatprep.mubr.bf16.mxu1 %v7720_v37  ;;  %6034 = vmatprep.subr.bf16.mxu0 %v6385_v0 }
 0x23f   : > { %v5392_v30 = vpop.f32.mrb[52].mxu0  ;;  %3958 = vmatmul.mubr.bf16.gmra.mrb[100].mxu0 %v7328_v39 }
 0x240   : > { %v5393_v33 = vpop.f32.mrb[53].mxu0  ;;  %3965 = vmatprep.mubr.bf16.mxu0 %v7397_v52  ;;  %6035 = vmatpush3.bf16.msra.mxu0 %v6385_v0 }
 0x241   : > { %v7934_v1 = vadd.f32 %v5393_v33, %v5392_v30  ;;  %v5395_v23 = vpop.f32.mrb[54].mxu0  ;;  %6036 = vmatprep.subr.bf16.mxu0 %v6386_v32  ;;  %v2414_v30 = vrot.slane %v2412_v17, 1 }
 0x242   : > { %v5396_v43 = vpop.f32.mrb[55].mxu0 }
 0x243   : > { %v7936_v20 = vadd.f32 %v5396_v43, %v5395_v23 }
 0x244   : > { %3411 = vmatmul.mubr.bf16.gmra.mrb[192].mxu1 %v7696_v26  ;;  %6037 = vmatpush3.bf16.msra.mxu0 %v6386_v32 }
 0x245   : > { %3418 = vmatprep.mubr.bf16.mxu1 %v7741_v9 }
 0x247   : > { %v5398_v50 = vpop.f32.mrb[108].mxu1  ;;  %3966 = vmatmul.mubr.bf16.gmra.mrb[104].mxu0 %v7336_v21  ;;  %v2405_v21 = vshrl.u32 %v7768_v40, 16 }
 0x248   : > { %v5399_v39 = vpop.f32.mrb[109].mxu1  ;;  %3973 = vmatprep.mubr.bf16.mxu0 %v7524_v22  ;;  %v2409_v22 = vrot.slane %v2407_v12, 1 }
 0x249   : > { %v7942_v52 = vadd.f32 %v5399_v39, %v5398_v50  ;;  %v5401_v25 = vpop.f32.mrb[110].mxu1 }
 0x24a   : > { %v5402_v47 = vpop.f32.mrb[111].mxu1 }
 0x24b   : > { %v7944_v53 = vadd.f32 %v5402_v47, %v5401_v25 }
 0x24c   : > { %3419 = vmatmul.mubr.bf16.gmra.mrb[196].mxu1 %v7726_v36 }
 0x24d   : > { %3426 = vmatprep.mubr.bf16.mxu1 %v7754_v14 }
 0x24f   : > { %3974 = vmatmul.mubr.bf16.gmra.mrb[108].mxu0 %v8444_v62  ;;  %v2410_v62 = vor.u32 %v2409_v22, %v2405_v21 }
 0x250   : > { %3981 = vmatprep.mubr.bf16.mxu0 %v7579_v31 }
 0x251   : > { %v2415_v55 = vsel %vm2211_vm9, %v2410_v62, %v2414_v30 }
 0x254   : > { %3427 = vmatmul.mubr.bf16.gmra.mrb[200].mxu1 %v7730_v29 }
 0x255   : > { %3434 = vmatprep.mubr.bf16.mxu1 %v7775_v46 }
 0x257   : > { %v5404_v0 = vpop.f32.mrb[112].mxu1  ;;  %3982 = vmatmul.mubr.bf16.gmra.mrb[112].mxu0 %v7496_v16 }
 0x258   : > { %v5405_v32 = vpop.f32.mrb[113].mxu1  ;;  %3989 = vmatprep.mubr.bf16.mxu0 %v7650_v54 }
 0x259   : > { %v7957_v31 = vadd.f32 %v5405_v32, %v5404_v0  ;;  %v5407_v33 = vpop.f32.mrb[114].mxu1 }
 0x25a   : > { %v5408_v23 = vpop.f32.mrb[115].mxu1 }
 0x25b   : > { %v7959_v43 = vadd.f32 %v5408_v23, %v5407_v33  ;;  %v7992_v23 = vpack.c.bf16 %v7807_v59, %v7807_v59 }
 0x25c   : > { %3435 = vmatmul.mubr.bf16.gmra.mrb[204].mxu1 %v7760_v35 }
 0x25d   : > { %3442 = vmatprep.mubr.bf16.mxu1 %v2415_v55 }
 0x25f   : > { %v5410_v50 = vpop.f32.mrb[116].mxu1  ;;  %3990 = vmatmul.mubr.bf16.gmra.mrb[116].mxu0 %v7621_v44 }
 0x260   : > { %v5411_v16 = vpop.f32.mrb[117].mxu1  ;;  %3997 = vmatprep.mubr.bf16.mxu0 %v7676_v45 }
 0x261   : > { %v7965_v54 = vadd.f32 %v5411_v16, %v5410_v50  ;;  %v5413_v39 = vpop.f32.mrb[118].mxu1 }
 0x262   : > { %v5414_v25 = vpop.f32.mrb[119].mxu1 }
 0x263   : > { %v7967_v47 = vadd.f32 %v5414_v25, %v5413_v39 }
 0x264   : > { %3443 = vmatmul.mubr.bf16.gmra.mrb[208].mxu1 %v7768_v40 }
 0x267   : > { %3998 = vmatmul.mubr.bf16.gmra.mrb[120].mxu0 %v7633_v3 }
 0x268   : > { %4005 = vmatprep.mubr.bf16.mxu0 %v7707_v34 }
 0x26f   : > { %v5416_v12 = vpop.f32.mrb[120].mxu1  ;;  %4006 = vmatmul.mubr.bf16.gmra.mrb[124].mxu0 %v7692_v8 }
 0x270   : > { %v5417_v21 = vpop.f32.mrb[121].mxu1  ;;  %4013 = vmatprep.mubr.bf16.mxu0 %v7720_v37 }
 0x271   : > { %v7974_v44 = vadd.f32 %v5417_v21, %v5416_v12  ;;  %v5419_v45 = vpop.f32.mrb[122].mxu1 }
 0x272   : > { %v5420_v22 = vpop.f32.mrb[123].mxu1 }
 0x273   : > { %v7976_v17 = vadd.f32 %v5420_v22, %v5419_v45 }
 0x277   : > { %v5422_v0 = vpop.f32.mrb[124].mxu1  ;;  %4014 = vmatmul.mubr.bf16.gmra.mrb[128].mxu0 %v7696_v26 }
 0x278   : > { %v5423_v32 = vpop.f32.mrb[125].mxu1  ;;  %4021 = vmatprep.mubr.bf16.mxu0 %v7741_v9 }
 0x279   : > { %v7980_v3 = vadd.f32 %v5423_v32, %v5422_v0  ;;  %v5425_v34 = vpop.f32.mrb[126].mxu1 }
 0x27a   : > { %v5426_v62 = vpop.f32.mrb[127].mxu1 }
 0x27b   : > { %v7982_v8 = vadd.f32 %v5426_v62, %v5425_v34 }
 0x27f   : > { %4022 = vmatmul.mubr.bf16.gmra.mrb[132].mxu0 %v7726_v36  ;;  %v2419_v36 = vshll.u32 %v7818_v57, 16 }
 0x280   : > { %4029 = vmatprep.mubr.bf16.mxu0 %v7754_v14 }
 0x281   : > { %v2421_v14 = vrot.slane %v2419_v36, 1 }
 0x287   : > { %v5428_v37 = vpop.f32.mrb[128].mxu1  ;;  %4030 = vmatmul.mubr.bf16.gmra.mrb[136].mxu0 %v7730_v29  ;;  %v2417_v29 = vshrl.u32 %v7818_v57, 16 }
 0x288   : > { %v5429_v30 = vpop.f32.mrb[129].mxu1  ;;  %4037 = vmatprep.mubr.bf16.mxu0 %v7775_v46  ;;  %v2424_v46 = vshll.u32 %v7992_v23, 16 }
 0x289   : > { %v7988_v26 = vadd.f32 %v5429_v30, %v5428_v37  ;;  %v5431_v33 = vpop.f32.mrb[130].mxu1  ;;  %v2422_v45 = vor.u32 %v2421_v14, %v2417_v29 }
 0x28a   : > { %v5432_v9 = vpop.f32.mrb[131].mxu1  ;;  %v2426_v22 = vrot.slane %v2424_v46, 1 }
 0x28b   : > { %v7994_v50 = vadd.f32 %v5432_v9, %v5431_v33 }
 0x28c   : > { %v2427_v0 = vsel %vm2211_vm9, %v2422_v45, %v2426_v22 }
 0x28f   : > { %v5434_v16 = vpop.f32.mrb[132].mxu1  ;;  %4038 = vmatmul.mubr.bf16.gmra.mrb[140].mxu0 %v7760_v35 }
 0x290   : > { %v5435_v39 = vpop.f32.mrb[133].mxu1  ;;  %4045 = vmatprep.mubr.bf16.mxu0 %v2415_v55 }
 0x291   : > { %v8000_v25 = vadd.f32 %v5435_v39, %v5434_v16  ;;  %v5437_v12 = vpop.f32.mrb[134].mxu1 }
 0x292   : > { %v5438_v21 = vpop.f32.mrb[135].mxu1 }
 0x293   : > { %v8002_v59 = vadd.f32 %v5438_v21, %v5437_v12 }
 0x297   : > { %4046 = vmatmul.mubr.bf16.gmra.mrb[144].mxu0 %v7768_v40 }
 0x298   : > { %4053 = vmatprep.mubr.bf16.mxu0 %v2427_v0 }
 0x29f   : > { %v5440_v35 = vpop.f32.mrb[136].mxu1  ;;  %4054 = vmatmul.mubr.bf16.gmra.mrb[148].mxu0 %v7818_v57 }
 0x2a0   : > { %v5441_v32 = vpop.f32.mrb[137].mxu1  ;;  %6038 = vmatprep.mubr.bf16.mxu0 %v7317_v4 }
 0x2a1   : > { %v8008_v55 = vadd.f32 %v5441_v32, %v5440_v35  ;;  %v5443_v34 = vpop.f32.mrb[138].mxu1 }
 0x2a2   : > { %v5444_v62 = vpop.f32.mrb[139].mxu1 }
 0x2a3   : > { %v8010_v37 = vadd.f32 %v5444_v62, %v5443_v34 }
 0x2a7   : > { %v5446_v30 = vpop.f32.mrb[140].mxu1  ;;  %6039 = vmatmul.mubr.bf16.vlgmr.msra.gmra.mrb[56].mxu0 %v7320_v24 }
 0x2a8   : > { %v5447_v33 = vpop.f32.mrb[141].mxu1  ;;  %6042 = vmatprep.mubr.bf16.mxu0 %v7323_v27 }
 0x2a9   : > { %v8014_v40 = vadd.f32 %v5447_v33, %v5446_v30  ;;  %v5449_v9 = vpop.f32.mrb[142].mxu1 }
 0x2aa   : > { %v5450_v36 = vpop.f32.mrb[143].mxu1 }
 0x2ab   : > { %v8016_v16 = vadd.f32 %v5450_v36, %v5449_v9 }
 0x2af   : > { %6043 = vmatmul.mubr.bf16.gmra.mrb[60].mxu0 %v7345_v19 }
 0x2b0   : > { %6046 = vmatprep.mubr.bf16.mxu0 %v7454_v2 }
 0x2b7   : > { %v5452_v4 = vpop.f32.mrb[144].mxu1  ;;  %6047 = vmatmul.mubr.bf16.gmra.mrb[64].mxu0 %v7519_v42 }
 0x2b8   : > { %v5453_v29 = vpop.f32.mrb[145].mxu1  ;;  %6050 = vmatprep.mubr.bf16.mxu0 %v7571_v49 }
 0x2b9   : > { %v8022_v24 = vadd.f32 %v5453_v29, %v5452_v4  ;;  %v5455_v14 = vpop.f32.mrb[146].mxu1 }
 0x2ba   : > { %v5456_v27 = vpop.f32.mrb[147].mxu1 }
 0x2bb   : > { %v8024_v46 = vadd.f32 %v5456_v27, %v5455_v14  ;;  %v2499_v14 = vrot.slane %v7992_v23, 1 }
 0x2bf   : > { %v5498_v39 = vpop.f32.mrb[148].mxu1  ;;  %6051 = vmatmul.mubr.bf16.gmra.mrb[68].mxu0 %v7636_v6 }
 0x2c0   : > { %v5499_v12 = vpop.f32.mrb[149].mxu1  ;;  %6054 = vmatprep.mubr.bf16.mxu0 %v7671_v51 }
 0x2c1   : > { %v5500_v19 = vadd.f32 %v5499_v12, %v5498_v39  ;;  %v5501_v2 = vpop.f32.mrb[150].mxu1 }
 0x2c2   : > { %v5502_v21 = vpop.f32.mrb[151].mxu1 }
 0x2c3   : > { %v8029_v42 = vadd.f32 %v5500_v19, %v7849_v48  ;;  %v5503_v45 = vadd.f32 %v5502_v21, %v5501_v2 }
 0x2c5   : > { %v8032_v49 = vadd.f32 %v5503_v45, %v7854_v15 }
 0x2c7   : > { %v5504_v22 = vpop.f32.mrb[152].mxu1  ;;  %6055 = vmatmul.mubr.bf16.gmra.mrb[72].mxu0 %v7699_v10 }
 0x2c8   : > { %v5505_v0 = vpop.f32.mrb[153].mxu1  ;;  %6058 = vmatprep.mubr.bf16.mxu0 %v7715_v38 }
 0x2c9   : > { %v5506_v6 = vadd.f32 %v5505_v0, %v5504_v22  ;;  %v5507_v35 = vpop.f32.mrb[154].mxu1 }
 0x2ca   : > { %v5508_v32 = vpop.f32.mrb[155].mxu1 }
 0x2cb   : > { %v8037_v51 = vadd.f32 %v5506_v6, %v7864_v60  ;;  %v5509_v34 = vadd.f32 %v5508_v32, %v5507_v35 }
 0x2cd   : > { %v8040_v48 = vadd.f32 %v5509_v34, %v7866_v28 }
 0x2cf   : > { %v5510_v62 = vpop.f32.mrb[156].mxu1  ;;  %6059 = vmatmul.mubr.bf16.gmra.mrb[76].mxu0 %v7733_v56 }
 0x2d0   : > { %v5511_v15 = vpop.f32.mrb[157].mxu1  ;;  %6062 = vmatprep.mubr.bf16.mxu0 %v7749_v18  ;;  %v2498_v18 = vrot.slane %v7818_v57, 1 }
 0x2d1   : > { %v5512_v10 = vadd.f32 %v5511_v15, %v5510_v62  ;;  %v5513_v30 = vpop.f32.mrb[158].mxu1 }
 0x2d2   : > { %v5514_v33 = vpop.f32.mrb[159].mxu1  ;;  %v2500_v39 = vsel %vm2446_vm8, %v2498_v18, %v2499_v14 }
 0x2d3   : > { %v8045_v38 = vadd.f32 %v5512_v10, %v7876_v11  ;;  %v5515_v9 = vadd.f32 %v5514_v33, %v5513_v30 }
 0x2d5   : > { %v8048_v60 = vadd.f32 %v5515_v9, %v7880_v5 }
 0x2d7   : > { %v5516_v36 = vpop.f32.mrb[160].mxu1  ;;  %6063 = vmatmul.mubr.bf16.gmra.mrb[80].mxu0 %v7765_v7 }
 0x2d8   : > { %v5517_v28 = vpop.f32.mrb[161].mxu1  ;;  %6066 = vmatprep.mubr.bf16.mxu0 %v7885_v13 }
 0x2d9   : > { %v5518_v56 = vadd.f32 %v5517_v28, %v5516_v36  ;;  %v5519_v4 = vpop.f32.mrb[162].mxu1 }
 0x2da   : > { %v5520_v29 = vpop.f32.mrb[163].mxu1 }
 0x2db   : > { %v8055_v11 = vadd.f32 %v5518_v56, %v7896_v63  ;;  %v5521_v27 = vadd.f32 %v5520_v29, %v5519_v4 }
 0x2dd   : > { %v8058_v5 = vadd.f32 %v5521_v27, %v7901_v41 }
 0x2df   : > { %v5522_v7 = vpop.f32.mrb[164].mxu1  ;;  %6067 = vmatmul.mubr.bf16.gmra.mrb[84].mxu0 %v2500_v39 }
 0x2e0   : > { %v5523_v12 = vpop.f32.mrb[165].mxu1 }
 0x2e1   : > { %v5524_v13 = vadd.f32 %v5523_v12, %v5522_v7  ;;  %v5525_v19 = vpop.f32.mrb[166].mxu1 }
 0x2e2   : > { %v5526_v2 = vpop.f32.mrb[167].mxu1 }
 0x2e3   : > { %v8062_v21 = vadd.f32 %v5524_v13, %v7910_v61  ;;  %v5527_v57 = vadd.f32 %v5526_v2, %v5525_v19 }
 0x2e5   : > { %v8065_v23 = vadd.f32 %v5527_v57, %v7915_v58 }
 0x2e7   : > { %v5528_v63 = vpop.f32.mrb[168].mxu1 }
 0x2e8   : > { %v5529_v45 = vpop.f32.mrb[169].mxu1 }
 0x2e9   : > { %v5530_v22 = vadd.f32 %v5529_v45, %v5528_v63  ;;  %v5531_v41 = vpop.f32.mrb[170].mxu1 }
 0x2ea   : > { %v5532_v0 = vpop.f32.mrb[171].mxu1 }
 0x2eb   : > { %v8068_v6 = vadd.f32 %v5530_v22, %v7934_v1  ;;  %v5533_v35 = vadd.f32 %v5532_v0, %v5531_v41 }
 0x2ed   : > { %v8071_v32 = vadd.f32 %v5533_v35, %v7936_v20 }
 0x2ef   : > { %v5534_v34 = vpop.f32.mrb[172].mxu1 }
 0x2f0   : > { %v5535_v62 = vpop.f32.mrb[173].mxu1 }
 0x2f1   : > { %v5536_v61 = vadd.f32 %v5535_v62, %v5534_v34  ;;  %v5537_v15 = vpop.f32.mrb[174].mxu1 }
 0x2f2   : > { %v5538_v10 = vpop.f32.mrb[175].mxu1 }
 0x2f3   : > { %v8074_v58 = vadd.f32 %v5536_v61, %v7942_v52  ;;  %v5539_v30 = vadd.f32 %v5538_v10, %v5537_v15 }
 0x2f5   : > { %v8077_v33 = vadd.f32 %v5539_v30, %v7944_v53 }
 0x2f7   : > { %v5540_v9 = vpop.f32.mrb[176].mxu1 }
 0x2f8   : > { %v5541_v36 = vpop.f32.mrb[177].mxu1 }
 0x2f9   : > { %v5542_v1 = vadd.f32 %v5541_v36, %v5540_v9  ;;  %v5543_v28 = vpop.f32.mrb[178].mxu1 }
 0x2fa   : > { %v5544_v56 = vpop.f32.mrb[179].mxu1  ;;  %v5634_v4 = vpop.f32.mrb[88].mxu0 }
 0x2fb   : > { %v8080_v20 = vadd.f32 %v5542_v1, %v7957_v31  ;;  %v5545_v29 = vadd.f32 %v5544_v56, %v5543_v28  ;;  %v5635_v18 = vpop.f32.mrb[89].mxu0 }
 0x2fc   : > { %v5636_v14 = vadd.f32 %v5635_v18, %v5634_v4  ;;  %v5637_v27 = vpop.f32.mrb[90].mxu0 }
 0x2fd   : > { %v8083_v52 = vadd.f32 %v5545_v29, %v7959_v43  ;;  %v5638_v39 = vpop.f32.mrb[91].mxu0 }
 0x2fe   : > { %v5639_v7 = vadd.f32 %v5638_v39, %v5637_v27  ;;  %v8086_v53 = vadd.f32 %v8029_v42, %v5636_v14 }
 0x2ff   : > { %v5546_v12 = vpop.f32.mrb[180].mxu1 }
 0x300   : > { %v5547_v13 = vpop.f32.mrb[181].mxu1  ;;  %v8089_v19 = vadd.f32 %v8032_v49, %v5639_v7 }
 0x301   : > { %v5548_v2 = vadd.f32 %v5547_v13, %v5546_v12  ;;  %v5549_v31 = vpop.f32.mrb[182].mxu1 }
 0x302   : > { %v5550_v57 = vpop.f32.mrb[183].mxu1  ;;  %v5640_v63 = vpop.f32.mrb[92].mxu0 }
 0x303   : > { %v8092_v45 = vadd.f32 %v5548_v2, %v7965_v54  ;;  %v5551_v22 = vadd.f32 %v5550_v57, %v5549_v31  ;;  %v5641_v43 = vpop.f32.mrb[93].mxu0 }
 0x304   : > { %v5642_v41 = vadd.f32 %v5641_v43, %v5640_v63  ;;  %v5643_v0 = vpop.f32.mrb[94].mxu0 }
 0x305   : > { %v8095_v35 = vadd.f32 %v5551_v22, %v7967_v47  ;;  %v5644_v42 = vpop.f32.mrb[95].mxu0 }
 0x306   : > { %v5645_v34 = vadd.f32 %v5644_v42, %v5643_v0  ;;  %v8098_v62 = vadd.f32 %v8037_v51, %v5642_v41 }
 0x307   : > { %v5552_v49 = vpop.f32.mrb[184].mxu1 }
 0x308   : > { %v5553_v61 = vpop.f32.mrb[185].mxu1  ;;  %v8101_v15 = vadd.f32 %v8040_v48, %v5645_v34 }
 0x309   : > { %v5554_v10 = vadd.f32 %v5553_v61, %v5552_v49  ;;  %v5555_v54 = vpop.f32.mrb[186].mxu1 }
 0x30a   : > { %v5556_v30 = vpop.f32.mrb[187].mxu1  ;;  %v5646_v9 = vpop.f32.mrb[96].mxu0 }
 0x30b   : > { %v8104_v36 = vadd.f32 %v5554_v10, %v7974_v44  ;;  %v5557_v1 = vadd.f32 %v5556_v30, %v5555_v54  ;;  %v5647_v47 = vpop.f32.mrb[97].mxu0 }
 0x30c   : > { %v5648_v28 = vadd.f32 %v5647_v47, %v5646_v9  ;;  %v5649_v56 = vpop.f32.mrb[98].mxu0 }
 0x30d   : > { %v8107_v4 = vadd.f32 %v5557_v1, %v7976_v17  ;;  %v5650_v51 = vpop.f32.mrb[99].mxu0 }
 0x30e   : > { %v5651_v29 = vadd.f32 %v5650_v51, %v5649_v56  ;;  %v8110_v18 = vadd.f32 %v8045_v38, %v5648_v28 }
 0x30f   : > { %v5558_v48 = vpop.f32.mrb[188].mxu1 }
 0x310   : > { %v5559_v14 = vpop.f32.mrb[189].mxu1  ;;  %v8113_v27 = vadd.f32 %v8048_v60, %v5651_v29 }
 0x311   : > { %v5560_v39 = vadd.f32 %v5559_v14, %v5558_v48  ;;  %v5561_v44 = vpop.f32.mrb[190].mxu1 }
 0x312   : > { %v5562_v7 = vpop.f32.mrb[191].mxu1  ;;  %v5652_v12 = vpop.f32.mrb[100].mxu0 }
 0x313   : > { %v8116_v13 = vadd.f32 %v5560_v39, %v7980_v3  ;;  %v5563_v2 = vadd.f32 %v5562_v7, %v5561_v44  ;;  %v5653_v17 = vpop.f32.mrb[101].mxu0 }
 0x314   : > { %v5654_v31 = vadd.f32 %v5653_v17, %v5652_v12  ;;  %v5655_v57 = vpop.f32.mrb[102].mxu0 }
 0x315   : > { %v8119_v63 = vadd.f32 %v5563_v2, %v7982_v8  ;;  %v5656_v38 = vpop.f32.mrb[103].mxu0 }
 0x316   : > { %v5657_v22 = vadd.f32 %v5656_v38, %v5655_v57  ;;  %v8122_v43 = vadd.f32 %v8055_v11, %v5654_v31 }
 0x317   : > { %v5564_v60 = vpop.f32.mrb[192].mxu1 }
 0x318   : > { %v5565_v41 = vpop.f32.mrb[193].mxu1  ;;  %v8125_v0 = vadd.f32 %v8058_v5, %v5657_v22 }
 0x319   : > { %v5566_v42 = vadd.f32 %v5565_v41, %v5564_v60  ;;  %v5567_v3 = vpop.f32.mrb[194].mxu1 }
 0x31a   : > { %v5568_v34 = vpop.f32.mrb[195].mxu1  ;;  %v5658_v49 = vpop.f32.mrb[104].mxu0 }
 0x31b   : > { %v8128_v61 = vadd.f32 %v5566_v42, %v7988_v26  ;;  %v5569_v10 = vadd.f32 %v5568_v34, %v5567_v3  ;;  %v5659_v8 = vpop.f32.mrb[105].mxu0 }
 0x31c   : > { %v5660_v54 = vadd.f32 %v5659_v8, %v5658_v49  ;;  %v5661_v30 = vpop.f32.mrb[106].mxu0 }
 0x31d   : > { %v8131_v9 = vadd.f32 %v5569_v10, %v7994_v50  ;;  %v5662_v11 = vpop.f32.mrb[107].mxu0 }
 0x31e   : > { %v5663_v1 = vadd.f32 %v5662_v11, %v5661_v30  ;;  %v8134_v47 = vadd.f32 %v8062_v21, %v5660_v54 }
 0x31f   : > { %v5570_v5 = vpop.f32.mrb[196].mxu1 }
 0x320   : > { %v5571_v28 = vpop.f32.mrb[197].mxu1  ;;  %v8137_v56 = vadd.f32 %v8065_v23, %v5663_v1 }
 0x321   : > { %v5572_v51 = vadd.f32 %v5571_v28, %v5570_v5  ;;  %v5573_v26 = vpop.f32.mrb[198].mxu1 }
 0x322   : > { %v5574_v29 = vpop.f32.mrb[199].mxu1  ;;  %v5664_v48 = vpop.f32.mrb[108].mxu0 }
 0x323   : > { %v8140_v14 = vadd.f32 %v5572_v51, %v8000_v25  ;;  %v5575_v39 = vadd.f32 %v5574_v29, %v5573_v26  ;;  %v5665_v50 = vpop.f32.mrb[109].mxu0 }
 0x324   : > { %v5666_v44 = vadd.f32 %v5665_v50, %v5664_v48  ;;  %v5667_v7 = vpop.f32.mrb[110].mxu0 }
 0x325   : > { %v8143_v12 = vadd.f32 %v5575_v39, %v8002_v59  ;;  %v5668_v21 = vpop.f32.mrb[111].mxu0 }
 0x326   : > { %v5669_v2 = vadd.f32 %v5668_v21, %v5667_v7  ;;  %v8146_v17 = vadd.f32 %v8068_v6, %v5666_v44 }
 0x327   : > { %v5576_v23 = vpop.f32.mrb[200].mxu1 }
 0x328   : > { %v5577_v31 = vpop.f32.mrb[201].mxu1  ;;  %v8149_v57 = vadd.f32 %v8071_v32, %v5669_v2 }
 0x329   : > { %v5578_v38 = vadd.f32 %v5577_v31, %v5576_v23  ;;  %v5579_v25 = vpop.f32.mrb[202].mxu1 }
 0x32a   : > { %v5580_v22 = vpop.f32.mrb[203].mxu1  ;;  %v5670_v60 = vpop.f32.mrb[112].mxu0 }
 0x32b   : > { %v8152_v41 = vadd.f32 %v5578_v38, %v8008_v55  ;;  %v5581_v42 = vadd.f32 %v5580_v22, %v5579_v25  ;;  %v5671_v59 = vpop.f32.mrb[113].mxu0 }
 0x32c   : > { %v5672_v3 = vadd.f32 %v5671_v59, %v5670_v60  ;;  %v5673_v34 = vpop.f32.mrb[114].mxu0 }
 0x32d   : > { %v8155_v49 = vadd.f32 %v5581_v42, %v8010_v37  ;;  %v5674_v6 = vpop.f32.mrb[115].mxu0 }
 0x32e   : > { %v5675_v10 = vadd.f32 %v5674_v6, %v5673_v34  ;;  %v8158_v8 = vadd.f32 %v8074_v58, %v5672_v3 }
 0x32f   : > { %v5582_v32 = vpop.f32.mrb[204].mxu1 }
 0x330   : > { %v5583_v54 = vpop.f32.mrb[205].mxu1  ;;  %v8161_v30 = vadd.f32 %v8077_v33, %v5675_v10 }
 0x331   : > { %v5584_v11 = vadd.f32 %v5583_v54, %v5582_v32  ;;  %v5585_v55 = vpop.f32.mrb[206].mxu1 }
 0x332   : > { %v5586_v1 = vpop.f32.mrb[207].mxu1  ;;  %v5676_v5 = vpop.f32.mrb[116].mxu0 }
 0x333   : > { %v8164_v28 = vadd.f32 %v5584_v11, %v8014_v40  ;;  %v5587_v51 = vadd.f32 %v5586_v1, %v5585_v55  ;;  %v5677_v37 = vpop.f32.mrb[117].mxu0 }
 0x334   : > { %v5678_v26 = vadd.f32 %v5677_v37, %v5676_v5  ;;  %v5679_v29 = vpop.f32.mrb[118].mxu0 }
 0x335   : > { %v8167_v48 = vadd.f32 %v5587_v51, %v8016_v16  ;;  %v5680_v58 = vpop.f32.mrb[119].mxu0 }
 0x336   : > { %v5681_v39 = vadd.f32 %v5680_v58, %v5679_v29  ;;  %v8170_v50 = vadd.f32 %v8080_v20, %v5678_v26 }
 0x337   : > { %v5588_v33 = vpop.f32.mrb[208].mxu1 }
 0x338   : > { %v5589_v44 = vpop.f32.mrb[209].mxu1  ;;  %v8173_v7 = vadd.f32 %v8083_v52, %v5681_v39 }
 0x339   : > { %v5590_v21 = vadd.f32 %v5589_v44, %v5588_v33  ;;  %v5591_v40 = vpop.f32.mrb[210].mxu1 }
 0x33a   : > { %v5592_v2 = vpop.f32.mrb[211].mxu1  ;;  %v5682_v23 = vpop.f32.mrb[120].mxu0 }
 0x33b   : > { %v8176_v31 = vadd.f32 %v5590_v21, %v8022_v24  ;;  %v5593_v38 = vadd.f32 %v5592_v2, %v5591_v40  ;;  %v5683_v16 = vpop.f32.mrb[121].mxu0 }
 0x33c   : > { %v5684_v25 = vadd.f32 %v5683_v16, %v5682_v23  ;;  %v5685_v22 = vpop.f32.mrb[122].mxu0 }
 0x33d   : > { %v6176_v60 = vadd.f32 %v5593_v38, %v8024_v46  ;;  %v5686_v20 = vpop.f32.mrb[123].mxu0 }
 0x33e   : > { %v5687_v42 = vadd.f32 %v5686_v20, %v5685_v22  ;;  %v8180_v59 = vadd.f32 %v8092_v45, %v5684_v25 }
 0x340   : > { %v8183_v52 = vadd.f32 %v8095_v35, %v5687_v42 }
 0x342   : > { %v5688_v3 = vpop.f32.mrb[124].mxu0 }
 0x343   : > { %v5689_v34 = vpop.f32.mrb[125].mxu0 }
 0x344   : > { %v5690_v6 = vadd.f32 %v5689_v34, %v5688_v3  ;;  %v5691_v10 = vpop.f32.mrb[126].mxu0 }
 0x345   : > { %v5692_v24 = vpop.f32.mrb[127].mxu0 }
 0x346   : > { %v5693_v32 = vadd.f32 %v5692_v24, %v5691_v10  ;;  %v8186_v54 = vadd.f32 %v8104_v36, %v5690_v6 }
 0x348   : > { %v8189_v11 = vadd.f32 %v8107_v4, %v5693_v32 }
 0x34a   : > { %v5694_v46 = vpop.f32.mrb[128].mxu0 }
 0x34b   : > { %v5695_v55 = vpop.f32.mrb[129].mxu0 }
 0x34c   : > { %v5696_v1 = vadd.f32 %v5695_v55, %v5694_v46  ;;  %v5697_v45 = vpop.f32.mrb[130].mxu0 }
 0x34d   : > { %v5698_v5 = vpop.f32.mrb[131].mxu0 }
 0x34e   : > { %v5699_v51 = vadd.f32 %v5698_v5, %v5697_v45  ;;  %v8192_v35 = vadd.f32 %v8116_v13, %v5696_v1 }
 0x350   : > { %v8195_v37 = vadd.f32 %v8119_v63, %v5699_v51 }
 0x352   : > { %v5700_v26 = vpop.f32.mrb[132].mxu0 }
 0x353   : > { %v5701_v29 = vpop.f32.mrb[133].mxu0 }
 0x354   : > { %v5702_v58 = vadd.f32 %v5701_v29, %v5700_v26  ;;  %v5703_v36 = vpop.f32.mrb[134].mxu0 }
 0x355   : > { %v5704_v39 = vpop.f32.mrb[135].mxu0 }
 0x356   : > { %v5705_v33 = vadd.f32 %v5704_v39, %v5703_v36  ;;  %v8198_v4 = vadd.f32 %v8128_v61, %v5702_v58 }
 0x358   : > { %v8201_v44 = vadd.f32 %v8131_v9, %v5705_v33 }
 0x35a   : > { %v5706_v21 = vpop.f32.mrb[136].mxu0 }
 0x35b   : > { %v5707_v40 = vpop.f32.mrb[137].mxu0 }
 0x35c   : > { %v5708_v2 = vadd.f32 %v5707_v40, %v5706_v21  ;;  %v5709_v13 = vpop.f32.mrb[138].mxu0 }
 0x35d   : > { %v5710_v23 = vpop.f32.mrb[139].mxu0 }
 0x35e   : > { %v5711_v38 = vadd.f32 %v5710_v23, %v5709_v13  ;;  %v8204_v63 = vadd.f32 %v8140_v14, %v5708_v2 }
 0x360   : > { %v8207_v16 = vadd.f32 %v8143_v12, %v5711_v38 }
 0x362   : > { %v5712_v25 = vpop.f32.mrb[140].mxu0 }
 0x363   : > { %v5713_v22 = vpop.f32.mrb[141].mxu0 }
 0x364   : > { %v5714_v20 = vadd.f32 %v5713_v22, %v5712_v25  ;;  %v5715_v61 = vpop.f32.mrb[142].mxu0 }
 0x365   : > { %v5716_v42 = vpop.f32.mrb[143].mxu0 }
 0x366   : > { %v5717_v3 = vadd.f32 %v5716_v42, %v5715_v61  ;;  %v8210_v9 = vadd.f32 %v8152_v41, %v5714_v20 }
 0x368   : > { %v8213_v34 = vadd.f32 %v8155_v49, %v5717_v3 }
 0x36a   : > { %v5718_v6 = vpop.f32.mrb[144].mxu0 }
 0x36b   : > { %v5719_v10 = vpop.f32.mrb[145].mxu0 }
 0x36c   : > { %v5720_v24 = vadd.f32 %v5719_v10, %v5718_v6  ;;  %v5721_v14 = vpop.f32.mrb[146].mxu0 }
 0x36d   : > { %v5722_v32 = vpop.f32.mrb[147].mxu0 }
 0x36e   : > { %v5723_v46 = vadd.f32 %v5722_v32, %v5721_v14  ;;  %v8216_v12 = vadd.f32 %v8164_v28, %v5720_v24  ;;  %v8229_v28 = vld [vmem:[%s8326_s6] ss:$0 sm:$0xff] }
 0x370   : > { %v8219_v55 = vadd.f32 %v8167_v48, %v5723_v46 }
 0x372   : > { %v5724_v1 = vpop.f32.mrb[148].mxu0 }
 0x373   : > { %v5725_v45 = vpop.f32.mrb[149].mxu0 }
 0x374   : > { %v5726_v5 = vadd.f32 %v5725_v45, %v5724_v1  ;;  %v5727_v41 = vpop.f32.mrb[150].mxu0 }
 0x375   : > { %v5728_v51 = vpop.f32.mrb[151].mxu0 }
 0x376   : > { %v5729_v26 = vadd.f32 %v5728_v51, %v5727_v41  ;;  %v8222_v49 = vadd.f32 %v8176_v31, %v5726_v5 }
 0x378   : > { %v8224_v29 = vadd.f32 %v6176_v60, %v5729_v26 }
 0x37a   : > { %v6040_v58 = vpop.f32.mrb[56].mxu0 }
 0x37b   : > { %v6088_v48 = vadd.f32 %v8098_v62, %v6040_v58  ;;  %v4096_v36 = vpop.f32.mrb[57].mxu0 }
 0x37c   : > { %v6091_v39 = vadd.f32 %v8086_v53, %v4096_v36  ;;  %v6041_v33 = vpop.f32.mrb[58].mxu0 }
 0x37d   : > { %v4328_v21 = vadd.f32 %v6088_v48, %v8229_v28  ;;  %v6094_v40 = vadd.f32 %v8101_v15, %v6041_v33  ;;  %v4099_v31 = vpop.f32.mrb[59].mxu0 }
 0x37e   : > { %v4326_v60 = vadd.f32 %v6091_v39, %v8229_v28  ;;  %v6097_v2 = vadd.f32 %v8089_v19, %v4099_v31 }
 0x37f   : > { %v4392_v13 = vmul.f32 0.01, %v4328_v21  ;;  %v4329_v23 = vadd.f32 %v6094_v40, %v8229_v28  ;;  %vm4360_vm8 = vcmp.gt.f32.partialorder %v4328_v21, 0.0 }
 0x380   : > { %v4390_v38 = vmul.f32 0.01, %v4326_v60  ;;  %v4327_v62 = vadd.f32 %v6097_v2, %v8229_v28  ;;  %vm4358_vm9 = vcmp.gt.f32.partialorder %v4326_v60, 0.0 }
 0x381   : > { %vm4361_vm6 = vcmp.gt.f32.partialorder %v4329_v23, 0.0  ;;  %v4393_v53 = vmul.f32 0.01, %v4329_v23  ;;  %v4424_v15 = vsel %vm4360_vm8, %v4328_v21, %v4392_v13 }
 0x382   : > { %vm4359_vm7 = vcmp.gt.f32.partialorder %v4327_v62, 0.0  ;;  %v4391_v25 = vmul.f32 0.01, %v4327_v62  ;;  %v6044_v22 = vpop.f32.mrb[60].mxu0  ;;  %v4422_v42 = vsel %vm4358_vm9, %v4326_v60, %v4390_v38 }
 0x383   : > { %v4425_v20 = vsel %vm4361_vm6, %v4329_v23, %v4393_v53  ;;  %v6100_v61 = vadd.f32 %v8122_v43, %v6044_v22  ;;  %v4112_v19 = vpop.f32.mrb[61].mxu0 }
 0x384   : > { %v5200_v3 = vpack.c.bf16 %v4425_v20, %v4424_v15  ;;  %v4423_v6 = vsel %vm4359_vm7, %v4327_v62, %v4391_v25  ;;  %v6103_v10 = vadd.f32 %v8110_v18, %v4112_v19  ;;  %v6045_v24 = vpop.f32.mrb[62].mxu0 }
 0x385   : > { %v5195_v14 = vpack.c.bf16 %v4423_v6, %v4422_v42  ;;  %v4332_v32 = vadd.f32 %v6100_v61, %v8229_v28  ;;  %v6106_v46 = vadd.f32 %v8125_v0, %v6045_v24  ;;  %v4115_v1 = vpop.f32.mrb[63].mxu0 }
 0x386   : > { %5272 = vst [vmem:[%s6496_s17 + $0x8] sm:$0xff] %v5200_v3   ;;  %v4330_v45 = vadd.f32 %v6103_v10, %v8229_v28  ;;  %v6109_v5 = vadd.f32 %v8113_v27, %v4115_v1 }
 0x387   : > { %5196 = vst [vmem:[%s6496_s17] sm:$0xff] %v5195_v14   ;;  %v4396_v43 = vmul.f32 0.01, %v4332_v32  ;;  %v4333_v41 = vadd.f32 %v6106_v46, %v8229_v28  ;;  %vm4364_vm10 = vcmp.gt.f32.partialorder %v4332_v32, 0.0 }
 0x388   : > { %v4394_v51 = vmul.f32 0.01, %v4330_v45  ;;  %v4331_v18 = vadd.f32 %v6109_v5, %v8229_v28  ;;  %vm4362_vm11 = vcmp.gt.f32.partialorder %v4330_v45, 0.0 }
 0x389   : > { %vm4365_vm12 = vcmp.gt.f32.partialorder %v4333_v41, 0.0  ;;  %v4397_v26 = vmul.f32 0.01, %v4333_v41  ;;  %v4428_v48 = vsel %vm4364_vm10, %v4332_v32, %v4396_v43 }
 0x38a   : > { %vm4363_vm13 = vcmp.gt.f32.partialorder %v4331_v18, 0.0  ;;  %v4395_v0 = vmul.f32 0.01, %v4331_v18  ;;  %v6048_v58 = vpop.f32.mrb[64].mxu0  ;;  %v4426_v33 = vsel %vm4362_vm11, %v4330_v45, %v4394_v51 }
 0x38b   : > { %v4429_v36 = vsel %vm4365_vm12, %v4333_v41, %v4397_v26  ;;  %v6112_v27 = vadd.f32 %v8146_v17, %v6048_v58  ;;  %v4128_v39 = vpop.f32.mrb[65].mxu0 }
 0x38c   : > { %v5210_v21 = vpack.c.bf16 %v4429_v36, %v4428_v48  ;;  %v4427_v40 = vsel %vm4363_vm13, %v4331_v18, %v4395_v0  ;;  %v6115_v31 = vadd.f32 %v8134_v47, %v4128_v39  ;;  %v6049_v60 = vpop.f32.mrb[66].mxu0 }
 0x38d   : > { %v5205_v2 = vpack.c.bf16 %v4427_v40, %v4426_v33  ;;  %v4336_v13 = vadd.f32 %v6112_v27, %v8229_v28  ;;  %v6118_v23 = vadd.f32 %v8149_v57, %v6049_v60  ;;  %v4131_v38 = vpop.f32.mrb[67].mxu0 }
 0x38e   : > { %5274 = vst [vmem:[%s6496_s17 + $0x18] sm:$0xff] %v5210_v21   ;;  %v4334_v62 = vadd.f32 %v6115_v31, %v8229_v28  ;;  %v6121_v53 = vadd.f32 %v8137_v56, %v4131_v38 }
 0x38f   : > { %5273 = vst [vmem:[%s6496_s17 + $0x10] sm:$0xff] %v5205_v2   ;;  %v4400_v17 = vmul.f32 0.01, %v4336_v13  ;;  %v4337_v25 = vadd.f32 %v6118_v23, %v8229_v28  ;;  %vm4368_vm14 = vcmp.gt.f32.partialorder %v4336_v13, 0.0 }
 0x390   : > { %v4398_v22 = vmul.f32 0.01, %v4334_v62  ;;  %v4335_v47 = vadd.f32 %v6121_v53, %v8229_v28  ;;  %vm4366_vm15 = vcmp.gt.f32.partialorder %v4334_v62, 0.0 }
 0x391   : > { %vm4369_vm0 = vcmp.gt.f32.partialorder %v4337_v25, 0.0  ;;  %v4401_v15 = vmul.f32 0.01, %v4337_v25  ;;  %v4432_v61 = vsel %vm4368_vm14, %v4336_v13, %v4400_v17 }
 0x392   : > { %vm4367_vm1 = vcmp.gt.f32.partialorder %v4335_v47, 0.0  ;;  %v4399_v57 = vmul.f32 0.01, %v4335_v47  ;;  %v6052_v20 = vpop.f32.mrb[68].mxu0  ;;  %v4430_v3 = vsel %vm4366_vm15, %v4334_v62, %v4398_v22 }
 0x393   : > { %v4433_v19 = vsel %vm4369_vm0, %v4337_v25, %v4401_v15  ;;  %v6124_v56 = vadd.f32 %v8170_v50, %v6052_v20  ;;  %v4144_v42 = vpop.f32.mrb[69].mxu0 }
 0x394   : > { %v5220_v6 = vpack.c.bf16 %v4433_v19, %v4432_v61  ;;  %v4431_v10 = vsel %vm4367_vm1, %v4335_v47, %v4399_v57  ;;  %v6127_v24 = vadd.f32 %v8158_v8, %v4144_v42  ;;  %v6053_v14 = vpop.f32.mrb[70].mxu0 }
 0x395   : > { %v5215_v32 = vpack.c.bf16 %v4431_v10, %v4430_v3  ;;  %v4340_v46 = vadd.f32 %v6124_v56, %v8229_v28  ;;  %v6130_v1 = vadd.f32 %v8173_v7, %v6053_v14  ;;  %v4147_v45 = vpop.f32.mrb[71].mxu0 }
 0x396   : > { %5276 = vst [vmem:[%s6496_s17 + $0x28] sm:$0xff] %v5220_v6   ;;  %v4338_v5 = vadd.f32 %v6127_v24, %v8229_v28  ;;  %v6133_v43 = vadd.f32 %v8161_v30, %v4147_v45 }
 0x397   : > { %5275 = vst [vmem:[%s6496_s17 + $0x20] sm:$0xff] %v5215_v32   ;;  %v4404_v50 = vmul.f32 0.01, %v4340_v46  ;;  %v4341_v41 = vadd.f32 %v6130_v1, %v8229_v28  ;;  %vm4372_vm2 = vcmp.gt.f32.partialorder %v4340_v46, 0.0 }
 0x398   : > { %v4402_v51 = vmul.f32 0.01, %v4338_v5  ;;  %v4339_v8 = vadd.f32 %v6133_v43, %v8229_v28  ;;  %vm4370_vm3 = vcmp.gt.f32.partialorder %v4338_v5, 0.0 }
 0x399   : > { %vm4373_vm4 = vcmp.gt.f32.partialorder %v4341_v41, 0.0  ;;  %v4405_v18 = vmul.f32 0.01, %v4341_v41  ;;  %v4436_v0 = vsel %vm4372_vm2, %v4340_v46, %v4404_v50 }
 0x39a   : > { %vm4371_vm5 = vcmp.gt.f32.partialorder %v4339_v8, 0.0  ;;  %v4403_v7 = vmul.f32 0.01, %v4339_v8  ;;  %v6056_v26 = vpop.f32.mrb[72].mxu0  ;;  %v4434_v36 = vsel %vm4370_vm3, %v4338_v5, %v4402_v51 }
 0x39b   : > { %v4437_v58 = vsel %vm4373_vm4, %v4341_v41, %v4405_v18  ;;  %v6136_v30 = vadd.f32 %v8186_v54, %v6056_v26  ;;  %v4160_v48 = vpop.f32.mrb[73].mxu0 }
 0x39c   : > { %v5230_v27 = vpack.c.bf16 %v4437_v58, %v4436_v0  ;;  %v4435_v39 = vsel %vm4371_vm5, %v4339_v8, %v4403_v7  ;;  %v6139_v33 = vadd.f32 %v8180_v59, %v4160_v48  ;;  %v6057_v21 = vpop.f32.mrb[74].mxu0 }
 0x39d   : > { %v5225_v40 = vpack.c.bf16 %v4435_v39, %v4434_v36  ;;  %v4344_v31 = vadd.f32 %v6136_v30, %v8229_v28  ;;  %v6142_v60 = vadd.f32 %v8189_v11, %v6057_v21  ;;  %v4163_v2 = vpop.f32.mrb[75].mxu0 }
 0x39e   : > { %5278 = vst [vmem:[%s6496_s17 + $0x38] sm:$0xff] %v5230_v27   ;;  %v4342_v13 = vadd.f32 %v6139_v33, %v8229_v28  ;;  %v6145_v23 = vadd.f32 %v8183_v52, %v4163_v2 }
 0x39f   : > { %5277 = vst [vmem:[%s6496_s17 + $0x30] sm:$0xff] %v5225_v40   ;;  %v4408_v54 = vmul.f32 0.01, %v4344_v31  ;;  %v4345_v38 = vadd.f32 %v6142_v60, %v8229_v28  ;;  %vm4376_vm8 = vcmp.gt.f32.partialorder %v4344_v31, 0.0 }
 0x3a0   : > { %v4406_v62 = vmul.f32 0.01, %v4342_v13  ;;  %v4343_v59 = vadd.f32 %v6145_v23, %v8229_v28  ;;  %vm4374_vm9 = vcmp.gt.f32.partialorder %v4342_v13, 0.0 }
 0x3a1   : > { %vm4377_vm6 = vcmp.gt.f32.partialorder %v4345_v38, 0.0  ;;  %v4409_v53 = vmul.f32 0.01, %v4345_v38  ;;  %v4440_v25 = vsel %vm4376_vm8, %v4344_v31, %v4408_v54 }
 0x3a2   : > { %vm4375_vm7 = vcmp.gt.f32.partialorder %v4343_v59, 0.0  ;;  %v4407_v11 = vmul.f32 0.01, %v4343_v59  ;;  %v6060_v17 = vpop.f32.mrb[76].mxu0  ;;  %v4438_v15 = vsel %vm4374_vm9, %v4342_v13, %v4406_v62 }
 0x3a3   : > { %v4441_v22 = vsel %vm4377_vm6, %v4345_v38, %v4409_v53  ;;  %v6148_v52 = vadd.f32 %v8198_v4, %v6060_v17  ;;  %v4176_v47 = vpop.f32.mrb[77].mxu0 }
 0x3a4   : > { %v5240_v57 = vpack.c.bf16 %v4441_v22, %v4440_v25  ;;  %v4439_v20 = vsel %vm4375_vm7, %v4343_v59, %v4407_v11  ;;  %v6151_v61 = vadd.f32 %v8192_v35, %v4176_v47  ;;  %v6061_v19 = vpop.f32.mrb[78].mxu0 }
 0x3a5   : > { %v5235_v56 = vpack.c.bf16 %v4439_v20, %v4438_v15  ;;  %v4348_v42 = vadd.f32 %v6148_v52, %v8229_v28  ;;  %v6154_v3 = vadd.f32 %v8201_v44, %v6061_v19  ;;  %v4179_v6 = vpop.f32.mrb[79].mxu0 }
 0x3a6   : > { %5280 = vst [vmem:[%s6496_s17 + $0x48] sm:$0xff] %v5240_v57   ;;  %v4346_v10 = vadd.f32 %v6151_v61, %v8229_v28  ;;  %v6157_v24 = vadd.f32 %v8195_v37, %v4179_v6 }
 0x3a7   : > { %5279 = vst [vmem:[%s6496_s17 + $0x40] sm:$0xff] %v5235_v56   ;;  %v4412_v4 = vmul.f32 0.01, %v4348_v42  ;;  %v4349_v14 = vadd.f32 %v6154_v3, %v8229_v28  ;;  %vm4380_vm10 = vcmp.gt.f32.partialorder %v4348_v42, 0.0 }
 0x3a8   : > { %v4410_v32 = vmul.f32 0.01, %v4346_v10  ;;  %v4347_v35 = vadd.f32 %v6157_v24, %v8229_v28  ;;  %vm4378_vm11 = vcmp.gt.f32.partialorder %v4346_v10, 0.0 }
 0x3a9   : > { %vm4381_vm12 = vcmp.gt.f32.partialorder %v4349_v14, 0.0  ;;  %v4413_v46 = vmul.f32 0.01, %v4349_v14  ;;  %v4444_v45 = vsel %vm4380_vm10, %v4348_v42, %v4412_v4 }
 0x3aa   : > { %vm4379_vm13 = vcmp.gt.f32.partialorder %v4347_v35, 0.0  ;;  %v4411_v44 = vmul.f32 0.01, %v4347_v35  ;;  %v6064_v1 = vpop.f32.mrb[80].mxu0  ;;  %v4442_v50 = vsel %vm4378_vm11, %v4346_v10, %v4410_v32 }
 0x3ab   : > { %v4445_v5 = vsel %vm4381_vm12, %v4349_v14, %v4413_v46  ;;  %v6160_v37 = vadd.f32 %v8210_v9, %v6064_v1  ;;  %v4192_v43 = vpop.f32.mrb[81].mxu0 }
 0x3ac   : > { %v5250_v41 = vpack.c.bf16 %v4445_v5, %v4444_v45  ;;  %v4443_v51 = vsel %vm4379_vm13, %v4347_v35, %v4411_v44  ;;  %v6163_v8 = vadd.f32 %v8204_v63, %v4192_v43  ;;  %v6065_v18 = vpop.f32.mrb[82].mxu0 }
 0x3ad   : > { %v5245_v7 = vpack.c.bf16 %v4443_v51, %v4442_v50  ;;  %v4352_v26 = vadd.f32 %v6160_v37, %v8229_v28  ;;  %v6166_v0 = vadd.f32 %v8213_v34, %v6065_v18  ;;  %v4195_v58 = vpop.f32.mrb[83].mxu0 }
 0x3ae   : > { %5282 = vst [vmem:[%s6496_s17 + $0x58] sm:$0xff] %v5250_v41   ;;  %v4350_v30 = vadd.f32 %v6163_v8, %v8229_v28  ;;  %v6169_v48 = vadd.f32 %v8207_v16, %v4195_v58 }
 0x3af   : > { %5281 = vst [vmem:[%s6496_s17 + $0x50] sm:$0xff] %v5245_v7   ;;  %v4416_v9 = vmul.f32 0.01, %v4352_v26  ;;  %v4353_v36 = vadd.f32 %v6166_v0, %v8229_v28  ;;  %vm4384_vm14 = vcmp.gt.f32.partialorder %v4352_v26, 0.0 }
 0x3b0   : > { %v4414_v27 = vmul.f32 0.01, %v4350_v30  ;;  %v4351_v63 = vadd.f32 %v6169_v48, %v8229_v28  ;;  %vm4382_vm15 = vcmp.gt.f32.partialorder %v4350_v30, 0.0 }
 0x3b1   : > { %vm4385_vm0 = vcmp.gt.f32.partialorder %v4353_v36, 0.0  ;;  %v4417_v39 = vmul.f32 0.01, %v4353_v36  ;;  %v4448_v21 = vsel %vm4384_vm14, %v4352_v26, %v4416_v9 }
 0x3b2   : > { %vm4383_vm1 = vcmp.gt.f32.partialorder %v4351_v63, 0.0  ;;  %v4415_v34 = vmul.f32 0.01, %v4351_v63  ;;  %v6068_v33 = vpop.f32.mrb[84].mxu0  ;;  %v4446_v60 = vsel %vm4382_vm15, %v4350_v30, %v4414_v27 }
 0x3b3   : > { %v4449_v40 = vsel %vm4385_vm0, %v4353_v36, %v4417_v39  ;;  %v6172_v16 = vadd.f32 %v8222_v49, %v6068_v33  ;;  %v4208_v31 = vpop.f32.mrb[85].mxu0 }
 0x3b4   : > { %v5260_v2 = vpack.c.bf16 %v4449_v40, %v4448_v21  ;;  %v4447_v13 = vsel %vm4383_vm1, %v4351_v63, %v4415_v34  ;;  %v6175_v23 = vadd.f32 %v8216_v12, %v4208_v31  ;;  %v6069_v54 = vpop.f32.mrb[86].mxu0 }
 0x3b5   : > { %v5255_v38 = vpack.c.bf16 %v4447_v13, %v4446_v60  ;;  %v4356_v62 = vadd.f32 %v6172_v16, %v8229_v28  ;;  %v6178_v59 = vadd.f32 %v8224_v29, %v6069_v54  ;;  %v4211_v53 = vpop.f32.mrb[87].mxu0 }
 0x3b6   : > { %5284 = vst [vmem:[%s6496_s17 + $0x68] sm:$0xff] %v5260_v2   ;;  %v4354_v11 = vadd.f32 %v6175_v23, %v8229_v28  ;;  %v6181_v17 = vadd.f32 %v8219_v55, %v4211_v53 }
 0x3b7   : > { %5283 = vst [vmem:[%s6496_s17 + $0x60] sm:$0xff] %v5255_v38   ;;  %v4420_v49 = vmul.f32 0.01, %v4356_v62  ;;  %v4357_v25 = vadd.f32 %v6178_v59, %v8229_v28  ;;  %vm4388_vm2 = vcmp.gt.f32.partialorder %v4356_v62, 0.0 }
 0x3b8   : > { %v4418_v12 = vmul.f32 0.01, %v4354_v11  ;;  %v4355_v22 = vadd.f32 %v6181_v17, %v8229_v28  ;;  %vm4386_vm3 = vcmp.gt.f32.partialorder %v4354_v11, 0.0 }
 0x3b9   : > { %vm4389_vm4 = vcmp.gt.f32.partialorder %v4357_v25, 0.0  ;;  %v4421_v52 = vmul.f32 0.01, %v4357_v25  ;;  %v4452_v47 = vsel %vm4388_vm2, %v4356_v62, %v4420_v49 }
 0x3ba   : > { %vm4387_vm5 = vcmp.gt.f32.partialorder %v4355_v22, 0.0  ;;  %v4419_v29 = vmul.f32 0.01, %v4355_v22  ;;  %v4450_v57 = vsel %vm4386_vm3, %v4354_v11, %v4418_v12 }
 0x3bb   : > { %v4453_v15 = vsel %vm4389_vm4, %v4357_v25, %v4421_v52 }
 0x3bc   : > { %v5270_v20 = vpack.c.bf16 %v4453_v15, %v4452_v47  ;;  %v4451_v55 = vsel %vm4387_vm5, %v4355_v22, %v4419_v29 }
 0x3bd   : > { %v5265_v61 = vpack.c.bf16 %v4451_v55, %v4450_v57 }
 0x3be   : > { %5286 = vst [vmem:[%s6496_s17 + $0x78] sm:$0xff] %v5270_v20  }
 0x3bf   : > { %5285 = vst [vmem:[%s6496_s17 + $0x70] sm:$0xff] %v5265_v61  }
 0x3c0 PF: > { %s19_s29 = sadd.s32 1, %s6418_s29   ;;  %s8445_s27 = smov %s6414_s28 }
 0x3c1   : > { %p16_p5 = scmp.ge.s32.totalorder %s19_s29, 4   ;;  %s8446_s28 = smov %s8448_s30 }
 0x3c3   :  { %18 = sbr.rel (!%p16_p5) target bundleno = 2 (0x2), region = 184 }
 0x3ca   :  { %4673 = vsyncmov [#allocation3] }
 0x3cd   :  { %s4674_s13 = vpop.sfrf %4673 }
 0x3ce   :  { %p5137_p6 = scmp.ne.s32.totalorder %s4674_s13, 0 }
 0x3d0   :  { %4678 = shalt.err (%p5137_p6)  }
 0x3d1   :  { %4680 = vsyncmov [#allocation3 + $0x1] }
 0x3d4   :  { %s4681_s14 = vpop.sfrf %4680 }
 0x3d5   :  { %p5138_p7 = scmp.ne.s32.totalorder %s4681_s14, 0 }
 0x3d7   :  { %4685 = shalt.err (%p5138_p7)  }

// kernel: residual_module3.5
= control target key start
LH: loop header
LB: loop body
LE: loop exit
PB: predicated region body
PF: predicated region fallthrough
CT: control target
= control target key end

     0   :  { %s4651_s18 = smov 0   ;;  %s4653_s19 = smov 0   ;;  %s5733_s0 = inlined_call_operand.vmem [shape: bf16[2,18,24,128], index: 0, kind: input, shape index: {}]   ;;  %s5734_s1 = inlined_call_operand.vmem [shape: bf16[3,384,128], index: 1, kind: input, shape index: {}]   ;;  %s5735_s2 = inlined_call_operand.vmem [shape: f32[1,128], index: 2, kind: input, shape index: {}]   ;;  %s5736_s3 = inlined_call_operand.vmem [shape: bf16[128,128], index: 3, kind: input, shape index: {}]   ;;  %s5737_s4 = inlined_call_operand.vmem [shape: f32[1,128], index: 4, kind: input, shape index: {}]   ;;  %s5738_s5 = inlined_call_operand.vmem [shape: f32[2,16,16,128], index: 5, kind: output, shape index: {}]  }
   0x1   :  { %s4655_s20 = smov 0  }
   0x2 LB: > { %s27_s21 = sadd.s32 1, %s4615_s19  ;;  %p3390_p0 = scmp.ge.s32.totalorder %s4619_s20, 1  ;;  %s4619_s20 = sphi %s4655_s20, %s15_s20   ;;  %s4615_s19 = sphi %s4653_s19, %s5740_s19   ;;  %s4611_s18 = sphi %s4651_s18, %s5739_s18  }
   0x3   : > { %p29_p1 = scmp.ge.s32.totalorder %s27_s21, 2  ;;  %p167_p2 = scmp.lt.s32.totalorder %s4619_s20, 3 }
   0x5   : > { %s5742_s21 = smov (%p29_p1, %s27_s21), 0  ;;  %p168_p3 = pnand %p3390_p0, %p167_p2 }
   0x6   : > { %p194_p4 = scmp.lt.s32.totalorder (!%p168_p3), %s4611_s18, 1  ;;  %s3670_s22 = smul.u32 (!%p168_p3), 216, %s4611_s18 }
   0x7   : > { %171 = sbr.rel (%p168_p3) target bundleno = 818 (0x332), region = 36 }
   0x8   : > { %s4672_s25 = scalar_lea.vmem (!%p168_p3), %s5733_s0, %s3670_s22 }
   0x9   : > { %v246_v0 = vld [vmem:[%s4672_s25] sm:$0xff] (!%p168_p3)  ;;  %v248_v1 = vld [vmem:[%s4672_s25 + $0x8] sm:$0xff] (!%p168_p3)  ;;  %v250_v2 = vld [vmem:[%s4672_s25 + $0x10] sm:$0xff] (!%p168_p3) }
   0xa   : > { %247 = vst [vmem:[#allocation2] sm:$0xff] (!%p168_p3), %v246_v0  ;;  %249 = vst [vmem:[#allocation2 + $0x8] sm:$0xff] (!%p168_p3), %v248_v1  ;;  %v252_v3 = vld [vmem:[%s4672_s25 + $0x18] sm:$0xff] (!%p168_p3)  ;;  %v254_v4 = vld [vmem:[%s4672_s25 + $0x20] sm:$0xff] (!%p168_p3) }
   0xb   : > { %251 = vst [vmem:[#allocation2 + $0x10] sm:$0xff] (!%p168_p3), %v250_v2  ;;  %v256_v5 = vld [vmem:[%s4672_s25 + $0x28] sm:$0xff] (!%p168_p3)  ;;  %253 = vst [vmem:[#allocation2 + $0x18] sm:$0xff] (!%p168_p3), %v252_v3  ;;  %v258_v6 = vld [vmem:[%s4672_s25 + $0x30] sm:$0xff] (!%p168_p3) }
   0xc   : > { %255 = vst [vmem:[#allocation2 + $0x20] sm:$0xff] (!%p168_p3), %v254_v4  ;;  %257 = vst [vmem:[#allocation2 + $0x28] sm:$0xff] (!%p168_p3), %v256_v5  ;;  %v260_v7 = vld [vmem:[%s4672_s25 + $0x38] sm:$0xff] (!%p168_p3)  ;;  %v262_v8 = vld [vmem:[%s4672_s25 + $0x40] sm:$0xff] (!%p168_p3) }
   0xd   : > { %259 = vst [vmem:[#allocation2 + $0x30] sm:$0xff] (!%p168_p3), %v258_v6  ;;  %261 = vst [vmem:[#allocation2 + $0x38] sm:$0xff] (!%p168_p3), %v260_v7  ;;  %v264_v9 = vld [vmem:[%s4672_s25 + $0x48] sm:$0xff] (!%p168_p3)  ;;  %v266_v10 = vld [vmem:[%s4672_s25 + $0x50] sm:$0xff] (!%p168_p3) }
   0xe   : > { %s5744_s18 = smov (!%p194_p4, %s4611_s18), 1  ;;  %263 = vst [vmem:[#allocation2 + $0x40] sm:$0xff] %v262_v8  ;;  %v268_v11 = vld [vmem:[%s4672_s25 + $0x58] sm:$0xff]  ;;  %265 = vst [vmem:[#allocation2 + $0x48] sm:$0xff] %v264_v9  ;;  %v270_v12 = vld [vmem:[%s4672_s25 + $0x60] sm:$0xff] }
   0xf   : > { %s3669_s26 = sshll.u32 %s5744_s18, 8  ;;  %267 = vst [vmem:[#allocation2 + $0x50] sm:$0xff] %v266_v10  ;;  %269 = vst [vmem:[#allocation2 + $0x58] sm:$0xff] %v268_v11  ;;  %v272_v13 = vld [vmem:[%s4672_s25 + $0x68] sm:$0xff]  ;;  %v274_v14 = vld [vmem:[%s4672_s25 + $0x70] sm:$0xff] }
  0x10   : > { %s4680_s29 = scalar_lea.vmem %s5738_s5, %s3669_s26  ;;  %271 = vst [vmem:[#allocation2 + $0x60] sm:$0xff] %v270_v12  ;;  %273 = vst [vmem:[#allocation2 + $0x68] sm:$0xff] %v272_v13  ;;  %v276_v15 = vld [vmem:[%s4672_s25 + $0x78] sm:$0xff]  ;;  %v278_v16 = vld [vmem:[%s4672_s25 + $0x80] sm:$0xff] }
  0x11   : > { %275 = vst [vmem:[#allocation2 + $0x70] sm:$0xff] %v274_v14  ;;  %v280_v17 = vld [vmem:[%s4672_s25 + $0x88] sm:$0xff]  ;;  %277 = vst [vmem:[#allocation2 + $0x78] sm:$0xff] %v276_v15  ;;  %v282_v18 = vld [vmem:[%s4672_s25 + $0x90] sm:$0xff] }
  0x12   : > { %279 = vst [vmem:[#allocation2 + $0x80] sm:$0xff] %v278_v16  ;;  %281 = vst [vmem:[#allocation2 + $0x88] sm:$0xff] %v280_v17  ;;  %v284_v19 = vld [vmem:[%s4672_s25 + $0x98] sm:$0xff]  ;;  %v286_v20 = vld [vmem:[%s4672_s25 + $0xa0] sm:$0xff] }
  0x13   : > { %283 = vst [vmem:[#allocation2 + $0x90] sm:$0xff] %v282_v18  ;;  %285 = vst [vmem:[#allocation2 + $0x98] sm:$0xff] %v284_v19  ;;  %v288_v21 = vld [vmem:[%s4672_s25 + $0xa8] sm:$0xff]  ;;  %v290_v22 = vld [vmem:[%s4672_s25 + $0xb0] sm:$0xff] }
  0x14   : > { %287 = vst [vmem:[#allocation2 + $0xa0] sm:$0xff] %v286_v20  ;;  %v292_v23 = vld [vmem:[%s4672_s25 + $0xb8] sm:$0xff]  ;;  %289 = vst [vmem:[#allocation2 + $0xa8] sm:$0xff] %v288_v21  ;;  %v294_v24 = vld [vmem:[%s4672_s25 + $0xc0] sm:$0xff] }
  0x15   : > { %291 = vst [vmem:[#allocation2 + $0xb0] sm:$0xff] %v290_v22  ;;  %293 = vst [vmem:[#allocation2 + $0xb8] sm:$0xff] %v292_v23  ;;  %v296_v25 = vld [vmem:[%s4672_s25 + $0xc8] sm:$0xff]  ;;  %v298_v26 = vld [vmem:[%s4672_s25 + $0xd0] sm:$0xff] }
  0x16   : > { %295 = vst [vmem:[#allocation2 + $0xc0] sm:$0xff] %v294_v24  ;;  %297 = vst [vmem:[#allocation2 + $0xc8] sm:$0xff] %v296_v25 }
  0x17   : > { %299 = vst [vmem:[#allocation2 + $0xd0] sm:$0xff] %v298_v26 }
  0x18   : > { %307 = vsyncadd [#allocation3], 3456 }
  0x19   : > { %4607 = dma.done.wait [#allocation3], 3456 }
  0x1a   : > { %4608 = vsyncadd [#allocation3], 4294963840  ;;  %v4479_v27 = vld [vmem:[%s5734_s1 + $0x40] sm:$0xff]   ;;  %v4482_v30 = vld [vmem:[%s5734_s1 + $0x48] sm:$0xff]   ;;  %vm649_vm0 = vsmask.f32 7424 }
  0x1b   : > { %v4480_v28 = vld [vmem:[%s5734_s1 + $0x80] sm:$0xff]   ;;  %3671 = vmatprep.subr.bf16.mxu0 %v4479_v27  ;;  %v4483_v31 = vld [vmem:[%s5734_s1 + $0x88] sm:$0xff]   ;;  %v4485_v33 = vld [vmem:[%s5734_s1 + $0x50] sm:$0xff]   ;;  %vm884_vm1 = vcmask 1046528  }
  0x1c   : > { %v4481_v29 = vld [vmem:[%s5734_s1] sm:$0xff]   ;;  %4103 = vmatprep.subr.bf16.mxu1 %v4480_v28  ;;  %v4484_v32 = vld [vmem:[%s5734_s1 + $0x8] sm:$0xff]   ;;  %v4486_v34 = vld [vmem:[%s5734_s1 + $0x90] sm:$0xff]  }
  0x1d   : > { %3672 = vmatpush3.bf16.msra.mxu0 %v4481_v29  ;;  %4104 = vmatpush3.bf16.msra.mxu1 %v4480_v28  ;;  %v4487_v35 = vld [vmem:[%s5734_s1 + $0x10] sm:$0xff]   ;;  %v4488_v36 = vld [vmem:[%s5734_s1 + $0x58] sm:$0xff]   ;;  %v4491_v39 = vld [vmem:[%s5734_s1 + $0x60] sm:$0xff]  }
  0x1e   : > { %3673 = vmatprep.subr.bf16.mxu0 %v4482_v30  ;;  %4105 = vmatprep.subr.bf16.mxu1 %v4483_v31  ;;  %v4489_v37 = vld [vmem:[%s5734_s1 + $0x98] sm:$0xff]   ;;  %v4492_v40 = vld [vmem:[%s5734_s1 + $0xa0] sm:$0xff]   ;;  %v4494_v42 = vld [vmem:[%s5734_s1 + $0x68] sm:$0xff]  }
  0x1f   : > { %v4490_v38 = vld [vmem:[%s5734_s1 + $0x18] sm:$0xff]   ;;  %v4493_v41 = vld [vmem:[%s5734_s1 + $0x20] sm:$0xff]   ;;  %v4495_v43 = vld [vmem:[%s5734_s1 + $0xa8] sm:$0xff]  }
  0x20   : > { %v4496_v44 = vld [vmem:[%s5734_s1 + $0x28] sm:$0xff]   ;;  %v4497_v45 = vld [vmem:[%s5734_s1 + $0x70] sm:$0xff]   ;;  %v4500_v48 = vld [vmem:[%s5734_s1 + $0x78] sm:$0xff]  }
  0x21   : > { %3674 = vmatpush3.bf16.msra.mxu0 %v4484_v32  ;;  %4106 = vmatpush3.bf16.msra.mxu1 %v4483_v31  ;;  %v4498_v46 = vld [vmem:[%s5734_s1 + $0xb0] sm:$0xff]   ;;  %v4501_v49 = vld [vmem:[%s5734_s1 + $0xb8] sm:$0xff]   ;;  %v4503_v50 = vld [vmem:[#allocation2] sm:$0xff]  }
  0x22   : > { %3675 = vmatprep.subr.bf16.mxu0 %v4485_v33  ;;  %4107 = vmatprep.subr.bf16.mxu1 %v4486_v34  ;;  %v4499_v47 = vld [vmem:[%s5734_s1 + $0x30] sm:$0xff]   ;;  %v4504_v51 = vld [vmem:[#allocation2 + $0x8] ss:$0 sps:$4 sm:$0xff]   ;;  %v4502_v52 = vld [vmem:[%s5734_s1 + $0x38] sm:$0xff]   ;;  %v651_v54 = vshrl.u32 %v4503_v50, 16  ;;  %v653_v55 = vshll.u32 %v4503_v50, 16 }
  0x23   : > { %v4778_v53 = vld [vmem:[#allocation2 + $0xc] sm:$0xff]   ;;  %v658_v56 = vshll.u32 %v4504_v51, 16  ;;  %v885_v57 = vrot.slane %v4503_v50, 1  ;;  %v4506_v58 = vld [vmem:[#allocation2 + $0x14] ss:$0 sps:$4 sm:$0xff]   ;;  %v886_v59 = vrot.slane %v4504_v51, 1 }
  0x24   : > { %v888_v60 = vrot.slane %v4778_v53, 1  ;;  %v655_v61 = vrot.slane %v653_v55, 1  ;;  %v889_v63 = vrot.slane %v4506_v58, 1  ;;  %v4507_v0 = vld [vmem:[%s5734_s1 + $0x100] sm:$0xff]   ;;  %v663_v3 = vshrl.u32 %v4778_v53, 16  ;;  %v4793_v10 = vld [vmem:[#allocation2 + $0x18] sm:$0xff]  }
  0x25   : > { %3676 = vmatpush3.bf16.msra.mxu0 %v4487_v35  ;;  %4108 = vmatpush3.bf16.msra.mxu1 %v4486_v34  ;;  %v660_v62 = vrot.slane %v658_v56, 1  ;;  %v887_v1 = vsel %vm884_vm1, %v885_v57, %v886_v59  ;;  %v4508_v2 = vld [vmem:[%s5734_s1 + $0xc0] sm:$0xff]   ;;  %v665_v4 = vshll.u32 %v4778_v53, 16  ;;  %v670_v5 = vshll.u32 %v4506_v58, 16  ;;  %v4512_v17 = vld [vmem:[#allocation2 + $0x2c] ss:$0 sps:$4 sm:$0xff]  }
  0x26   : > { %3677 = vmatprep.subr.bf16.mxu0 %v4488_v36  ;;  %4109 = vmatprep.subr.bf16.mxu1 %v4489_v37  ;;  %v656_v6 = vor.u32 %v655_v61, %v651_v54  ;;  %v4791_v7 = vsel %vm884_vm1, %v888_v60, %v889_v63  ;;  %v4510_v11 = vld [vmem:[#allocation2 + $0x20] ss:$0 sps:$4 sm:$0xff]   ;;  %v4795_v12 = vld [vmem:[#allocation2 + $0x24] sm:$0xff]   ;;  %v891_v15 = vrot.slane %v4793_v10, 1  ;;  %v895_v22 = vrot.slane %v4512_v17, 1  ;;  %v4814_v25 = vld [vmem:[#allocation2 + $0x30] sm:$0xff]  }
  0x27   : > { %4119 = vmatprep.mubr.bf16.mxu1 %v887_v1  ;;  %v667_v8 = vrot.slane %v665_v4, 1  ;;  %v672_v9 = vrot.slane %v670_v5, 1  ;;  %v892_v16 = vrot.slane %v4510_v11, 1  ;;  %v894_v18 = vrot.slane %v4795_v12, 1  ;;  %v4513_v19 = vld [vmem:[%s5734_s1 + $0x108] sm:$0xff]   ;;  %v4820_v30 = vld [vmem:[#allocation2 + $0x3c] sm:$0xff]  }
  0x28   : > { %v661_v13 = vsel %vm649_vm0, %v656_v6, %v660_v62  ;;  %v4514_v23 = vld [vmem:[%s5734_s1 + $0xc8] sm:$0xff]   ;;  %v675_v24 = vshrl.u32 %v4793_v10, 16  ;;  %v677_v26 = vshll.u32 %v4793_v10, 16  ;;  %v682_v27 = vshll.u32 %v4510_v11, 16  ;;  %v4516_v28 = vld [vmem:[#allocation2 + $0x38] ss:$0 sps:$4 sm:$0xff]  }
  0x29   : > { %3678 = vmatpush3.bf16.msra.mxu0 %v4490_v38  ;;  %4110 = vmatpush3.bf16.msra.mxu1 %v4489_v37  ;;  %v668_v14 = vor.u32 %v667_v8, %v663_v3  ;;  %v4808_v21 = vsel %vm884_vm1, %v891_v15, %v892_v16  ;;  %v897_v29 = vrot.slane %v4814_v25, 1  ;;  %v4823_v33 = vsel %vm884_vm1, %v894_v18, %v895_v22  ;;  %v4825_v35 = vld [vmem:[#allocation2 + $0x44] ss:$0 sps:$4 sm:$0xff]   ;;  %v4519_v38 = vld [vmem:[%s5734_s1 + $0x110] sm:$0xff]   ;;  %v4525_v54 = vld [vmem:[%s5734_s1 + $0x118] sm:$0xff]  }
  0x2a   : > { %3679 = vmatprep.subr.bf16.mxu0 %v4491_v39  ;;  %4111 = vmatprep.subr.bf16.mxu1 %v4492_v40  ;;  %v679_v31 = vrot.slane %v677_v26, 1  ;;  %v684_v32 = vrot.slane %v682_v27, 1  ;;  %v898_v34 = vrot.slane %v4516_v28, 1  ;;  %v900_v37 = vrot.slane %v4820_v30, 1  ;;  %v4858_v56 = vld [vmem:[#allocation2 + $0x5c] ss:$0 sps:$4 sm:$0xff]  }
  0x2b   : > { %1181 = vmatprep.mubr.bf16.mxu0 %v661_v13  ;;  %v4805_v20 = vsel %vm649_vm0, %v668_v14, %v672_v9  ;;  %v4526_v58 = vld [vmem:[%s5734_s1 + $0xd8] sm:$0xff]   ;;  %v699_v59 = vshrl.u32 %v4814_v25, 16  ;;  %v701_v62 = vshll.u32 %v4814_v25, 16  ;;  %v706_v63 = vshll.u32 %v4516_v28, 16  ;;  %v4876_v1 = vld [vmem:[#allocation2 + $0x68] ss:$0 sps:$4 sm:$0xff]  }
  0x2c   : > { %v680_v36 = vor.u32 %v679_v31, %v675_v24  ;;  %v4832_v39 = vsel %vm884_vm1, %v897_v29, %v898_v34  ;;  %v907_v4 = vrot.slane %v4858_v56, 1  ;;  %v4531_v5 = vld [vmem:[%s5734_s1 + $0x120] sm:$0xff]   ;;  %v910_v11 = vrot.slane %v4876_v1, 1  ;;  %v4892_v14 = vld [vmem:[#allocation2 + $0x6c] sm:$0xff]   ;;  %v4894_v15 = vld [vmem:[#allocation2 + $0x74] ss:$0 sps:$4 sm:$0xff]  }
  0x2d   : > { %3680 = vmatpush3.bf16.msra.mxu0 %v4493_v41  ;;  %4112 = vmatpush3.bf16.msra.mxu1 %v4492_v40  ;;  %v4520_v40 = vld [vmem:[%s5734_s1 + $0xd0] sm:$0xff]   ;;  %v687_v41 = vshrl.u32 %v4795_v12, 16  ;;  %v703_v3 = vrot.slane %v701_v62, 1  ;;  %v708_v8 = vrot.slane %v706_v63, 1  ;;  %v4532_v13 = vld [vmem:[%s5734_s1 + $0xe0] sm:$0xff]   ;;  %v713_v16 = vshll.u32 %v4820_v30, 16 }
  0x2e   : > { %3681 = vmatprep.subr.bf16.mxu0 %v4494_v42  ;;  %4113 = vmatprep.subr.bf16.mxu1 %v4495_v43  ;;  %v4841_v42 = vsel %vm649_vm0, %v680_v36, %v684_v32  ;;  %v711_v18 = vshrl.u32 %v4820_v30, 16  ;;  %v718_v26 = vshll.u32 %v4825_v35, 16  ;;  %v4910_v27 = vld [vmem:[#allocation2 + $0x80] ss:$0 sps:$4 sm:$0xff]   ;;  %v912_v28 = vrot.slane %v4892_v14, 1  ;;  %v4537_v31 = vld [vmem:[%s5734_s1 + $0x128] sm:$0xff]  }
  0x2f   : > { %v704_v6 = vor.u32 %v703_v3, %v699_v59  ;;  %v715_v24 = vrot.slane %v713_v16, 1  ;;  %v913_v29 = vrot.slane %v4894_v15, 1  ;;  %v916_v36 = vrot.slane %v4910_v27, 1  ;;  %v4969_v16 = vld [vmem:[#allocation2 + $0xb0] ss:$0 sps:$4 sm:$0xff]  }
  0x30   : > { %v720_v34 = vrot.slane %v718_v26, 1 }
  0x31   : > { %3682 = vmatpush3.bf16.msra.mxu0 %v4496_v44  ;;  %4114 = vmatpush3.bf16.msra.mxu1 %v4495_v43  ;;  %v689_v43 = vshll.u32 %v4795_v12, 16  ;;  %v694_v44 = vshll.u32 %v4512_v17, 16  ;;  %v4904_v22 = vsel %vm649_vm0, %v704_v6, %v708_v8  ;;  %v716_v32 = vor.u32 %v715_v24, %v711_v18  ;;  %v4964_v8 = vld [vmem:[#allocation2 + $0xa4] ss:$0 sps:$4 sm:$0xff]   ;;  %v4549_v18 = vld [vmem:[%s5734_s1 + $0x138] sm:$0xff]  }
  0x32   : > { %3683 = vmatprep.subr.bf16.mxu0 %v4497_v45  ;;  %4115 = vmatprep.subr.bf16.mxu1 %v4498_v46  ;;  %v901_v45 = vrot.slane %v4825_v35, 1 }
  0x34   : > { %v4861_v57 = vsel %vm884_vm1, %v900_v37, %v901_v45  ;;  %v4538_v37 = vld [vmem:[%s5734_s1 + $0xe8] sm:$0xff]  }
  0x35   : > { %3684 = vmatpush3.bf16.msra.mxu0 %v4499_v47  ;;  %4116 = vmatpush3.bf16.msra.mxu1 %v4498_v46  ;;  %v4847_v46 = vld [vmem:[#allocation2 + $0x48] sm:$0xff]   ;;  %v4849_v47 = vld [vmem:[#allocation2 + $0x50] ss:$0 sps:$4 sm:$0xff]  }
  0x36   : > { %3685 = vmatprep.subr.bf16.mxu0 %v4500_v48  ;;  %4117 = vmatprep.subr.bf16.mxu1 %v4501_v49  ;;  %v691_v48 = vrot.slane %v689_v43, 1  ;;  %v904_v51 = vrot.slane %v4849_v47, 1  ;;  %v4931_v43 = vld [vmem:[#allocation2 + $0x90] sm:$0xff]   ;;  %v723_v45 = vshrl.u32 %v4847_v46, 16 }
  0x37   : > { %v921_v62 = vrot.slane %v4931_v43, 1 }
  0x38   : > { %v692_v55 = vor.u32 %v691_v48, %v687_v41  ;;  %v4929_v41 = vld [vmem:[#allocation2 + $0x8c] ss:$0 sps:$4 sm:$0xff]   ;;  %v4938_v48 = vsel %vm649_vm0, %v716_v32, %v720_v34  ;;  %v4552_v32 = vld [vmem:[%s5734_s1 + $0x180] sm:$0xff]  }
  0x39   : > { %3686 = vmatpush3.bf16.msra.mxu0 %v4502_v52  ;;  %4118 = vmatpush3.bf16.msra.mxu1 %v4501_v49  ;;  %v696_v49 = vrot.slane %v694_v44, 1  ;;  %v4853_v52 = vld [vmem:[#allocation2 + $0x54] sm:$0xff]   ;;  %v4934_v44 = vsel %vm884_vm1, %v912_v28, %v913_v29  ;;  %v919_v59 = vrot.slane %v4929_v41, 1  ;;  %v4551_v29 = vld [vmem:[%s5734_s1 + $0x1c0] sm:$0xff]  }
  0x3a   : > { %3807 = vmatprep.subr.bf16.mxu1 %v4507_v0  ;;  %v4874_v0 = vld [vmem:[#allocation2 + $0x60] sm:$0xff]   ;;  %v737_v63 = vshll.u32 %v4853_v52, 16  ;;  %v735_v6 = vshrl.u32 %v4853_v52, 16  ;;  %3943 = vmatprep.subr.bf16.mxu0 %v4551_v29  ;;  %v761_v29 = vshll.u32 %v4892_v14, 16 }
  0x3b   : > { %v4868_v60 = vsel %vm649_vm0, %v692_v55, %v696_v49  ;;  %v909_v9 = vrot.slane %v4874_v0, 1  ;;  %v4998_v34 = vld [vmem:[%s5734_s1 + $0x140] sm:$0xff]  }
  0x3c   : > { %1182 = vmatmul.mubr.bf16.vlgmr.msra.gmra.mrb[0].mxu0 %v4503_v50  ;;  %4120 = vmatmul.mubr.bf16.vlgmr.msra.gmra.mrb[0].mxu1 %v4791_v7  ;;  %v903_v50 = vrot.slane %v4847_v46, 1 }
  0x3d   : > { %3808 = vmatpush3.bf16.msra.mxu1 %v4508_v2  ;;  %1189 = vmatprep.mubr.bf16.mxu0 %v4805_v20  ;;  %v906_v2 = vrot.slane %v4853_v52, 1 }
  0x3e   : > { %4123 = vmatprep.mubr.bf16.mxu1 %v4808_v21  ;;  %3809 = vmatprep.subr.bf16.mxu1 %v4513_v19  ;;  %v4871_v61 = vsel %vm884_vm1, %v903_v50, %v904_v51  ;;  %v4901_v19 = vld [vmem:[#allocation2 + $0x78] sm:$0xff]   ;;  %v730_v51 = vshll.u32 %v4849_v47, 16  ;;  %v4544_v47 = vld [vmem:[%s5734_s1 + $0xf0] sm:$0xff]  }
  0x3f   : > { %v4898_v17 = vsel %vm884_vm1, %v906_v2, %v907_v4  ;;  %v915_v35 = vrot.slane %v4901_v19, 1  ;;  %3944 = vmatpush3.bf16.msra.mxu0 %v4552_v32  ;;  %v4561_v32 = vld [vmem:[%s5734_s1 + $0x198] sm:$0xff]  }
  0x40   : > { %v732_v3 = vrot.slane %v730_v51, 1  ;;  %v4554_v51 = vld [vmem:[%s5734_s1 + $0x1c8] sm:$0xff]  }
  0x41   : > { %3810 = vmatpush3.bf16.msra.mxu1 %v4514_v23  ;;  %v4907_v23 = vsel %vm884_vm1, %v909_v9, %v910_v11  ;;  %v4941_v49 = vsel %vm884_vm1, %v915_v35, %v916_v36  ;;  %v739_v9 = vrot.slane %v737_v63, 1  ;;  %v742_v11 = vshll.u32 %v4858_v56, 16  ;;  %v4550_v56 = vld [vmem:[%s5734_s1 + $0xf8] sm:$0xff]   ;;  %3945 = vmatprep.subr.bf16.mxu0 %v4554_v51  ;;  %v4564_v51 = vld [vmem:[%s5734_s1 + $0x1a0] sm:$0xff]  }
  0x42   : > { %3811 = vmatprep.subr.bf16.mxu1 %v4519_v38  ;;  %v4926_v38 = vld [vmem:[#allocation2 + $0x84] sm:$0xff]   ;;  %v925_v35 = vrot.slane %v4964_v8, 1 }
  0x43   : > { %v918_v55 = vrot.slane %v4926_v38, 1  ;;  %v740_v36 = vor.u32 %v739_v9, %v735_v6  ;;  %v4557_v6 = vld [vmem:[%s5734_s1 + $0x1d0] sm:$0xff]  }
  0x44   : > { %1190 = vmatmul.mubr.bf16.gmra.mrb[4].mxu0 %v4778_v53  ;;  %4124 = vmatmul.mubr.bf16.gmra.mrb[4].mxu1 %v4823_v33  ;;  %v4558_v9 = vld [vmem:[%s5734_s1 + $0x190] sm:$0xff]  }
  0x45   : > { %1197 = vmatprep.mubr.bf16.mxu0 %v4841_v42  ;;  %4127 = vmatprep.mubr.bf16.mxu1 %v4832_v39  ;;  %v4975_v24 = vsel %vm884_vm1, %v918_v55, %v919_v59  ;;  %v4555_v55 = vld [vmem:[%s5734_s1 + $0x188] sm:$0xff]  }
  0x46   : > { %3812 = vmatpush3.bf16.msra.mxu1 %v4520_v40  ;;  %v725_v40 = vshll.u32 %v4847_v46, 16  ;;  %3946 = vmatpush3.bf16.msra.mxu0 %v4555_v55 }
  0x47   : > { %3813 = vmatprep.subr.bf16.mxu1 %v4525_v54  ;;  %v4944_v54 = vld [vmem:[#allocation2 + $0x98] ss:$0 sps:$4 sm:$0xff]   ;;  %3947 = vmatprep.subr.bf16.mxu0 %v4557_v6  ;;  %v771_v6 = vshrl.u32 %v4901_v19, 16 }
  0x48   : > { %v727_v50 = vrot.slane %v725_v40, 1  ;;  %v922_v4 = vrot.slane %v4944_v54, 1 }
  0x4a   : > { %3814 = vmatpush3.bf16.msra.mxu1 %v4526_v58  ;;  %v4543_v58 = vld [vmem:[%s5734_s1 + $0x130] sm:$0xff]   ;;  %v728_v2 = vor.u32 %v727_v50, %v723_v45  ;;  %v4981_v28 = vsel %vm884_vm1, %v921_v62, %v922_v4  ;;  %v928_v45 = vrot.slane %v4969_v16, 1  ;;  %v749_v50 = vshll.u32 %v4874_v0, 16  ;;  %3948 = vmatpush3.bf16.msra.mxu0 %v4558_v9 }
  0x4b   : > { %3815 = vmatprep.subr.bf16.mxu1 %v4531_v5  ;;  %v4961_v5 = vld [vmem:[#allocation2 + $0x9c] sm:$0xff]   ;;  %v754_v4 = vshll.u32 %v4876_v1, 16 }
  0x4c   : > { %1198 = vmatmul.mubr.bf16.gmra.mrb[8].mxu0 %v4793_v10  ;;  %4128 = vmatmul.mubr.bf16.gmra.mrb[8].mxu1 %v4861_v57  ;;  %v4978_v26 = vsel %vm649_vm0, %v728_v2, %v732_v3  ;;  %v747_v2 = vshrl.u32 %v4874_v0, 16  ;;  %v751_v3 = vrot.slane %v749_v50, 1  ;;  %v4563_v50 = vld [vmem:[%s5734_s1 + $0x1e0] sm:$0xff]  }
  0x4d   : > { %1205 = vmatprep.mubr.bf16.mxu0 %v4868_v60  ;;  %4131 = vmatprep.mubr.bf16.mxu1 %v4871_v61 }
  0x4e   : > { %3816 = vmatpush3.bf16.msra.mxu1 %v4532_v13  ;;  %v4967_v13 = vld [vmem:[#allocation2 + $0xa8] sm:$0xff]  }
  0x4f   : > { %3817 = vmatprep.subr.bf16.mxu1 %v4537_v31  ;;  %v924_v31 = vrot.slane %v4961_v5, 1  ;;  %v927_v40 = vrot.slane %v4967_v13, 1 }
  0x51   : > { %v5016_v59 = vsel %vm884_vm1, %v924_v31, %v925_v35  ;;  %v5024_v63 = vsel %vm884_vm1, %v927_v40, %v928_v45  ;;  %v4560_v31 = vld [vmem:[%s5734_s1 + $0x1d8] sm:$0xff]   ;;  %v763_v40 = vrot.slane %v761_v29, 1  ;;  %v766_v45 = vshll.u32 %v4894_v15, 16  ;;  %v4565_v15 = vld [vmem:[%s5734_s1 + $0x1e8] sm:$0xff]   ;;  %v4568_v29 = vld [vmem:[%s5734_s1 + $0x1b0] sm:$0xff]  }
  0x52   : > { %3818 = vmatpush3.bf16.msra.mxu1 %v4538_v37  ;;  %v744_v37 = vrot.slane %v742_v11, 1  ;;  %3949 = vmatprep.subr.bf16.mxu0 %v4560_v31  ;;  %v4569_v31 = vld [vmem:[%s5734_s1 + $0x1f8] sm:$0xff]  }
  0x53   : > { %3819 = vmatprep.subr.bf16.mxu1 %v4543_v58  ;;  %v5013_v58 = vld [vmem:[#allocation2 + $0xb4] sm:$0xff]   ;;  %3950 = vmatpush3.bf16.msra.mxu0 %v4561_v32 }
  0x54   : > { %1206 = vmatmul.mubr.bf16.gmra.mrb[12].mxu0 %v4795_v12  ;;  %4132 = vmatmul.mubr.bf16.gmra.mrb[12].mxu1 %v4898_v17  ;;  %v5019_v62 = vsel %vm649_vm0, %v740_v36, %v744_v37  ;;  %v930_v11 = vrot.slane %v5013_v58, 1  ;;  %v759_v36 = vshrl.u32 %v4892_v14, 16 }
  0x55   : > { %1213 = vmatprep.mubr.bf16.mxu0 %v4904_v22  ;;  %4135 = vmatprep.mubr.bf16.mxu1 %v4907_v23 }
  0x56   : > { %3820 = vmatpush3.bf16.msra.mxu1 %v4544_v47  ;;  %v5021_v47 = vld [vmem:[#allocation2 + $0xbc] ss:$0 sps:$4 sm:$0xff]   ;;  %v764_v55 = vor.u32 %v763_v40, %v759_v36  ;;  %3951 = vmatprep.subr.bf16.mxu0 %v4563_v50  ;;  %v4559_v36 = vld [vmem:[%s5734_s1 + $0x150] sm:$0xff]  }
  0x57   : > { %3821 = vmatprep.subr.bf16.mxu1 %v4549_v18  ;;  %v931_v1 = vrot.slane %v5021_v47, 1  ;;  %v752_v18 = vor.u32 %v751_v3, %v747_v2  ;;  %v768_v2 = vrot.slane %v766_v45, 1  ;;  %v773_v3 = vshll.u32 %v4901_v19, 16  ;;  %3952 = vmatpush3.bf16.msra.mxu0 %v4564_v51  ;;  %v4570_v50 = vld [vmem:[%s5734_s1 + $0x1b8] sm:$0xff]  }
  0x58   : > { %3953 = vmatprep.subr.bf16.mxu0 %v4565_v15  ;;  %v795_v15 = vshrl.u32 %v4931_v43, 16 }
  0x59   : > { %v5048_v35 = vsel %vm884_vm1, %v930_v11, %v931_v1  ;;  %v5077_v9 = vsel %vm649_vm0, %v764_v55, %v768_v2  ;;  %v775_v11 = vrot.slane %v773_v3, 1  ;;  %v778_v1 = vshll.u32 %v4910_v27, 16  ;;  %v4562_v55 = vld [vmem:[%s5734_s1 + $0x158] sm:$0xff]  }
  0x5a   : > { %3822 = vmatpush3.bf16.msra.mxu1 %v4550_v56  ;;  %v756_v56 = vrot.slane %v754_v4, 1  ;;  %v4566_v4 = vld [vmem:[%s5734_s1 + $0x1a8] sm:$0xff]   ;;  %v790_v27 = vshll.u32 %v4929_v41, 16  ;;  %v783_v41 = vshrl.u32 %v4926_v38, 16  ;;  %v802_v3 = vshll.u32 %v4944_v54, 16 }
  0x5b   : > { %4151 = vmatprep.subr.bf16.mxu1 %v4998_v34  ;;  %3954 = vmatpush3.bf16.msra.mxu0 %v4566_v4  ;;  %v776_v32 = vor.u32 %v775_v11, %v771_v6  ;;  %v4571_v4 = vld [vmem:[%s5734_s1 + $0x160] sm:$0xff]  }
  0x5c   : > { %1214 = vmatmul.mubr.bf16.gmra.mrb[16].mxu0 %v4814_v25  ;;  %4136 = vmatmul.mubr.bf16.gmra.mrb[16].mxu1 %v4934_v44  ;;  %v5052_v37 = vsel %vm649_vm0, %v752_v18, %v756_v56  ;;  %v4567_v18 = vld [vmem:[%s5734_s1 + $0x1f0] sm:$0xff]   ;;  %v785_v56 = vshll.u32 %v4926_v38, 16  ;;  %v792_v45 = vrot.slane %v790_v27, 1  ;;  %v807_v27 = vshrl.u32 %v4961_v5, 16 }
  0x5d   : > { %1221 = vmatprep.mubr.bf16.mxu0 %v4938_v48  ;;  %4139 = vmatprep.mubr.bf16.mxu1 %v4941_v49 }
  0x5e   : > { %3955 = vmatprep.subr.bf16.mxu0 %v4567_v18  ;;  %v787_v40 = vrot.slane %v785_v56, 1  ;;  %v809_v18 = vshll.u32 %v4961_v5, 16  ;;  %v4573_v56 = vld [vmem:[%s5734_s1 + $0x170] sm:$0xff]  }
  0x5f   : > { %3956 = vmatpush3.bf16.msra.mxu0 %v4568_v29 }
  0x60   : > { %3957 = vmatprep.subr.bf16.mxu0 %v4569_v31  ;;  %v788_v6 = vor.u32 %v787_v40, %v783_v41  ;;  %v811_v31 = vrot.slane %v809_v18, 1  ;;  %v821_v41 = vshll.u32 %v4967_v13, 16 }
  0x62   : > { %v5123_v11 = vsel %vm649_vm0, %v788_v6, %v792_v45  ;;  %v819_v45 = vshrl.u32 %v4967_v13, 16 }
  0x63   : > { %3958 = vmatpush3.bf16.msra.mxu0 %v4570_v50  ;;  %v823_v50 = vrot.slane %v821_v41, 1 }
  0x64   : > { %1222 = vmatmul.mubr.bf16.gmra.mrb[20].mxu0 %v4820_v30  ;;  %4140 = vmatmul.mubr.bf16.gmra.mrb[20].mxu1 %v4975_v24 }
  0x65   : > { %1229 = vmatprep.mubr.bf16.mxu0 %v4978_v26  ;;  %4143 = vmatprep.mubr.bf16.mxu1 %v4981_v28 }
  0x6c   : > { %1230 = vmatmul.mubr.bf16.gmra.mrb[24].mxu0 %v4847_v46  ;;  %4144 = vmatmul.mubr.bf16.gmra.mrb[24].mxu1 %v5016_v59 }
  0x6d   : > { %1237 = vmatprep.mubr.bf16.mxu0 %v5019_v62  ;;  %4147 = vmatprep.mubr.bf16.mxu1 %v5024_v63 }
  0x74   : > { %1238 = vmatmul.mubr.bf16.gmra.mrb[28].mxu0 %v4853_v52  ;;  %4148 = vmatmul.mubr.bf16.gmra.mrb[28].mxu1 %v5048_v35 }
  0x75   : > { %1245 = vmatprep.mubr.bf16.mxu0 %v5052_v37  ;;  %1760 = vmatprep.mubr.bf16.mxu1 %v4805_v20  ;;  %v4556_v20 = vld [vmem:[%s5734_s1 + $0x148] sm:$0xff]  }
  0x7c   : > { %1246 = vmatmul.mubr.bf16.gmra.mrb[32].mxu0 %v4874_v0  ;;  %1761 = vmatmul.mubr.bf16.vlgmr.msra.gmra.mrb[32].mxu1 %v4778_v53  ;;  %v780_v53 = vrot.slane %v778_v1, 1  ;;  %v804_v1 = vrot.slane %v802_v3, 1  ;;  %v833_v3 = vshll.u32 %v5013_v58, 16 }
  0x7d   : > { %4152 = vmatpush3.bf16.msra.mxu1 %v4998_v34  ;;  %1253 = vmatprep.mubr.bf16.mxu0 %v5077_v9  ;;  %v797_v34 = vshll.u32 %v4931_v43, 16 }
  0x7e   : > { %1768 = vmatprep.mubr.bf16.mxu1 %v4841_v42  ;;  %4153 = vmatprep.subr.bf16.mxu1 %v4556_v20  ;;  %v5105_v51 = vsel %vm649_vm0, %v776_v32, %v780_v53  ;;  %v814_v32 = vshll.u32 %v4964_v8, 16  ;;  %v4574_v53 = vld [vmem:[%s5734_s1 + $0x178] sm:$0xff]   ;;  %v5149_v8 = vld [vmem:[%s5734_s1 + $0x200] sm:$0xff]   ;;  %v835_v6 = vrot.slane %v833_v3, 1 }
  0x7f   : > { %v799_v2 = vrot.slane %v797_v34, 1 }
  0x80   : > { %v816_v34 = vrot.slane %v814_v32, 1 }
  0x81   : > { %4154 = vmatpush3.bf16.msra.mxu1 %v4556_v20  ;;  %v4572_v20 = vld [vmem:[%s5734_s1 + $0x168] sm:$0xff]   ;;  %v800_v54 = vor.u32 %v799_v2, %v795_v15  ;;  %v826_v15 = vshll.u32 %v4969_v16, 16  ;;  %v831_v16 = vshrl.u32 %v5013_v58, 16 }
  0x82   : > { %4155 = vmatprep.subr.bf16.mxu1 %v4559_v36 }
  0x83   : > { %v5134_v29 = vsel %vm649_vm0, %v800_v54, %v804_v1  ;;  %v828_v2 = vrot.slane %v826_v15, 1  ;;  %v836_v54 = vor.u32 %v835_v6, %v831_v16 }
  0x84   : > { %1254 = vmatmul.mubr.bf16.gmra.mrb[36].mxu0 %v4892_v14  ;;  %1769 = vmatmul.mubr.bf16.gmra.mrb[36].mxu1 %v4793_v10 }
  0x85   : > { %1261 = vmatprep.mubr.bf16.mxu0 %v5105_v51  ;;  %1776 = vmatprep.mubr.bf16.mxu1 %v4868_v60 }
  0x86   : > { %4156 = vmatpush3.bf16.msra.mxu1 %v4559_v36  ;;  %v812_v36 = vor.u32 %v811_v31, %v807_v27  ;;  %v5268_v31 = vld [vmem:[#allocation2 + $0xcc] sm:$0xff]  }
  0x87   : > { %4157 = vmatprep.subr.bf16.mxu1 %v4562_v55 }
  0x88   : > { %v5152_v40 = vsel %vm649_vm0, %v812_v36, %v816_v34  ;;  %v5279_v36 = vld [vmem:[#allocation2 + $0xd4] ss:$0 sps:$4 sm:$0xff]   ;;  %v857_v34 = vshll.u32 %v5268_v31, 16 }
  0x89   : > { %v862_v15 = vshll.u32 %v5279_v36, 16 }
  0x8a   : > { %4158 = vmatpush3.bf16.msra.mxu1 %v4562_v55  ;;  %v824_v55 = vor.u32 %v823_v50, %v819_v45  ;;  %v859_v50 = vrot.slane %v857_v34, 1 }
  0x8b   : > { %4159 = vmatprep.subr.bf16.mxu1 %v4571_v4 }
  0x8c   : > { %1262 = vmatmul.mubr.bf16.gmra.mrb[40].mxu0 %v4901_v19  ;;  %1777 = vmatmul.mubr.bf16.gmra.mrb[40].mxu1 %v4795_v12 }
  0x8d   : > { %1269 = vmatprep.mubr.bf16.mxu0 %v5123_v11  ;;  %1784 = vmatprep.mubr.bf16.mxu1 %v4904_v22 }
  0x8e   : > { %4160 = vmatpush3.bf16.msra.mxu1 %v4571_v4  ;;  %v5163_v4 = vsel %vm649_vm0, %v824_v55, %v828_v2 }
  0x8f   : > { %4161 = vmatprep.subr.bf16.mxu1 %v4572_v20 }
  0x92   : > { %4162 = vmatpush3.bf16.msra.mxu1 %v4572_v20  ;;  %v838_v20 = vshll.u32 %v5021_v47, 16 }
  0x93   : > { %4163 = vmatprep.subr.bf16.mxu1 %v4573_v56 }
  0x94   : > { %1270 = vmatmul.mubr.bf16.gmra.mrb[44].mxu0 %v4926_v38  ;;  %1785 = vmatmul.mubr.bf16.gmra.mrb[44].mxu1 %v4814_v25  ;;  %v840_v1 = vrot.slane %v838_v20, 1 }
  0x95   : > { %1277 = vmatprep.mubr.bf16.mxu0 %v5134_v29  ;;  %1792 = vmatprep.mubr.bf16.mxu1 %v4938_v48 }
  0x96   : > { %4164 = vmatpush3.bf16.msra.mxu1 %v4573_v56  ;;  %v5172_v18 = vsel %vm649_vm0, %v836_v54, %v840_v1 }
  0x97   : > { %4165 = vmatprep.subr.bf16.mxu1 %v4574_v53 }
  0x9a   : > { %4166 = vmatpush3.bf16.msra.mxu1 %v4574_v53 }
  0x9b   : > { %4199 = vmatprep.subr.bf16.mxu1 %v5149_v8 }
  0x9c   : > { %1278 = vmatmul.mubr.bf16.gmra.mrb[48].mxu0 %v4931_v43  ;;  %1793 = vmatmul.mubr.bf16.gmra.mrb[48].mxu1 %v4820_v30 }
  0x9d   : > { %1285 = vmatprep.mubr.bf16.mxu0 %v5152_v40  ;;  %1800 = vmatprep.mubr.bf16.mxu1 %v4978_v26 }
  0xa4   : > { %1286 = vmatmul.mubr.bf16.gmra.mrb[52].mxu0 %v4961_v5  ;;  %1801 = vmatmul.mubr.bf16.gmra.mrb[52].mxu1 %v4847_v46 }
  0xa5   : > { %1293 = vmatprep.mubr.bf16.mxu0 %v5163_v4  ;;  %1808 = vmatprep.mubr.bf16.mxu1 %v5019_v62 }
  0xac   : > { %1294 = vmatmul.mubr.bf16.gmra.mrb[56].mxu0 %v4967_v13  ;;  %1809 = vmatmul.mubr.bf16.gmra.mrb[56].mxu1 %v4853_v52 }
  0xad   : > { %1301 = vmatprep.mubr.bf16.mxu0 %v5172_v18  ;;  %1816 = vmatprep.mubr.bf16.mxu1 %v5052_v37 }
  0xb4   : > { %1302 = vmatmul.mubr.bf16.gmra.mrb[60].mxu0 %v5013_v58  ;;  %1817 = vmatmul.mubr.bf16.gmra.mrb[60].mxu1 %v4874_v0 }
  0xb5   : > { %1824 = vmatprep.mubr.bf16.mxu1 %v5077_v9  ;;  %2371 = vmatprep.mubr.bf16.mxu0 %v4841_v42 }
  0xbc   : > { %1825 = vmatmul.mubr.bf16.gmra.mrb[64].mxu1 %v4892_v14  ;;  %2372 = vmatmul.mubr.bf16.vlgmr.msra.gmra.mrb[64].mxu0 %v4793_v10  ;;  %v5198_v10 = vld [vmem:[#allocation2 + $0xc0] sm:$0xff]  }
  0xbd   : > { %1832 = vmatprep.mubr.bf16.mxu1 %v5105_v51  ;;  %2379 = vmatprep.mubr.bf16.mxu0 %v4868_v60 }
  0xc4   : > { %1833 = vmatmul.mubr.bf16.gmra.mrb[68].mxu1 %v4901_v19  ;;  %2380 = vmatmul.mubr.bf16.gmra.mrb[68].mxu0 %v4795_v12  ;;  %v5204_v12 = vld [vmem:[#allocation2 + $0xc8] ss:$0 sps:$4 sm:$0xff]  }
  0xc5   : > { %1840 = vmatprep.mubr.bf16.mxu1 %v5123_v11  ;;  %2387 = vmatprep.mubr.bf16.mxu0 %v4904_v22  ;;  %v850_v60 = vshll.u32 %v5204_v12, 16 }
  0xc7   : > { %v852_v22 = vrot.slane %v850_v60, 1 }
  0xcc   : > { %1841 = vmatmul.mubr.bf16.gmra.mrb[72].mxu1 %v4926_v38  ;;  %2388 = vmatmul.mubr.bf16.gmra.mrb[72].mxu0 %v4814_v25  ;;  %v845_v25 = vshll.u32 %v5198_v10, 16 }
  0xcd   : > { %1848 = vmatprep.mubr.bf16.mxu1 %v5134_v29  ;;  %2395 = vmatprep.mubr.bf16.mxu0 %v4938_v48 }
  0xce   : > { %v847_v42 = vrot.slane %v845_v25, 1 }
  0xd4   : > { %1849 = vmatmul.mubr.bf16.gmra.mrb[76].mxu1 %v4931_v43  ;;  %2396 = vmatmul.mubr.bf16.gmra.mrb[76].mxu0 %v4820_v30  ;;  %v843_v30 = vshrl.u32 %v5198_v10, 16 }
  0xd5   : > { %1856 = vmatprep.mubr.bf16.mxu1 %v5152_v40  ;;  %2403 = vmatprep.mubr.bf16.mxu0 %v4978_v26 }
  0xdc   : > { %1857 = vmatmul.mubr.bf16.gmra.mrb[80].mxu1 %v4961_v5  ;;  %2404 = vmatmul.mubr.bf16.gmra.mrb[80].mxu0 %v4847_v46  ;;  %v848_v46 = vor.u32 %v847_v42, %v843_v30  ;;  %v934_v30 = vrot.slane %v5204_v12, 1  ;;  %v4588_v42 = vld [vmem:[%s5736_s3 + $0x8] sm:$0xff]  }
  0xdd   : > { %1864 = vmatprep.mubr.bf16.mxu1 %v5163_v4  ;;  %2411 = vmatprep.mubr.bf16.mxu0 %v5019_v62 }
  0xde   : > { %v5214_v48 = vsel %vm649_vm0, %v848_v46, %v852_v22 }
  0xe4   : > { %1865 = vmatmul.mubr.bf16.gmra.mrb[84].mxu1 %v4967_v13  ;;  %2412 = vmatmul.mubr.bf16.gmra.mrb[84].mxu0 %v4853_v52  ;;  %v4578_v52 = vld [vmem:[%s5734_s1 + $0x208] sm:$0xff]  }
  0xe5   : > { %1872 = vmatprep.mubr.bf16.mxu1 %v5172_v18  ;;  %2419 = vmatprep.mubr.bf16.mxu0 %v5052_v37 }
  0xec   : > { %1873 = vmatmul.mubr.bf16.gmra.mrb[88].mxu1 %v5013_v58  ;;  %2420 = vmatmul.mubr.bf16.gmra.mrb[88].mxu0 %v4874_v0  ;;  %v4580_v0 = vld [vmem:[%s5734_s1 + $0x218] sm:$0xff]  }
  0xed   : > { %1880 = vmatprep.mubr.bf16.mxu1 %v5214_v48  ;;  %2427 = vmatprep.mubr.bf16.mxu0 %v5077_v9 }
  0xf4   : > { %1881 = vmatmul.mubr.bf16.gmra.mrb[92].mxu1 %v5198_v10  ;;  %2428 = vmatmul.mubr.bf16.gmra.mrb[92].mxu0 %v4892_v14  ;;  %v4581_v14 = vld [vmem:[%s5734_s1 + $0x220] sm:$0xff]  }
  0xf5   : > { %4167 = vmatprep.mubr.bf16.mxu1 %v4791_v7  ;;  %2435 = vmatprep.mubr.bf16.mxu0 %v5105_v51  ;;  %v4579_v7 = vld [vmem:[%s5734_s1 + $0x210] sm:$0xff]  }
  0xfc   : > { %4168 = vmatmul.mubr.bf16.vlgmr.msra.gmra.mrb[0].mxu1 %v4808_v21  ;;  %2436 = vmatmul.mubr.bf16.gmra.mrb[96].mxu0 %v4901_v19  ;;  %v4582_v19 = vld [vmem:[%s5734_s1 + $0x228] sm:$0xff]  }
  0xfd   : > { %4200 = vmatpush3.bf16.msra.mxu1 %v5149_v8  ;;  %4171 = vmatprep.mubr.bf16.mxu1 %v4823_v33 }
  0xfe   : > { %2443 = vmatprep.mubr.bf16.mxu0 %v5123_v11  ;;  %4201 = vmatprep.subr.bf16.mxu1 %v4578_v52 }
 0x101   : > { %4202 = vmatpush3.bf16.msra.mxu1 %v4578_v52 }
 0x102   : > { %4203 = vmatprep.subr.bf16.mxu1 %v4579_v7 }
 0x104   : > { %4172 = vmatmul.mubr.bf16.gmra.mrb[4].mxu1 %v4832_v39  ;;  %2444 = vmatmul.mubr.bf16.gmra.mrb[100].mxu0 %v4926_v38  ;;  %v4583_v38 = vld [vmem:[%s5734_s1 + $0x230] sm:$0xff]  }
 0x105   : > { %4175 = vmatprep.mubr.bf16.mxu1 %v4861_v57  ;;  %2451 = vmatprep.mubr.bf16.mxu0 %v5134_v29 }
 0x106   : > { %4204 = vmatpush3.bf16.msra.mxu1 %v4579_v7 }
 0x107   : > { %4205 = vmatprep.subr.bf16.mxu1 %v4580_v0 }
 0x10a   : > { %4206 = vmatpush3.bf16.msra.mxu1 %v4580_v0 }
 0x10b   : > { %4207 = vmatprep.subr.bf16.mxu1 %v4581_v14 }
 0x10c   : > { %4176 = vmatmul.mubr.bf16.gmra.mrb[8].mxu1 %v4871_v61  ;;  %2452 = vmatmul.mubr.bf16.gmra.mrb[104].mxu0 %v4931_v43  ;;  %v4586_v43 = vld [vmem:[%s5734_s1 + $0x238] sm:$0xff]  }
 0x10d   : > { %4179 = vmatprep.mubr.bf16.mxu1 %v4898_v17  ;;  %2459 = vmatprep.mubr.bf16.mxu0 %v5152_v40 }
 0x10e   : > { %4208 = vmatpush3.bf16.msra.mxu1 %v4581_v14 }
 0x10f   : > { %4209 = vmatprep.subr.bf16.mxu1 %v4582_v19  ;;  %v3687_v26 = vpop.f32.mrb[0].mxu0 }
 0x110   : > { %v3688_v62 = vpop.f32.mrb[1].mxu0 }
 0x111   : > { %v5255_v47 = vadd.f32 %v3688_v62, %v3687_v26  ;;  %v3690_v37 = vpop.f32.mrb[2].mxu0  ;;  %v4589_v62 = vld [vmem:[%s5736_s3 + $0x10] sm:$0xff]  }
 0x112   : > { %4210 = vmatpush3.bf16.msra.mxu1 %v4582_v19  ;;  %v3691_v9 = vpop.f32.mrb[3].mxu0 }
 0x113   : > { %4211 = vmatprep.subr.bf16.mxu1 %v4583_v38  ;;  %v5260_v51 = vadd.f32 %v3691_v9, %v3690_v37 }
 0x114   : > { %4180 = vmatmul.mubr.bf16.gmra.mrb[12].mxu1 %v4907_v23  ;;  %2460 = vmatmul.mubr.bf16.gmra.mrb[108].mxu0 %v4961_v5  ;;  %v4587_v5 = vld [vmem:[%s5736_s3] sm:$0xff]  }
 0x115   : > { %4183 = vmatprep.mubr.bf16.mxu1 %v4934_v44  ;;  %2467 = vmatprep.mubr.bf16.mxu0 %v5163_v4  ;;  %v864_v4 = vrot.slane %v862_v15, 1 }
 0x116   : > { %4212 = vmatpush3.bf16.msra.mxu1 %v4583_v38  ;;  %4247 = vmatprep.subr.bf16.mxu0 %v4587_v5 }
 0x117   : > { %4213 = vmatprep.subr.bf16.mxu1 %v4586_v43  ;;  %v3693_v11 = vpop.f32.mrb[4].mxu0  ;;  %4248 = vmatpush3.bf16.msra.mxu0 %v4587_v5 }
 0x118   : > { %v3694_v56 = vpop.f32.mrb[5].mxu0  ;;  %4249 = vmatprep.subr.bf16.mxu0 %v4588_v42 }
 0x119   : > { %v5266_v29 = vadd.f32 %v3694_v56, %v3693_v11  ;;  %v3696_v27 = vpop.f32.mrb[6].mxu0 }
 0x11a   : > { %4214 = vmatpush3.bf16.msra.mxu1 %v4586_v43  ;;  %v3697_v32 = vpop.f32.mrb[7].mxu0 }
 0x11b   : > { %v5270_v53 = vadd.f32 %v3697_v32, %v3696_v27  ;;  %4250 = vmatpush3.bf16.msra.mxu0 %v4588_v42 }
 0x11c   : > { %4184 = vmatmul.mubr.bf16.gmra.mrb[16].mxu1 %v4941_v49  ;;  %2468 = vmatmul.mubr.bf16.gmra.mrb[112].mxu0 %v4967_v13  ;;  %v855_v13 = vshrl.u32 %v5268_v31, 16 }
 0x11d   : > { %4187 = vmatprep.mubr.bf16.mxu1 %v4975_v24  ;;  %2475 = vmatprep.mubr.bf16.mxu0 %v5172_v18 }
 0x11e   : > { %v860_v3 = vor.u32 %v859_v50, %v855_v13  ;;  %4251 = vmatprep.subr.bf16.mxu0 %v4589_v62 }
 0x11f   : > { %v3699_v41 = vpop.f32.mrb[8].mxu0  ;;  %4252 = vmatpush3.bf16.msra.mxu0 %v4589_v62 }
 0x120   : > { %v3700_v8 = vpop.f32.mrb[9].mxu0  ;;  %v865_v1 = vsel %vm649_vm0, %v860_v3, %v864_v4 }
 0x121   : > { %v5282_v40 = vadd.f32 %v3700_v8, %v3699_v41  ;;  %v3702_v45 = vpop.f32.mrb[10].mxu0  ;;  %v4590_v41 = vld [vmem:[%s5736_s3 + $0x18] sm:$0xff]  }
 0x122   : > { %v3703_v55 = vpop.f32.mrb[11].mxu0  ;;  %4253 = vmatprep.subr.bf16.mxu0 %v4590_v41 }
 0x123   : > { %v5286_v2 = vadd.f32 %v3703_v55, %v3702_v45  ;;  %4254 = vmatpush3.bf16.msra.mxu0 %v4590_v41 }
 0x124   : > { %4188 = vmatmul.mubr.bf16.gmra.mrb[20].mxu1 %v4981_v28  ;;  %2476 = vmatmul.mubr.bf16.gmra.mrb[116].mxu0 %v5013_v58  ;;  %v933_v58 = vrot.slane %v5198_v10, 1 }
 0x125   : > { %4191 = vmatprep.mubr.bf16.mxu1 %v5016_v59  ;;  %2483 = vmatprep.mubr.bf16.mxu0 %v5214_v48 }
 0x126   : > { %v5306_v22 = vsel %vm884_vm1, %v933_v58, %v934_v30 }
 0x127   : > { %v3705_v16 = vpop.f32.mrb[12].mxu0 }
 0x128   : > { %v3706_v6 = vpop.f32.mrb[13].mxu0 }
 0x129   : > { %v5292_v20 = vadd.f32 %v3706_v6, %v3705_v16  ;;  %v3708_v54 = vpop.f32.mrb[14].mxu0 }
 0x12a   : > { %v3709_v18 = vpop.f32.mrb[15].mxu0 }
 0x12b   : > { %v5295_v25 = vadd.f32 %v3709_v18, %v3708_v54 }
 0x12c   : > { %4192 = vmatmul.mubr.bf16.gmra.mrb[24].mxu1 %v5024_v63  ;;  %2484 = vmatmul.mubr.bf16.gmra.mrb[120].mxu0 %v5198_v10 }
 0x12d   : > { %4195 = vmatprep.mubr.bf16.mxu1 %v5048_v35  ;;  %2491 = vmatprep.mubr.bf16.mxu0 %v865_v1 }
 0x12f   : > { %v3711_v60 = vpop.f32.mrb[16].mxu0 }
 0x130   : > { %v3712_v46 = vpop.f32.mrb[17].mxu0 }
 0x131   : > { %v5308_v48 = vadd.f32 %v3712_v46, %v3711_v60  ;;  %v3714_v52 = vpop.f32.mrb[18].mxu0 }
 0x132   : > { %v3715_v7 = vpop.f32.mrb[19].mxu0 }
 0x133   : > { %v5310_v0 = vadd.f32 %v3715_v7, %v3714_v52 }
 0x134   : > { %4196 = vmatmul.mubr.bf16.gmra.mrb[28].mxu1 %v5306_v22  ;;  %2492 = vmatmul.mubr.bf16.gmra.mrb[124].mxu0 %v5268_v31 }
 0x135   : > { %4215 = vmatprep.mubr.bf16.mxu1 %v4808_v21 }
 0x137   : > { %v3717_v10 = vpop.f32.mrb[20].mxu0 }
 0x138   : > { %v3718_v12 = vpop.f32.mrb[21].mxu0 }
 0x139   : > { %v5315_v14 = vadd.f32 %v3718_v12, %v3717_v10  ;;  %v3720_v19 = vpop.f32.mrb[22].mxu0 }
 0x13a   : > { %v3721_v38 = vpop.f32.mrb[23].mxu0 }
 0x13b   : > { %v5317_v26 = vadd.f32 %v3721_v38, %v3720_v19 }
 0x13c   : > { %4216 = vmatmul.mubr.bf16.vlgmr.msra.gmra.mrb[0].mxu1 %v4823_v33 }
 0x13d   : > { %4219 = vmatprep.mubr.bf16.mxu1 %v4832_v39 }
 0x13f   : > { %v3723_v37 = vpop.f32.mrb[24].mxu0 }
 0x140   : > { %v3724_v9 = vpop.f32.mrb[25].mxu0 }
 0x141   : > { %v5324_v21 = vadd.f32 %v3724_v9, %v3723_v37  ;;  %v3726_v43 = vpop.f32.mrb[26].mxu0 }
 0x142   : > { %v3727_v11 = vpop.f32.mrb[27].mxu0 }
 0x143   : > { %v5326_v56 = vadd.f32 %v3727_v11, %v3726_v43 }
 0x144   : > { %4220 = vmatmul.mubr.bf16.gmra.mrb[4].mxu1 %v4861_v57 }
 0x145   : > { %4223 = vmatprep.mubr.bf16.mxu1 %v4871_v61 }
 0x147   : > { %v3729_v33 = vpop.f32.mrb[28].mxu0 }
 0x148   : > { %v3730_v39 = vpop.f32.mrb[29].mxu0 }
 0x149   : > { %v5330_v27 = vadd.f32 %v3730_v39, %v3729_v33  ;;  %v3732_v32 = vpop.f32.mrb[30].mxu0 }
 0x14a   : > { %v3733_v5 = vpop.f32.mrb[31].mxu0 }
 0x14b   : > { %v5332_v34 = vadd.f32 %v3733_v5, %v3732_v32 }
 0x14c   : > { %4224 = vmatmul.mubr.bf16.gmra.mrb[8].mxu1 %v4898_v17 }
 0x14d   : > { %4227 = vmatprep.mubr.bf16.mxu1 %v4907_v23 }
 0x14f   : > { %v3823_v8 = vpop.f32.mrb[32].mxu1  ;;  %v3735_v57 = vpop.f32.mrb[32].mxu0 }
 0x150   : > { %v3824_v61 = vpop.f32.mrb[33].mxu1  ;;  %v3736_v45 = vpop.f32.mrb[33].mxu0 }
 0x151   : > { %v3825_v13 = vadd.f32 %v3824_v61, %v3823_v8  ;;  %v3826_v50 = vpop.f32.mrb[34].mxu1  ;;  %v5339_v15 = vadd.f32 %v3736_v45, %v3735_v57  ;;  %v3738_v55 = vpop.f32.mrb[34].mxu0 }
 0x152   : > { %v3827_v3 = vpop.f32.mrb[35].mxu1  ;;  %v3739_v4 = vpop.f32.mrb[35].mxu0 }
 0x153   : > { %v5342_v17 = vadd.f32 %v3825_v13, %v5255_v47  ;;  %v3828_v23 = vadd.f32 %v3827_v3, %v3826_v50  ;;  %v5344_v16 = vadd.f32 %v3739_v4, %v3738_v55  ;;  %v936_v4 = vrot.slane %v5268_v31, 1 }
 0x154   : > { %4228 = vmatmul.mubr.bf16.gmra.mrb[12].mxu1 %v4934_v44 }
 0x155   : > { %v5348_v6 = vadd.f32 %v3828_v23, %v5260_v51  ;;  %4231 = vmatprep.mubr.bf16.mxu1 %v4941_v49  ;;  %v4591_v49 = vld [vmem:[%s5736_s3 + $0x20] sm:$0xff]   ;;  %v937_v23 = vrot.slane %v5279_v36, 1 }
 0x156   : > { %4255 = vmatprep.subr.bf16.mxu0 %v4591_v49 }
 0x157   : > { %v3829_v54 = vpop.f32.mrb[36].mxu1  ;;  %v3741_v1 = vpop.f32.mrb[36].mxu0  ;;  %4256 = vmatpush3.bf16.msra.mxu0 %v4591_v49 }
 0x158   : > { %v3830_v18 = vpop.f32.mrb[37].mxu1  ;;  %v3742_v58 = vpop.f32.mrb[37].mxu0 }
 0x159   : > { %v3831_v30 = vadd.f32 %v3830_v18, %v3829_v54  ;;  %v3832_v42 = vpop.f32.mrb[38].mxu1  ;;  %v5351_v60 = vadd.f32 %v3742_v58, %v3741_v1  ;;  %v3744_v47 = vpop.f32.mrb[38].mxu0 }
 0x15a   : > { %v3833_v46 = vpop.f32.mrb[39].mxu1  ;;  %v3745_v52 = vpop.f32.mrb[39].mxu0 }
 0x15b   : > { %v5354_v7 = vadd.f32 %v3831_v30, %v5266_v29  ;;  %v3834_v44 = vadd.f32 %v3833_v46, %v3832_v42  ;;  %v5356_v10 = vadd.f32 %v3745_v52, %v3744_v47  ;;  %v938_v42 = vsel %vm884_vm1, %v936_v4, %v937_v23 }
 0x15c   : > { %4232 = vmatmul.mubr.bf16.gmra.mrb[16].mxu1 %v4975_v24 }
 0x15d   : > { %v5363_v51 = vadd.f32 %v3834_v44, %v5270_v53  ;;  %4235 = vmatprep.mubr.bf16.mxu1 %v4981_v28 }
 0x15f   : > { %v3835_v12 = vpop.f32.mrb[40].mxu1  ;;  %v3747_v19 = vpop.f32.mrb[40].mxu0 }
 0x160   : > { %v3836_v29 = vpop.f32.mrb[41].mxu1  ;;  %v3748_v38 = vpop.f32.mrb[41].mxu0 }
 0x161   : > { %v3837_v62 = vadd.f32 %v3836_v29, %v3835_v12  ;;  %v3838_v37 = vpop.f32.mrb[42].mxu1  ;;  %v5366_v9 = vadd.f32 %v3748_v38, %v3747_v19  ;;  %v3750_v43 = vpop.f32.mrb[42].mxu0 }
 0x162   : > { %v3839_v11 = vpop.f32.mrb[43].mxu1  ;;  %v3751_v33 = vpop.f32.mrb[43].mxu0 }
 0x163   : > { %v5369_v24 = vadd.f32 %v3837_v62, %v5282_v40  ;;  %v3840_v53 = vadd.f32 %v3839_v11, %v3838_v37  ;;  %v5371_v39 = vadd.f32 %v3751_v33, %v3750_v43 }
 0x164   : > { %4236 = vmatmul.mubr.bf16.gmra.mrb[20].mxu1 %v5016_v59 }
 0x165   : > { %v5375_v28 = vadd.f32 %v3840_v53, %v5286_v2  ;;  %4239 = vmatprep.mubr.bf16.mxu1 %v5024_v63  ;;  %v4592_v63 = vld [vmem:[%s5736_s3 + $0x28] sm:$0xff]  }
 0x166   : > { %4257 = vmatprep.subr.bf16.mxu0 %v4592_v63 }
 0x167   : > { %v3841_v32 = vpop.f32.mrb[44].mxu1  ;;  %v3753_v5 = vpop.f32.mrb[44].mxu0  ;;  %4258 = vmatpush3.bf16.msra.mxu0 %v4592_v63 }
 0x168   : > { %v3842_v41 = vpop.f32.mrb[45].mxu1  ;;  %v3754_v8 = vpop.f32.mrb[45].mxu0 }
 0x169   : > { %v3843_v57 = vadd.f32 %v3842_v41, %v3841_v32  ;;  %v3844_v61 = vpop.f32.mrb[46].mxu1  ;;  %v5378_v45 = vadd.f32 %v3754_v8, %v3753_v5  ;;  %v3756_v40 = vpop.f32.mrb[46].mxu0 }
 0x16a   : > { %v3845_v13 = vpop.f32.mrb[47].mxu1  ;;  %v3757_v50 = vpop.f32.mrb[47].mxu0 }
 0x16b   : > { %v5381_v55 = vadd.f32 %v3843_v57, %v5292_v20  ;;  %v3846_v59 = vadd.f32 %v3845_v13, %v3844_v61  ;;  %v5383_v3 = vadd.f32 %v3757_v50, %v3756_v40 }
 0x16c   : > { %4240 = vmatmul.mubr.bf16.gmra.mrb[24].mxu1 %v5048_v35 }
 0x16d   : > { %v5390_v2 = vadd.f32 %v3846_v59, %v5295_v25  ;;  %4243 = vmatprep.mubr.bf16.mxu1 %v5306_v22 }
 0x16f   : > { %v3847_v20 = vpop.f32.mrb[48].mxu1  ;;  %v3759_v54 = vpop.f32.mrb[48].mxu0 }
 0x170   : > { %v3848_v1 = vpop.f32.mrb[49].mxu1  ;;  %v3760_v18 = vpop.f32.mrb[49].mxu0 }
 0x171   : > { %v3849_v58 = vadd.f32 %v3848_v1, %v3847_v20  ;;  %v3850_v30 = vpop.f32.mrb[50].mxu1  ;;  %v5396_v35 = vadd.f32 %v3760_v18, %v3759_v54  ;;  %v3762_v25 = vpop.f32.mrb[50].mxu0 }
 0x172   : > { %v3851_v47 = vpop.f32.mrb[51].mxu1  ;;  %v3763_v46 = vpop.f32.mrb[51].mxu0 }
 0x173   : > { %v5399_v22 = vadd.f32 %v3849_v58, %v5308_v48  ;;  %v3852_v31 = vadd.f32 %v3851_v47, %v3850_v30  ;;  %v5401_v36 = vadd.f32 %v3763_v46, %v3762_v25 }
 0x174   : > { %4244 = vmatmul.mubr.bf16.gmra.mrb[28].mxu1 %v938_v42 }
 0x175   : > { %v5404_v52 = vadd.f32 %v3852_v31, %v5310_v0  ;;  %v4593_v0 = vld [vmem:[%s5736_s3 + $0x30] sm:$0xff]  }
 0x176   : > { %4259 = vmatprep.subr.bf16.mxu0 %v4593_v0 }
 0x177   : > { %v3853_v44 = vpop.f32.mrb[52].mxu1  ;;  %v3765_v49 = vpop.f32.mrb[52].mxu0  ;;  %4260 = vmatpush3.bf16.msra.mxu0 %v4593_v0 }
 0x178   : > { %v3854_v12 = vpop.f32.mrb[53].mxu1  ;;  %v3766_v19 = vpop.f32.mrb[53].mxu0 }
 0x179   : > { %v3855_v29 = vadd.f32 %v3854_v12, %v3853_v44  ;;  %v3856_v38 = vpop.f32.mrb[54].mxu1  ;;  %v5406_v62 = vadd.f32 %v3766_v19, %v3765_v49  ;;  %v3768_v37 = vpop.f32.mrb[54].mxu0 }
 0x17a   : > { %v3857_v43 = vpop.f32.mrb[55].mxu1  ;;  %v3769_v11 = vpop.f32.mrb[55].mxu0 }
 0x17b   : > { %v5409_v48 = vadd.f32 %v3855_v29, %v5315_v14  ;;  %v3858_v33 = vadd.f32 %v3857_v43, %v3856_v38  ;;  %v5411_v53 = vadd.f32 %v3769_v11, %v3768_v37 }
 0x17d   : > { %v5417_v32 = vadd.f32 %v3858_v33, %v5317_v26 }
 0x17f   : > { %v3859_v5 = vpop.f32.mrb[56].mxu1  ;;  %v3771_v41 = vpop.f32.mrb[56].mxu0 }
 0x180   : > { %v3860_v8 = vpop.f32.mrb[57].mxu1  ;;  %v3772_v57 = vpop.f32.mrb[57].mxu0 }
 0x181   : > { %v3861_v61 = vadd.f32 %v3860_v8, %v3859_v5  ;;  %v3862_v40 = vpop.f32.mrb[58].mxu1  ;;  %v5419_v14 = vadd.f32 %v3772_v57, %v3771_v41  ;;  %v3774_v13 = vpop.f32.mrb[58].mxu0 }
 0x182   : > { %v3863_v50 = vpop.f32.mrb[59].mxu1  ;;  %v3775_v59 = vpop.f32.mrb[59].mxu0 }
 0x183   : > { %v5422_v63 = vadd.f32 %v3861_v61, %v5324_v21  ;;  %v3864_v4 = vadd.f32 %v3863_v50, %v3862_v40  ;;  %v5424_v23 = vadd.f32 %v3775_v59, %v3774_v13 }
 0x185   : > { %v5427_v26 = vadd.f32 %v3864_v4, %v5326_v56  ;;  %v4594_v56 = vld [vmem:[%s5736_s3 + $0x38] sm:$0xff]  }
 0x186   : > { %4261 = vmatprep.subr.bf16.mxu0 %v4594_v56 }
 0x187   : > { %v3865_v20 = vpop.f32.mrb[60].mxu1  ;;  %v3777_v54 = vpop.f32.mrb[60].mxu0  ;;  %4262 = vmatpush3.bf16.msra.mxu0 %v4594_v56 }
 0x188   : > { %v3866_v1 = vpop.f32.mrb[61].mxu1  ;;  %v3778_v18 = vpop.f32.mrb[61].mxu0 }
 0x189   : > { %v3867_v58 = vadd.f32 %v3866_v1, %v3865_v20  ;;  %v3868_v30 = vpop.f32.mrb[62].mxu1  ;;  %v5429_v42 = vadd.f32 %v3778_v18, %v3777_v54  ;;  %v3780_v25 = vpop.f32.mrb[62].mxu0 }
 0x18a   : > { %v3869_v47 = vpop.f32.mrb[63].mxu1  ;;  %v3781_v46 = vpop.f32.mrb[63].mxu0 }
 0x18b   : > { %v5432_v21 = vadd.f32 %v3867_v58, %v5330_v27  ;;  %v3870_v31 = vadd.f32 %v3869_v47, %v3868_v30  ;;  %v5434_v44 = vadd.f32 %v3781_v46, %v3780_v25 }
 0x18d   : > { %v5440_v49 = vadd.f32 %v3870_v31, %v5332_v34 }
 0x18f   : > { %v3871_v12 = vpop.f32.mrb[64].mxu1  ;;  %v3959_v19 = vpop.f32.mrb[64].mxu0 }
 0x190   : > { %v3872_v29 = vpop.f32.mrb[65].mxu1  ;;  %v3960_v38 = vpop.f32.mrb[65].mxu0 }
 0x191   : > { %v3873_v37 = vadd.f32 %v3872_v29, %v3871_v12  ;;  %v3961_v43 = vadd.f32 %v3960_v38, %v3959_v19  ;;  %v3874_v27 = vpop.f32.mrb[66].mxu1  ;;  %v3962_v11 = vpop.f32.mrb[66].mxu0 }
 0x192   : > { %v3875_v33 = vpop.f32.mrb[67].mxu1  ;;  %v3963_v0 = vpop.f32.mrb[67].mxu0 }
 0x193   : > { %v5443_v5 = vadd.f32 %v3873_v37, %v5339_v15  ;;  %v3876_v41 = vadd.f32 %v3875_v33, %v3874_v27  ;;  %v3964_v8 = vadd.f32 %v3963_v0, %v3962_v11  ;;  %v5446_v34 = vadd.f32 %v5342_v17, %v3961_v43 }
 0x195   : > { %v5449_v57 = vadd.f32 %v3876_v41, %v5344_v16  ;;  %v5452_v61 = vadd.f32 %v5348_v6, %v3964_v8 }
 0x197   : > { %v3877_v40 = vpop.f32.mrb[68].mxu1  ;;  %v3965_v13 = vpop.f32.mrb[68].mxu0 }
 0x198   : > { %v3878_v50 = vpop.f32.mrb[69].mxu1  ;;  %v3966_v59 = vpop.f32.mrb[69].mxu0 }
 0x199   : > { %v3879_v4 = vadd.f32 %v3878_v50, %v3877_v40  ;;  %v3967_v20 = vadd.f32 %v3966_v59, %v3965_v13  ;;  %v3880_v54 = vpop.f32.mrb[70].mxu1  ;;  %v3968_v15 = vpop.f32.mrb[70].mxu0 }
 0x19a   : > { %v3881_v1 = vpop.f32.mrb[71].mxu1  ;;  %v3969_v18 = vpop.f32.mrb[71].mxu0 }
 0x19b   : > { %v5455_v58 = vadd.f32 %v3879_v4, %v5351_v60  ;;  %v3882_v17 = vadd.f32 %v3881_v1, %v3880_v54  ;;  %v3970_v30 = vadd.f32 %v3969_v18, %v3968_v15  ;;  %v5458_v16 = vadd.f32 %v5354_v7, %v3967_v20 }
 0x19d   : > { %v5461_v6 = vadd.f32 %v3882_v17, %v5356_v10  ;;  %v5464_v25 = vadd.f32 %v5363_v51, %v3970_v30 }
 0x19f   : > { %v3883_v47 = vpop.f32.mrb[72].mxu1  ;;  %v3971_v46 = vpop.f32.mrb[72].mxu0 }
 0x1a0   : > { %v3884_v31 = vpop.f32.mrb[73].mxu1  ;;  %v3972_v56 = vpop.f32.mrb[73].mxu0 }
 0x1a1   : > { %v3885_v12 = vadd.f32 %v3884_v31, %v3883_v47  ;;  %v3973_v19 = vadd.f32 %v3972_v56, %v3971_v46  ;;  %v3886_v29 = vpop.f32.mrb[74].mxu1  ;;  %v3974_v60 = vpop.f32.mrb[74].mxu0 }
 0x1a2   : > { %v3887_v38 = vpop.f32.mrb[75].mxu1  ;;  %v3975_v37 = vpop.f32.mrb[75].mxu0 }
 0x1a3   : > { %v5467_v43 = vadd.f32 %v3885_v12, %v5366_v9  ;;  %v3888_v7 = vadd.f32 %v3887_v38, %v3886_v29  ;;  %v3976_v27 = vadd.f32 %v3975_v37, %v3974_v60  ;;  %v5470_v10 = vadd.f32 %v5369_v24, %v3973_v19 }
 0x1a5   : > { %v5473_v51 = vadd.f32 %v3888_v7, %v5371_v39  ;;  %v5476_v11 = vadd.f32 %v5375_v28, %v3976_v27 }
 0x1a7   : > { %v3889_v33 = vpop.f32.mrb[76].mxu1  ;;  %v3977_v0 = vpop.f32.mrb[76].mxu0 }
 0x1a8   : > { %v3890_v41 = vpop.f32.mrb[77].mxu1  ;;  %v3978_v8 = vpop.f32.mrb[77].mxu0 }
 0x1a9   : > { %v3891_v40 = vadd.f32 %v3890_v41, %v3889_v33  ;;  %v3979_v13 = vadd.f32 %v3978_v8, %v3977_v0  ;;  %v3892_v50 = vpop.f32.mrb[78].mxu1  ;;  %v3980_v9 = vpop.f32.mrb[78].mxu0 }
 0x1aa   : > { %v3893_v59 = vpop.f32.mrb[79].mxu1  ;;  %v3981_v4 = vpop.f32.mrb[79].mxu0 }
 0x1ab   : > { %v5479_v20 = vadd.f32 %v3891_v40, %v5378_v45  ;;  %v3894_v24 = vadd.f32 %v3893_v59, %v3892_v50  ;;  %v3982_v54 = vadd.f32 %v3981_v4, %v3980_v9  ;;  %v5482_v39 = vadd.f32 %v5381_v55, %v3979_v13 }
 0x1ad   : > { %v5485_v28 = vadd.f32 %v3894_v24, %v5383_v3  ;;  %v5488_v15 = vadd.f32 %v5390_v2, %v3982_v54 }
 0x1af   : > { %v3895_v1 = vpop.f32.mrb[80].mxu1  ;;  %v3983_v18 = vpop.f32.mrb[80].mxu0 }
 0x1b0   : > { %v3896_v17 = vpop.f32.mrb[81].mxu1  ;;  %v3984_v30 = vpop.f32.mrb[81].mxu0 }
 0x1b1   : > { %v3897_v47 = vadd.f32 %v3896_v17, %v3895_v1  ;;  %v3985_v46 = vadd.f32 %v3984_v30, %v3983_v18  ;;  %v3898_v31 = vpop.f32.mrb[82].mxu1  ;;  %v3986_v45 = vpop.f32.mrb[82].mxu0 }
 0x1b2   : > { %v3899_v56 = vpop.f32.mrb[83].mxu1  ;;  %v3987_v12 = vpop.f32.mrb[83].mxu0 }
 0x1b3   : > { %v5491_v19 = vadd.f32 %v3897_v47, %v5396_v35  ;;  %v3900_v55 = vadd.f32 %v3899_v56, %v3898_v31  ;;  %v3988_v29 = vadd.f32 %v3987_v12, %v3986_v45  ;;  %v5494_v3 = vadd.f32 %v5399_v22, %v3985_v46 }
 0x1b5   : > { %v5497_v2 = vadd.f32 %v3900_v55, %v5401_v36  ;;  %v5500_v60 = vadd.f32 %v5404_v52, %v3988_v29 }
 0x1b7   : > { %v3901_v38 = vpop.f32.mrb[84].mxu1  ;;  %v3989_v37 = vpop.f32.mrb[84].mxu0 }
 0x1b8   : > { %v3902_v7 = vpop.f32.mrb[85].mxu1  ;;  %v3990_v27 = vpop.f32.mrb[85].mxu0 }
 0x1b9   : > { %v3903_v33 = vadd.f32 %v3902_v7, %v3901_v38  ;;  %v3991_v0 = vadd.f32 %v3990_v27, %v3989_v37  ;;  %v3904_v41 = vpop.f32.mrb[86].mxu1  ;;  %v3992_v35 = vpop.f32.mrb[86].mxu0 }
 0x1ba   : > { %v3905_v8 = vpop.f32.mrb[87].mxu1  ;;  %v3993_v40 = vpop.f32.mrb[87].mxu0 }
 0x1bb   : > { %v5503_v13 = vadd.f32 %v3903_v33, %v5406_v62  ;;  %v3906_v22 = vadd.f32 %v3905_v8, %v3904_v41  ;;  %v3994_v50 = vadd.f32 %v3993_v40, %v3992_v35  ;;  %v5506_v36 = vadd.f32 %v5409_v48, %v3991_v0 }
 0x1bd   : > { %v5509_v52 = vadd.f32 %v3906_v22, %v5411_v53  ;;  %v5512_v9 = vadd.f32 %v5417_v32, %v3994_v50 }
 0x1bf   : > { %v3907_v59 = vpop.f32.mrb[88].mxu1  ;;  %v3995_v4 = vpop.f32.mrb[88].mxu0 }
 0x1c0   : > { %v3908_v24 = vpop.f32.mrb[89].mxu1  ;;  %v3996_v54 = vpop.f32.mrb[89].mxu0 }
 0x1c1   : > { %v3909_v1 = vadd.f32 %v3908_v24, %v3907_v59  ;;  %v3997_v18 = vadd.f32 %v3996_v54, %v3995_v4  ;;  %v3910_v17 = vpop.f32.mrb[90].mxu1  ;;  %v3998_v62 = vpop.f32.mrb[90].mxu0 }
 0x1c2   : > { %v3911_v30 = vpop.f32.mrb[91].mxu1  ;;  %v3999_v47 = vpop.f32.mrb[91].mxu0 }
 0x1c3   : > { %v5515_v46 = vadd.f32 %v3909_v1, %v5419_v14  ;;  %v3912_v48 = vadd.f32 %v3911_v30, %v3910_v17  ;;  %v4000_v31 = vadd.f32 %v3999_v47, %v3998_v62  ;;  %v5518_v53 = vadd.f32 %v5422_v63, %v3997_v18 }
 0x1c5   : > { %v5521_v32 = vadd.f32 %v3912_v48, %v5424_v23  ;;  %v5524_v45 = vadd.f32 %v5427_v26, %v4000_v31 }
 0x1c7   : > { %v3913_v56 = vpop.f32.mrb[92].mxu1  ;;  %v4001_v12 = vpop.f32.mrb[92].mxu0 }
 0x1c8   : > { %v3914_v55 = vpop.f32.mrb[93].mxu1  ;;  %v4002_v29 = vpop.f32.mrb[93].mxu0 }
 0x1c9   : > { %v3915_v38 = vadd.f32 %v3914_v55, %v3913_v56  ;;  %v4003_v37 = vadd.f32 %v4002_v29, %v4001_v12  ;;  %v3916_v7 = vpop.f32.mrb[94].mxu1  ;;  %v4004_v14 = vpop.f32.mrb[94].mxu0 }
 0x1ca   : > { %v3917_v27 = vpop.f32.mrb[95].mxu1  ;;  %v4005_v33 = vpop.f32.mrb[95].mxu0 }
 0x1cb   : > { %v5527_v0 = vadd.f32 %v3915_v38, %v5429_v42  ;;  %v3918_v63 = vadd.f32 %v3917_v27, %v3916_v7  ;;  %v4006_v41 = vadd.f32 %v4005_v33, %v4004_v14  ;;  %v5530_v23 = vadd.f32 %v5432_v21, %v4003_v37 }
 0x1cd   : > { %v5533_v26 = vadd.f32 %v3918_v63, %v5434_v44  ;;  %v5536_v35 = vadd.f32 %v5440_v49, %v4006_v41 }
 0x1cf   : > { %v4007_v8 = vpop.f32.mrb[96].mxu0 }
 0x1d0   : > { %v4008_v40 = vpop.f32.mrb[97].mxu0 }
 0x1d1   : > { %v4009_v22 = vadd.f32 %v4008_v40, %v4007_v8  ;;  %v4010_v50 = vpop.f32.mrb[98].mxu0 }
 0x1d2   : > { %v4011_v59 = vpop.f32.mrb[99].mxu0 }
 0x1d3   : > { %v4012_v4 = vadd.f32 %v4011_v59, %v4010_v50  ;;  %v5539_v42 = vadd.f32 %v5443_v5, %v4009_v22 }
 0x1d5   : > { %v5542_v24 = vadd.f32 %v5449_v57, %v4012_v4 }
 0x1d7   : > { %v4013_v21 = vpop.f32.mrb[100].mxu0 }
 0x1d8   : > { %v4014_v54 = vpop.f32.mrb[101].mxu0 }
 0x1d9   : > { %v4015_v1 = vadd.f32 %v4014_v54, %v4013_v21  ;;  %v4016_v44 = vpop.f32.mrb[102].mxu0 }
 0x1da   : > { %v4017_v18 = vpop.f32.mrb[103].mxu0 }
 0x1db   : > { %v4018_v17 = vadd.f32 %v4017_v18, %v4016_v44  ;;  %v5545_v49 = vadd.f32 %v5455_v58, %v4015_v1 }
 0x1dd   : > { %v5548_v62 = vadd.f32 %v5461_v6, %v4018_v17 }
 0x1df   : > { %v4019_v30 = vpop.f32.mrb[104].mxu0 }
 0x1e0   : > { %v4020_v47 = vpop.f32.mrb[105].mxu0 }
 0x1e1   : > { %v4021_v48 = vadd.f32 %v4020_v47, %v4019_v30  ;;  %v4022_v5 = vpop.f32.mrb[106].mxu0 }
 0x1e2   : > { %v4023_v31 = vpop.f32.mrb[107].mxu0 }
 0x1e3   : > { %v4024_v56 = vadd.f32 %v4023_v31, %v4022_v5  ;;  %v5551_v57 = vadd.f32 %v5467_v43, %v4021_v48 }
 0x1e5   : > { %v5554_v12 = vadd.f32 %v5473_v51, %v4024_v56 }
 0x1e7   : > { %v4025_v55 = vpop.f32.mrb[108].mxu0 }
 0x1e8   : > { %v4026_v29 = vpop.f32.mrb[109].mxu0 }
 0x1e9   : > { %v4027_v38 = vadd.f32 %v4026_v29, %v4025_v55  ;;  %v4028_v58 = vpop.f32.mrb[110].mxu0 }
 0x1ea   : > { %v4029_v37 = vpop.f32.mrb[111].mxu0 }
 0x1eb   : > { %v4030_v7 = vadd.f32 %v4029_v37, %v4028_v58  ;;  %v5557_v6 = vadd.f32 %v5479_v20, %v4027_v38 }
 0x1ed   : > { %v5560_v14 = vadd.f32 %v5485_v28, %v4030_v7 }
 0x1ef   : > { %v4031_v27 = vpop.f32.mrb[112].mxu0 }
 0x1f0   : > { %v4032_v33 = vpop.f32.mrb[113].mxu0 }
 0x1f1   : > { %v4033_v63 = vadd.f32 %v4032_v33, %v4031_v27  ;;  %v4034_v43 = vpop.f32.mrb[114].mxu0 }
 0x1f2   : > { %v4035_v41 = vpop.f32.mrb[115].mxu0 }
 0x1f3   : > { %v4036_v8 = vadd.f32 %v4035_v41, %v4034_v43  ;;  %v5563_v51 = vadd.f32 %v5491_v19, %v4033_v63 }
 0x1f5   : > { %v5566_v40 = vadd.f32 %v5497_v2, %v4036_v8 }
 0x1f7   : > { %v4037_v22 = vpop.f32.mrb[116].mxu0 }
 0x1f8   : > { %v4038_v50 = vpop.f32.mrb[117].mxu0 }
 0x1f9   : > { %v4039_v59 = vadd.f32 %v4038_v50, %v4037_v22  ;;  %v4040_v20 = vpop.f32.mrb[118].mxu0 }
 0x1fa   : > { %v4041_v4 = vpop.f32.mrb[119].mxu0 }
 0x1fb   : > { %v4042_v21 = vadd.f32 %v4041_v4, %v4040_v20  ;;  %v5569_v28 = vadd.f32 %v5503_v13, %v4039_v59 }
 0x1fd   : > { %v5572_v54 = vadd.f32 %v5509_v52, %v4042_v21 }
 0x1ff   : > { %v4043_v1 = vpop.f32.mrb[120].mxu0 }
 0x200   : > { %v4044_v44 = vpop.f32.mrb[121].mxu0 }
 0x201   : > { %v4045_v18 = vadd.f32 %v4044_v44, %v4043_v1  ;;  %v4046_v19 = vpop.f32.mrb[122].mxu0 }
 0x202   : > { %v4047_v17 = vpop.f32.mrb[123].mxu0 }
 0x203   : > { %v4048_v30 = vadd.f32 %v4047_v17, %v4046_v19  ;;  %v5575_v2 = vadd.f32 %v5515_v46, %v4045_v18  ;;  %v5589_v46 = vld [vmem:[%s5735_s2] ss:$0 sm:$0xff] }
 0x205   : > { %v5578_v47 = vadd.f32 %v5521_v32, %v4048_v30 }
 0x207   : > { %v4049_v48 = vpop.f32.mrb[124].mxu0 }
 0x208   : > { %v4050_v5 = vpop.f32.mrb[125].mxu0 }
 0x209   : > { %v4051_v31 = vadd.f32 %v4050_v5, %v4049_v48  ;;  %v4052_v13 = vpop.f32.mrb[126].mxu0 }
 0x20a   : > { %v4053_v56 = vpop.f32.mrb[127].mxu0 }
 0x20b   : > { %v4054_v55 = vadd.f32 %v4053_v56, %v4052_v13  ;;  %v5581_v52 = vadd.f32 %v5527_v0, %v4051_v31 }
 0x20d   : > { %v5584_v29 = vadd.f32 %v5533_v26, %v4054_v55 }
 0x20f   : > { %v4217_v38 = vpop.f32.mrb[0].mxu1 }
 0x210   : > { %v4297_v32 = vadd.f32 %v5458_v16, %v4217_v38  ;;  %v2534_v58 = vpop.f32.mrb[1].mxu1 }
 0x211   : > { %v4300_v37 = vadd.f32 %v5446_v34, %v2534_v58  ;;  %v4218_v7 = vpop.f32.mrb[2].mxu1 }
 0x212   : > { %v2766_v27 = vadd.f32 %v4297_v32, %v5589_v46  ;;  %v4303_v0 = vadd.f32 %v5464_v25, %v4218_v7  ;;  %v2537_v33 = vpop.f32.mrb[3].mxu1 }
 0x213   : > { %v2764_v26 = vadd.f32 %v4300_v37, %v5589_v46  ;;  %v4306_v63 = vadd.f32 %v5452_v61, %v2537_v33 }
 0x214   : > { %v2830_v43 = vmul.f32 0.01, %v2766_v27  ;;  %v2767_v41 = vadd.f32 %v4303_v0, %v5589_v46  ;;  %vm2798_vm2 = vcmp.gt.f32.partialorder %v2766_v27, 0.0 }
 0x215   : > { %v2828_v8 = vmul.f32 0.01, %v2764_v26  ;;  %v2765_v16 = vadd.f32 %v4306_v63, %v5589_v46  ;;  %vm2796_vm3 = vcmp.gt.f32.partialorder %v2764_v26, 0.0 }
 0x216   : > { %vm2799_vm4 = vcmp.gt.f32.partialorder %v2767_v41, 0.0  ;;  %v2831_v34 = vmul.f32 0.01, %v2767_v41  ;;  %v2862_v59 = vsel %vm2798_vm2, %v2766_v27, %v2830_v43 }
 0x217   : > { %vm2797_vm5 = vcmp.gt.f32.partialorder %v2765_v16, 0.0  ;;  %v2829_v22 = vmul.f32 0.01, %v2765_v16  ;;  %v4221_v50 = vpop.f32.mrb[4].mxu1  ;;  %v2860_v44 = vsel %vm2796_vm3, %v2764_v26, %v2828_v8 }
 0x218   : > { %v2863_v25 = vsel %vm2799_vm4, %v2767_v41, %v2831_v34  ;;  %v4309_v20 = vadd.f32 %v5482_v39, %v4221_v50  ;;  %v2550_v4 = vpop.f32.mrb[5].mxu1 }
 0x219   : > { %v2893_v21 = vpack.c.bf16 %v2863_v25, %v2862_v59  ;;  %v4312_v61 = vadd.f32 %v5470_v10, %v2550_v4  ;;  %v4222_v1 = vpop.f32.mrb[6].mxu1  ;;  %v2861_v18 = vsel %vm2797_vm5, %v2765_v16, %v2829_v22 }
 0x21a   : > { %v2770_v19 = vadd.f32 %v4309_v20, %v5589_v46  ;;  %v4315_v17 = vadd.f32 %v5488_v15, %v4222_v1  ;;  %v2553_v30 = vpop.f32.mrb[7].mxu1  ;;  %v2892_v48 = vpack.c.bf16 %v2861_v18, %v2860_v44 }
 0x21b   : > { %v2768_v5 = vadd.f32 %v4312_v61, %v5589_v46  ;;  %v4318_v31 = vadd.f32 %v5476_v11, %v2553_v30 }
 0x21c   : > { %v2834_v13 = vmul.f32 0.01, %v2770_v19  ;;  %v2771_v39 = vadd.f32 %v4315_v17, %v5589_v46  ;;  %4263 = vmatprep.mubr.bf16.mxu0 %v2892_v48  ;;  %vm2802_vm6 = vcmp.gt.f32.partialorder %v2770_v19, 0.0 }
 0x21d   : > { %v2832_v56 = vmul.f32 0.01, %v2768_v5  ;;  %v2769_v10 = vadd.f32 %v4318_v31, %v5589_v46  ;;  %4264 = vmatmul.mubr.bf16.vlgmr.msra.gmra.mrb[128].mxu0 %v2893_v21  ;;  %vm2800_vm7 = vcmp.gt.f32.partialorder %v2768_v5, 0.0 }
 0x21e   : > { %vm2803_vm8 = vcmp.gt.f32.partialorder %v2771_v39, 0.0  ;;  %v2835_v55 = vmul.f32 0.01, %v2771_v39  ;;  %v2866_v37 = vsel %vm2802_vm6, %v2770_v19, %v2834_v13 }
 0x21f   : > { %vm2801_vm9 = vcmp.gt.f32.partialorder %v2769_v10, 0.0  ;;  %v2833_v15 = vmul.f32 0.01, %v2769_v10  ;;  %v4225_v38 = vpop.f32.mrb[8].mxu1  ;;  %v2864_v0 = vsel %vm2800_vm7, %v2768_v5, %v2832_v56 }
 0x220   : > { %v4321_v32 = vadd.f32 %v5506_v36, %v4225_v38  ;;  %v2566_v58 = vpop.f32.mrb[9].mxu1  ;;  %v2867_v11 = vsel %vm2803_vm8, %v2771_v39, %v2835_v55 }
 0x221   : > { %v4324_v7 = vadd.f32 %v5494_v3, %v2566_v58  ;;  %v4226_v27 = vpop.f32.mrb[10].mxu1  ;;  %v2865_v33 = vsel %vm2801_vm9, %v2769_v10, %v2833_v15  ;;  %v2895_v26 = vpack.c.bf16 %v2867_v11, %v2866_v37 }
 0x222   : > { %v2774_v63 = vadd.f32 %v4321_v32, %v5589_v46  ;;  %v4327_v43 = vadd.f32 %v5512_v9, %v4226_v27  ;;  %v2569_v41 = vpop.f32.mrb[11].mxu1  ;;  %v2894_v8 = vpack.c.bf16 %v2865_v33, %v2864_v0 }
 0x223   : > { %v2772_v16 = vadd.f32 %v4324_v7, %v5589_v46  ;;  %v4330_v34 = vadd.f32 %v5500_v60, %v2569_v41 }
 0x224   : > { %v2838_v36 = vmul.f32 0.01, %v2774_v63  ;;  %v2775_v22 = vadd.f32 %v4327_v43, %v5589_v46  ;;  %4267 = vmatprep.mubr.bf16.mxu0 %v2894_v8  ;;  %vm2806_vm10 = vcmp.gt.f32.partialorder %v2774_v63, 0.0 }
 0x225   : > { %v2836_v3 = vmul.f32 0.01, %v2772_v16  ;;  %v2773_v50 = vadd.f32 %v4330_v34, %v5589_v46  ;;  %4268 = vmatmul.mubr.bf16.gmra.mrb[132].mxu0 %v2895_v26  ;;  %vm2804_vm11 = vcmp.gt.f32.partialorder %v2772_v16, 0.0 }
 0x226   : > { %vm2807_vm12 = vcmp.gt.f32.partialorder %v2775_v22, 0.0  ;;  %v2839_v59 = vmul.f32 0.01, %v2775_v22  ;;  %v2870_v21 = vsel %vm2806_vm10, %v2774_v63, %v2838_v36 }
 0x227   : > { %vm2805_vm13 = vcmp.gt.f32.partialorder %v2773_v50, 0.0  ;;  %v2837_v9 = vmul.f32 0.01, %v2773_v50  ;;  %v4229_v25 = vpop.f32.mrb[12].mxu1  ;;  %v2868_v44 = vsel %vm2804_vm11, %v2772_v16, %v2836_v3 }
 0x228   : > { %v4333_v20 = vadd.f32 %v5530_v23, %v4229_v25  ;;  %v2582_v4 = vpop.f32.mrb[13].mxu1  ;;  %v2871_v60 = vsel %vm2807_vm12, %v2775_v22, %v2839_v59 }
 0x229   : > { %v4336_v61 = vadd.f32 %v5518_v53, %v2582_v4  ;;  %v4230_v1 = vpop.f32.mrb[14].mxu1  ;;  %v2869_v18 = vsel %vm2805_vm13, %v2773_v50, %v2837_v9  ;;  %v2897_v19 = vpack.c.bf16 %v2871_v60, %v2870_v21 }
 0x22a   : > { %v2778_v17 = vadd.f32 %v4333_v20, %v5589_v46  ;;  %v4339_v30 = vadd.f32 %v5536_v35, %v4230_v1  ;;  %v2585_v48 = vpop.f32.mrb[15].mxu1  ;;  %v2896_v5 = vpack.c.bf16 %v2869_v18, %v2868_v44 }
 0x22b   : > { %v2776_v31 = vadd.f32 %v4336_v61, %v5589_v46  ;;  %v4342_v13 = vadd.f32 %v5524_v45, %v2585_v48 }
 0x22c   : > { %v2842_v23 = vmul.f32 0.01, %v2778_v17  ;;  %v2779_v39 = vadd.f32 %v4339_v30, %v5589_v46  ;;  %4271 = vmatprep.mubr.bf16.mxu0 %v2896_v5  ;;  %vm2810_vm14 = vcmp.gt.f32.partialorder %v2778_v17, 0.0 }
 0x22d   : > { %v2840_v53 = vmul.f32 0.01, %v2776_v31  ;;  %v2777_v56 = vadd.f32 %v4342_v13, %v5589_v46  ;;  %4272 = vmatmul.mubr.bf16.gmra.mrb[136].mxu0 %v2897_v19  ;;  %vm2808_vm15 = vcmp.gt.f32.partialorder %v2776_v31, 0.0 }
 0x22e   : > { %vm2811_vm0 = vcmp.gt.f32.partialorder %v2779_v39, 0.0  ;;  %v2843_v10 = vmul.f32 0.01, %v2779_v39  ;;  %v2874_v32 = vsel %vm2810_vm14, %v2778_v17, %v2842_v23 }
 0x22f   : > { %vm2809_vm1 = vcmp.gt.f32.partialorder %v2777_v56, 0.0  ;;  %v2841_v35 = vmul.f32 0.01, %v2777_v56  ;;  %v4233_v55 = vpop.f32.mrb[16].mxu1  ;;  %v2872_v11 = vsel %vm2808_vm15, %v2776_v31, %v2840_v53 }
 0x230   : > { %v4345_v15 = vadd.f32 %v5545_v49, %v4233_v55  ;;  %v2598_v38 = vpop.f32.mrb[17].mxu1  ;;  %v2875_v45 = vsel %vm2811_vm0, %v2779_v39, %v2843_v10 }
 0x231   : > { %v4348_v58 = vadd.f32 %v5539_v42, %v2598_v38  ;;  %v4234_v37 = vpop.f32.mrb[18].mxu1  ;;  %v2873_v7 = vsel %vm2809_vm1, %v2777_v56, %v2841_v35  ;;  %v2899_v27 = vpack.c.bf16 %v2875_v45, %v2874_v32 }
 0x232   : > { %v2782_v0 = vadd.f32 %v4345_v15, %v5589_v46  ;;  %v4351_v33 = vadd.f32 %v5548_v62, %v4234_v37  ;;  %v2601_v26 = vpop.f32.mrb[19].mxu1  ;;  %v2898_v63 = vpack.c.bf16 %v2873_v7, %v2872_v11 }
 0x233   : > { %v2780_v43 = vadd.f32 %v4348_v58, %v5589_v46  ;;  %v4354_v41 = vadd.f32 %v5542_v24, %v2601_v26 }
 0x234   : > { %v2846_v49 = vmul.f32 0.01, %v2782_v0  ;;  %v2783_v8 = vadd.f32 %v4351_v33, %v5589_v46  ;;  %4275 = vmatprep.mubr.bf16.mxu0 %v2898_v63  ;;  %vm2814_vm2 = vcmp.gt.f32.partialorder %v2782_v0, 0.0 }
 0x235   : > { %v2844_v42 = vmul.f32 0.01, %v2780_v43  ;;  %v2781_v16 = vadd.f32 %v4354_v41, %v5589_v46  ;;  %4276 = vmatmul.mubr.bf16.gmra.mrb[140].mxu0 %v2899_v27  ;;  %vm2812_vm3 = vcmp.gt.f32.partialorder %v2780_v43, 0.0 }
 0x236   : > { %vm2815_vm4 = vcmp.gt.f32.partialorder %v2783_v8, 0.0  ;;  %v2847_v34 = vmul.f32 0.01, %v2783_v8  ;;  %v2878_v50 = vsel %vm2814_vm2, %v2782_v0, %v2846_v49 }
 0x237   : > { %vm2813_vm5 = vcmp.gt.f32.partialorder %v2781_v16, 0.0  ;;  %v2845_v62 = vmul.f32 0.01, %v2781_v16  ;;  %v4237_v36 = vpop.f32.mrb[20].mxu1  ;;  %v2876_v25 = vsel %vm2812_vm3, %v2780_v43, %v2844_v42 }
 0x238   : > { %v4357_v22 = vadd.f32 %v5557_v6, %v4237_v36  ;;  %v2614_v3 = vpop.f32.mrb[21].mxu1  ;;  %v2879_v24 = vsel %vm2815_vm4, %v2783_v8, %v2847_v34 }
 0x239   : > { %v4360_v59 = vadd.f32 %v5551_v57, %v2614_v3  ;;  %v4238_v9 = vpop.f32.mrb[22].mxu1  ;;  %v2877_v20 = vsel %vm2813_vm5, %v2781_v16, %v2845_v62  ;;  %v2901_v4 = vpack.c.bf16 %v2879_v24, %v2878_v50 }
 0x23a   : > { %v2786_v21 = vadd.f32 %v4357_v22, %v5589_v46  ;;  %v4363_v60 = vadd.f32 %v5560_v14, %v4238_v9  ;;  %v2617_v61 = vpop.f32.mrb[23].mxu1  ;;  %v2900_v1 = vpack.c.bf16 %v2877_v20, %v2876_v25 }
 0x23b   : > { %v2784_v44 = vadd.f32 %v4360_v59, %v5589_v46  ;;  %v4366_v18 = vadd.f32 %v5554_v12, %v2617_v61 }
 0x23c   : > { %v2850_v6 = vmul.f32 0.01, %v2786_v21  ;;  %v2787_v19 = vadd.f32 %v4363_v60, %v5589_v46  ;;  %4279 = vmatprep.mubr.bf16.mxu0 %v2900_v1  ;;  %vm2818_vm6 = vcmp.gt.f32.partialorder %v2786_v21, 0.0 }
 0x23d   : > { %v2848_v57 = vmul.f32 0.01, %v2784_v44  ;;  %v2785_v17 = vadd.f32 %v4366_v18, %v5589_v46  ;;  %4280 = vmatmul.mubr.bf16.gmra.mrb[144].mxu0 %v2901_v4  ;;  %vm2816_vm7 = vcmp.gt.f32.partialorder %v2784_v44, 0.0  ;;  %v5658_v4 = vld [vmem:[%s5737_s4] ss:$0 sm:$0xff] }
 0x23e   : > { %vm2819_vm8 = vcmp.gt.f32.partialorder %v2787_v19, 0.0  ;;  %v2851_v30 = vmul.f32 0.01, %v2787_v19  ;;  %v2882_v13 = vsel %vm2818_vm6, %v2786_v21, %v2850_v6 }
 0x23f   : > { %vm2817_vm9 = vcmp.gt.f32.partialorder %v2785_v17, 0.0  ;;  %v2849_v14 = vmul.f32 0.01, %v2785_v17  ;;  %v4241_v48 = vpop.f32.mrb[24].mxu1  ;;  %v2880_v53 = vsel %vm2816_vm7, %v2784_v44, %v2848_v57 }
 0x240   : > { %v4369_v5 = vadd.f32 %v5569_v28, %v4241_v48  ;;  %v2630_v31 = vpop.f32.mrb[25].mxu1  ;;  %v2883_v12 = vsel %vm2819_vm8, %v2787_v19, %v2851_v30 }
 0x241   : > { %v4372_v23 = vadd.f32 %v5563_v51, %v2630_v31  ;;  %v4242_v39 = vpop.f32.mrb[26].mxu1  ;;  %v2881_v56 = vsel %vm2817_vm9, %v2785_v17, %v2849_v14  ;;  %v2903_v10 = vpack.c.bf16 %v2883_v12, %v2882_v13 }
 0x242   : > { %v2790_v35 = vadd.f32 %v4369_v5, %v5589_v46  ;;  %v4375_v55 = vadd.f32 %v5572_v54, %v4242_v39  ;;  %v2633_v15 = vpop.f32.mrb[27].mxu1  ;;  %v2902_v38 = vpack.c.bf16 %v2881_v56, %v2880_v53 }
 0x243   : > { %v2788_v32 = vadd.f32 %v4372_v23, %v5589_v46  ;;  %v4378_v45 = vadd.f32 %v5566_v40, %v2633_v15 }
 0x244   : > { %v2854_v28 = vmul.f32 0.01, %v2790_v35  ;;  %v2791_v58 = vadd.f32 %v4375_v55, %v5589_v46  ;;  %4283 = vmatprep.mubr.bf16.mxu0 %v2902_v38  ;;  %vm2822_vm10 = vcmp.gt.f32.partialorder %v2790_v35, 0.0 }
 0x245   : > { %v2852_v51 = vmul.f32 0.01, %v2788_v32  ;;  %v2789_v37 = vadd.f32 %v4378_v45, %v5589_v46  ;;  %4284 = vmatmul.mubr.bf16.gmra.mrb[148].mxu0 %v2903_v10  ;;  %vm2820_vm11 = vcmp.gt.f32.partialorder %v2788_v32, 0.0 }
 0x246   : > { %vm2823_vm12 = vcmp.gt.f32.partialorder %v2791_v58, 0.0  ;;  %v2855_v11 = vmul.f32 0.01, %v2791_v58  ;;  %v2886_v33 = vsel %vm2822_vm10, %v2790_v35, %v2854_v28 }
 0x247   : > { %vm2821_vm13 = vcmp.gt.f32.partialorder %v2789_v37, 0.0  ;;  %v2853_v54 = vmul.f32 0.01, %v2789_v37  ;;  %v4245_v7 = vpop.f32.mrb[28].mxu1  ;;  %v2884_v43 = vsel %vm2820_vm11, %v2788_v32, %v2852_v51 }
 0x248   : > { %v4381_v27 = vadd.f32 %v5581_v52, %v4245_v7  ;;  %v2646_v0 = vpop.f32.mrb[29].mxu1  ;;  %v2887_v40 = vsel %vm2823_vm12, %v2791_v58, %v2855_v11 }
 0x249   : > { %v4384_v26 = vadd.f32 %v5575_v2, %v2646_v0  ;;  %v4246_v63 = vpop.f32.mrb[30].mxu1  ;;  %v2885_v41 = vsel %vm2821_vm13, %v2789_v37, %v2853_v54  ;;  %v2905_v49 = vpack.c.bf16 %v2887_v40, %v2886_v33 }
 0x24a   : > { %v2794_v8 = vadd.f32 %v4381_v27, %v5589_v46  ;;  %v4387_v42 = vadd.f32 %v5584_v29, %v4246_v63  ;;  %v2649_v16 = vpop.f32.mrb[31].mxu1  ;;  %v2904_v34 = vpack.c.bf16 %v2885_v41, %v2884_v43 }
 0x24b   : > { %v2792_v62 = vadd.f32 %v4384_v26, %v5589_v46  ;;  %v4390_v36 = vadd.f32 %v5578_v47, %v2649_v16 }
 0x24c   : > { %v2858_v52 = vmul.f32 0.01, %v2794_v8  ;;  %v2795_v22 = vadd.f32 %v4387_v42, %v5589_v46  ;;  %4287 = vmatprep.mubr.bf16.mxu0 %v2904_v34  ;;  %vm2826_vm14 = vcmp.gt.f32.partialorder %v2794_v8, 0.0 }
 0x24d   : > { %v2856_v2 = vmul.f32 0.01, %v2792_v62  ;;  %v2793_v3 = vadd.f32 %v4390_v36, %v5589_v46  ;;  %4288 = vmatmul.mubr.bf16.gmra.mrb[152].mxu0 %v2905_v49  ;;  %vm2824_vm15 = vcmp.gt.f32.partialorder %v2792_v62, 0.0 }
 0x24e   : > { %vm2827_vm0 = vcmp.gt.f32.partialorder %v2795_v22, 0.0  ;;  %v2859_v50 = vmul.f32 0.01, %v2795_v22  ;;  %v2890_v24 = vsel %vm2826_vm14, %v2794_v8, %v2858_v52 }
 0x24f   : > { %vm2825_vm1 = vcmp.gt.f32.partialorder %v2793_v3, 0.0  ;;  %v2857_v29 = vmul.f32 0.01, %v2793_v3  ;;  %v2888_v9 = vsel %vm2824_vm15, %v2792_v62, %v2856_v2 }
 0x250   : > { %v2891_v59 = vsel %vm2827_vm0, %v2795_v22, %v2859_v50 }
 0x251   : > { %v2889_v25 = vsel %vm2825_vm1, %v2793_v3, %v2857_v29  ;;  %v2907_v20 = vpack.c.bf16 %v2891_v59, %v2890_v24 }
 0x252   : > { %v2906_v47 = vpack.c.bf16 %v2889_v25, %v2888_v9 }
 0x254   : > { %4291 = vmatprep.mubr.bf16.mxu0 %v2906_v47 }
 0x255   : > { %4292 = vmatmul.mubr.bf16.gmra.mrb[156].mxu0 %v2907_v20 }
 0x2f0   : > { %v4265_v46 = vpop.f32.mrb[128].mxu0 }
 0x2f1   : > { %v3022_v21 = vadd.f32 %v4265_v46, %v5658_v4  ;;  %v3013_v60 = vpop.f32.mrb[129].mxu0 }
 0x2f2   : > { %v3014_v61 = vadd.f32 %v5658_v4, %v3013_v60  ;;  %v4266_v1 = vpop.f32.mrb[130].mxu0 }
 0x2f3   : > { %vm3142_vm2 = vcmp.gt.f32.partialorder %v3022_v21, 0.0  ;;  %v3174_v44 = vmul.f32 0.01, %v3022_v21  ;;  %v3025_v18 = vadd.f32 %v4266_v1, %v5658_v4  ;;  %v3016_v6 = vpop.f32.mrb[131].mxu0 }
 0x2f4   : > { %vm3140_vm3 = vcmp.gt.f32.partialorder %v3014_v61, 0.0  ;;  %v3172_v19 = vmul.f32 0.01, %v3014_v61  ;;  %v3017_v57 = vadd.f32 %v5658_v4, %v3016_v6 }
 0x2f5   : > { %v3206_v17 = vsel %vm3142_vm2, %v3022_v21, %v3174_v44  ;;  %vm3143_vm4 = vcmp.gt.f32.partialorder %v3025_v18, 0.0  ;;  %v3175_v30 = vmul.f32 0.01, %v3025_v18 }
 0x2f6   : > { %3238 = vst [vmem:[%s4680_s29 + $0x10] sm:$0xff] %v3206_v17  ;;  %v3204_v14 = vsel %vm3140_vm3, %v3014_v61, %v3172_v19  ;;  %vm3141_vm5 = vcmp.gt.f32.partialorder %v3017_v57, 0.0  ;;  %v3173_v48 = vmul.f32 0.01, %v3017_v57 }
 0x2f7   : > { %3236 = vst [vmem:[%s4680_s29] sm:$0xff] %v3204_v14  ;;  %v3207_v5 = vsel %vm3143_vm4, %v3025_v18, %v3175_v30 }
 0x2f8   : > { %3239 = vst [vmem:[%s4680_s29 + $0x18] sm:$0xff] %v3207_v5  ;;  %v3205_v31 = vsel %vm3141_vm5, %v3017_v57, %v3173_v48  ;;  %v4269_v13 = vpop.f32.mrb[132].mxu0 }
 0x2f9   : > { %3237 = vst [vmem:[%s4680_s29 + $0x8] sm:$0xff] %v3205_v31  ;;  %v3038_v12 = vadd.f32 %v4269_v13, %v5658_v4  ;;  %v3029_v23 = vpop.f32.mrb[133].mxu0 }
 0x2fa   : > { %v3030_v39 = vadd.f32 %v5658_v4, %v3029_v23  ;;  %v4270_v53 = vpop.f32.mrb[134].mxu0 }
 0x2fb   : > { %vm3146_vm6 = vcmp.gt.f32.partialorder %v3038_v12, 0.0  ;;  %v3178_v56 = vmul.f32 0.01, %v3038_v12  ;;  %v3041_v10 = vadd.f32 %v4270_v53, %v5658_v4  ;;  %v3032_v35 = vpop.f32.mrb[135].mxu0 }
 0x2fc   : > { %vm3144_vm7 = vcmp.gt.f32.partialorder %v3030_v39, 0.0  ;;  %v3176_v55 = vmul.f32 0.01, %v3030_v39  ;;  %v3033_v15 = vadd.f32 %v5658_v4, %v3032_v35 }
 0x2fd   : > { %v3210_v38 = vsel %vm3146_vm6, %v3038_v12, %v3178_v56  ;;  %vm3147_vm8 = vcmp.gt.f32.partialorder %v3041_v10, 0.0  ;;  %v3179_v32 = vmul.f32 0.01, %v3041_v10 }
 0x2fe   : > { %3242 = vst [vmem:[%s4680_s29 + $0x30] sm:$0xff] %v3210_v38  ;;  %v3208_v45 = vsel %vm3144_vm7, %v3030_v39, %v3176_v55  ;;  %vm3145_vm9 = vcmp.gt.f32.partialorder %v3033_v15, 0.0  ;;  %v3177_v28 = vmul.f32 0.01, %v3033_v15 }
 0x2ff   : > { %3240 = vst [vmem:[%s4680_s29 + $0x20] sm:$0xff] %v3208_v45  ;;  %v3211_v58 = vsel %vm3147_vm8, %v3041_v10, %v3179_v32 }
 0x300   : > { %3243 = vst [vmem:[%s4680_s29 + $0x38] sm:$0xff] %v3211_v58  ;;  %v3209_v51 = vsel %vm3145_vm9, %v3033_v15, %v3177_v28  ;;  %v4273_v37 = vpop.f32.mrb[136].mxu0 }
 0x301   : > { %3241 = vst [vmem:[%s4680_s29 + $0x28] sm:$0xff] %v3209_v51  ;;  %v3054_v11 = vadd.f32 %v4273_v37, %v5658_v4  ;;  %v3045_v54 = vpop.f32.mrb[137].mxu0 }
 0x302   : > { %v3046_v7 = vadd.f32 %v5658_v4, %v3045_v54  ;;  %v4274_v27 = vpop.f32.mrb[138].mxu0 }
 0x303   : > { %vm3150_vm10 = vcmp.gt.f32.partialorder %v3054_v11, 0.0  ;;  %v3182_v0 = vmul.f32 0.01, %v3054_v11  ;;  %v3057_v33 = vadd.f32 %v4274_v27, %v5658_v4  ;;  %v3048_v40 = vpop.f32.mrb[139].mxu0 }
 0x304   : > { %vm3148_vm11 = vcmp.gt.f32.partialorder %v3046_v7, 0.0  ;;  %v3180_v26 = vmul.f32 0.01, %v3046_v7  ;;  %v3049_v63 = vadd.f32 %v5658_v4, %v3048_v40 }
 0x305   : > { %v3214_v43 = vsel %vm3150_vm10, %v3054_v11, %v3182_v0  ;;  %vm3151_vm12 = vcmp.gt.f32.partialorder %v3057_v33, 0.0  ;;  %v3183_v41 = vmul.f32 0.01, %v3057_v33 }
 0x306   : > { %3246 = vst [vmem:[%s4680_s29 + $0x50] sm:$0xff] %v3214_v43  ;;  %v3212_v49 = vsel %vm3148_vm11, %v3046_v7, %v3180_v26  ;;  %vm3149_vm13 = vcmp.gt.f32.partialorder %v3049_v63, 0.0  ;;  %v3181_v8 = vmul.f32 0.01, %v3049_v63 }
 0x307   : > { %3244 = vst [vmem:[%s4680_s29 + $0x40] sm:$0xff] %v3212_v49  ;;  %v3215_v42 = vsel %vm3151_vm12, %v3057_v33, %v3183_v41 }
 0x308   : > { %3247 = vst [vmem:[%s4680_s29 + $0x58] sm:$0xff] %v3215_v42  ;;  %v3213_v16 = vsel %vm3149_vm13, %v3049_v63, %v3181_v8  ;;  %v4277_v34 = vpop.f32.mrb[140].mxu0 }
 0x309   : > { %3245 = vst [vmem:[%s4680_s29 + $0x48] sm:$0xff] %v3213_v16  ;;  %v3070_v62 = vadd.f32 %v4277_v34, %v5658_v4  ;;  %v3061_v36 = vpop.f32.mrb[141].mxu0 }
 0x30a   : > { %v3062_v52 = vadd.f32 %v5658_v4, %v3061_v36  ;;  %v4278_v22 = vpop.f32.mrb[142].mxu0 }
 0x30b   : > { %vm3154_vm14 = vcmp.gt.f32.partialorder %v3070_v62, 0.0  ;;  %v3186_v2 = vmul.f32 0.01, %v3070_v62  ;;  %v3073_v3 = vadd.f32 %v4278_v22, %v5658_v4  ;;  %v3064_v50 = vpop.f32.mrb[143].mxu0 }
 0x30c   : > { %vm3152_vm15 = vcmp.gt.f32.partialorder %v3062_v52, 0.0  ;;  %v3184_v29 = vmul.f32 0.01, %v3062_v52  ;;  %v3065_v24 = vadd.f32 %v5658_v4, %v3064_v50 }
 0x30d   : > { %v3218_v59 = vsel %vm3154_vm14, %v3070_v62, %v3186_v2  ;;  %vm3155_vm0 = vcmp.gt.f32.partialorder %v3073_v3, 0.0  ;;  %v3187_v9 = vmul.f32 0.01, %v3073_v3 }
 0x30e   : > { %3250 = vst [vmem:[%s4680_s29 + $0x70] sm:$0xff] %v3218_v59  ;;  %v3216_v25 = vsel %vm3152_vm15, %v3062_v52, %v3184_v29  ;;  %vm3153_vm1 = vcmp.gt.f32.partialorder %v3065_v24, 0.0  ;;  %v3185_v20 = vmul.f32 0.01, %v3065_v24 }
 0x30f   : > { %3248 = vst [vmem:[%s4680_s29 + $0x60] sm:$0xff] %v3216_v25  ;;  %v3219_v47 = vsel %vm3155_vm0, %v3073_v3, %v3187_v9 }
 0x310   : > { %3251 = vst [vmem:[%s4680_s29 + $0x78] sm:$0xff] %v3219_v47  ;;  %v3217_v46 = vsel %vm3153_vm1, %v3065_v24, %v3185_v20  ;;  %v4281_v21 = vpop.f32.mrb[144].mxu0 }
 0x311   : > { %3249 = vst [vmem:[%s4680_s29 + $0x68] sm:$0xff] %v3217_v46  ;;  %v3086_v60 = vadd.f32 %v4281_v21, %v5658_v4  ;;  %v3077_v61 = vpop.f32.mrb[145].mxu0 }
 0x312   : > { %v3078_v1 = vadd.f32 %v5658_v4, %v3077_v61  ;;  %v4282_v44 = vpop.f32.mrb[146].mxu0 }
 0x313   : > { %vm3158_vm2 = vcmp.gt.f32.partialorder %v3086_v60, 0.0  ;;  %v3190_v18 = vmul.f32 0.01, %v3086_v60  ;;  %v3089_v6 = vadd.f32 %v4282_v44, %v5658_v4  ;;  %v3080_v19 = vpop.f32.mrb[147].mxu0 }
 0x314   : > { %vm3156_vm3 = vcmp.gt.f32.partialorder %v3078_v1, 0.0  ;;  %v3188_v57 = vmul.f32 0.01, %v3078_v1  ;;  %v3081_v17 = vadd.f32 %v5658_v4, %v3080_v19 }
 0x315   : > { %v3222_v30 = vsel %vm3158_vm2, %v3086_v60, %v3190_v18  ;;  %vm3159_vm4 = vcmp.gt.f32.partialorder %v3089_v6, 0.0  ;;  %v3191_v14 = vmul.f32 0.01, %v3089_v6 }
 0x316   : > { %3254 = vst [vmem:[%s4680_s29 + $0x90] sm:$0xff] %v3222_v30  ;;  %v3220_v48 = vsel %vm3156_vm3, %v3078_v1, %v3188_v57  ;;  %vm3157_vm5 = vcmp.gt.f32.partialorder %v3081_v17, 0.0  ;;  %v3189_v5 = vmul.f32 0.01, %v3081_v17 }
 0x317   : > { %3252 = vst [vmem:[%s4680_s29 + $0x80] sm:$0xff] %v3220_v48  ;;  %v3223_v31 = vsel %vm3159_vm4, %v3089_v6, %v3191_v14 }
 0x318   : > { %3255 = vst [vmem:[%s4680_s29 + $0x98] sm:$0xff] %v3223_v31  ;;  %v3221_v13 = vsel %vm3157_vm5, %v3081_v17, %v3189_v5  ;;  %v4285_v12 = vpop.f32.mrb[148].mxu0 }
 0x319   : > { %3253 = vst [vmem:[%s4680_s29 + $0x88] sm:$0xff] %v3221_v13  ;;  %v3102_v23 = vadd.f32 %v4285_v12, %v5658_v4  ;;  %v3093_v39 = vpop.f32.mrb[149].mxu0 }
 0x31a   : > { %v3094_v53 = vadd.f32 %v5658_v4, %v3093_v39  ;;  %v4286_v56 = vpop.f32.mrb[150].mxu0 }
 0x31b   : > { %vm3162_vm6 = vcmp.gt.f32.partialorder %v3102_v23, 0.0  ;;  %v3194_v10 = vmul.f32 0.01, %v3102_v23  ;;  %v3105_v35 = vadd.f32 %v4286_v56, %v5658_v4  ;;  %v3096_v55 = vpop.f32.mrb[151].mxu0 }
 0x31c   : > { %vm3160_vm7 = vcmp.gt.f32.partialorder %v3094_v53, 0.0  ;;  %v3192_v15 = vmul.f32 0.01, %v3094_v53  ;;  %v3097_v38 = vadd.f32 %v5658_v4, %v3096_v55 }
 0x31d   : > { %v3226_v32 = vsel %vm3162_vm6, %v3102_v23, %v3194_v10  ;;  %vm3163_vm8 = vcmp.gt.f32.partialorder %v3105_v35, 0.0  ;;  %v3195_v45 = vmul.f32 0.01, %v3105_v35 }
 0x31e   : > { %3258 = vst [vmem:[%s4680_s29 + $0xb0] sm:$0xff] %v3226_v32  ;;  %v3224_v28 = vsel %vm3160_vm7, %v3094_v53, %v3192_v15  ;;  %vm3161_vm9 = vcmp.gt.f32.partialorder %v3097_v38, 0.0  ;;  %v3193_v58 = vmul.f32 0.01, %v3097_v38 }
 0x31f   : > { %3256 = vst [vmem:[%s4680_s29 + $0xa0] sm:$0xff] %v3224_v28  ;;  %v3227_v51 = vsel %vm3163_vm8, %v3105_v35, %v3195_v45 }
 0x320   : > { %3259 = vst [vmem:[%s4680_s29 + $0xb8] sm:$0xff] %v3227_v51  ;;  %v3225_v37 = vsel %vm3161_vm9, %v3097_v38, %v3193_v58  ;;  %v4289_v11 = vpop.f32.mrb[152].mxu0 }
 0x321   : > { %3257 = vst [vmem:[%s4680_s29 + $0xa8] sm:$0xff] %v3225_v37  ;;  %v3118_v54 = vadd.f32 %v4289_v11, %v5658_v4  ;;  %v3109_v7 = vpop.f32.mrb[153].mxu0 }
 0x322   : > { %v3110_v27 = vadd.f32 %v5658_v4, %v3109_v7  ;;  %v4290_v0 = vpop.f32.mrb[154].mxu0 }
 0x323   : > { %vm3166_vm10 = vcmp.gt.f32.partialorder %v3118_v54, 0.0  ;;  %v3198_v33 = vmul.f32 0.01, %v3118_v54  ;;  %v3121_v40 = vadd.f32 %v4290_v0, %v5658_v4  ;;  %v3112_v26 = vpop.f32.mrb[155].mxu0 }
 0x324   : > { %vm3164_vm11 = vcmp.gt.f32.partialorder %v3110_v27, 0.0  ;;  %v3196_v63 = vmul.f32 0.01, %v3110_v27  ;;  %v3113_v43 = vadd.f32 %v5658_v4, %v3112_v26 }
 0x325   : > { %v3230_v41 = vsel %vm3166_vm10, %v3118_v54, %v3198_v33  ;;  %vm3167_vm12 = vcmp.gt.f32.partialorder %v3121_v40, 0.0  ;;  %v3199_v49 = vmul.f32 0.01, %v3121_v40 }
 0x326   : > { %3262 = vst [vmem:[%s4680_s29 + $0xd0] sm:$0xff] %v3230_v41  ;;  %v3228_v8 = vsel %vm3164_vm11, %v3110_v27, %v3196_v63  ;;  %vm3165_vm13 = vcmp.gt.f32.partialorder %v3113_v43, 0.0  ;;  %v3197_v42 = vmul.f32 0.01, %v3113_v43 }
 0x327   : > { %3260 = vst [vmem:[%s4680_s29 + $0xc0] sm:$0xff] %v3228_v8  ;;  %v3231_v16 = vsel %vm3167_vm12, %v3121_v40, %v3199_v49 }
 0x328   : > { %3263 = vst [vmem:[%s4680_s29 + $0xd8] sm:$0xff] %v3231_v16  ;;  %v3229_v34 = vsel %vm3165_vm13, %v3113_v43, %v3197_v42  ;;  %v4293_v62 = vpop.f32.mrb[156].mxu0 }
 0x329   : > { %3261 = vst [vmem:[%s4680_s29 + $0xc8] sm:$0xff] %v3229_v34  ;;  %v3134_v36 = vadd.f32 %v4293_v62, %v5658_v4  ;;  %v3125_v52 = vpop.f32.mrb[157].mxu0 }
 0x32a   : > { %v3126_v22 = vadd.f32 %v5658_v4, %v3125_v52  ;;  %v4294_v2 = vpop.f32.mrb[158].mxu0 }
 0x32b   : > { %vm3170_vm14 = vcmp.gt.f32.partialorder %v3134_v36, 0.0  ;;  %v3202_v3 = vmul.f32 0.01, %v3134_v36  ;;  %v3137_v50 = vadd.f32 %v4294_v2, %v5658_v4  ;;  %v3128_v29 = vpop.f32.mrb[159].mxu0 }
 0x32c   : > { %vm3168_vm15 = vcmp.gt.f32.partialorder %v3126_v22, 0.0  ;;  %v3200_v24 = vmul.f32 0.01, %v3126_v22  ;;  %v3129_v59 = vadd.f32 %v5658_v4, %v3128_v29 }
 0x32d   : > { %v3234_v9 = vsel %vm3170_vm14, %v3134_v36, %v3202_v3  ;;  %vm3171_vm0 = vcmp.gt.f32.partialorder %v3137_v50, 0.0  ;;  %v3203_v25 = vmul.f32 0.01, %v3137_v50 }
 0x32e   : > { %3266 = vst [vmem:[%s4680_s29 + $0xf0] sm:$0xff] %v3234_v9  ;;  %v3232_v20 = vsel %vm3168_vm15, %v3126_v22, %v3200_v24  ;;  %vm3169_vm1 = vcmp.gt.f32.partialorder %v3129_v59, 0.0  ;;  %v3201_v47 = vmul.f32 0.01, %v3129_v59 }
 0x32f   : > { %3264 = vst [vmem:[%s4680_s29 + $0xe0] sm:$0xff] %v3232_v20  ;;  %v3235_v46 = vsel %vm3171_vm0, %v3137_v50, %v3203_v25 }
 0x330   : > { %3267 = vst [vmem:[%s4680_s29 + $0xf8] sm:$0xff] %v3235_v46  ;;  %v3233_v21 = vsel %vm3169_vm1, %v3129_v59, %v3201_v47 }
 0x331   : > { %3265 = vst [vmem:[%s4680_s29 + $0xe8] sm:$0xff] %v3233_v21 }
 0x332 PF: > { %s15_s20 = sadd.s32 1, %s4619_s20   ;;  %s5739_s18 = smov %s4615_s19 }
 0x333   : > { %p12_p5 = scmp.ge.s32.totalorder %s15_s20, 4   ;;  %s5740_s19 = smov %s5742_s21 }
 0x335   :  { %14 = sbr.rel (!%p12_p5) target bundleno = 2 (0x2), region = 164 }
 0x33c   :  { %3300 = vsyncmov [#allocation3] }
 0x33f   :  { %s3301_s25 = vpop.sfrf %3300 }
 0x340   :  { %p3667_p6 = scmp.ne.s32.totalorder %s3301_s25, 0 }
 0x342   :  { %3305 = shalt.err (%p3667_p6)  }
 0x343   :  { %3307 = vsyncmov [#allocation3 + $0x1] }
 0x346   :  { %s3308_s26 = vpop.sfrf %3307 }
 0x347   :  { %p3668_p7 = scmp.ne.s32.totalorder %s3308_s26, 0 }
 0x349   :  { %3312 = shalt.err (%p3668_p7)  }

</bundles_post_ra>
